<compile_context>
chip_gen: v6e
topology: v6e:2x2x1
jax: 0.10.0
libtpu: 0.0.40
codegen_flags: <defaults>
</compile_context>

<pallas_src>
import functools

import jax
import jax.numpy as jnp
from jax.experimental import pallas as pl
from jax.experimental.pallas import tpu as pltpu


# --------------------------------------------------------------------------
# In-kernel building blocks (all operate on VMEM-resident values)
# --------------------------------------------------------------------------
def _pad_hw1(x):
    """Zero-pad (Bt, H, W, C) by 1 on each spatial side via concatenation."""
    Bt, H, W, C = x.shape
    zr = jnp.zeros((Bt, 1, W, C), x.dtype)
    x = jnp.concatenate([zr, x, zr], axis=1)            # (Bt, H+2, W, C)
    zc = jnp.zeros((Bt, H + 2, 1, C), x.dtype)
    return jnp.concatenate([zc, x, zc], axis=2)         # (Bt, H+2, W+2, C)
    # TODO(synk): a persistent zeroed VMEM scratch (write interior only) would
    # save the two value-level copies per conv; kept concat for simplicity.


def _conv3x3_relu_cin1(x, w, b):
    """3x3 conv (padding=1, Cin=1) + ReLU, entirely on the VPU.

    x: (Bt, H, W, 1); w: (9, Cout); b: (1, Cout).
    A (M,9)x(9,Cout) matmul uses <1% of the MXU; nine broadcast FMAs avoid the
    im2col relayout and the MXU push/pop round-trip.
    """
    Bt, H, W, _ = x.shape
    Cout = w.shape[1]
    xp = _pad_hw1(x)
    acc = jnp.zeros((Bt, H, W, Cout), jnp.float32)
    for dy in range(3):
        for dx in range(3):
            s = xp[:, dy:dy + H, dx:dx + W, :]          # (Bt, H, W, 1) shifted slab
            acc = acc + s * w[3 * dy + dx]              # lane-broadcast FMA
    return jnp.maximum(acc + b, 0.0)                    # ReLU


def _conv3x3_relu_acc9(x, w, b, mm_dtype):
    """3x3 conv (padding=1) + ReLU as 9 accumulated MXU matmuls.

    x: (Bt, H, W, Cin); w: (9, Cin, Cout); b: (1, Cout).
    No (M, 9*Cin) im2col slab: per-tap (Bt*H*W, Cin) x (Cin, Cout) accumulated
    in f32.  Kills 8 lane-offset relayouts per conv and the big slab buffer.
    """
    Bt, H, W, Cin = x.shape
    Cout = w.shape[-1]
    xp = _pad_hw1(x).astype(mm_dtype)
    wc = w.astype(mm_dtype)
    acc = jnp.zeros((Bt * H * W, Cout), jnp.float32)
    for dy in range(3):
        for dx in range(3):
            s = xp[:, dy:dy + H, dx:dx + W, :].reshape(Bt * H * W, Cin)
            acc = acc + jnp.dot(s, wc[3 * dy + dx],
                                preferred_element_type=jnp.float32)
    y = jnp.maximum(acc + b, 0.0)
    return y.reshape(Bt, H, W, Cout)


def _maxpool2x2(x):
    """MaxPool2d(kernel=2, stride=2) via two reshape-based reductions."""
    Bt, H, W, C = x.shape
    x = jnp.max(x.reshape(Bt, H, W // 2, 2, C), axis=3)       # pool along W
    x = jnp.max(x.reshape(Bt, H // 2, 2, W // 2, C), axis=2)  # pool along H
    return x                                                  # (Bt, H//2, W//2, C)


def _upsample2x_bilinear(x):
    """2x bilinear upsample, align_corners=False (PyTorch), separable VPU lerp.

    1-D rule (scale 2): out[2i]   = 0.25*x[max(i-1,0)] + 0.75*x[i]
                        out[2i+1] = 0.75*x[i] + 0.25*x[min(i+1,n-1)]
    Interleaving is done with a single stack+reshape per axis (no slice loops).
    """
    Bt, H, W, C = x.shape
    # --- rows ---
    xm = jnp.concatenate([x[:, 0:1], x[:, :H - 1]], axis=1)       # x[max(i-1,0)]
    xp = jnp.concatenate([x[:, 1:], x[:, H - 1:H]], axis=1)       # x[min(i+1,H-1)]
    even = 0.25 * xm + 0.75 * x
    odd = 0.75 * x + 0.25 * xp
    y = jnp.stack([even, odd], axis=2).reshape(Bt, 2 * H, W, C)   # interleave rows
    # --- cols ---
    ym = jnp.concatenate([y[:, :, 0:1], y[:, :, :W - 1]], axis=2)
    yp = jnp.concatenate([y[:, :, 1:], y[:, :, W - 1:W]], axis=2)
    even = 0.25 * ym + 0.75 * y
    odd = 0.75 * y + 0.25 * yp
    return jnp.stack([even, odd], axis=3).reshape(Bt, 2 * H, 2 * W, C)


# --------------------------------------------------------------------------
# Fused forward kernel (one grid step = block_b images)
# --------------------------------------------------------------------------
def _unet_kernel(x_ref, w1_ref, b1_ref, w2_ref, b2_ref, w3_ref, b3_ref,
                 w4_ref, b4_ref, o_ref, *, mm_dtype):
    x = x_ref[...]                                                  # (Bt, H, W, 1)
    Bt, H, W, _ = x.shape

    x1 = _conv3x3_relu_cin1(x, w1_ref[...], b1_ref[...])            # (Bt,H,W,32)
    x2 = _maxpool2x2(x1)                                             # (Bt,H/2,W/2,32)
    x3 = _conv3x3_relu_acc9(x2, w2_ref[...], b2_ref[...], mm_dtype)  # (Bt,H/2,W/2,64)
    x4 = _upsample2x_bilinear(x3)                                    # (Bt,H,W,64)
    x5 = _conv3x3_relu_acc9(x4, w3_ref[...], b3_ref[...], mm_dtype)  # (Bt,H,W,32)

    # final 1x1 conv, then lane-dense store (H*W on lanes -> unmasked vst).
    y5 = x5.reshape(Bt * H * W, 32)
    out = jnp.dot(y5.astype(mm_dtype), w4_ref[...].astype(mm_dtype),
                  preferred_element_type=jnp.float32) + b4_ref[...]
    o_ref[...] = out.reshape(Bt, 1, H * W).astype(o_ref.dtype)


# --------------------------------------------------------------------------
# Wrapper
# --------------------------------------------------------------------------
def simple_unet_forward(x_nchw, params, *, matmul_dtype=jnp.float32, block_b=None):
    """x_nchw: (B, 1, H, W) float32 -> (B, 1, H, W), matching the PyTorch module.

    matmul_dtype=jnp.bfloat16 halves matmul-operand VMEM and runs the MXU at full
    rate on v6e/v7x (f32 accumulation kept); default f32 preserves reference
    numerics exactly.
    """
    B, C_in, H, W = x_nchw.shape
    assert C_in == 1 and H % 2 == 0 and W % 2 == 0
    x = x_nchw.reshape(B, H, W, 1)        # NCHW with C=1 -> NHWC (pure reshape)

    if block_b is None:
        # Fold batch into the matmul M dim, but keep >=2 grid steps when possible
        # so v7x's two TensorCores can each take a step.
        block_b = B // 2 if (B % 2 == 0 and B >= 2) else 1
    assert B % block_b == 0
    num_steps = B // block_b

    # Weights laid out (kh, kw, Cin, Cout) -> (9[, Cin], Cout); tap order (dy, dx).
    # NOTE: real PyTorch Conv2d weights (Cout, Cin, kh, kw) need .permute(2,3,1,0)
    # before this reshape.
    w1 = params["w1"].reshape(9, 32)
    b1 = params["b1"].reshape(1, 32)
    w2 = params["w2"].reshape(9, 32, 64)
    b2 = params["b2"].reshape(1, 64)
    w3 = params["w3"].reshape(9, 64, 32)
    b3 = params["b3"].reshape(1, 32)
    w4 = params["w4"].reshape(32, 1)
    b4 = params["b4"].reshape(1, 1)

    hw = H * W
    flops = 2 * B * (hw * 9 * 1 * 32 + (hw // 4) * 9 * 32 * 64
                     + hw * 9 * 64 * 32 + hw * 32 * 1)
    weight_bytes = 4 * sum(int(a.size) for a in (w1, b1, w2, b2, w3, b3, w4, b4))
    bytes_accessed = 4 * (2 * B * hw) + weight_bytes

    kernel = functools.partial(_unet_kernel, mm_dtype=matmul_dtype)

    out = pl.pallas_call(
        kernel,
        out_shape=jax.ShapeDtypeStruct((B, 1, hw), x.dtype),
        grid=(num_steps,),
        in_specs=[
            pl.BlockSpec((block_b, H, W, 1), lambda bb: (bb, 0, 0, 0)),
            pl.BlockSpec(w1.shape, lambda bb: (0, 0)),
            pl.BlockSpec(b1.shape, lambda bb: (0, 0)),
            pl.BlockSpec(w2.shape, lambda bb: (0, 0, 0)),
            pl.BlockSpec(b2.shape, lambda bb: (0, 0)),
            pl.BlockSpec(w3.shape, lambda bb: (0, 0, 0)),
            pl.BlockSpec(b3.shape, lambda bb: (0, 0)),
            pl.BlockSpec(w4.shape, lambda bb: (0, 0)),
            pl.BlockSpec(b4.shape, lambda bb: (0, 0)),
        ],
        out_specs=pl.BlockSpec((block_b, 1, hw), lambda bb: (bb, 0, 0)),
        compiler_params=pltpu.CompilerParams(
            # TODO(synk): on v7x verify the grid actually core-shards; if plain
            # "parallel" doesn't split in the Mosaic dump, switch to
            # pltpu.CORE_PARALLEL (kept "parallel" so v5e/v6e compile unchanged).
            dimension_semantics=("parallel",),
            vmem_limit_bytes=32 * 1024 * 1024,   # explicit (v5e default is 16 MiB)
        ),
        cost_estimate=pl.CostEstimate(flops=flops, transcendentals=0,
                                      bytes_accessed=bytes_accessed),
    )(x, w1, b1, w2, b2, w3, b3, w4, b4)

    return out.reshape(B, 1, H, W)


# --------------------------------------------------------------------------
# Parameters (deterministic init mirroring PyTorch Conv2d defaults)
# --------------------------------------------------------------------------
def _init_conv(key, kh, kw, cin, cout):
    fan_in = cin * kh * kw
    bound = 1.0 / float(fan_in) ** 0.5
    kw_, kb_ = jax.random.split(key)
    w = jax.random.uniform(kw_, (kh, kw, cin, cout), jnp.float32, -bound, bound)
    b = jax.random.uniform(kb_, (cout,), jnp.float32, -bound, bound)
    return w, b


def init_params(key):
    k1, k2, k3, k4 = jax.random.split(key, 4)
    w1, b1 = _init_conv(k1, 3, 3, 1, 32)     # enc1
    w2, b2 = _init_conv(k2, 3, 3, 32, 64)    # enc2
    w3, b3 = _init_conv(k3, 3, 3, 64, 32)    # dec1
    w4, b4 = _init_conv(k4, 1, 1, 32, 1)     # final
    return dict(w1=w1, b1=b1, w2=w2, b2=b2, w3=w3, b3=b3, w4=w4, b4=b4)


if __name__ == "__main__":
    key = jax.random.PRNGKey(0)
    k_x, k_p = jax.random.split(key)
    x = jax.random.normal(k_x, (2, 1, 16, 16), jnp.float32)
    params = init_params(k_p)

    out = jax.jit(simple_unet_forward)(x, params)
    out = jax.block_until_ready(out)
    assert out.shape == (2, 1, 16, 16) and out.dtype == jnp.float32
    print("KERNEL_OK")
</pallas_src>

<mosaic_0001>
module attributes {stable_mosaic.version = 11 : i64} {
  func.func @_unet_kernel(%arg0: i32, %arg1: memref<1x16x16x1xf32, #tpu.memory_space<vmem>>, %arg2: memref<9x32xf32, #tpu.memory_space<vmem>>, %arg3: memref<1x32xf32, #tpu.memory_space<vmem>>, %arg4: memref<9x32x64xf32, #tpu.memory_space<vmem>>, %arg5: memref<1x64xf32, #tpu.memory_space<vmem>>, %arg6: memref<9x64x32xf32, #tpu.memory_space<vmem>>, %arg7: memref<1x32xf32, #tpu.memory_space<vmem>>, %arg8: memref<32x1xf32, #tpu.memory_space<vmem>>, %arg9: memref<1x1xf32, #tpu.memory_space<vmem>>, %arg10: memref<1x1x256xf32, #tpu.memory_space<vmem>>) attributes {dimension_semantics = [#tpu.dimension_semantics<parallel>], iteration_bounds = array<i64: 2>, scalar_prefetch = 0 : i64, scratch_operands = 0 : i64, tpu.core_type = #tpu.core_type<tc>, window_params = [{transform_indices = @transform_0, window_bounds = array<i64: 1, 16, 16, 1>}, {pipeline_mode = #tpu.pipeline_mode<synchronous>, transform_indices = @transform_1, window_bounds = array<i64: 9, 32>}, {pipeline_mode = #tpu.pipeline_mode<synchronous>, transform_indices = @transform_2, window_bounds = array<i64: 1, 32>}, {pipeline_mode = #tpu.pipeline_mode<synchronous>, transform_indices = @transform_3, window_bounds = array<i64: 9, 32, 64>}, {pipeline_mode = #tpu.pipeline_mode<synchronous>, transform_indices = @transform_4, window_bounds = array<i64: 1, 64>}, {pipeline_mode = #tpu.pipeline_mode<synchronous>, transform_indices = @transform_5, window_bounds = array<i64: 9, 64, 32>}, {pipeline_mode = #tpu.pipeline_mode<synchronous>, transform_indices = @transform_6, window_bounds = array<i64: 1, 32>}, {pipeline_mode = #tpu.pipeline_mode<synchronous>, transform_indices = @transform_7, window_bounds = array<i64: 32, 1>}, {pipeline_mode = #tpu.pipeline_mode<synchronous>, transform_indices = @transform_8, window_bounds = array<i64: 1, 1>}, {transform_indices = @transform_9, window_bounds = array<i64: 1, 1, 256>}]} {
    %c0 = arith.constant 0 : index
    %c0_0 = arith.constant 0 : index
    %c0_1 = arith.constant 0 : index
    %c0_2 = arith.constant 0 : index
    %0 = vector.load %arg1[%c0, %c0_0, %c0_1, %c0_2] : memref<1x16x16x1xf32, #tpu.memory_space<vmem>>, vector<1x16x16x1xf32>
    %c0_3 = arith.constant 0 : index
    %c0_4 = arith.constant 0 : index
    %1 = vector.load %arg2[%c0_3, %c0_4] : memref<9x32xf32, #tpu.memory_space<vmem>>, vector<9x32xf32>
    %c0_5 = arith.constant 0 : index
    %c0_6 = arith.constant 0 : index
    %2 = vector.load %arg3[%c0_5, %c0_6] : memref<1x32xf32, #tpu.memory_space<vmem>>, vector<1x32xf32>
    %cst = arith.constant 0.000000e+00 : f32
    %3 = vector.broadcast %cst : f32 to vector<1x1x16x1xf32>
    %4 = tpu.concatenate %3, %0, %3 in 1 : vector<1x1x16x1xf32>, vector<1x16x16x1xf32>, vector<1x1x16x1xf32> -> vector<1x18x16x1xf32>
    %cst_7 = arith.constant 0.000000e+00 : f32
    %5 = vector.broadcast %cst_7 : f32 to vector<1x18x1x1xf32>
    %6 = tpu.concatenate %5, %4, %5 in 2 : vector<1x18x1x1xf32>, vector<1x18x16x1xf32>, vector<1x18x1x1xf32> -> vector<1x18x18x1xf32>
    %cst_8 = arith.constant 0.000000e+00 : f32
    %7 = vector.broadcast %cst_8 : f32 to vector<1x16x16x32xf32>
    %8 = vector.extract_strided_slice %6 {offsets = [0, 0, 0, 0], sizes = [1, 16, 16, 1], strides = [1, 1, 1, 1]} : vector<1x18x18x1xf32> to vector<1x16x16x1xf32>
    %9 = vector.extract_strided_slice %1 {offsets = [0, 0], sizes = [1, 32], strides = [1, 1]} : vector<9x32xf32> to vector<1x32xf32>
    %10 = vector.shape_cast %9 : vector<1x32xf32> to vector<32xf32>
    %11 = vector.shape_cast %10 : vector<32xf32> to vector<1x1x1x32xf32>
    %12 = vector.broadcast %8 : vector<1x16x16x1xf32> to vector<1x16x16x32xf32>
    %13 = vector.broadcast %11 : vector<1x1x1x32xf32> to vector<1x16x16x32xf32>
    %14 = arith.mulf %12, %13 : vector<1x16x16x32xf32>
    %15 = arith.addf %7, %14 : vector<1x16x16x32xf32>
    %16 = vector.extract_strided_slice %6 {offsets = [0, 0, 1, 0], sizes = [1, 16, 16, 1], strides = [1, 1, 1, 1]} : vector<1x18x18x1xf32> to vector<1x16x16x1xf32>
    %17 = vector.extract_strided_slice %1 {offsets = [1, 0], sizes = [1, 32], strides = [1, 1]} : vector<9x32xf32> to vector<1x32xf32>
    %18 = vector.shape_cast %17 : vector<1x32xf32> to vector<32xf32>
    %19 = vector.shape_cast %18 : vector<32xf32> to vector<1x1x1x32xf32>
    %20 = vector.broadcast %16 : vector<1x16x16x1xf32> to vector<1x16x16x32xf32>
    %21 = vector.broadcast %19 : vector<1x1x1x32xf32> to vector<1x16x16x32xf32>
    %22 = arith.mulf %20, %21 : vector<1x16x16x32xf32>
    %23 = arith.addf %15, %22 : vector<1x16x16x32xf32>
    %24 = vector.extract_strided_slice %6 {offsets = [0, 0, 2, 0], sizes = [1, 16, 16, 1], strides = [1, 1, 1, 1]} : vector<1x18x18x1xf32> to vector<1x16x16x1xf32>
    %25 = vector.extract_strided_slice %1 {offsets = [2, 0], sizes = [1, 32], strides = [1, 1]} : vector<9x32xf32> to vector<1x32xf32>
    %26 = vector.shape_cast %25 : vector<1x32xf32> to vector<32xf32>
    %27 = vector.shape_cast %26 : vector<32xf32> to vector<1x1x1x32xf32>
    %28 = vector.broadcast %24 : vector<1x16x16x1xf32> to vector<1x16x16x32xf32>
    %29 = vector.broadcast %27 : vector<1x1x1x32xf32> to vector<1x16x16x32xf32>
    %30 = arith.mulf %28, %29 : vector<1x16x16x32xf32>
    %31 = arith.addf %23, %30 : vector<1x16x16x32xf32>
    %32 = vector.extract_strided_slice %6 {offsets = [0, 1, 0, 0], sizes = [1, 16, 16, 1], strides = [1, 1, 1, 1]} : vector<1x18x18x1xf32> to vector<1x16x16x1xf32>
    %33 = vector.extract_strided_slice %1 {offsets = [3, 0], sizes = [1, 32], strides = [1, 1]} : vector<9x32xf32> to vector<1x32xf32>
    %34 = vector.shape_cast %33 : vector<1x32xf32> to vector<32xf32>
    %35 = vector.shape_cast %34 : vector<32xf32> to vector<1x1x1x32xf32>
    %36 = vector.broadcast %32 : vector<1x16x16x1xf32> to vector<1x16x16x32xf32>
    %37 = vector.broadcast %35 : vector<1x1x1x32xf32> to vector<1x16x16x32xf32>
    %38 = arith.mulf %36, %37 : vector<1x16x16x32xf32>
    %39 = arith.addf %31, %38 : vector<1x16x16x32xf32>
    %40 = vector.extract_strided_slice %6 {offsets = [0, 1, 1, 0], sizes = [1, 16, 16, 1], strides = [1, 1, 1, 1]} : vector<1x18x18x1xf32> to vector<1x16x16x1xf32>
    %41 = vector.extract_strided_slice %1 {offsets = [4, 0], sizes = [1, 32], strides = [1, 1]} : vector<9x32xf32> to vector<1x32xf32>
    %42 = vector.shape_cast %41 : vector<1x32xf32> to vector<32xf32>
    %43 = vector.shape_cast %42 : vector<32xf32> to vector<1x1x1x32xf32>
    %44 = vector.broadcast %40 : vector<1x16x16x1xf32> to vector<1x16x16x32xf32>
    %45 = vector.broadcast %43 : vector<1x1x1x32xf32> to vector<1x16x16x32xf32>
    %46 = arith.mulf %44, %45 : vector<1x16x16x32xf32>
    %47 = arith.addf %39, %46 : vector<1x16x16x32xf32>
    %48 = vector.extract_strided_slice %6 {offsets = [0, 1, 2, 0], sizes = [1, 16, 16, 1], strides = [1, 1, 1, 1]} : vector<1x18x18x1xf32> to vector<1x16x16x1xf32>
    %49 = vector.extract_strided_slice %1 {offsets = [5, 0], sizes = [1, 32], strides = [1, 1]} : vector<9x32xf32> to vector<1x32xf32>
    %50 = vector.shape_cast %49 : vector<1x32xf32> to vector<32xf32>
    %51 = vector.shape_cast %50 : vector<32xf32> to vector<1x1x1x32xf32>
    %52 = vector.broadcast %48 : vector<1x16x16x1xf32> to vector<1x16x16x32xf32>
    %53 = vector.broadcast %51 : vector<1x1x1x32xf32> to vector<1x16x16x32xf32>
    %54 = arith.mulf %52, %53 : vector<1x16x16x32xf32>
    %55 = arith.addf %47, %54 : vector<1x16x16x32xf32>
    %56 = vector.extract_strided_slice %6 {offsets = [0, 2, 0, 0], sizes = [1, 16, 16, 1], strides = [1, 1, 1, 1]} : vector<1x18x18x1xf32> to vector<1x16x16x1xf32>
    %57 = vector.extract_strided_slice %1 {offsets = [6, 0], sizes = [1, 32], strides = [1, 1]} : vector<9x32xf32> to vector<1x32xf32>
    %58 = vector.shape_cast %57 : vector<1x32xf32> to vector<32xf32>
    %59 = vector.shape_cast %58 : vector<32xf32> to vector<1x1x1x32xf32>
    %60 = vector.broadcast %56 : vector<1x16x16x1xf32> to vector<1x16x16x32xf32>
    %61 = vector.broadcast %59 : vector<1x1x1x32xf32> to vector<1x16x16x32xf32>
    %62 = arith.mulf %60, %61 : vector<1x16x16x32xf32>
    %63 = arith.addf %55, %62 : vector<1x16x16x32xf32>
    %64 = vector.extract_strided_slice %6 {offsets = [0, 2, 1, 0], sizes = [1, 16, 16, 1], strides = [1, 1, 1, 1]} : vector<1x18x18x1xf32> to vector<1x16x16x1xf32>
    %65 = vector.extract_strided_slice %1 {offsets = [7, 0], sizes = [1, 32], strides = [1, 1]} : vector<9x32xf32> to vector<1x32xf32>
    %66 = vector.shape_cast %65 : vector<1x32xf32> to vector<32xf32>
    %67 = vector.shape_cast %66 : vector<32xf32> to vector<1x1x1x32xf32>
    %68 = vector.broadcast %64 : vector<1x16x16x1xf32> to vector<1x16x16x32xf32>
    %69 = vector.broadcast %67 : vector<1x1x1x32xf32> to vector<1x16x16x32xf32>
    %70 = arith.mulf %68, %69 : vector<1x16x16x32xf32>
    %71 = arith.addf %63, %70 : vector<1x16x16x32xf32>
    %72 = vector.extract_strided_slice %6 {offsets = [0, 2, 2, 0], sizes = [1, 16, 16, 1], strides = [1, 1, 1, 1]} : vector<1x18x18x1xf32> to vector<1x16x16x1xf32>
    %73 = vector.extract_strided_slice %1 {offsets = [8, 0], sizes = [1, 32], strides = [1, 1]} : vector<9x32xf32> to vector<1x32xf32>
    %74 = vector.shape_cast %73 : vector<1x32xf32> to vector<32xf32>
    %75 = vector.shape_cast %74 : vector<32xf32> to vector<1x1x1x32xf32>
    %76 = vector.broadcast %72 : vector<1x16x16x1xf32> to vector<1x16x16x32xf32>
    %77 = vector.broadcast %75 : vector<1x1x1x32xf32> to vector<1x16x16x32xf32>
    %78 = arith.mulf %76, %77 : vector<1x16x16x32xf32>
    %79 = arith.addf %71, %78 : vector<1x16x16x32xf32>
    %80 = vector.shape_cast %2 : vector<1x32xf32> to vector<1x1x1x32xf32>
    %81 = vector.broadcast %80 : vector<1x1x1x32xf32> to vector<1x16x16x32xf32>
    %82 = arith.addf %79, %81 : vector<1x16x16x32xf32>
    %cst_9 = arith.constant 0.000000e+00 : f32
    %83 = vector.broadcast %cst_9 : f32 to vector<1x16x16x32xf32>
    %84 = arith.maximumf %82, %83 : vector<1x16x16x32xf32>
    %85 = vector.shape_cast %84 : vector<1x16x16x32xf32> to vector<1x16x8x2x32xf32>
    %cst_10 = arith.constant dense<0xFF800000> : vector<1x16x8x32xf32>
    %86 = vector.multi_reduction <maximumf>, %85, %cst_10 [3] : vector<1x16x8x2x32xf32> to vector<1x16x8x32xf32>
    %87 = vector.shape_cast %86 : vector<1x16x8x32xf32> to vector<1x8x2x8x32xf32>
    %cst_11 = arith.constant dense<0xFF800000> : vector<1x8x8x32xf32>
    %88 = vector.multi_reduction <maximumf>, %87, %cst_11 [2] : vector<1x8x2x8x32xf32> to vector<1x8x8x32xf32>
    %c0_12 = arith.constant 0 : index
    %c0_13 = arith.constant 0 : index
    %c0_14 = arith.constant 0 : index
    %89 = vector.load %arg4[%c0_12, %c0_13, %c0_14] : memref<9x32x64xf32, #tpu.memory_space<vmem>>, vector<9x32x64xf32>
    %c0_15 = arith.constant 0 : index
    %c0_16 = arith.constant 0 : index
    %90 = vector.load %arg5[%c0_15, %c0_16] : memref<1x64xf32, #tpu.memory_space<vmem>>, vector<1x64xf32>
    %cst_17 = arith.constant 0.000000e+00 : f32
    %91 = vector.broadcast %cst_17 : f32 to vector<1x1x8x32xf32>
    %92 = tpu.concatenate %91, %88, %91 in 1 : vector<1x1x8x32xf32>, vector<1x8x8x32xf32>, vector<1x1x8x32xf32> -> vector<1x10x8x32xf32>
    %cst_18 = arith.constant 0.000000e+00 : f32
    %93 = vector.broadcast %cst_18 : f32 to vector<1x10x1x32xf32>
    %94 = tpu.concatenate %93, %92, %93 in 2 : vector<1x10x1x32xf32>, vector<1x10x8x32xf32>, vector<1x10x1x32xf32> -> vector<1x10x10x32xf32>
    %cst_19 = arith.constant 0.000000e+00 : f32
    %95 = vector.broadcast %cst_19 : f32 to vector<64x64xf32>
    %96 = vector.extract_strided_slice %94 {offsets = [0, 0, 0, 0], sizes = [1, 8, 8, 32], strides = [1, 1, 1, 1]} : vector<1x10x10x32xf32> to vector<1x8x8x32xf32>
    %97 = vector.shape_cast %96 : vector<1x8x8x32xf32> to vector<64x32xf32>
    %98 = vector.extract_strided_slice %89 {offsets = [0, 0, 0], sizes = [1, 32, 64], strides = [1, 1, 1]} : vector<9x32x64xf32> to vector<1x32x64xf32>
    %99 = vector.shape_cast %98 : vector<1x32x64xf32> to vector<32x64xf32>
    %cst_20 = arith.constant dense<0.000000e+00> : vector<64x64xf32>
    %100 = tpu.matmul %97, %99, %cst_20 {dimension_numbers = #tpu.dot_dimension_numbers<[1], [0], [0], [1], [0, 0, 1, 1], [], []>} : vector<64x32xf32>, vector<32x64xf32>, vector<64x64xf32> -> vector<64x64xf32>
    %101 = arith.addf %95, %100 : vector<64x64xf32>
    %102 = vector.extract_strided_slice %94 {offsets = [0, 0, 1, 0], sizes = [1, 8, 8, 32], strides = [1, 1, 1, 1]} : vector<1x10x10x32xf32> to vector<1x8x8x32xf32>
    %103 = vector.shape_cast %102 : vector<1x8x8x32xf32> to vector<64x32xf32>
    %104 = vector.extract_strided_slice %89 {offsets = [1, 0, 0], sizes = [1, 32, 64], strides = [1, 1, 1]} : vector<9x32x64xf32> to vector<1x32x64xf32>
    %105 = vector.shape_cast %104 : vector<1x32x64xf32> to vector<32x64xf32>
    %cst_21 = arith.constant dense<0.000000e+00> : vector<64x64xf32>
    %106 = tpu.matmul %103, %105, %cst_21 {dimension_numbers = #tpu.dot_dimension_numbers<[1], [0], [0], [1], [0, 0, 1, 1], [], []>} : vector<64x32xf32>, vector<32x64xf32>, vector<64x64xf32> -> vector<64x64xf32>
    %107 = arith.addf %101, %106 : vector<64x64xf32>
    %108 = vector.extract_strided_slice %94 {offsets = [0, 0, 2, 0], sizes = [1, 8, 8, 32], strides = [1, 1, 1, 1]} : vector<1x10x10x32xf32> to vector<1x8x8x32xf32>
    %109 = vector.shape_cast %108 : vector<1x8x8x32xf32> to vector<64x32xf32>
    %110 = vector.extract_strided_slice %89 {offsets = [2, 0, 0], sizes = [1, 32, 64], strides = [1, 1, 1]} : vector<9x32x64xf32> to vector<1x32x64xf32>
    %111 = vector.shape_cast %110 : vector<1x32x64xf32> to vector<32x64xf32>
    %cst_22 = arith.constant dense<0.000000e+00> : vector<64x64xf32>
    %112 = tpu.matmul %109, %111, %cst_22 {dimension_numbers = #tpu.dot_dimension_numbers<[1], [0], [0], [1], [0, 0, 1, 1], [], []>} : vector<64x32xf32>, vector<32x64xf32>, vector<64x64xf32> -> vector<64x64xf32>
    %113 = arith.addf %107, %112 : vector<64x64xf32>
    %114 = vector.extract_strided_slice %94 {offsets = [0, 1, 0, 0], sizes = [1, 8, 8, 32], strides = [1, 1, 1, 1]} : vector<1x10x10x32xf32> to vector<1x8x8x32xf32>
    %115 = vector.shape_cast %114 : vector<1x8x8x32xf32> to vector<64x32xf32>
    %116 = vector.extract_strided_slice %89 {offsets = [3, 0, 0], sizes = [1, 32, 64], strides = [1, 1, 1]} : vector<9x32x64xf32> to vector<1x32x64xf32>
    %117 = vector.shape_cast %116 : vector<1x32x64xf32> to vector<32x64xf32>
    %cst_23 = arith.constant dense<0.000000e+00> : vector<64x64xf32>
    %118 = tpu.matmul %115, %117, %cst_23 {dimension_numbers = #tpu.dot_dimension_numbers<[1], [0], [0], [1], [0, 0, 1, 1], [], []>} : vector<64x32xf32>, vector<32x64xf32>, vector<64x64xf32> -> vector<64x64xf32>
    %119 = arith.addf %113, %118 : vector<64x64xf32>
    %120 = vector.extract_strided_slice %94 {offsets = [0, 1, 1, 0], sizes = [1, 8, 8, 32], strides = [1, 1, 1, 1]} : vector<1x10x10x32xf32> to vector<1x8x8x32xf32>
    %121 = vector.shape_cast %120 : vector<1x8x8x32xf32> to vector<64x32xf32>
    %122 = vector.extract_strided_slice %89 {offsets = [4, 0, 0], sizes = [1, 32, 64], strides = [1, 1, 1]} : vector<9x32x64xf32> to vector<1x32x64xf32>
    %123 = vector.shape_cast %122 : vector<1x32x64xf32> to vector<32x64xf32>
    %cst_24 = arith.constant dense<0.000000e+00> : vector<64x64xf32>
    %124 = tpu.matmul %121, %123, %cst_24 {dimension_numbers = #tpu.dot_dimension_numbers<[1], [0], [0], [1], [0, 0, 1, 1], [], []>} : vector<64x32xf32>, vector<32x64xf32>, vector<64x64xf32> -> vector<64x64xf32>
    %125 = arith.addf %119, %124 : vector<64x64xf32>
    %126 = vector.extract_strided_slice %94 {offsets = [0, 1, 2, 0], sizes = [1, 8, 8, 32], strides = [1, 1, 1, 1]} : vector<1x10x10x32xf32> to vector<1x8x8x32xf32>
    %127 = vector.shape_cast %126 : vector<1x8x8x32xf32> to vector<64x32xf32>
    %128 = vector.extract_strided_slice %89 {offsets = [5, 0, 0], sizes = [1, 32, 64], strides = [1, 1, 1]} : vector<9x32x64xf32> to vector<1x32x64xf32>
    %129 = vector.shape_cast %128 : vector<1x32x64xf32> to vector<32x64xf32>
    %cst_25 = arith.constant dense<0.000000e+00> : vector<64x64xf32>
    %130 = tpu.matmul %127, %129, %cst_25 {dimension_numbers = #tpu.dot_dimension_numbers<[1], [0], [0], [1], [0, 0, 1, 1], [], []>} : vector<64x32xf32>, vector<32x64xf32>, vector<64x64xf32> -> vector<64x64xf32>
    %131 = arith.addf %125, %130 : vector<64x64xf32>
    %132 = vector.extract_strided_slice %94 {offsets = [0, 2, 0, 0], sizes = [1, 8, 8, 32], strides = [1, 1, 1, 1]} : vector<1x10x10x32xf32> to vector<1x8x8x32xf32>
    %133 = vector.shape_cast %132 : vector<1x8x8x32xf32> to vector<64x32xf32>
    %134 = vector.extract_strided_slice %89 {offsets = [6, 0, 0], sizes = [1, 32, 64], strides = [1, 1, 1]} : vector<9x32x64xf32> to vector<1x32x64xf32>
    %135 = vector.shape_cast %134 : vector<1x32x64xf32> to vector<32x64xf32>
    %cst_26 = arith.constant dense<0.000000e+00> : vector<64x64xf32>
    %136 = tpu.matmul %133, %135, %cst_26 {dimension_numbers = #tpu.dot_dimension_numbers<[1], [0], [0], [1], [0, 0, 1, 1], [], []>} : vector<64x32xf32>, vector<32x64xf32>, vector<64x64xf32> -> vector<64x64xf32>
    %137 = arith.addf %131, %136 : vector<64x64xf32>
    %138 = vector.extract_strided_slice %94 {offsets = [0, 2, 1, 0], sizes = [1, 8, 8, 32], strides = [1, 1, 1, 1]} : vector<1x10x10x32xf32> to vector<1x8x8x32xf32>
    %139 = vector.shape_cast %138 : vector<1x8x8x32xf32> to vector<64x32xf32>
    %140 = vector.extract_strided_slice %89 {offsets = [7, 0, 0], sizes = [1, 32, 64], strides = [1, 1, 1]} : vector<9x32x64xf32> to vector<1x32x64xf32>
    %141 = vector.shape_cast %140 : vector<1x32x64xf32> to vector<32x64xf32>
    %cst_27 = arith.constant dense<0.000000e+00> : vector<64x64xf32>
    %142 = tpu.matmul %139, %141, %cst_27 {dimension_numbers = #tpu.dot_dimension_numbers<[1], [0], [0], [1], [0, 0, 1, 1], [], []>} : vector<64x32xf32>, vector<32x64xf32>, vector<64x64xf32> -> vector<64x64xf32>
    %143 = arith.addf %137, %142 : vector<64x64xf32>
    %144 = vector.extract_strided_slice %94 {offsets = [0, 2, 2, 0], sizes = [1, 8, 8, 32], strides = [1, 1, 1, 1]} : vector<1x10x10x32xf32> to vector<1x8x8x32xf32>
    %145 = vector.shape_cast %144 : vector<1x8x8x32xf32> to vector<64x32xf32>
    %146 = vector.extract_strided_slice %89 {offsets = [8, 0, 0], sizes = [1, 32, 64], strides = [1, 1, 1]} : vector<9x32x64xf32> to vector<1x32x64xf32>
    %147 = vector.shape_cast %146 : vector<1x32x64xf32> to vector<32x64xf32>
    %cst_28 = arith.constant dense<0.000000e+00> : vector<64x64xf32>
    %148 = tpu.matmul %145, %147, %cst_28 {dimension_numbers = #tpu.dot_dimension_numbers<[1], [0], [0], [1], [0, 0, 1, 1], [], []>} : vector<64x32xf32>, vector<32x64xf32>, vector<64x64xf32> -> vector<64x64xf32>
    %149 = arith.addf %143, %148 : vector<64x64xf32>
    %150 = vector.broadcast %90 : vector<1x64xf32> to vector<64x64xf32>
    %151 = arith.addf %149, %150 : vector<64x64xf32>
    %cst_29 = arith.constant 0.000000e+00 : f32
    %152 = vector.broadcast %cst_29 : f32 to vector<64x64xf32>
    %153 = arith.maximumf %151, %152 : vector<64x64xf32>
    %154 = vector.shape_cast %153 : vector<64x64xf32> to vector<1x8x8x64xf32>
    %155 = vector.extract_strided_slice %154 {offsets = [0, 0, 0, 0], sizes = [1, 1, 8, 64], strides = [1, 1, 1, 1]} : vector<1x8x8x64xf32> to vector<1x1x8x64xf32>
    %156 = vector.extract_strided_slice %154 {offsets = [0, 0, 0, 0], sizes = [1, 7, 8, 64], strides = [1, 1, 1, 1]} : vector<1x8x8x64xf32> to vector<1x7x8x64xf32>
    %157 = tpu.concatenate %155, %156 in 1 : vector<1x1x8x64xf32>, vector<1x7x8x64xf32> -> vector<1x8x8x64xf32>
    %158 = vector.extract_strided_slice %154 {offsets = [0, 1, 0, 0], sizes = [1, 7, 8, 64], strides = [1, 1, 1, 1]} : vector<1x8x8x64xf32> to vector<1x7x8x64xf32>
    %159 = vector.extract_strided_slice %154 {offsets = [0, 7, 0, 0], sizes = [1, 1, 8, 64], strides = [1, 1, 1, 1]} : vector<1x8x8x64xf32> to vector<1x1x8x64xf32>
    %160 = tpu.concatenate %158, %159 in 1 : vector<1x7x8x64xf32>, vector<1x1x8x64xf32> -> vector<1x8x8x64xf32>
    %cst_30 = arith.constant 2.500000e-01 : f32
    %161 = vector.broadcast %cst_30 : f32 to vector<1x8x8x64xf32>
    %162 = arith.mulf %161, %157 : vector<1x8x8x64xf32>
    %cst_31 = arith.constant 7.500000e-01 : f32
    %163 = vector.broadcast %cst_31 : f32 to vector<1x8x8x64xf32>
    %164 = arith.mulf %163, %154 : vector<1x8x8x64xf32>
    %165 = arith.addf %162, %164 : vector<1x8x8x64xf32>
    %cst_32 = arith.constant 7.500000e-01 : f32
    %166 = vector.broadcast %cst_32 : f32 to vector<1x8x8x64xf32>
    %167 = arith.mulf %166, %154 : vector<1x8x8x64xf32>
    %cst_33 = arith.constant 2.500000e-01 : f32
    %168 = vector.broadcast %cst_33 : f32 to vector<1x8x8x64xf32>
    %169 = arith.mulf %168, %160 : vector<1x8x8x64xf32>
    %170 = arith.addf %167, %169 : vector<1x8x8x64xf32>
    %171 = vector.shape_cast %165 : vector<1x8x8x64xf32> to vector<1x8x1x8x64xf32>
    %172 = vector.shape_cast %170 : vector<1x8x8x64xf32> to vector<1x8x1x8x64xf32>
    %173 = tpu.concatenate %171, %172 in 2 : vector<1x8x1x8x64xf32>, vector<1x8x1x8x64xf32> -> vector<1x8x2x8x64xf32>
    %174 = vector.shape_cast %173 : vector<1x8x2x8x64xf32> to vector<1x16x8x64xf32>
    %175 = vector.extract_strided_slice %174 {offsets = [0, 0, 0, 0], sizes = [1, 16, 1, 64], strides = [1, 1, 1, 1]} : vector<1x16x8x64xf32> to vector<1x16x1x64xf32>
    %176 = vector.extract_strided_slice %174 {offsets = [0, 0, 0, 0], sizes = [1, 16, 7, 64], strides = [1, 1, 1, 1]} : vector<1x16x8x64xf32> to vector<1x16x7x64xf32>
    %177 = tpu.concatenate %175, %176 in 2 : vector<1x16x1x64xf32>, vector<1x16x7x64xf32> -> vector<1x16x8x64xf32>
    %178 = vector.extract_strided_slice %174 {offsets = [0, 0, 1, 0], sizes = [1, 16, 7, 64], strides = [1, 1, 1, 1]} : vector<1x16x8x64xf32> to vector<1x16x7x64xf32>
    %179 = vector.extract_strided_slice %174 {offsets = [0, 0, 7, 0], sizes = [1, 16, 1, 64], strides = [1, 1, 1, 1]} : vector<1x16x8x64xf32> to vector<1x16x1x64xf32>
    %180 = tpu.concatenate %178, %179 in 2 : vector<1x16x7x64xf32>, vector<1x16x1x64xf32> -> vector<1x16x8x64xf32>
    %cst_34 = arith.constant 2.500000e-01 : f32
    %181 = vector.broadcast %cst_34 : f32 to vector<1x16x8x64xf32>
    %182 = arith.mulf %181, %177 : vector<1x16x8x64xf32>
    %cst_35 = arith.constant 7.500000e-01 : f32
    %183 = vector.broadcast %cst_35 : f32 to vector<1x16x8x64xf32>
    %184 = arith.mulf %183, %174 : vector<1x16x8x64xf32>
    %185 = arith.addf %182, %184 : vector<1x16x8x64xf32>
    %cst_36 = arith.constant 7.500000e-01 : f32
    %186 = vector.broadcast %cst_36 : f32 to vector<1x16x8x64xf32>
    %187 = arith.mulf %186, %174 : vector<1x16x8x64xf32>
    %cst_37 = arith.constant 2.500000e-01 : f32
    %188 = vector.broadcast %cst_37 : f32 to vector<1x16x8x64xf32>
    %189 = arith.mulf %188, %180 : vector<1x16x8x64xf32>
    %190 = arith.addf %187, %189 : vector<1x16x8x64xf32>
    %191 = vector.shape_cast %185 : vector<1x16x8x64xf32> to vector<1x16x8x1x64xf32>
    %192 = vector.shape_cast %190 : vector<1x16x8x64xf32> to vector<1x16x8x1x64xf32>
    %193 = tpu.concatenate %191, %192 in 3 : vector<1x16x8x1x64xf32>, vector<1x16x8x1x64xf32> -> vector<1x16x8x2x64xf32>
    %194 = vector.shape_cast %193 : vector<1x16x8x2x64xf32> to vector<1x16x16x64xf32>
    %c0_38 = arith.constant 0 : index
    %c0_39 = arith.constant 0 : index
    %c0_40 = arith.constant 0 : index
    %195 = vector.load %arg6[%c0_38, %c0_39, %c0_40] : memref<9x64x32xf32, #tpu.memory_space<vmem>>, vector<9x64x32xf32>
    %c0_41 = arith.constant 0 : index
    %c0_42 = arith.constant 0 : index
    %196 = vector.load %arg7[%c0_41, %c0_42] : memref<1x32xf32, #tpu.memory_space<vmem>>, vector<1x32xf32>
    %cst_43 = arith.constant 0.000000e+00 : f32
    %197 = vector.broadcast %cst_43 : f32 to vector<1x1x16x64xf32>
    %198 = tpu.concatenate %197, %194, %197 in 1 : vector<1x1x16x64xf32>, vector<1x16x16x64xf32>, vector<1x1x16x64xf32> -> vector<1x18x16x64xf32>
    %cst_44 = arith.constant 0.000000e+00 : f32
    %199 = vector.broadcast %cst_44 : f32 to vector<1x18x1x64xf32>
    %200 = tpu.concatenate %199, %198, %199 in 2 : vector<1x18x1x64xf32>, vector<1x18x16x64xf32>, vector<1x18x1x64xf32> -> vector<1x18x18x64xf32>
    %cst_45 = arith.constant 0.000000e+00 : f32
    %201 = vector.broadcast %cst_45 : f32 to vector<256x32xf32>
    %202 = vector.extract_strided_slice %200 {offsets = [0, 0, 0, 0], sizes = [1, 16, 16, 64], strides = [1, 1, 1, 1]} : vector<1x18x18x64xf32> to vector<1x16x16x64xf32>
    %203 = vector.shape_cast %202 : vector<1x16x16x64xf32> to vector<256x64xf32>
    %204 = vector.extract_strided_slice %195 {offsets = [0, 0, 0], sizes = [1, 64, 32], strides = [1, 1, 1]} : vector<9x64x32xf32> to vector<1x64x32xf32>
    %205 = vector.shape_cast %204 : vector<1x64x32xf32> to vector<64x32xf32>
    %cst_46 = arith.constant dense<0.000000e+00> : vector<256x32xf32>
    %206 = tpu.matmul %203, %205, %cst_46 {dimension_numbers = #tpu.dot_dimension_numbers<[1], [0], [0], [1], [0, 0, 1, 1], [], []>} : vector<256x64xf32>, vector<64x32xf32>, vector<256x32xf32> -> vector<256x32xf32>
    %207 = arith.addf %201, %206 : vector<256x32xf32>
    %208 = vector.extract_strided_slice %200 {offsets = [0, 0, 1, 0], sizes = [1, 16, 16, 64], strides = [1, 1, 1, 1]} : vector<1x18x18x64xf32> to vector<1x16x16x64xf32>
    %209 = vector.shape_cast %208 : vector<1x16x16x64xf32> to vector<256x64xf32>
    %210 = vector.extract_strided_slice %195 {offsets = [1, 0, 0], sizes = [1, 64, 32], strides = [1, 1, 1]} : vector<9x64x32xf32> to vector<1x64x32xf32>
    %211 = vector.shape_cast %210 : vector<1x64x32xf32> to vector<64x32xf32>
    %cst_47 = arith.constant dense<0.000000e+00> : vector<256x32xf32>
    %212 = tpu.matmul %209, %211, %cst_47 {dimension_numbers = #tpu.dot_dimension_numbers<[1], [0], [0], [1], [0, 0, 1, 1], [], []>} : vector<256x64xf32>, vector<64x32xf32>, vector<256x32xf32> -> vector<256x32xf32>
    %213 = arith.addf %207, %212 : vector<256x32xf32>
    %214 = vector.extract_strided_slice %200 {offsets = [0, 0, 2, 0], sizes = [1, 16, 16, 64], strides = [1, 1, 1, 1]} : vector<1x18x18x64xf32> to vector<1x16x16x64xf32>
    %215 = vector.shape_cast %214 : vector<1x16x16x64xf32> to vector<256x64xf32>
    %216 = vector.extract_strided_slice %195 {offsets = [2, 0, 0], sizes = [1, 64, 32], strides = [1, 1, 1]} : vector<9x64x32xf32> to vector<1x64x32xf32>
    %217 = vector.shape_cast %216 : vector<1x64x32xf32> to vector<64x32xf32>
    %cst_48 = arith.constant dense<0.000000e+00> : vector<256x32xf32>
    %218 = tpu.matmul %215, %217, %cst_48 {dimension_numbers = #tpu.dot_dimension_numbers<[1], [0], [0], [1], [0, 0, 1, 1], [], []>} : vector<256x64xf32>, vector<64x32xf32>, vector<256x32xf32> -> vector<256x32xf32>
    %219 = arith.addf %213, %218 : vector<256x32xf32>
    %220 = vector.extract_strided_slice %200 {offsets = [0, 1, 0, 0], sizes = [1, 16, 16, 64], strides = [1, 1, 1, 1]} : vector<1x18x18x64xf32> to vector<1x16x16x64xf32>
    %221 = vector.shape_cast %220 : vector<1x16x16x64xf32> to vector<256x64xf32>
    %222 = vector.extract_strided_slice %195 {offsets = [3, 0, 0], sizes = [1, 64, 32], strides = [1, 1, 1]} : vector<9x64x32xf32> to vector<1x64x32xf32>
    %223 = vector.shape_cast %222 : vector<1x64x32xf32> to vector<64x32xf32>
    %cst_49 = arith.constant dense<0.000000e+00> : vector<256x32xf32>
    %224 = tpu.matmul %221, %223, %cst_49 {dimension_numbers = #tpu.dot_dimension_numbers<[1], [0], [0], [1], [0, 0, 1, 1], [], []>} : vector<256x64xf32>, vector<64x32xf32>, vector<256x32xf32> -> vector<256x32xf32>
    %225 = arith.addf %219, %224 : vector<256x32xf32>
    %226 = vector.extract_strided_slice %200 {offsets = [0, 1, 1, 0], sizes = [1, 16, 16, 64], strides = [1, 1, 1, 1]} : vector<1x18x18x64xf32> to vector<1x16x16x64xf32>
    %227 = vector.shape_cast %226 : vector<1x16x16x64xf32> to vector<256x64xf32>
    %228 = vector.extract_strided_slice %195 {offsets = [4, 0, 0], sizes = [1, 64, 32], strides = [1, 1, 1]} : vector<9x64x32xf32> to vector<1x64x32xf32>
    %229 = vector.shape_cast %228 : vector<1x64x32xf32> to vector<64x32xf32>
    %cst_50 = arith.constant dense<0.000000e+00> : vector<256x32xf32>
    %230 = tpu.matmul %227, %229, %cst_50 {dimension_numbers = #tpu.dot_dimension_numbers<[1], [0], [0], [1], [0, 0, 1, 1], [], []>} : vector<256x64xf32>, vector<64x32xf32>, vector<256x32xf32> -> vector<256x32xf32>
    %231 = arith.addf %225, %230 : vector<256x32xf32>
    %232 = vector.extract_strided_slice %200 {offsets = [0, 1, 2, 0], sizes = [1, 16, 16, 64], strides = [1, 1, 1, 1]} : vector<1x18x18x64xf32> to vector<1x16x16x64xf32>
    %233 = vector.shape_cast %232 : vector<1x16x16x64xf32> to vector<256x64xf32>
    %234 = vector.extract_strided_slice %195 {offsets = [5, 0, 0], sizes = [1, 64, 32], strides = [1, 1, 1]} : vector<9x64x32xf32> to vector<1x64x32xf32>
    %235 = vector.shape_cast %234 : vector<1x64x32xf32> to vector<64x32xf32>
    %cst_51 = arith.constant dense<0.000000e+00> : vector<256x32xf32>
    %236 = tpu.matmul %233, %235, %cst_51 {dimension_numbers = #tpu.dot_dimension_numbers<[1], [0], [0], [1], [0, 0, 1, 1], [], []>} : vector<256x64xf32>, vector<64x32xf32>, vector<256x32xf32> -> vector<256x32xf32>
    %237 = arith.addf %231, %236 : vector<256x32xf32>
    %238 = vector.extract_strided_slice %200 {offsets = [0, 2, 0, 0], sizes = [1, 16, 16, 64], strides = [1, 1, 1, 1]} : vector<1x18x18x64xf32> to vector<1x16x16x64xf32>
    %239 = vector.shape_cast %238 : vector<1x16x16x64xf32> to vector<256x64xf32>
    %240 = vector.extract_strided_slice %195 {offsets = [6, 0, 0], sizes = [1, 64, 32], strides = [1, 1, 1]} : vector<9x64x32xf32> to vector<1x64x32xf32>
    %241 = vector.shape_cast %240 : vector<1x64x32xf32> to vector<64x32xf32>
    %cst_52 = arith.constant dense<0.000000e+00> : vector<256x32xf32>
    %242 = tpu.matmul %239, %241, %cst_52 {dimension_numbers = #tpu.dot_dimension_numbers<[1], [0], [0], [1], [0, 0, 1, 1], [], []>} : vector<256x64xf32>, vector<64x32xf32>, vector<256x32xf32> -> vector<256x32xf32>
    %243 = arith.addf %237, %242 : vector<256x32xf32>
    %244 = vector.extract_strided_slice %200 {offsets = [0, 2, 1, 0], sizes = [1, 16, 16, 64], strides = [1, 1, 1, 1]} : vector<1x18x18x64xf32> to vector<1x16x16x64xf32>
    %245 = vector.shape_cast %244 : vector<1x16x16x64xf32> to vector<256x64xf32>
    %246 = vector.extract_strided_slice %195 {offsets = [7, 0, 0], sizes = [1, 64, 32], strides = [1, 1, 1]} : vector<9x64x32xf32> to vector<1x64x32xf32>
    %247 = vector.shape_cast %246 : vector<1x64x32xf32> to vector<64x32xf32>
    %cst_53 = arith.constant dense<0.000000e+00> : vector<256x32xf32>
    %248 = tpu.matmul %245, %247, %cst_53 {dimension_numbers = #tpu.dot_dimension_numbers<[1], [0], [0], [1], [0, 0, 1, 1], [], []>} : vector<256x64xf32>, vector<64x32xf32>, vector<256x32xf32> -> vector<256x32xf32>
    %249 = arith.addf %243, %248 : vector<256x32xf32>
    %250 = vector.extract_strided_slice %200 {offsets = [0, 2, 2, 0], sizes = [1, 16, 16, 64], strides = [1, 1, 1, 1]} : vector<1x18x18x64xf32> to vector<1x16x16x64xf32>
    %251 = vector.shape_cast %250 : vector<1x16x16x64xf32> to vector<256x64xf32>
    %252 = vector.extract_strided_slice %195 {offsets = [8, 0, 0], sizes = [1, 64, 32], strides = [1, 1, 1]} : vector<9x64x32xf32> to vector<1x64x32xf32>
    %253 = vector.shape_cast %252 : vector<1x64x32xf32> to vector<64x32xf32>
    %cst_54 = arith.constant dense<0.000000e+00> : vector<256x32xf32>
    %254 = tpu.matmul %251, %253, %cst_54 {dimension_numbers = #tpu.dot_dimension_numbers<[1], [0], [0], [1], [0, 0, 1, 1], [], []>} : vector<256x64xf32>, vector<64x32xf32>, vector<256x32xf32> -> vector<256x32xf32>
    %255 = arith.addf %249, %254 : vector<256x32xf32>
    %256 = vector.broadcast %196 : vector<1x32xf32> to vector<256x32xf32>
    %257 = arith.addf %255, %256 : vector<256x32xf32>
    %cst_55 = arith.constant 0.000000e+00 : f32
    %258 = vector.broadcast %cst_55 : f32 to vector<256x32xf32>
    %259 = arith.maximumf %257, %258 : vector<256x32xf32>
    %260 = vector.shape_cast %259 : vector<256x32xf32> to vector<1x16x16x32xf32>
    %261 = vector.shape_cast %260 : vector<1x16x16x32xf32> to vector<256x32xf32>
    %c0_56 = arith.constant 0 : index
    %c0_57 = arith.constant 0 : index
    %262 = vector.load %arg8[%c0_56, %c0_57] : memref<32x1xf32, #tpu.memory_space<vmem>>, vector<32x1xf32>
    %cst_58 = arith.constant dense<0.000000e+00> : vector<256x1xf32>
    %263 = tpu.matmul %261, %262, %cst_58 {dimension_numbers = #tpu.dot_dimension_numbers<[1], [0], [0], [1], [0, 0, 1, 1], [], []>} : vector<256x32xf32>, vector<32x1xf32>, vector<256x1xf32> -> vector<256x1xf32>
    %c0_59 = arith.constant 0 : index
    %c0_60 = arith.constant 0 : index
    %264 = vector.load %arg9[%c0_59, %c0_60] : memref<1x1xf32, #tpu.memory_space<vmem>>, vector<1x1xf32>
    %265 = vector.broadcast %264 : vector<1x1xf32> to vector<256x1xf32>
    %266 = arith.addf %263, %265 : vector<256x1xf32>
    %267 = vector.shape_cast %266 : vector<256x1xf32> to vector<1x1x256xf32>
    %c0_61 = arith.constant 0 : index
    %c0_62 = arith.constant 0 : index
    %c0_63 = arith.constant 0 : index
    %268 = vector.load %arg10[%c0_61, %c0_62, %c0_63] : memref<1x1x256xf32, #tpu.memory_space<vmem>>, vector<1x1x256xf32>
    tpu.vector_store %arg10[%c0_61, %c0_62, %c0_63], %267 {strides = array<i32>} : memref<1x1x256xf32, #tpu.memory_space<vmem>>, vector<1x1x256xf32>,
    return
  }
  func.func @transform_0(%arg0: i32) -> (i32, i32, i32, i32) {
    %c0_i32 = arith.constant 0 : i32
    %c0_i32_0 = arith.constant 0 : i32
    %c0_i32_1 = arith.constant 0 : i32
    %c0_i32_2 = arith.constant 0 : i32
    return %arg0, %c0_i32, %c0_i32_0, %c0_i32_1 : i32, i32, i32, i32
  }
  func.func @transform_1(%arg0: i32) -> (i32, i32) {
    %c0_i32 = arith.constant 0 : i32
    %c0_i32_0 = arith.constant 0 : i32
    %c0_i32_1 = arith.constant 0 : i32
    return %c0_i32, %c0_i32_0 : i32, i32
  }
  func.func @transform_2(%arg0: i32) -> (i32, i32) {
    %c0_i32 = arith.constant 0 : i32
    %c0_i32_0 = arith.constant 0 : i32
    %c0_i32_1 = arith.constant 0 : i32
    return %c0_i32, %c0_i32_0 : i32, i32
  }
  func.func @transform_3(%arg0: i32) -> (i32, i32, i32) {
    %c0_i32 = arith.constant 0 : i32
    %c0_i32_0 = arith.constant 0 : i32
    %c0_i32_1 = arith.constant 0 : i32
    %c0_i32_2 = arith.constant 0 : i32
    return %c0_i32, %c0_i32_0, %c0_i32_1 : i32, i32, i32
  }
  func.func @transform_4(%arg0: i32) -> (i32, i32) {
    %c0_i32 = arith.constant 0 : i32
    %c0_i32_0 = arith.constant 0 : i32
    %c0_i32_1 = arith.constant 0 : i32
    return %c0_i32, %c0_i32_0 : i32, i32
  }
  func.func @transform_5(%arg0: i32) -> (i32, i32, i32) {
    %c0_i32 = arith.constant 0 : i32
    %c0_i32_0 = arith.constant 0 : i32
    %c0_i32_1 = arith.constant 0 : i32
    %c0_i32_2 = arith.constant 0 : i32
    return %c0_i32, %c0_i32_0, %c0_i32_1 : i32, i32, i32
  }
  func.func @transform_6(%arg0: i32) -> (i32, i32) {
    %c0_i32 = arith.constant 0 : i32
    %c0_i32_0 = arith.constant 0 : i32
    %c0_i32_1 = arith.constant 0 : i32
    return %c0_i32, %c0_i32_0 : i32, i32
  }
  func.func @transform_7(%arg0: i32) -> (i32, i32) {
    %c0_i32 = arith.constant 0 : i32
    %c0_i32_0 = arith.constant 0 : i32
    %c0_i32_1 = arith.constant 0 : i32
    return %c0_i32, %c0_i32_0 : i32, i32
  }
  func.func @transform_8(%arg0: i32) -> (i32, i32) {
    %c0_i32 = arith.constant 0 : i32
    %c0_i32_0 = arith.constant 0 : i32
    %c0_i32_1 = arith.constant 0 : i32
    return %c0_i32, %c0_i32_0 : i32, i32
  }
  func.func @transform_9(%arg0: i32) -> (i32, i32, i32) {
    %c0_i32 = arith.constant 0 : i32
    %c0_i32_0 = arith.constant 0 : i32
    %c0_i32_1 = arith.constant 0 : i32
    return %arg0, %c0_i32, %c0_i32_0 : i32, i32, i32
  }
}

</mosaic_0001>

<bundles_post_ra>
// kernel: simple_unet_forward.1
= control target key start
LH: loop header
LB: loop body
LE: loop exit
PB: predicated region body
PF: predicated region fallthrough
CT: control target
= control target key end

     0   :  { %s17681_s11 = smov 0   ;;  %s25145_s0 = inlined_call_operand.vmem [shape: f32[2,16,16,1], index: 0, kind: input, shape index: {}]   ;;  %s25146_s1 = inlined_call_operand.vmem [shape: f32[9,32], index: 1, kind: input, shape index: {}]   ;;  %s25147_s2 = inlined_call_operand.vmem [shape: f32[1,32], index: 2, kind: input, shape index: {}]   ;;  %s25148_s3 = inlined_call_operand.vmem [shape: f32[9,32,64], index: 3, kind: input, shape index: {}]   ;;  %s25149_s4 = inlined_call_operand.vmem [shape: f32[1,64], index: 4, kind: input, shape index: {}]   ;;  %s25150_s5 = inlined_call_operand.vmem [shape: f32[9,64,32], index: 5, kind: input, shape index: {}]   ;;  %s25151_s6 = inlined_call_operand.vmem [shape: f32[1,32], index: 6, kind: input, shape index: {}]   ;;  %s25152_s7 = inlined_call_operand.vmem [shape: f32[32,1], index: 7, kind: input, shape index: {}]   ;;  %s25153_s8 = inlined_call_operand.<no memory space> [shape: f32[1,1], index: 8, kind: input, shape index: {}]   ;;  %s25154_s9 = inlined_call_operand.vmem [shape: f32[2,1,256], index: 9, kind: output, shape index: {}]  }
   0x1   :  { %v14_v0 = vstv %s25153_s8 }
   0x2   :  { %15 = vst [vmem:[#allocation2] sm:$0x1] %v14_v0 }
   0x3 LB: > { %s15793_s12 = sadd.s32 4294967295, %s17622_s11   ;;  %p15797_p0 = scmp.ge.s32.totalorder %s17622_s11, 1  ;;  %s17622_s11 = sphi %s17681_s11, %s21_s11  }
   0x4   : > { %p289_p1 = scmp.lt.s32.totalorder %s17622_s11, 3 }
   0x6   : > { %p290_p2 = pnand %p15797_p0, %p289_p1 }
   0x8   : > { %293 = sbr.rel (%p290_p2) target bundleno = 2251 (0x8cb), region = 56 }
   0xd   : > { %p324_p3 = scmp.lt.s32.totalorder %s15793_s12, 1  ;;  %v17624_v1 = vmov 0   ;;  %vm401_vm0 = vcmask 1040384   ;;  %v17625_v20 = vmov 0.0   ;;  %vm911_vm1 = vcmask 1046528  }
   0xe   : > { %17602 = vset.pattern.permute.xlu1 %v17624_v1  ;;  %17601 = vset.pattern.permute.xlu0 %v17624_v1  ;;  %v17719_v21 = vrot.slane %v17625_v20, 7  ;;  %vm1156_vm2 = vcmask 1045504   ;;  %vm3201_vm3 = vcmask 254976   ;;  %vm4098_vm4 = vcmask 261120  }
   0xf   : > { %s26404_s12 = smov (!%p324_p3, %s15793_s12), 1  ;;  %vm4392_vm5 = vcmask 1041409   ;;  %vm4394_vm6 = vcmask 1042434   ;;  %vm4396_vm7 = vcmask 1043459   ;;  %vm4398_vm8 = vcmask 1044484  }
  0x10   : > { %s16264_s8 = sshll.u32 %s26404_s12, 8  ;;  %25468 = vst [vmem:[#allocation3_spill] sm:$0xff] %v17719_v21  ;;  %v17731_v29 = vsel %vm401_vm0, 0.0, %v17719_v21  ;;  %vm4400_vm9 = vcmask 1045509   ;;  %vm4402_vm10 = vcmask 1046534   ;;  %vm4404_vm11 = vcmask 1047559  }
  0x11   : > { %s17695_s15 = scalar_lea.vmem %s25145_s0, %s16264_s8  ;;  %25469 = vst [vmem:[#allocation4_spill] sm:$0xff] %v17731_v29  ;;  %v17603_v33 = vpack.i.bf16 %v17719_v21, %v17731_v29  ;;  %vm9319_vm12 = vcmask 523264   ;;  %vm15540_vm13 = vcmask 130112   ;;  %vm15547_vm14 = vcmask 195712   ;;  %s15800_s24 = sshll.u32 %s26404_s12, 1 }
  0x12   : > { %v345_v2 = vld [vmem:[%s17695_s15 + $0x60] sm:$0xff]  ;;  %v343_v3 = vld [vmem:[%s17695_s15 + $0x50] sm:$0xff]  ;;  %v17700_v4 = vld [vmem:[%s17695_s15 + $0x68] sm:$0xff]  ;;  %vm15554_vm15 = vcmask 261312   ;;  %s332_s27 = scalar_lea.vmem %s25154_s9, %s15800_s24 }
  0x13   : > { %v422_v5 = vrot.slane %v345_v2, 7  ;;  %v419_v6 = vrot.slane %v343_v3, 7  ;;  %v423_v7 = vrot.slane %v17700_v4, 7  ;;  %v344_v8 = vld [vmem:[%s17695_s15 + $0x58] sm:$0xff]  ;;  %v347_v10 = vld [vmem:[%s17695_s15 + $0x70] sm:$0xff]  ;;  %v349_v18 = vld [vmem:[%s17695_s15 + $0x80] sm:$0xff] }
  0x14   : > { %v420_v9 = vrot.slane %v344_v8, 7  ;;  %v17706_v11 = vld [vmem:[%s17695_s15 + $0x78] sm:$0xff]  ;;  %v425_v16 = vrot.slane %v347_v10, 7  ;;  %v17717_v19 = vld [vmem:[%s17695_s15 + $0x88] sm:$0xff]  ;;  %v428_v24 = vrot.slane %v349_v18, 7  ;;  %v333_v26 = vld [vmem:[%s17695_s15] sm:$0xff] }
  0x15   : > { %v492_v12 = vsel %vm401_vm0, 0.0, %v422_v5  ;;  %v491_v13 = vsel %vm401_vm0, 0.0, %v419_v6  ;;  %v424_v14 = vsel %vm401_vm0, %v422_v5, %v423_v7  ;;  %v426_v17 = vrot.slane %v17706_v11, 7  ;;  %v351_v31 = vld [vmem:[%s17695_s15 + $0x90] sm:$0xff]  ;;  %v17735_v32 = vld [vmem:[%s17695_s15 + $0x8] sm:$0xff]  ;;  %v353_v37 = vld [vmem:[%s17695_s15 + $0xa0] sm:$0xff] }
  0x16   : > { %584 = vperm.xlu1 %17602, %v492_v12   ;;  %575 = vperm.xlu0 %17601, %v491_v13   ;;  %v421_v15 = vsel %vm401_vm0, %v419_v6, %v420_v9  ;;  %v493_v23 = vsel %vm401_vm0, 0.0, %v425_v16  ;;  %v429_v25 = vrot.slane %v17717_v19, 7  ;;  %v494_v28 = vsel %vm401_vm0, 0.0, %v428_v24  ;;  %v17743_v38 = vld [vmem:[%s17695_s15 + $0x98] sm:$0xff]  ;;  %v17751_v43 = vld [vmem:[%s17695_s15 + $0xa8] sm:$0xff]  ;;  %v355_v47 = vld [vmem:[%s17695_s15 + $0xb0] sm:$0xff] }
  0x17   : > { %v427_v22 = vsel %vm401_vm0, %v425_v16, %v426_v17  ;;  %v404_v30 = vrot.slane %v333_v26, 7  ;;  %v431_v35 = vrot.slane %v351_v31, 7  ;;  %v405_v36 = vrot.slane %v17735_v32, 7  ;;  %v357_v51 = vld [vmem:[%s17695_s15 + $0xc0] sm:$0xff]  ;;  %v356_v52 = vld [vmem:[%s17695_s15 + $0xb8] sm:$0xff]  ;;  %v358_v57 = vld [vmem:[%s17695_s15 + $0xc8] sm:$0xff] }
  0x18   : > { %v430_v27 = vsel %vm401_vm0, %v428_v24, %v429_v25  ;;  %v434_v41 = vrot.slane %v353_v37, 7  ;;  %v432_v42 = vrot.slane %v17743_v38, 7  ;;  %v435_v46 = vrot.slane %v17751_v43, 7  ;;  %v335_v61 = vld [vmem:[%s17695_s15 + $0x10] sm:$0xff]  ;;  %v337_v1 = vld [vmem:[%s17695_s15 + $0x20] sm:$0xff]  ;;  %v336_v2 = vld [vmem:[%s17695_s15 + $0x18] sm:$0xff] }
  0x19   : > { %v486_v34 = vsel %vm401_vm0, 0.0, %v404_v30  ;;  %v495_v39 = vsel %vm401_vm0, 0.0, %v431_v35  ;;  %v406_v40 = vsel %vm401_vm0, %v404_v30, %v405_v36  ;;  %v508_v48 = vsel %vm401_vm0, %v420_v9, 0.0  ;;  %v338_v8 = vld [vmem:[%s17695_s15 + $0x28] sm:$0xff]  ;;  %v341_v13 = vld [vmem:[%s17695_s15 + $0x40] sm:$0xff]  ;;  %v359_v31 = vld [vmem:[%s17695_s15 + $0xd0] sm:$0xff] }
  0x1a   : > { %588 = vperm.xlu1 %17602, %v424_v14   ;;  %579 = vperm.xlu0 %17601, %v421_v15   ;;  %v496_v44 = vsel %vm401_vm0, 0.0, %v434_v41  ;;  %v433_v45 = vsel %vm401_vm0, %v431_v35, %v432_v42  ;;  %v436_v49 = vsel %vm401_vm0, %v434_v41, %v435_v46  ;;  %v437_v50 = vrot.slane %v355_v47, 7  ;;  %v340_v14 = vld [vmem:[%s17695_s15 + $0x38] sm:$0xff]  ;;  %v342_v19 = vld [vmem:[%s17695_s15 + $0x48] sm:$0xff]  ;;  %v361_v41 = vld [vmem:[%s17695_s15 + $0xe0] sm:$0xff] }
  0x1b   : > { %v509_v54 = vsel %vm401_vm0, %v423_v7, 0.0  ;;  %v440_v55 = vrot.slane %v357_v51, 7  ;;  %v438_v56 = vrot.slane %v356_v52, 7  ;;  %v441_v60 = vrot.slane %v358_v57, 7  ;;  %v339_v7 = vld [vmem:[%s17695_s15 + $0x30] sm:$0xff]  ;;  %v360_v35 = vld [vmem:[%s17695_s15 + $0xd8] sm:$0xff] }
  0x1c   : > { %v497_v53 = vsel %vm401_vm0, 0.0, %v437_v50  ;;  %v510_v62 = vsel %vm401_vm0, %v426_v17, 0.0  ;;  %v407_v0 = vrot.slane %v335_v61, 7  ;;  %v511_v4 = vsel %vm401_vm0, %v429_v25, 0.0  ;;  %v363_v47 = vld [vmem:[%s17695_s15 + $0xf0] sm:$0xff]  ;;  %v364_v51 = vld [vmem:[%s17695_s15 + $0xf8] sm:$0xff] }
  0x1d   : > { %v498_v58 = vsel %vm401_vm0, 0.0, %v440_v55  ;;  %v439_v59 = vsel %vm401_vm0, %v437_v50, %v438_v56  ;;  %v442_v63 = vsel %vm401_vm0, %v440_v55, %v441_v60  ;;  %v410_v5 = vrot.slane %v337_v1, 7 }
  0x1e   : > { %597 = vperm.xlu1 %17602, %v427_v22   ;;  %593 = vperm.xlu0 %17601, %v493_v23   ;;  %v487_v3 = vsel %vm401_vm0, 0.0, %v407_v0  ;;  %v408_v6 = vrot.slane %v336_v2, 7  ;;  %v413_v11 = vrot.slane %v339_v7, 7  ;;  %v411_v12 = vrot.slane %v338_v8, 7 }
  0x1f   : > { %v488_v9 = vsel %vm401_vm0, 0.0, %v410_v5  ;;  %v416_v17 = vrot.slane %v341_v13, 7  ;;  %v414_v18 = vrot.slane %v340_v14, 7  ;;  %v417_v23 = vrot.slane %v342_v19, 7 }
  0x20   : > { %v409_v10 = vsel %vm401_vm0, %v407_v0, %v408_v6  ;;  %v489_v15 = vsel %vm401_vm0, 0.0, %v413_v11  ;;  %v412_v16 = vsel %vm401_vm0, %v410_v5, %v411_v12  ;;  %v17794_v24 = vsel %vm401_vm0, %v17719_v21, 0.0 }
  0x21   : > { %v490_v20 = vsel %vm401_vm0, 0.0, %v416_v17  ;;  %v415_v22 = vsel %vm401_vm0, %v413_v11, %v414_v18  ;;  %25470 = vst [vmem:[#allocation5_spill] sm:$0xff] %v17794_v24  ;;  %v418_v25 = vsel %vm401_vm0, %v416_v17, %v417_v23  ;;  %v512_v26 = vsel %vm401_vm0, %v432_v42, 0.0  ;;  %v362_v42 = vld [vmem:[%s17695_s15 + $0xe8] sm:$0xff] }
  0x22   : > { %606 = vperm.xlu1 %17602, %v430_v27   ;;  %602 = vperm.xlu0 %17601, %v494_v28   ;;  %v503_v27 = vsel %vm401_vm0, %v405_v36, 0.0  ;;  %v514_v28 = vsel %vm401_vm0, %v438_v56, 0.0  ;;  %v513_v30 = vsel %vm401_vm0, %v435_v46, 0.0  ;;  %v443_v32 = vrot.slane %v359_v31, 7 }
  0x23   : > { %v505_v37 = vsel %vm401_vm0, %v411_v12, 0.0  ;;  %v444_v38 = vrot.slane %v360_v35, 7  ;;  %v447_v46 = vrot.slane %v362_v42, 7  ;;  %v449_v50 = vrot.slane %v363_v47, 7 }
  0x24   : > { %v499_v36 = vsel %vm401_vm0, 0.0, %v443_v32  ;;  %v25155_v57 = vlaneseq }
  0x25   : > { %v516_v43 = vsel %vm401_vm0, %v444_v38, 0.0  ;;  %v501_v52 = vsel %vm401_vm0, 0.0, %v449_v50 }
  0x26   : > { %17604 = vperm.xlu0 %17601, %v17603_v33   ;;  %530 = vperm.xlu1 %17602, %v486_v34   ;;  %v504_v33 = vsel %vm401_vm0, %v408_v6, 0.0  ;;  %v515_v34 = vsel %vm401_vm0, %v441_v60, 0.0 }
  0x2a   : > { %611 = vperm.xlu1 %17602, %v495_v39   ;;  %534 = vperm.xlu0 %17601, %v406_v40   ;;  %v506_v39 = vsel %vm401_vm0, %v414_v18, 0.0  ;;  %v445_v40 = vsel %vm401_vm0, %v443_v32, %v444_v38 }
  0x2e   : > { %620 = vperm.xlu1 %17602, %v496_v44   ;;  %615 = vperm.xlu0 %17601, %v433_v45   ;;  %v507_v44 = vsel %vm401_vm0, %v417_v23, 0.0  ;;  %v446_v45 = vrot.slane %v361_v41, 7 }
  0x32   : > { %763 = vperm.xlu1 %17602, %v508_v48   ;;  %624 = vperm.xlu0 %17601, %v436_v49   ;;  %v448_v48 = vsel %vm401_vm0, %v446_v45, %v447_v46  ;;  %v500_v49 = vsel %vm401_vm0, 0.0, %v446_v45 }
  0x36   : > { %629 = vperm.xlu1 %17602, %v497_v53   ;;  %768 = vperm.xlu0 %17601, %v509_v54   ;;  %v517_v53 = vsel %vm401_vm0, %v447_v46, 0.0  ;;  %v450_v54 = vrot.slane %v364_v51, 7 }
  0x38   : > { %v518_v55 = vsel %vm401_vm0, %v450_v54, 0.0  ;;  %v451_v56 = vsel %vm401_vm0, %v449_v50, %v450_v54 }
  0x3a   : > { %638 = vperm.xlu1 %17602, %v498_v58   ;;  %633 = vperm.xlu0 %17601, %v439_v59   ;;  %v17829_v58 = vshrl.u32 %v25155_v57, 7  ;;  %v17626_v59 = vmov 1983009808  }
  0x3b   : > { %v2531_v60 = vunpack.c.l.s4 %v17626_v59 }
  0x3c   : > { %25471 = vst [vmem:[#allocation6_spill] sm:$0xff] %v17829_v58  ;;  %v813_v61 = vsub.s32 1, %v17829_v58  ;;  %v17837_v0 = vsub.s32 0, %v17829_v58  ;;  %v1385_v1 = vsub.s32 4, %v17829_v58  ;;  %v1629_v2 = vsub.s32 5, %v17829_v58 }
  0x3d   : > { %v1873_v5 = vsub.s32 6, %v17829_v58  ;;  %v2532_v6 = vunpack.c.0.s8 %v2531_v60 }
  0x3e   : > { %773 = vperm.xlu1 %17602, %v510_v62   ;;  %642 = vperm.xlu0 %17601, %v442_v63   ;;  %v1058_v62 = vsub.s32 2, %v17829_v58  ;;  %v365_v63 = vld [vmem:[%s25146_s1] sm:$0xff]  ;;  %25472 = vst [vmem:[#allocation7_spill] sm:$0xff] %v17837_v0 }
  0x3f   : > { %v17851_v11 = vrot.slane %v365_v63, %v17837_v0  ;;  %v17853_v12 = vrot.slane %v365_v63, %v1385_v1  ;;  %v17855_v13 = vrot.slane %v365_v63, %v1629_v2  ;;  %v17861_v18 = vrot.slane %v365_v63, %v1873_v5 }
  0x42   : > { %539 = vperm.xlu1 %17602, %v487_v3   ;;  %778 = vperm.xlu0 %17601, %v511_v4   ;;  %v1941_v3 = vsub.s32 7, %v17829_v58  ;;  %v1312_v4 = vsub.s32 3, %v17829_v58 }
  0x44   : > { %v17857_v14 = vrot.slane %v365_v63, %v1941_v3  ;;  %v17859_v17 = vrot.slane %v365_v63, %v1312_v4 }
  0x46   : > { %548 = vperm.xlu1 %17602, %v488_v9   ;;  %543 = vperm.xlu0 %17601, %v409_v10   ;;  %v17846_v9 = vrot.slane %v365_v63, %v813_v61  ;;  %v17848_v10 = vrot.slane %v365_v63, %v1058_v62 }
  0x4a   : > { %557 = vperm.xlu1 %17602, %v489_v15   ;;  %552 = vperm.xlu0 %17601, %v412_v16  }
  0x4e   : > { %566 = vperm.xlu1 %17602, %v490_v20   ;;  %561 = vperm.xlu0 %17601, %v415_v22   ;;  %v17872_v22 = vld [vmem:[%s25146_s1 + $0x8] ss:$0 sm:$0xff] }
  0x52   : > { %733 = vperm.xlu1 %17602, %v17794_v24   ;;  %570 = vperm.xlu0 %17601, %v418_v25  }
  0x56   : > { %783 = vperm.xlu1 %17602, %v512_v26   ;;  %738 = vperm.xlu0 %17601, %v503_v27   ;;  %v17884_v27 = vsub.s32 %v2532_v6, %v17829_v58 }
  0x58   : > { %25473 = vst [vmem:[#allocation8_spill] sm:$0xff] %v17884_v27 }
  0x5a   : > { %793 = vperm.xlu1 %17602, %v514_v28   ;;  %788 = vperm.xlu0 %17601, %v513_v30  }
  0x5e   : > { %743 = vperm.xlu1 %17602, %v504_v33   ;;  %798 = vperm.xlu0 %17601, %v515_v34  }
  0x62   : > { %647 = vperm.xlu1 %17602, %v499_v36   ;;  %748 = vperm.xlu0 %17601, %v505_v37  }
  0x66   : > { %753 = vperm.xlu1 %17602, %v506_v39   ;;  %651 = vperm.xlu0 %17601, %v445_v40  }
  0x6a   : > { %803 = vperm.xlu1 %17602, %v516_v43   ;;  %758 = vperm.xlu0 %17601, %v507_v44  }
  0x6e   : > { %660 = vperm.xlu1 %17602, %v448_v48   ;;  %656 = vperm.xlu0 %17601, %v500_v49  }
  0x72   : > { %1303 = vperm.xlu1 %17602, %v501_v52   ;;  %808 = vperm.xlu0 %17601, %v517_v53  }
  0x76   : > { %1380 = vperm.xlu1 %17602, %v518_v55   ;;  %1307 = vperm.xlu0 %17601, %v451_v56  }
  0x91   : > { %v585_v15 = vpop.permute.xlu1 %584  ;;  %v576_v16 = vpop.permute.xlu0 %575 }
  0x92   : > { %v17864_v19 = vmul.f32 %v17846_v9, %v585_v15  ;;  %v17867_v20 = vmul.f32 %v17848_v10, %v585_v15  ;;  %v17875_v23 = vmul.f32 %v17853_v12, %v585_v15  ;;  %v17878_v25 = vmul.f32 %v17855_v13, %v585_v15 }
  0x93   : > { %v17881_v26 = vmul.f32 %v17857_v14, %v585_v15  ;;  %v17887_v28 = vmul.f32 %v17851_v11, %v585_v15  ;;  %v17890_v30 = vmul.f32 %v17859_v17, %v585_v15  ;;  %v17893_v31 = vmul.f32 %v17861_v18, %v585_v15 }
  0x94   : > { %v17896_v33 = vmul.f32 %v17872_v22, %v585_v15  ;;  %v17901_v35 = vmul.f32 %v17851_v11, %v576_v16  ;;  %v17904_v36 = vmul.f32 %v17846_v9, %v576_v16  ;;  %v17913_v41 = vmul.f32 %v17848_v10, %v576_v16 }
  0x95   : > { %25474 = vst [vmem:[#allocation9_spill] sm:$0xff] %v17893_v31  ;;  %v17906_v37 = vpop.permute.xlu1 %588  ;;  %v17908_v38 = vpop.permute.xlu0 %579  ;;  %v17916_v42 = vmul.f32 %v17853_v12, %v576_v16  ;;  %v17921_v45 = vmul.f32 %v17855_v13, %v576_v16  ;;  %v17924_v46 = vmul.f32 %v17857_v14, %v576_v16  ;;  %v17928_v48 = vmul.f32 %v17859_v17, %v576_v16 }
  0x96   : > { %25475 = vst [vmem:[#allocation10_spill] sm:$0xff] %v17908_v38  ;;  %v942_v47 = vrot.slane %v17904_v36, 1  ;;  %v17931_v49 = vmul.f32 %v17861_v18, %v576_v16  ;;  %v17934_v50 = vmul.f32 %v17872_v22, %v576_v16  ;;  %v17941_v54 = vmul.f32 %v17861_v18, %v17906_v37 }
  0x97   : > { %25476 = vst [vmem:[#allocation11_spill] sm:$0xff] %v17928_v48  ;;  %v17954_v62 = vmul.f32 %v17846_v9, %v17908_v38  ;;  %v17965_v3 = vmul.f32 %v17851_v11, %v17908_v38  ;;  %v17994_v16 = vmul.f32 %v17848_v10, %v17908_v38 }
  0x98   : > { %25477 = vst [vmem:[#allocation12_spill] sm:$0xff] %v17931_v49  ;;  %25478 = vst [vmem:[#allocation13_spill] sm:$0xff] %v17941_v54 }
  0x99   : > { %v17943_v55 = vpop.permute.xlu1 %597  ;;  %v594_v56 = vpop.permute.xlu0 %593 }
  0x9a   : > { %v17947_v60 = vmul.f32 %v17846_v9, %v594_v56  ;;  %v17950_v61 = vmul.f32 %v17848_v10, %v594_v56  ;;  %v17958_v1 = vmul.f32 %v17853_v12, %v594_v56  ;;  %v17961_v2 = vmul.f32 %v17855_v13, %v594_v56 }
  0x9b   : > { %v17968_v4 = vmul.f32 %v17851_v11, %v594_v56  ;;  %v17971_v5 = vmul.f32 %v17859_v17, %v594_v56  ;;  %v17974_v6 = vmul.f32 %v17857_v14, %v594_v56  ;;  %v17977_v15 = vmul.f32 %v17872_v22, %v594_v56 }
  0x9c   : > { %v17983_v8 = vmul.f32 %v17861_v18, %v594_v56 }
  0x9d   : > { %v17985_v7 = vpop.permute.xlu1 %606  ;;  %v603_v44 = vpop.permute.xlu0 %602 }
  0x9e   : > { %25479 = vst [vmem:[#allocation14_spill] sm:$0xff] %v17985_v7  ;;  %v17989_v40 = vmul.f32 %v17846_v9, %v603_v44  ;;  %v17998_v57 = vmul.f32 %v17848_v10, %v603_v44  ;;  %v18001_v56 = vmul.f32 %v17853_v12, %v603_v44  ;;  %v18004_v32 = vmul.f32 %v17855_v13, %v603_v44 }
  0x9f   : > { %v18008_v34 = vmul.f32 %v17851_v11, %v603_v44  ;;  %v18011_v63 = vmul.f32 %v17857_v14, %v603_v44  ;;  %v18014_v59 = vmul.f32 %v17872_v22, %v603_v44  ;;  %v18019_v52 = vmul.f32 %v17859_v17, %v603_v44 }
  0xa0   : > { %25480 = vst [vmem:[#allocation15_spill] sm:$0xff] %v17989_v40  ;;  %25481 = vst [vmem:[#allocation16_spill] sm:$0xff] %v17998_v57  ;;  %v18022_v51 = vmul.f32 %v17861_v18, %v603_v44  ;;  %v25489_v44 = vrot.slane %v17954_v62, 1 }
  0xa1   : > { %25482 = vst [vmem:[#allocation17_spill] sm:$0xff] %v18001_v56  ;;  %25483 = vst [vmem:[#allocation18_spill] sm:$0xff] %v18004_v32  ;;  %v17605_v43 = vpop.permute.xlu0 %17604  ;;  %v531_v39 = vpop.permute.xlu1 %530 }
  0xa2   : > { %25484 = vst [vmem:[#allocation19_spill] sm:$0xff] %v18008_v34  ;;  %25485 = vst [vmem:[#allocation20_spill] sm:$0xff] %v18011_v63  ;;  %v18026_v21 = vunpack.i.h.bf16 %v17605_v43  ;;  %v17606_v24 = vunpack.i.l.bf16 %v17605_v43  ;;  %v18031_v29 = vmul.f32 %v17851_v11, %v531_v39  ;;  %v18036_v54 = vsel %vm911_vm1, %v942_v47, %v25489_v44 }
  0xa3   : > { %25486 = vst [vmem:[#allocation21_spill] sm:$0xff] %v18014_v59  ;;  %25487 = vst [vmem:[#allocation22_spill] sm:$0xff] %v18022_v51  ;;  %v818_v53 = vmul.f32 %v17846_v9, %v531_v39  ;;  %v1063_v44 = vmul.f32 %v17848_v10, %v531_v39  ;;  %v1314_v63 = vmul.f32 %v17859_v17, %v531_v39 }
  0xa4   : > { %25488 = vst [vmem:[#allocation23_spill] sm:$0xff] %v18026_v21  ;;  %v18040_v0 = vmul.f32 %v18026_v21, %v17846_v9  ;;  %v18044_v58 = vmul.f32 %v18026_v21, %v17848_v10  ;;  %v815_v43 = vmul.f32 %v17606_v24, %v17846_v9  ;;  %v1060_v36 = vmul.f32 %v17606_v24, %v17848_v10 }
  0xa5   : > { %v18050_v31 = vmul.f32 %v17606_v24, %v17857_v14  ;;  %v18053_v47 = vmul.f32 %v17606_v24, %v17872_v22  ;;  %v612_v32 = vpop.permute.xlu1 %611  ;;  %v18061_v57 = vmul.f32 %v18026_v21, %v17861_v18  ;;  %v18064_v56 = vmul.f32 %v17606_v24, %v17861_v18 }
  0xa6   : > { %25490 = vst [vmem:[#allocation24_spill] sm:$0xff] %v18040_v0  ;;  %25491 = vst [vmem:[#allocation25_spill] sm:$0xff] %v18044_v58  ;;  %v25178_v49 = vrot.slane %v18040_v0, 1  ;;  %v912_v59 = vrot.slane %v815_v43, 1  ;;  %v1157_v34 = vrot.slane %v1060_v36, 2  ;;  %v667_v40 = vmul.f32 %v17606_v24, %v17851_v11 }
  0xa7   : > { %25492 = vst [vmem:[#allocation26_spill] sm:$0xff] %v18050_v31  ;;  %25493 = vst [vmem:[#allocation27_spill] sm:$0xff] %v18053_v47  ;;  %v1387_v43 = vmul.f32 %v17853_v12, %v531_v39  ;;  %v1631_v27 = vmul.f32 %v17855_v13, %v531_v39  ;;  %v18075_v36 = vmul.f32 %v17846_v9, %v612_v32  ;;  %v1162_v7 = vrot.slane %v1063_v44, 2 }
  0xa8   : > { %25494 = vst [vmem:[#allocation28_spill] sm:$0xff] %v18061_v57  ;;  %25495 = vst [vmem:[#allocation29_spill] sm:$0xff] %v18064_v56  ;;  %v914_v48 = vsel %vm911_vm1, %v912_v59, %v25178_v49  ;;  %v917_v57 = vrot.slane %v818_v53, 1  ;;  %v25497_v56 = vrot.slane %v18044_v58, 2  ;;  %v18081_v31 = vmul.f32 %v17851_v11, %v612_v32 }
  0xa9   : > { %v1024_v21 = vadd.f32 %v914_v48, %v667_v40  ;;  %25496 = vst [vmem:[#allocation30_spill] sm:$0xff] %v18075_v36  ;;  %v18084_v59 = vmul.f32 %v17848_v10, %v612_v32  ;;  %v1483_v39 = vrot.slane %v1387_v43, 1  ;;  %v18087_v51 = vmul.f32 %v17853_v12, %v612_v32  ;;  %v535_v48 = vpop.permute.xlu0 %534 }
  0xaa   : > { %v1159_v24 = vsel %vm1156_vm2, %v1157_v34, %v25497_v56  ;;  %25498 = vst [vmem:[#allocation31_spill] sm:$0xff] %v18081_v31  ;;  %v18090_v40 = vmul.f32 %v17855_v13, %v612_v32  ;;  %v1727_v53 = vrot.slane %v1631_v27, 2  ;;  %v18093_v58 = vmul.f32 %v17859_v17, %v612_v32  ;;  %v621_v31 = vpop.permute.xlu1 %620 }
  0xab   : > { %25499 = vst [vmem:[#allocation32_spill] sm:$0xff] %v18084_v59  ;;  %v1269_v49 = vadd.f32 %v1159_v24, %v1024_v21  ;;  %25500 = vst [vmem:[#allocation33_spill] sm:$0xff] %v18087_v51  ;;  %v18096_v34 = vmul.f32 %v17857_v14, %v612_v32  ;;  %v18099_v56 = vmul.f32 %v17872_v22, %v612_v32 }
  0xac   : > { %25501 = vst [vmem:[#allocation34_spill] sm:$0xff] %v18090_v40  ;;  %25502 = vst [vmem:[#allocation35_spill] sm:$0xff] %v18093_v58  ;;  %v18104_v24 = vmul.f32 %v17861_v18, %v612_v32  ;;  %v18109_v0 = vmul.f32 %v17846_v9, %v535_v48  ;;  %v18112_v58 = vmul.f32 %v17848_v10, %v535_v48 }
  0xad   : > { %25503 = vst [vmem:[#allocation36_spill] sm:$0xff] %v18096_v34  ;;  %25504 = vst [vmem:[#allocation37_spill] sm:$0xff] %v18099_v56  ;;  %v1346_v44 = vadd.f32 %v1314_v63, %v1269_v49  ;;  %v18116_v63 = vmul.f32 %v17851_v11, %v535_v48  ;;  %v18119_v43 = vmul.f32 %v17853_v12, %v535_v48 }
  0xae   : > { %25505 = vst [vmem:[#allocation38_spill] sm:$0xff] %v18104_v24  ;;  %25506 = vst [vmem:[#allocation39_spill] sm:$0xff] %v18109_v0  ;;  %v18122_v32 = vmul.f32 %v17855_v13, %v535_v48  ;;  %v25189_v47 = vrot.slane %v18109_v0, 1  ;;  %v25190_v21 = vrot.slane %v18112_v58, 2  ;;  %v18128_v40 = vmul.f32 %v17846_v9, %v621_v31 }
  0xaf   : > { %25507 = vst [vmem:[#allocation40_spill] sm:$0xff] %v18112_v58  ;;  %25508 = vst [vmem:[#allocation41_spill] sm:$0xff] %v18116_v63  ;;  %v18133_v63 = vmul.f32 %v17848_v10, %v621_v31  ;;  %v18136_v51 = vmul.f32 %v17853_v12, %v621_v31  ;;  %v18145_v59 = vmul.f32 %v17859_v17, %v535_v48  ;;  %v25515_v36 = vrot.slane %v18119_v43, 1 }
  0xb0   : > { %25509 = vst [vmem:[#allocation42_spill] sm:$0xff] %v18119_v43  ;;  %25510 = vst [vmem:[#allocation43_spill] sm:$0xff] %v18122_v32  ;;  %v919_v27 = vsel %vm911_vm1, %v917_v57, %v25189_v47  ;;  %v1164_v56 = vsel %vm1156_vm2, %v1162_v7, %v25190_v21  ;;  %v18148_v49 = vmul.f32 %v17851_v11, %v621_v31  ;;  %v25516_v0 = vrot.slane %v18122_v32, 2 }
  0xb1   : > { %25511 = vst [vmem:[#allocation44_spill] sm:$0xff] %v18128_v40  ;;  %25512 = vst [vmem:[#allocation45_spill] sm:$0xff] %v18133_v63  ;;  %v1026_v34 = vadd.f32 %v919_v27, %v18031_v29  ;;  %v1485_v24 = vsel %vm911_vm1, %v1483_v39, %v25515_v36  ;;  %v18158_v47 = vmul.f32 %v17859_v17, %v621_v31  ;;  %v25525_v58 = vrot.slane %v17954_v62, 1 }
  0xb2   : > { %25513 = vst [vmem:[#allocation46_spill] sm:$0xff] %v18136_v51  ;;  %25514 = vst [vmem:[#allocation47_spill] sm:$0xff] %v18148_v49  ;;  %v1729_v57 = vsel %vm1156_vm2, %v1727_v53, %v25516_v0  ;;  %v1595_v7 = vadd.f32 %v1485_v24, %v1346_v44  ;;  %v18162_v21 = vmul.f32 %v17855_v13, %v621_v31  ;;  %v764_v53 = vpop.permute.xlu1 %763  ;;  %v1188_v24 = vrot.slane %v17994_v16, 2 }
  0xb3   : > { %25517 = vst [vmem:[#allocation48_spill] sm:$0xff] %v18158_v47  ;;  %v18165_v49 = vmul.f32 %v17857_v14, %v621_v31  ;;  %v18167_v29 = vadd.f32 %v1164_v56, %v1026_v34  ;;  %v18172_v0 = vmul.f32 %v17861_v18, %v621_v31  ;;  %v18177_v44 = vmul.f32 %v17872_v22, %v621_v31  ;;  %v18183_v56 = vpop.permute.xlu0 %615 }
  0xb4   : > { %25518 = vst [vmem:[#allocation49_spill] sm:$0xff] %v18162_v21  ;;  %v18174_v27 = vadd.f32 %v1729_v57, %v1595_v7  ;;  %v1403_v48 = vmul.f32 %v17853_v12, %v17908_v38  ;;  %v1036_v39 = vadd.f32 %v18036_v54, %v17901_v35  ;;  %v1647_v36 = vmul.f32 %v17855_v13, %v17908_v38 }
  0xb5   : > { %25519 = vst [vmem:[#allocation50_spill] sm:$0xff] %v18165_v49  ;;  %25520 = vst [vmem:[#allocation51_spill] sm:$0xff] %v18172_v0  ;;  %v1956_v57 = vmul.f32 %v17857_v14, %v17908_v38  ;;  %v2200_v16 = vmul.f32 %v17872_v22, %v17908_v38  ;;  %v835_v51 = vmul.f32 %v17846_v9, %v764_v53  ;;  %v25522_v54 = vrot.slane %v17913_v41, 2 }
  0xb6   : > { %25521 = vst [vmem:[#allocation52_spill] sm:$0xff] %v18177_v44  ;;  %v1509_v7 = vrot.slane %v1403_v48, 1  ;;  %v1753_v34 = vrot.slane %v1647_v36, 2  ;;  %v1080_v0 = vmul.f32 %v17848_v10, %v764_v53  ;;  %v1404_v35 = vmul.f32 %v17853_v12, %v764_v53  ;;  %v630_v43 = vpop.permute.xlu1 %629 }
  0xb7   : > { %v2060_v21 = vrot.slane %v1956_v57, 1  ;;  %v1189_v63 = vsel %vm1156_vm2, %v25522_v54, %v1188_v24  ;;  %v2304_v40 = vrot.slane %v2200_v16, 2  ;;  %v945_v47 = vrot.slane %v835_v51, 1  ;;  %v18223_v62 = vpop.permute.xlu0 %624 }
  0xb8   : > { %v1648_v31 = vmul.f32 %v17855_v13, %v764_v53  ;;  %v1281_v49 = vadd.f32 %v1189_v63, %v1036_v39  ;;  %v1190_v38 = vrot.slane %v1080_v0, 2  ;;  %v1511_v32 = vrot.slane %v1404_v35, 1 }
  0xb9   : > { %v25523_v36 = vrot.slane %v17916_v42, 1  ;;  %v946_v41 = vsel %vm911_vm1, %v25525_v58, %v945_v47  ;;  %v1957_v51 = vmul.f32 %v17857_v14, %v764_v53  ;;  %v25526_v16 = vrot.slane %v17921_v45, 2 }
  0xba   : > { %v1755_v54 = vrot.slane %v1648_v31, 2  ;;  %v25528_v63 = vrot.slane %v17924_v46, 1  ;;  %v1037_v42 = vadd.f32 %v946_v41, %v17965_v3  ;;  %v2201_v0 = vmul.f32 %v17872_v22, %v764_v53 }
  0xbb   : > { %v18205_v57 = vsel %vm911_vm1, %v25523_v36, %v1509_v7  ;;  %v18214_v48 = vsel %vm1156_vm2, %v25526_v16, %v1753_v34  ;;  %v25530_v58 = vrot.slane %v17934_v50, 2  ;;  %v1191_v45 = vsel %vm1156_vm2, %v1188_v24, %v1190_v38 }
  0xbc   : > { %25524 = vst [vmem:[#allocation53_spill] sm:$0xff] %v18205_v57  ;;  %25527 = vst [vmem:[#allocation54_spill] sm:$0xff] %v18214_v48  ;;  %v18219_v39 = vsel %vm911_vm1, %v25528_v63, %v2060_v21  ;;  %v2062_v31 = vrot.slane %v1957_v51, 1  ;;  %v18232_v35 = vmul.f32 %v17846_v9, %v630_v43  ;;  %v18235_v46 = vsel %vm911_vm1, %v1509_v7, %v1511_v32 }
  0xbd   : > { %25529 = vst [vmem:[#allocation55_spill] sm:$0xff] %v18219_v39  ;;  %v18228_v47 = vsel %vm1156_vm2, %v25530_v58, %v2304_v40  ;;  %25532 = vst [vmem:[#allocation57_spill] sm:$0xff] %v18235_v46  ;;  %v18238_v3 = vsel %vm1156_vm2, %v1753_v34, %v1755_v54  ;;  %v2306_v53 = vrot.slane %v2201_v0, 2  ;;  %v18241_v36 = vmul.f32 %v17848_v10, %v630_v43 }
  0xbe   : > { %25531 = vst [vmem:[#allocation56_spill] sm:$0xff] %v18228_v47  ;;  %25533 = vst [vmem:[#allocation58_spill] sm:$0xff] %v18238_v3  ;;  %v1282_v50 = vadd.f32 %v1191_v45, %v1037_v42  ;;  %v18244_v41 = vmul.f32 %v17851_v11, %v630_v43  ;;  %v18247_v38 = vmul.f32 %v17853_v12, %v630_v43  ;;  %v769_v45 = vpop.permute.xlu0 %768  ;;  %v25538_v39 = vrot.slane %v17864_v19, 1 }
  0xbf   : > { %v18250_v24 = vmul.f32 %v17855_v13, %v630_v43  ;;  %v18253_v32 = vsel %vm911_vm1, %v2060_v21, %v2062_v31  ;;  %v18256_v34 = vsel %vm1156_vm2, %v2304_v40, %v2306_v53  ;;  %v18260_v54 = vmul.f32 %v17859_v17, %v630_v43 }
  0xc0   : > { %25534 = vst [vmem:[#allocation59_spill] sm:$0xff] %v18253_v32  ;;  %25535 = vst [vmem:[#allocation60_spill] sm:$0xff] %v18256_v34  ;;  %v18265_v63 = vmul.f32 %v17861_v18, %v630_v43  ;;  %v18268_v42 = vmul.f32 %v17857_v14, %v630_v43  ;;  %v18272_v40 = vmul.f32 %v17872_v22, %v630_v43  ;;  %v25539_v57 = vrot.slane %v17867_v20, 2 }
  0xc1   : > { %25536 = vst [vmem:[#allocation61_spill] sm:$0xff] %v18260_v54  ;;  %v837_v0 = vmul.f32 %v17846_v9, %v17906_v37  ;;  %v1082_v58 = vmul.f32 %v17848_v10, %v17906_v37  ;;  %v682_v31 = vmul.f32 %v17851_v11, %v17906_v37  ;;  %v1327_v53 = vmul.f32 %v17859_v17, %v17906_v37 }
  0xc2   : > { %25537 = vst [vmem:[#allocation62_spill] sm:$0xff] %v18265_v63  ;;  %v1406_v16 = vmul.f32 %v17853_v12, %v17906_v37  ;;  %v1650_v43 = vmul.f32 %v17855_v13, %v17906_v37  ;;  %v1358_v7 = vadd.f32 %v17890_v30, %v1281_v49  ;;  %v1959_v34 = vmul.f32 %v17857_v14, %v17906_v37 }
  0xc3   : > { %v948_v21 = vrot.slane %v837_v0, 1  ;;  %v1193_v51 = vrot.slane %v1082_v58, 2  ;;  %v2203_v46 = vmul.f32 %v17872_v22, %v17906_v37  ;;  %v838_v47 = vmul.f32 %v17846_v9, %v769_v45 }
  0xc4   : > { %v1514_v32 = vrot.slane %v1406_v16, 1  ;;  %v1758_v3 = vrot.slane %v1650_v43, 2  ;;  %v2065_v58 = vrot.slane %v1959_v34, 1  ;;  %v1083_v30 = vmul.f32 %v17848_v10, %v769_v45 }
  0xc5   : > { %v949_v48 = vsel %vm911_vm1, %v25538_v39, %v948_v21  ;;  %v1194_v0 = vsel %vm1156_vm2, %v25539_v57, %v1193_v51  ;;  %v25540_v16 = vrot.slane %v17875_v23, 1  ;;  %v25541_v37 = vrot.slane %v17878_v25, 2 }
  0xc6   : > { %v1038_v49 = vadd.f32 %v949_v48, %v17887_v28  ;;  %v2309_v19 = vrot.slane %v2203_v46, 2  ;;  %v25542_v39 = vrot.slane %v17881_v26, 1  ;;  %v950_v57 = vrot.slane %v838_v47, 1 }
  0xc7   : > { %v1515_v43 = vsel %vm911_vm1, %v25540_v16, %v1514_v32  ;;  %v1759_v63 = vsel %vm1156_vm2, %v25541_v37, %v1758_v3  ;;  %v1195_v34 = vrot.slane %v1083_v30, 2  ;;  %v25544_v28 = vrot.slane %v17896_v33, 2 }
  0xc8   : > { %v1607_v44 = vadd.f32 %v1515_v43, %v1358_v7  ;;  %v18309_v20 = vsel %vm911_vm1, %v25542_v39, %v2065_v58  ;;  %v1283_v54 = vadd.f32 %v1194_v0, %v1038_v49  ;;  %v1407_v48 = vmul.f32 %v17853_v12, %v769_v45  ;;  %v639_v43 = vpop.permute.xlu1 %638 }
  0xc9   : > { %25543 = vst [vmem:[#allocation63_spill] sm:$0xff] %v18309_v20  ;;  %v18314_v23 = vsel %vm1156_vm2, %v25544_v28, %v2309_v19  ;;  %v1651_v25 = vmul.f32 %v17855_v13, %v769_v45  ;;  %v1359_v16 = vadd.f32 %v1327_v53, %v1282_v50  ;;  %v951_v7 = vsel %vm911_vm1, %v948_v21, %v950_v57 }
  0xca   : > { %25545 = vst [vmem:[#allocation64_spill] sm:$0xff] %v18314_v23  ;;  %v1851_v46 = vadd.f32 %v1759_v63, %v1607_v44  ;;  %v1960_v26 = vmul.f32 %v17857_v14, %v769_v45  ;;  %v1039_v30 = vadd.f32 %v951_v7, %v682_v31  ;;  %v1516_v33 = vrot.slane %v1407_v48, 1 }
  0xcb   : > { %v1196_v49 = vsel %vm1156_vm2, %v1193_v51, %v1195_v34  ;;  %v1760_v37 = vrot.slane %v1651_v25, 2  ;;  %v2204_v28 = vmul.f32 %v17872_v22, %v769_v45  ;;  %v1360_v50 = vadd.f32 %v17971_v5, %v1283_v54 }
  0xcc   : > { %v2067_v39 = vrot.slane %v1960_v26, 1  ;;  %v1919_v44 = vadd.f32 %v17983_v8, %v1851_v46  ;;  %v1517_v63 = vsel %vm911_vm1, %v1514_v32, %v1516_v33  ;;  %v18328_v21 = vmul.f32 %v17846_v9, %v639_v43  ;;  %v774_v33 = vpop.permute.xlu1 %773 }
  0xcd   : > { %v1608_v53 = vadd.f32 %v1517_v63, %v1359_v16  ;;  %v2311_v31 = vrot.slane %v2204_v28, 2  ;;  %v18334_v51 = vmul.f32 %v17848_v10, %v639_v43  ;;  %v1284_v34 = vadd.f32 %v1196_v49, %v1039_v30 }
  0xce   : > { %25546 = vst [vmem:[#allocation65_spill] sm:$0xff] %v18328_v21  ;;  %v18331_v57 = vsel %vm911_vm1, %v2065_v58, %v2067_v39  ;;  %v18337_v45 = vmul.f32 %v17851_v11, %v639_v43  ;;  %v18340_v5 = vmul.f32 %v17853_v12, %v639_v43  ;;  %v18343_v8 = vmul.f32 %v17855_v13, %v639_v43 }
  0xcf   : > { %25547 = vst [vmem:[#allocation66_spill] sm:$0xff] %v18331_v57  ;;  %25548 = vst [vmem:[#allocation67_spill] sm:$0xff] %v18334_v51  ;;  %v1761_v32 = vsel %vm1156_vm2, %v1758_v3, %v1760_v37  ;;  %v18347_v54 = vsel %vm1156_vm2, %v2309_v19, %v2311_v31  ;;  %v18351_v48 = vmul.f32 %v17859_v17, %v639_v43  ;;  %v25557_v58 = vrot.slane %v17947_v60, 1 }
  0xd0   : > { %25549 = vst [vmem:[#allocation68_spill] sm:$0xff] %v18337_v45  ;;  %25550 = vst [vmem:[#allocation69_spill] sm:$0xff] %v18340_v5  ;;  %v1852_v25 = vadd.f32 %v1761_v32, %v1608_v53  ;;  %v18356_v7 = vmul.f32 %v17861_v18, %v639_v43  ;;  %v18360_v3 = vmul.f32 %v17857_v14, %v639_v43  ;;  %v25582_v5 = vld [vmem:[#allocation18_spill] sm:$0xff] }
  0xd1   : > { %25551 = vst [vmem:[#allocation70_spill] sm:$0xff] %v18343_v8  ;;  %25552 = vst [vmem:[#allocation71_spill] sm:$0xff] %v18347_v54  ;;  %v840_v19 = vmul.f32 %v17846_v9, %v17943_v55  ;;  %v1085_v30 = vmul.f32 %v17848_v10, %v17943_v55  ;;  %v18367_v49 = vmul.f32 %v17872_v22, %v639_v43  ;;  %v25583_v45 = vrot.slane %v25582_v5, 2  ;;  %v25585_v5 = vld [vmem:[#allocation35_spill] sm:$0xff] }
  0xd2   : > { %25553 = vst [vmem:[#allocation72_spill] sm:$0xff] %v18351_v48  ;;  %25554 = vst [vmem:[#allocation73_spill] sm:$0xff] %v18356_v7  ;;  %v684_v37 = vmul.f32 %v17851_v11, %v17943_v55  ;;  %v1409_v39 = vmul.f32 %v17853_v12, %v17943_v55  ;;  %v1653_v28 = vmul.f32 %v17855_v13, %v17943_v55  ;;  %v25561_v7 = vrot.slane %v17961_v2, 2 }
  0xd3   : > { %25555 = vst [vmem:[#allocation74_spill] sm:$0xff] %v18360_v3  ;;  %25556 = vst [vmem:[#allocation75_spill] sm:$0xff] %v18367_v49  ;;  %v953_v63 = vrot.slane %v840_v19, 1  ;;  %v1198_v53 = vrot.slane %v1085_v30, 2  ;;  %v1329_v31 = vmul.f32 %v17859_v17, %v17943_v55  ;;  %v1962_v32 = vmul.f32 %v17857_v14, %v17943_v55 }
  0xd4   : > { %v1519_v16 = vrot.slane %v1409_v39, 1  ;;  %v1763_v43 = vrot.slane %v1653_v28, 2  ;;  %v2206_v26 = vmul.f32 %v17872_v22, %v17943_v55  ;;  %v841_v46 = vmul.f32 %v17846_v9, %v774_v33 }
  0xd5   : > { %v954_v0 = vsel %vm911_vm1, %v25557_v58, %v953_v63  ;;  %v25558_v19 = vrot.slane %v17950_v61, 2  ;;  %v2070_v47 = vrot.slane %v1962_v32, 1  ;;  %v1086_v54 = vmul.f32 %v17848_v10, %v774_v33 }
  0xd6   : > { %v1040_v57 = vadd.f32 %v954_v0, %v17968_v4  ;;  %v25559_v39 = vrot.slane %v17958_v1, 1  ;;  %v1888_v23 = vmul.f32 %v17861_v18, %v17943_v55  ;;  %v2314_v20 = vrot.slane %v2206_v26, 2  ;;  %v18407_v55 = vld [vmem:[%s25147_s2] ss:$0 sm:$0xff] }
  0xd7   : > { %v1199_v30 = vsel %vm1156_vm2, %v25558_v19, %v1198_v53  ;;  %v25560_v58 = vrot.slane %v17974_v6, 1  ;;  %v955_v19 = vrot.slane %v841_v46, 1  ;;  %v1200_v32 = vrot.slane %v1086_v54, 2 }
  0xd8   : > { %v1520_v28 = vsel %vm911_vm1, %v25559_v39, %v1519_v16  ;;  %v1285_v51 = vadd.f32 %v1199_v30, %v1040_v57  ;;  %v1764_v4 = vsel %vm1156_vm2, %v25561_v7, %v1763_v43  ;;  %v25562_v0 = vrot.slane %v17977_v15, 2  ;;  %v540_v7 = vpop.permute.xlu1 %539 }
  0xd9   : > { %v1609_v60 = vadd.f32 %v1520_v28, %v1360_v50  ;;  %v2071_v61 = vsel %vm911_vm1, %v25560_v58, %v2070_v47  ;;  %v956_v6 = vsel %vm911_vm1, %v953_v63, %v955_v19  ;;  %v1201_v50 = vsel %vm1156_vm2, %v1198_v53, %v1200_v32  ;;  %v18427_v32 = vpop.permute.xlu0 %633 }
  0xda   : > { %v2163_v1 = vadd.f32 %v2071_v61, %v1919_v44  ;;  %v2315_v39 = vsel %vm1156_vm2, %v25562_v0, %v2314_v20  ;;  %v1361_v54 = vadd.f32 %v1329_v31, %v1284_v34  ;;  %v1410_v57 = vmul.f32 %v17853_v12, %v774_v33 }
  0xdb   : > { %v18413_v2 = vadd.f32 %v18019_v52, %v1285_v51  ;;  %v1041_v46 = vadd.f32 %v956_v6, %v684_v37  ;;  %v1654_v15 = vmul.f32 %v17855_v13, %v774_v33  ;;  %v1853_v26 = vadd.f32 %v1764_v4, %v1609_v60  ;;  %v25563_v4 = vld [vmem:[#allocation22_spill] sm:$0xff] }
  0xdc   : > { %v2407_v44 = vadd.f32 %v2315_v39, %v2163_v1  ;;  %v1521_v30 = vrot.slane %v1410_v57, 1  ;;  %v1920_v28 = vadd.f32 %v1888_v23, %v1852_v25  ;;  %v1963_v58 = vmul.f32 %v17857_v14, %v774_v33  ;;  %v25564_v39 = vld [vmem:[#allocation8_spill] sm:$0xff] }
  0xdd   : > { %v18418_v61 = vadd.f32 %v1201_v50, %v1041_v46  ;;  %v1765_v34 = vrot.slane %v1654_v15, 2  ;;  %v2207_v53 = vmul.f32 %v17872_v22, %v774_v33  ;;  %v18424_v31 = vmul.f32 %v17846_v9, %v540_v7 }
  0xde   : > { %v2445_v63 = vadd.f32 %v18407_v55, %v2407_v44  ;;  %v1522_v51 = vsel %vm911_vm1, %v1519_v16, %v1521_v30  ;;  %v2072_v37 = vrot.slane %v1963_v58, 1  ;;  %v18430_v1 = vadd.f32 %v25563_v4, %v1853_v26  ;;  %v18470_v4 = vpop.permute.xlu0 %642 }
  0xdf   : > { %v1610_v25 = vadd.f32 %v1522_v51, %v1361_v54  ;;  %v2316_v19 = vrot.slane %v2207_v53, 2  ;;  %v18434_v0 = vmul.f32 %v17851_v11, %v540_v7  ;;  %v18437_v16 = vmul.f32 %v17848_v10, %v540_v7  ;;  %25570 = vst [vmem:[#allocation79_spill] sm:$0xff] %v18470_v4 }
  0xe0   : > { %v2477_v23 = vmax.f32 %v2445_v63, 0.0  ;;  %v2073_v33 = vsel %vm911_vm1, %v2070_v47, %v2072_v37  ;;  %v1766_v50 = vsel %vm1156_vm2, %v1763_v43, %v1765_v34  ;;  %v1316_v15 = vmul.f32 %v17859_v17, %v540_v7 }
  0xe1   : > { %v2164_v57 = vadd.f32 %v2073_v33, %v1920_v28  ;;  %v2317_v46 = vsel %vm1156_vm2, %v2314_v20, %v2316_v19  ;;  %v18445_v47 = vmul.f32 %v17853_v12, %v540_v7  ;;  %v18448_v58 = vadd.f32 %v1766_v50, %v1610_v25 }
  0xe2   : > { %v2740_v6 = vrot.slane %v2477_v23, %v25564_v39  ;;  %v2733_v44 = vcombine.high %v2477_v23, %v2477_v23  ;;  %v18452_v28 = vmul.f32 %v17855_v13, %v540_v7  ;;  %v1875_v34 = vmul.f32 %v17861_v18, %v540_v7 }
  0xe3   : > { %v2408_v63 = vadd.f32 %v2317_v46, %v2164_v57  ;;  %v18460_v37 = vmul.f32 %v17857_v14, %v540_v7  ;;  %v18463_v23 = vmul.f32 %v17872_v22, %v540_v7  ;;  %v18473_v33 = vadd.f32 %v1316_v15, %v18167_v29 }
  0xe4   : > { %v2748_v26 = vcombine.high %v2740_v6, %v2740_v6  ;;  %v3538_v30 = vsel %vm3201_vm3, %v2740_v6, -inf  ;;  %v18466_v25 = vrot.slane %v2733_v44, %v25564_v39  ;;  %v18479_v7 = vadd.f32 %v1875_v34, %v18174_v27 }
  0xe5   : > { %v3539_v53 = vrot.slane %v3538_v30, 4  ;;  %v2446_v51 = vadd.f32 %v18407_v55, %v2408_v63  ;;  %25566 = vst [vmem:[#allocation8_spill] sm:$0xff] %v18460_v37  ;;  %25567 = vst [vmem:[#allocation76_spill] sm:$0xff] %v18463_v23 }
  0xe6   : > { %v18456_v20 = vsel %vm3201_vm3, %v2748_v26, -inf  ;;  %25568 = vst [vmem:[#allocation77_spill] sm:$0xff] %v18466_v25  ;;  %25571 = vst [vmem:[#allocation80_spill] sm:$0xff] %v18479_v7  ;;  %v25572_v26 = vld [vmem:[#allocation14_spill] sm:$0xff] }
  0xe7   : > { %25565 = vst [vmem:[#allocation22_spill] sm:$0xff] %v18456_v20  ;;  %v18468_v19 = vmax.f32 %v3538_v30, %v3539_v53  ;;  %v2478_v57 = vmax.f32 %v2446_v51, 0.0  ;;  %v843_v30 = vmul.f32 %v17846_v9, %v25572_v26  ;;  %v1088_v63 = vmul.f32 %v17848_v10, %v25572_v26 }
  0xe8   : > { %v1412_v29 = vmul.f32 %v17853_v12, %v25572_v26  ;;  %v1656_v27 = vmul.f32 %v17855_v13, %v25572_v26  ;;  %v686_v34 = vmul.f32 %v17851_v11, %v25572_v26  ;;  %v1331_v6 = vmul.f32 %v17859_v17, %v25572_v26 }
  0xe9   : > { %25569 = vst [vmem:[#allocation78_spill] sm:$0xff] %v18468_v19  ;;  %v2750_v15 = vcombine.high %v2478_v57, %v2478_v57  ;;  %v2757_v53 = vrot.slane %v2478_v57, %v25564_v39  ;;  %v958_v50 = vrot.slane %v843_v30, 1  ;;  %v1203_v60 = vrot.slane %v1088_v63, 2  ;;  %v25573_v57 = vld [vmem:[#allocation15_spill] sm:$0xff]  ;;  %v25575_v19 = vld [vmem:[#allocation17_spill] sm:$0xff]  ;;  %v779_v63 = vpop.permute.xlu0 %778 }
  0xea   : > { %v1524_v52 = vrot.slane %v1412_v29, 1  ;;  %v1768_v43 = vrot.slane %v1656_v27, 2  ;;  %v25574_v20 = vrot.slane %v25573_v57, 1  ;;  %v25576_v25 = vrot.slane %v25575_v19, 1 }
  0xeb   : > { %v2765_v44 = vcombine.high %v2757_v53, %v2757_v53  ;;  %v3566_v46 = vsel %vm3201_vm3, %v2757_v53, -inf  ;;  %v1890_v30 = vmul.f32 %v17861_v18, %v25572_v26  ;;  %v18506_v29 = vrot.slane %v2750_v15, %v25564_v39  ;;  %v25578_v53 = vld [vmem:[#allocation19_spill] sm:$0xff] }
  0xec   : > { %v3567_v54 = vrot.slane %v3566_v46, 4  ;;  %v959_v51 = vsel %vm911_vm1, %v25574_v20, %v958_v50  ;;  %v1525_v49 = vsel %vm911_vm1, %v25576_v25, %v1524_v52  ;;  %v1363_v27 = vadd.f32 %v1331_v6, %v18418_v61  ;;  %v25580_v20 = vld [vmem:[#allocation16_spill] sm:$0xff] }
  0xed   : > { %25577 = vst [vmem:[#allocation14_spill] sm:$0xff] %v18506_v29  ;;  %v1042_v3 = vadd.f32 %v959_v51, %v25578_v53  ;;  %v1611_v8 = vadd.f32 %v1525_v49, %v18413_v2  ;;  %v18512_v57 = vsel %vm3201_vm3, %v2765_v44, -inf  ;;  %v25581_v19 = vrot.slane %v25580_v20, 2 }
  0xee   : > { %25579 = vst [vmem:[#allocation15_spill] sm:$0xff] %v18512_v57  ;;  %v1769_v21 = vsel %vm1156_vm2, %v25583_v45, %v1768_v43  ;;  %v1965_v15 = vmul.f32 %v17857_v14, %v25572_v26  ;;  %v2209_v61 = vmul.f32 %v17872_v22, %v25572_v26  ;;  %v844_v49 = vmul.f32 %v17846_v9, %v779_v63  ;;  %v25586_v45 = vld [vmem:[#allocation38_spill] sm:$0xff] }
  0xef   : > { %v1204_v25 = vsel %vm1156_vm2, %v25581_v19, %v1203_v60  ;;  %v1855_v51 = vadd.f32 %v1769_v21, %v1611_v8  ;;  %v18525_v2 = vmax.f32 %v3566_v46, %v3567_v54  ;;  %v1089_v44 = vmul.f32 %v17848_v10, %v779_v63  ;;  %v25587_v8 = vld [vmem:[#allocation20_spill] sm:$0xff] }
  0xf0   : > { %v1287_v29 = vadd.f32 %v1204_v25, %v1042_v3  ;;  %v2075_v6 = vrot.slane %v1965_v15, 1  ;;  %v1413_v53 = vmul.f32 %v17853_v12, %v779_v63  ;;  %v2319_v3 = vrot.slane %v2209_v61, 2  ;;  %v549_v15 = vpop.permute.xlu1 %548 }
  0xf1   : > { %25584 = vst [vmem:[#allocation17_spill] sm:$0xff] %v18525_v2  ;;  %v18533_v19 = vadd.f32 %v25586_v45, %v1855_v51  ;;  %v960_v21 = vrot.slane %v844_v49, 1  ;;  %v25588_v25 = vrot.slane %v25587_v8, 1  ;;  %v1205_v48 = vrot.slane %v1089_v44, 2 }
  0xf2   : > { %v18530_v20 = vadd.f32 %v25585_v5, %v1287_v29  ;;  %v1526_v54 = vrot.slane %v1413_v53, 1  ;;  %v1657_v46 = vmul.f32 %v17855_v13, %v779_v63  ;;  %v1922_v4 = vadd.f32 %v1890_v30, %v18448_v58  ;;  %v25589_v5 = vld [vmem:[#allocation21_spill] sm:$0xff] }
  0xf3   : > { %v2076_v26 = vsel %vm911_vm1, %v25588_v25, %v2075_v6  ;;  %v961_v29 = vsel %vm911_vm1, %v958_v50, %v960_v21  ;;  %v1966_v51 = vmul.f32 %v17857_v14, %v779_v63  ;;  %v25590_v61 = vrot.slane %v25589_v5, 2 }
  0xf4   : > { %v2165_v23 = vadd.f32 %v2076_v26, %v18430_v1  ;;  %v1043_v45 = vadd.f32 %v961_v29, %v686_v34  ;;  %v1527_v8 = vsel %vm911_vm1, %v1524_v52, %v1526_v54  ;;  %v1770_v44 = vrot.slane %v1657_v46, 2 }
  0xf5   : > { %v2320_v49 = vsel %vm1156_vm2, %v25590_v61, %v2319_v3  ;;  %v1612_v25 = vadd.f32 %v1527_v8, %v1363_v27  ;;  %v2077_v7 = vrot.slane %v1966_v51, 1  ;;  %v2210_v37 = vmul.f32 %v17872_v22, %v779_v63 }
  0xf6   : > { %v2409_v53 = vadd.f32 %v2320_v49, %v2165_v23  ;;  %v1206_v1 = vsel %vm1156_vm2, %v1203_v60, %v1205_v48  ;;  %v1771_v50 = vsel %vm1156_vm2, %v1768_v43, %v1770_v44  ;;  %v18552_v30 = vmul.f32 %v17846_v9, %v549_v15  ;;  %v558_v48 = vpop.permute.xlu1 %557 }
  0xf7   : > { %v18555_v34 = vadd.f32 %v1771_v50, %v1612_v25  ;;  %v2078_v52 = vsel %vm911_vm1, %v2075_v6, %v2077_v7  ;;  %v2321_v23 = vrot.slane %v2210_v37, 2  ;;  %v18559_v26 = vadd.f32 %v1206_v1, %v1043_v45 }
  0xf8   : > { %25591 = vst [vmem:[#allocation19_spill] sm:$0xff] %v18552_v30  ;;  %v2447_v21 = vadd.f32 %v18407_v55, %v2409_v53  ;;  %v2166_v63 = vadd.f32 %v2078_v52, %v1922_v4  ;;  %v18562_v54 = vmul.f32 %v17848_v10, %v549_v15  ;;  %v18566_v46 = vmul.f32 %v17853_v12, %v549_v15 }
  0xf9   : > { %v2322_v43 = vsel %vm1156_vm2, %v2319_v3, %v2321_v23  ;;  %v18569_v29 = vmul.f32 %v17855_v13, %v549_v15  ;;  %v18572_v37 = vmul.f32 %v17851_v11, %v549_v15  ;;  %v18576_v4 = vmul.f32 %v17857_v14, %v549_v15 }
  0xfa   : > { %25592 = vst [vmem:[#allocation16_spill] sm:$0xff] %v18562_v54  ;;  %v2479_v60 = vmax.f32 %v2447_v21, 0.0  ;;  %25593 = vst [vmem:[#allocation18_spill] sm:$0xff] %v18566_v46  ;;  %v2410_v7 = vadd.f32 %v2322_v43, %v2166_v63  ;;  %v18581_v61 = vmul.f32 %v17859_v17, %v549_v15  ;;  %v18586_v8 = vmul.f32 %v17861_v18, %v549_v15  ;;  %v25632_v46 = vld [vmem:[#allocation27_spill] sm:$0xff] }
  0xfb   : > { %25594 = vst [vmem:[#allocation35_spill] sm:$0xff] %v18569_v29  ;;  %25595 = vst [vmem:[#allocation38_spill] sm:$0xff] %v18572_v37  ;;  %v18589_v44 = vmul.f32 %v17872_v22, %v549_v15  ;;  %v18594_v50 = vmul.f32 %v17846_v9, %v558_v48  ;;  %v18598_v63 = vmul.f32 %v17848_v10, %v558_v48 }
  0xfc   : > { %25596 = vst [vmem:[#allocation20_spill] sm:$0xff] %v18576_v4  ;;  %v2767_v51 = vcombine.high %v2479_v60, %v2479_v60  ;;  %v2774_v5 = vrot.slane %v2479_v60, %v25564_v39  ;;  %25597 = vst [vmem:[#allocation21_spill] sm:$0xff] %v18581_v61  ;;  %v2448_v49 = vadd.f32 %v18407_v55, %v2410_v7  ;;  %v567_v60 = vpop.permute.xlu1 %566  ;;  %v18606_v7 = vpop.permute.xlu0 %543 }
  0xfd   : > { %25598 = vst [vmem:[#allocation81_spill] sm:$0xff] %v18586_v8  ;;  %25599 = vst [vmem:[#allocation82_spill] sm:$0xff] %v18589_v44  ;;  %v18612_v58 = vmul.f32 %v17853_v12, %v558_v48  ;;  %v18621_v45 = vmul.f32 %v17859_v17, %v558_v48  ;;  %v18624_v3 = vmul.f32 %v17855_v13, %v558_v48  ;;  %v25627_v44 = vld [vmem:[#allocation24_spill] sm:$0xff]  ;;  %v25633_v8 = vrot.slane %v25632_v46, 2 }
  0xfe   : > { %v2782_v53 = vcombine.high %v2774_v5, %v2774_v5  ;;  %v3594_v25 = vsel %vm3201_vm3, %v2774_v5, -inf  ;;  %25600 = vst [vmem:[#allocation83_spill] sm:$0xff] %v18594_v50  ;;  %v2480_v52 = vmax.f32 %v2448_v49, 0.0  ;;  %25601 = vst [vmem:[#allocation84_spill] sm:$0xff] %v18598_v63  ;;  %v18601_v43 = vrot.slane %v2767_v51, %v25564_v39 }
  0xff   : > { %v3595_v21 = vrot.slane %v3594_v25, 4  ;;  %v18609_v5 = vmul.f32 %v17851_v11, %v558_v48  ;;  %25605 = vst [vmem:[#allocation88_spill] sm:$0xff] %v18612_v58  ;;  %25607 = vst [vmem:[#allocation90_spill] sm:$0xff] %v18621_v45  ;;  %v18648_v2 = vmul.f32 %v17848_v10, %v567_v60  ;;  %v18662_v58 = vmul.f32 %v17853_v12, %v567_v60 }
 0x100   : > { %25602 = vst [vmem:[#allocation85_spill] sm:$0xff] %v18601_v43  ;;  %v18604_v15 = vsel %vm3201_vm3, %v2782_v53, -inf  ;;  %v2784_v49 = vcombine.high %v2480_v52, %v2480_v52  ;;  %v2791_v27 = vrot.slane %v2480_v52, %v25564_v39  ;;  %25608 = vst [vmem:[#allocation91_spill] sm:$0xff] %v18624_v3  ;;  %v18629_v52 = vmul.f32 %v17857_v14, %v558_v48 }
 0x101   : > { %25603 = vst [vmem:[#allocation86_spill] sm:$0xff] %v18604_v15  ;;  %25604 = vst [vmem:[#allocation87_spill] sm:$0xff] %v18609_v5  ;;  %v18617_v51 = vmax.f32 %v3594_v25, %v3595_v21  ;;  %v18633_v21 = vmul.f32 %v17861_v18, %v558_v48  ;;  %v18636_v53 = vmul.f32 %v17872_v22, %v558_v48 }
 0x102   : > { %v2799_v6 = vcombine.high %v2791_v27, %v2791_v27  ;;  %v3622_v57 = vsel %vm3201_vm3, %v2791_v27, -inf  ;;  %25609 = vst [vmem:[#allocation92_spill] sm:$0xff] %v18629_v52  ;;  %v18639_v1 = vrot.slane %v2784_v49, %v25564_v39  ;;  %v18645_v27 = vmul.f32 %v17846_v9, %v567_v60  ;;  %25615 = vst [vmem:[#allocation98_spill] sm:$0xff] %v18648_v2 }
 0x103   : > { %25606 = vst [vmem:[#allocation89_spill] sm:$0xff] %v18617_v51  ;;  %v3623_v23 = vrot.slane %v3622_v57, 4  ;;  %25610 = vst [vmem:[#allocation93_spill] sm:$0xff] %v18633_v21  ;;  %v734_v51 = vpop.permute.xlu1 %733  ;;  %v18654_v21 = vpop.permute.xlu0 %552  ;;  %v18657_v49 = vmul.f32 %v17851_v11, %v567_v60  ;;  %v18665_v45 = vmul.f32 %v17855_v13, %v567_v60  ;;  %v18671_v43 = vmul.f32 %v17859_v17, %v567_v60 }
 0x104   : > { %25611 = vst [vmem:[#allocation94_spill] sm:$0xff] %v18636_v53  ;;  %25612 = vst [vmem:[#allocation95_spill] sm:$0xff] %v18639_v1  ;;  %v18642_v15 = vsel %vm3201_vm3, %v2799_v6, -inf  ;;  %v18677_v6 = vmul.f32 %v17857_v14, %v567_v60  ;;  %v18680_v1 = vmul.f32 %v17872_v22, %v567_v60 }
 0x105   : > { %25613 = vst [vmem:[#allocation96_spill] sm:$0xff] %v18642_v15  ;;  %25614 = vst [vmem:[#allocation97_spill] sm:$0xff] %v18645_v27  ;;  %v18650_v25 = vmax.f32 %v3622_v57, %v3623_v23  ;;  %v25625_v15 = vld [vmem:[#allocation23_spill] sm:$0xff] }
 0x106   : > { %25617 = vst [vmem:[#allocation100_spill] sm:$0xff] %v18654_v21  ;;  %25618 = vst [vmem:[#allocation101_spill] sm:$0xff] %v18657_v49  ;;  %v18674_v49 = vmul.f32 %v17861_v18, %v567_v60  ;;  %v1989_v53 = vmul.f32 %v25625_v15, %v17857_v14  ;;  %v2233_v48 = vmul.f32 %v25625_v15, %v17872_v22  ;;  %v18694_v60 = vld [vmem:[%s25146_s1 + $0x8] ss:$0 sm:$0xff] }
 0x107   : > { %25616 = vst [vmem:[#allocation99_spill] sm:$0xff] %v18650_v25  ;;  %25619 = vst [vmem:[#allocation102_spill] sm:$0xff] %v18662_v58  ;;  %v817_v25 = vmul.f32 %v17846_v9, %v734_v51  ;;  %v2234_v27 = vmul.f32 %v18694_v60, %v734_v51  ;;  %v784_v57 = vpop.permute.xlu1 %783  ;;  %v18697_v58 = vpop.permute.xlu0 %561  ;;  %v668_v22 = vmul.f32 %v25625_v15, %v17851_v11  ;;  %v25629_v15 = vld [vmem:[#allocation26_spill] sm:$0xff] }
 0x108   : > { %25620 = vst [vmem:[#allocation103_spill] sm:$0xff] %v18665_v45  ;;  %25621 = vst [vmem:[#allocation104_spill] sm:$0xff] %v18671_v43  ;;  %v2115_v2 = vrot.slane %v1989_v53, 1  ;;  %v1990_v43 = vmul.f32 %v17857_v14, %v734_v51  ;;  %v2359_v23 = vrot.slane %v2233_v48, 2  ;;  %v846_v53 = vmul.f32 %v17846_v9, %v18183_v56 }
 0x109   : > { %25622 = vst [vmem:[#allocation105_spill] sm:$0xff] %v18674_v49  ;;  %25623 = vst [vmem:[#allocation106_spill] sm:$0xff] %v18677_v6  ;;  %v1062_v49 = vmul.f32 %v17848_v10, %v734_v51  ;;  %v915_v45 = vrot.slane %v817_v25, 1  ;;  %v2361_v5 = vrot.slane %v2234_v27, 2  ;;  %v25628_v51 = vrot.slane %v25627_v44, 1  ;;  %v25635_v44 = vld [vmem:[#allocation25_spill] sm:$0xff] }
 0x10a   : > { %25624 = vst [vmem:[#allocation107_spill] sm:$0xff] %v18680_v1  ;;  %25626 = vst [vmem:[#allocation23_spill] sm:$0xff] %v18697_v58  ;;  %v2117_v63 = vrot.slane %v1990_v43, 1  ;;  %v847_v58 = vmul.f32 %v17846_v9, %v784_v57  ;;  %v963_v29 = vrot.slane %v846_v53, 1  ;;  %v25630_v48 = vrot.slane %v25629_v15, 1  ;;  %v25643_v1 = vld [vmem:[#allocation32_spill] sm:$0xff] }
 0x10b   : > { %v1160_v3 = vrot.slane %v1062_v49, 2  ;;  %v916_v4 = vsel %vm911_vm1, %v25628_v51, %v915_v45  ;;  %v18717_v49 = vsel %vm1156_vm2, %v25633_v8, %v2359_v23  ;;  %v688_v27 = vmul.f32 %v17851_v11, %v18183_v56 }
 0x10c   : > { %v18712_v25 = vsel %vm911_vm1, %v25630_v48, %v2115_v2  ;;  %25634 = vst [vmem:[#allocation26_spill] sm:$0xff] %v18717_v49  ;;  %v1025_v43 = vadd.f32 %v916_v4, %v668_v22  ;;  %v25636_v50 = vrot.slane %v25635_v44, 2  ;;  %v965_v51 = vrot.slane %v847_v58, 1  ;;  %v25639_v4 = vld [vmem:[#allocation30_spill] sm:$0xff] }
 0x10d   : > { %25631 = vst [vmem:[#allocation24_spill] sm:$0xff] %v18712_v25  ;;  %v1091_v53 = vmul.f32 %v17848_v10, %v18183_v56  ;;  %v1092_v15 = vmul.f32 %v17848_v10, %v784_v57  ;;  %v18728_v48 = vsel %vm911_vm1, %v2115_v2, %v2117_v63  ;;  %v18731_v46 = vsel %vm1156_vm2, %v2359_v23, %v2361_v5 }
 0x10e   : > { %v1161_v45 = vsel %vm1156_vm2, %v25636_v50, %v1160_v3  ;;  %25637 = vst [vmem:[#allocation27_spill] sm:$0xff] %v18728_v48  ;;  %25638 = vst [vmem:[#allocation25_spill] sm:$0xff] %v18731_v46  ;;  %v25640_v8 = vrot.slane %v25639_v4, 1  ;;  %v1415_v44 = vmul.f32 %v17853_v12, %v18183_v56  ;;  %v18738_v3 = vpop.permute.xlu0 %570  ;;  %v966_v58 = vsel %vm911_vm1, %v963_v29, %v965_v51  ;;  %v25642_v4 = vld [vmem:[#allocation31_spill] sm:$0xff] }
 0x10f   : > { %25641 = vst [vmem:[#allocation30_spill] sm:$0xff] %v18738_v3  ;;  %v1208_v50 = vrot.slane %v1091_v53, 2  ;;  %v1210_v52 = vrot.slane %v1092_v15, 2  ;;  %v1416_v49 = vmul.f32 %v17853_v12, %v784_v57  ;;  %v1270_v2 = vadd.f32 %v1161_v45, %v1025_v43  ;;  %v25645_v43 = vld [vmem:[#allocation33_spill] sm:$0xff] }
 0x110   : > { %v964_v22 = vsel %vm911_vm1, %v25640_v8, %v963_v29  ;;  %v1333_v63 = vmul.f32 %v17859_v17, %v18183_v56  ;;  %v1529_v5 = vrot.slane %v1415_v44, 1  ;;  %v1659_v23 = vmul.f32 %v17855_v13, %v18183_v56 }
 0x111   : > { %v1044_v8 = vadd.f32 %v964_v22, %v25642_v4  ;;  %v1045_v46 = vadd.f32 %v966_v58, %v688_v27  ;;  %v1531_v48 = vrot.slane %v1416_v49, 1  ;;  %v1660_v25 = vmul.f32 %v17855_v13, %v784_v57  ;;  %v25647_v58 = vld [vmem:[#allocation34_spill] sm:$0xff] }
 0x112   : > { %v25644_v29 = vrot.slane %v25643_v1, 2  ;;  %v1365_v53 = vadd.f32 %v1333_v63, %v18559_v26  ;;  %v25646_v45 = vrot.slane %v25645_v43, 1  ;;  %v1773_v44 = vrot.slane %v1659_v23, 2 }
 0x113   : > { %v1211_v6 = vsel %vm1156_vm2, %v1208_v50, %v1210_v52  ;;  %v1532_v3 = vsel %vm911_vm1, %v1529_v5, %v1531_v48  ;;  %v1775_v49 = vrot.slane %v1660_v25, 2  ;;  %v25648_v4 = vrot.slane %v25647_v58, 2  ;;  %v739_v25 = vpop.permute.xlu0 %738 }
 0x114   : > { %v1209_v51 = vsel %vm1156_vm2, %v25644_v29, %v1208_v50  ;;  %v1530_v15 = vsel %vm911_vm1, %v25646_v45, %v1529_v5  ;;  %v1614_v22 = vadd.f32 %v1532_v3, %v1365_v53  ;;  %v1968_v26 = vmul.f32 %v17857_v14, %v18183_v56  ;;  %v25649_v45 = vld [vmem:[#allocation36_spill] sm:$0xff] }
 0x115   : > { %v1613_v27 = vadd.f32 %v1530_v15, %v18530_v20  ;;  %v1774_v1 = vsel %vm1156_vm2, %v25648_v4, %v1773_v44  ;;  %v1969_v63 = vmul.f32 %v17857_v14, %v784_v57  ;;  %v18764_v29 = vadd.f32 %v1209_v51, %v1044_v8 }
 0x116   : > { %v1892_v52 = vmul.f32 %v17861_v18, %v18183_v56  ;;  %v2212_v20 = vmul.f32 %v18694_v60, %v18183_v56  ;;  %v1776_v48 = vsel %vm1156_vm2, %v1773_v44, %v1775_v49  ;;  %v2080_v3 = vrot.slane %v1968_v26, 1 }
 0x117   : > { %v18766_v23 = vadd.f32 %v1774_v1, %v1613_v27  ;;  %v2082_v50 = vrot.slane %v1969_v63, 1  ;;  %v2213_v5 = vmul.f32 %v18694_v60, %v784_v57  ;;  %v18774_v53 = vadd.f32 %v1211_v6, %v1045_v46  ;;  %v25651_v57 = vld [vmem:[#allocation37_spill] sm:$0xff] }
 0x118   : > { %v18776_v43 = vadd.f32 %v1776_v48, %v1614_v22  ;;  %v1924_v8 = vadd.f32 %v1892_v52, %v18555_v34  ;;  %v2324_v51 = vrot.slane %v2212_v20, 2  ;;  %v25650_v15 = vrot.slane %v25649_v45, 1 }
 0x119   : > { %v2083_v56 = vsel %vm911_vm1, %v2080_v3, %v2082_v50  ;;  %v2326_v58 = vrot.slane %v2213_v5, 2  ;;  %v820_v44 = vmul.f32 %v17846_v9, %v739_v25  ;;  %v25652_v6 = vrot.slane %v25651_v57, 2  ;;  %v25653_v50 = vld [vmem:[#allocation39_spill] sm:$0xff] }
 0x11a   : > { %v2081_v27 = vsel %vm911_vm1, %v25650_v15, %v2080_v3  ;;  %v2168_v4 = vadd.f32 %v2083_v56, %v1924_v8  ;;  %v1065_v22 = vmul.f32 %v17848_v10, %v739_v25  ;;  %v1389_v26 = vmul.f32 %v17853_v12, %v739_v25 }
 0x11b   : > { %v2167_v49 = vadd.f32 %v2081_v27, %v18533_v19  ;;  %v2325_v46 = vsel %vm1156_vm2, %v25652_v6, %v2324_v51  ;;  %v2327_v34 = vsel %vm1156_vm2, %v2324_v51, %v2326_v58  ;;  %v920_v1 = vrot.slane %v820_v44, 1  ;;  %v18793_v19 = vpop.permute.xlu1 %793  ;;  %v25656_v58 = vld [vmem:[#allocation40_spill] sm:$0xff] }
 0x11c   : > { %v1633_v63 = vmul.f32 %v17855_v13, %v739_v25  ;;  %v2412_v20 = vadd.f32 %v2327_v34, %v2168_v4  ;;  %v1347_v48 = vadd.f32 %v18145_v59, %v1270_v2  ;;  %v1165_v3 = vrot.slane %v1065_v22, 2  ;;  %v25655_v59 = vld [vmem:[#allocation41_spill] sm:$0xff]  ;;  %v25658_v4 = vld [vmem:[#allocation42_spill] sm:$0xff] }
 0x11d   : > { %v2411_v52 = vadd.f32 %v2325_v46, %v2167_v49  ;;  %v25654_v5 = vrot.slane %v25653_v50, 1  ;;  %v1486_v45 = vrot.slane %v1389_v26, 1  ;;  %v852_v51 = vmul.f32 %v17846_v9, %v18427_v32 }
 0x11e   : > { %v1730_v15 = vrot.slane %v1633_v63, 2  ;;  %v2450_v25 = vadd.f32 %v18407_v55, %v2412_v20  ;;  %v1317_v56 = vmul.f32 %v17859_v17, %v18606_v7  ;;  %v25657_v44 = vrot.slane %v25656_v58, 2  ;;  %v25660_v20 = vld [vmem:[#allocation43_spill] sm:$0xff] }
 0x11f   : > { %v921_v8 = vsel %vm911_vm1, %v25654_v5, %v920_v1  ;;  %v2449_v27 = vadd.f32 %v18407_v55, %v2411_v52  ;;  %v25659_v57 = vrot.slane %v25658_v4, 1  ;;  %v853_v46 = vmul.f32 %v17846_v9, %v18793_v19 }
 0x120   : > { %v1027_v2 = vadd.f32 %v921_v8, %v25655_v59  ;;  %v1166_v49 = vsel %vm1156_vm2, %v25657_v44, %v1165_v3  ;;  %v973_v22 = vrot.slane %v852_v51, 1  ;;  %v2482_v1 = vmax.f32 %v2450_v25, 0.0 }
 0x121   : > { %v1487_v6 = vsel %vm911_vm1, %v25659_v57, %v1486_v45  ;;  %v2481_v34 = vmax.f32 %v2449_v27, 0.0  ;;  %v1876_v52 = vmul.f32 %v17861_v18, %v18606_v7  ;;  %v25661_v50 = vrot.slane %v25660_v20, 2 }
 0x122   : > { %v1272_v26 = vadd.f32 %v1166_v49, %v1027_v2  ;;  %v1596_v63 = vadd.f32 %v1487_v6, %v1347_v48  ;;  %v692_v3 = vmul.f32 %v17851_v11, %v18427_v32  ;;  %v975_v8 = vrot.slane %v853_v46, 1 }
 0x123   : > { %v1731_v5 = vsel %vm1156_vm2, %v25661_v50, %v1730_v15  ;;  %v2801_v45 = vcombine.high %v2481_v34, %v2481_v34  ;;  %v2808_v59 = vrot.slane %v2481_v34, %v25564_v39  ;;  %v2825_v51 = vrot.slane %v2482_v1, %v25564_v39 }
 0x124   : > { %v25662_v27 = vrot.slane %v18232_v35, 1  ;;  %v2818_v25 = vcombine.high %v2482_v1, %v2482_v1  ;;  %v1840_v2 = vadd.f32 %v1731_v5, %v1596_v63  ;;  %v1097_v58 = vmul.f32 %v17848_v10, %v18427_v32 }
 0x125   : > { %v1098_v15 = vmul.f32 %v17848_v10, %v18793_v19  ;;  %v2816_v44 = vcombine.high %v2808_v59, %v2808_v59  ;;  %v2833_v49 = vcombine.high %v2825_v51, %v2825_v51  ;;  %v18829_v4 = vadd.f32 %v1317_v56, %v1272_v26 }
 0x126   : > { %v974_v48 = vsel %vm911_vm1, %v25662_v27, %v973_v22  ;;  %v976_v57 = vsel %vm911_vm1, %v973_v22, %v975_v8  ;;  %v18833_v6 = vrot.slane %v2801_v45, %v25564_v39  ;;  %v3650_v35 = vsel %vm3201_vm3, %v2808_v59, -inf }
 0x127   : > { %v3678_v46 = vsel %vm3201_vm3, %v2825_v51, -inf  ;;  %v1048_v34 = vadd.f32 %v974_v48, %v18244_v41  ;;  %v3651_v1 = vrot.slane %v3650_v35, 4  ;;  %v18839_v63 = vsel %vm3201_vm3, %v2816_v44, -inf  ;;  %v789_v51 = vpop.permute.xlu0 %788 }
 0x128   : > { %25663 = vst [vmem:[#allocation31_spill] sm:$0xff] %v18833_v6  ;;  %25664 = vst [vmem:[#allocation32_spill] sm:$0xff] %v18839_v63  ;;  %v3679_v20 = vrot.slane %v3678_v46, 4  ;;  %v18842_v50 = vsel %vm3201_vm3, %v2833_v49, -inf  ;;  %v18845_v56 = vrot.slane %v2818_v25, %v25564_v39  ;;  %v18847_v22 = vadd.f32 %v1876_v52, %v1840_v2 }
 0x129   : > { %25665 = vst [vmem:[#allocation33_spill] sm:$0xff] %v18842_v50  ;;  %v1049_v26 = vadd.f32 %v976_v57, %v692_v3  ;;  %v1218_v5 = vrot.slane %v1097_v58, 2  ;;  %v1220_v45 = vrot.slane %v1098_v15, 2  ;;  %v1421_v41 = vmul.f32 %v17853_v12, %v18427_v32 }
 0x12a   : > { %25666 = vst [vmem:[#allocation34_spill] sm:$0xff] %v18845_v56  ;;  %v3680_v8 = vmax.f32 %v3678_v46, %v3679_v20  ;;  %v1422_v59 = vmul.f32 %v17853_v12, %v18793_v19  ;;  %v1665_v48 = vmul.f32 %v17855_v13, %v18427_v32  ;;  %v1666_v52 = vmul.f32 %v17855_v13, %v18793_v19 }
 0x12b   : > { %v18859_v3 = vmax.f32 %v3650_v35, %v3651_v1  ;;  %v25668_v2 = vrot.slane %v18241_v36, 2  ;;  %v1539_v15 = vrot.slane %v1421_v41, 1  ;;  %v1974_v46 = vmul.f32 %v17857_v14, %v18427_v32 }
 0x12c   : > { %v3681_v25 = vrot.slane %v3680_v8, 2  ;;  %v1541_v44 = vrot.slane %v1422_v59, 1  ;;  %v1783_v49 = vrot.slane %v1665_v48, 2  ;;  %v1785_v57 = vrot.slane %v1666_v52, 2 }
 0x12d   : > { %25667 = vst [vmem:[#allocation36_spill] sm:$0xff] %v18859_v3  ;;  %v1219_v58 = vsel %vm1156_vm2, %v25668_v2, %v1218_v5  ;;  %v1221_v20 = vsel %vm1156_vm2, %v1218_v5, %v1220_v45  ;;  %v1975_v35 = vmul.f32 %v17857_v14, %v18793_v19  ;;  %v18873_v1 = vmul.f32 %v18694_v60, %v18427_v32 }
 0x12e   : > { %v18867_v27 = vadd.f32 %v1219_v58, %v1048_v34  ;;  %v18875_v36 = vmax.f32 %v3680_v8, %v3681_v25  ;;  %v18877_v41 = vadd.f32 %v1221_v20, %v1049_v26  ;;  %v25671_v59 = vrot.slane %v18247_v38, 1 }
 0x12f   : > { %v2090_v52 = vrot.slane %v1974_v46, 1  ;;  %v18883_v5 = vsel %vm911_vm1, %v1539_v15, %v1541_v44  ;;  %v2092_v34 = vrot.slane %v1975_v35, 1  ;;  %v18887_v45 = vmul.f32 %v18694_v60, %v18793_v19 }
 0x130   : > { %25669 = vst [vmem:[#allocation37_spill] sm:$0xff] %v18875_v36  ;;  %25670 = vst [vmem:[#allocation39_spill] sm:$0xff] %v18877_v41  ;;  %v1540_v48 = vsel %vm911_vm1, %v25671_v59, %v1539_v15  ;;  %v25249_v2 = vrot.slane %v18873_v1, 2  ;;  %v25672_v8 = vrot.slane %v18250_v24, 2  ;;  %v18896_v38 = vsel %vm1156_vm2, %v1783_v49, %v1785_v57  ;;  %v25682_v36 = vld [vmem:[#allocation47_spill] sm:$0xff] }
 0x131   : > { %25673 = vst [vmem:[#allocation41_spill] sm:$0xff] %v18896_v38  ;;  %v849_v25 = vmul.f32 %v17846_v9, %v18223_v62  ;;  %v1094_v58 = vmul.f32 %v17848_v10, %v18223_v62  ;;  %v25674_v15 = vrot.slane %v18268_v42, 1  ;;  %v18906_v44 = vsel %vm911_vm1, %v2090_v52, %v2092_v34  ;;  %v25676_v42 = vld [vmem:[#allocation48_spill] sm:$0xff] }
 0x132   : > { %v18893_v26 = vsel %vm1156_vm2, %v25672_v8, %v1783_v49  ;;  %v690_v24 = vmul.f32 %v17851_v11, %v18223_v62  ;;  %v1335_v49 = vmul.f32 %v17859_v17, %v18223_v62  ;;  %v25675_v57 = vrot.slane %v18272_v40, 2  ;;  %v25677_v40 = vld [vmem:[#allocation44_spill] sm:$0xff] }
 0x133   : > { %v2091_v19 = vsel %vm911_vm1, %v25674_v15, %v2090_v52  ;;  %v968_v20 = vrot.slane %v849_v25, 1  ;;  %v1213_v35 = vrot.slane %v1094_v58, 2  ;;  %v1366_v59 = vadd.f32 %v25676_v42, %v18764_v29  ;;  %v25679_v58 = vld [vmem:[#allocation45_spill] sm:$0xff] }
 0x134   : > { %v2335_v46 = vsel %vm1156_vm2, %v25675_v57, %v25249_v2  ;;  %v1418_v34 = vmul.f32 %v17853_v12, %v18223_v62  ;;  %v1662_v8 = vmul.f32 %v17855_v13, %v18223_v62  ;;  %v1894_v15 = vmul.f32 %v17861_v18, %v18223_v62  ;;  %v25681_v2 = vld [vmem:[#allocation51_spill] sm:$0xff] }
 0x135   : > { %v25678_v50 = vrot.slane %v25677_v40, 1  ;;  %v25680_v57 = vrot.slane %v25679_v58, 2  ;;  %v1367_v42 = vadd.f32 %v1335_v49, %v18774_v53  ;;  %v1925_v52 = vadd.f32 %v25681_v2, %v18766_v23  ;;  %v25683_v49 = vld [vmem:[#allocation46_spill] sm:$0xff] }
 0x136   : > { %v1534_v3 = vrot.slane %v1418_v34, 1  ;;  %v1778_v56 = vrot.slane %v1662_v8, 2  ;;  %v1926_v6 = vadd.f32 %v1894_v15, %v18776_v43  ;;  %v1971_v40 = vmul.f32 %v17857_v14, %v18223_v62 }
 0x137   : > { %v969_v25 = vsel %vm911_vm1, %v25678_v50, %v968_v20  ;;  %v1214_v29 = vsel %vm1156_vm2, %v25680_v57, %v1213_v35  ;;  %v2215_v50 = vmul.f32 %v18694_v60, %v18223_v62  ;;  %v850_v58 = vmul.f32 %v17846_v9, %v789_v51  ;;  %v25687_v62 = vld [vmem:[#allocation61_spill] sm:$0xff] }
 0x138   : > { %v1046_v63 = vadd.f32 %v969_v25, %v25682_v36  ;;  %v1095_v57 = vmul.f32 %v17848_v10, %v789_v51  ;;  %v25684_v54 = vrot.slane %v25683_v49, 1  ;;  %v25685_v36 = vld [vmem:[#allocation49_spill] sm:$0xff]  ;;  %v1419_v43 = vmul.f32 %v17853_v12, %v789_v51  ;;  %v25688_v49 = vld [vmem:[#allocation50_spill] sm:$0xff] }
 0x139   : > { %v25686_v2 = vrot.slane %v25685_v36, 2  ;;  %v2085_v15 = vrot.slane %v1971_v40, 1  ;;  %v2329_v25 = vrot.slane %v2215_v50, 2  ;;  %v970_v37 = vrot.slane %v850_v58, 1  ;;  %v25690_v36 = vld [vmem:[#allocation52_spill] sm:$0xff] }
 0x13a   : > { %v1291_v53 = vadd.f32 %v1214_v29, %v1046_v63  ;;  %v1535_v23 = vsel %vm911_vm1, %v25684_v54, %v1534_v3  ;;  %v1215_v61 = vrot.slane %v1095_v57, 2  ;;  %v1536_v21 = vrot.slane %v1419_v43, 1 }
 0x13b   : > { %v1779_v34 = vsel %vm1156_vm2, %v25686_v2, %v1778_v56  ;;  %v1615_v8 = vadd.f32 %v1535_v23, %v1366_v59  ;;  %v1663_v63 = vmul.f32 %v17855_v13, %v789_v51  ;;  %v25689_v41 = vrot.slane %v25688_v49, 1 }
 0x13c   : > { %v1368_v30 = vadd.f32 %v25687_v62, %v1291_v53  ;;  %v25691_v38 = vrot.slane %v25690_v36, 2  ;;  %v971_v59 = vsel %vm911_vm1, %v968_v20, %v970_v37  ;;  %v1216_v57 = vsel %vm1156_vm2, %v1213_v35, %v1215_v61  ;;  %v25692_v53 = vld [vmem:[#allocation62_spill] sm:$0xff]  ;;  %v18966_v36 = vpop.permute.xlu1 %743 }
 0x13d   : > { %v1859_v29 = vadd.f32 %v1779_v34, %v1615_v8  ;;  %v2086_v54 = vsel %vm911_vm1, %v25689_v41, %v2085_v15  ;;  %v1047_v58 = vadd.f32 %v971_v59, %v690_v24  ;;  %v1537_v34 = vsel %vm911_vm1, %v1534_v3, %v1536_v21 }
 0x13e   : > { %v2330_v2 = vsel %vm1156_vm2, %v25691_v38, %v2329_v25  ;;  %v18959_v40 = vadd.f32 %v1540_v48, %v1368_v30  ;;  %v2169_v50 = vadd.f32 %v2086_v54, %v1925_v52  ;;  %v1780_v43 = vrot.slane %v1663_v63, 2 }
 0x13f   : > { %v1927_v23 = vadd.f32 %v25692_v53, %v1859_v29  ;;  %v1972_v8 = vmul.f32 %v17857_v14, %v789_v51  ;;  %v1292_v62 = vadd.f32 %v1216_v57, %v1047_v58  ;;  %v1616_v49 = vadd.f32 %v1537_v34, %v1367_v42 }
 0x140   : > { %v2413_v41 = vadd.f32 %v2330_v2, %v2169_v50  ;;  %v2216_v38 = vmul.f32 %v18694_v60, %v789_v51  ;;  %v1337_v30 = vmul.f32 %v17859_v17, %v18427_v32  ;;  %v1781_v61 = vsel %vm1156_vm2, %v1778_v56, %v1780_v43 }
 0x141   : > { %v2171_v37 = vadd.f32 %v2091_v19, %v1927_v23  ;;  %v2087_v48 = vrot.slane %v1972_v8, 1  ;;  %v1896_v21 = vmul.f32 %v17861_v18, %v18427_v32  ;;  %v1860_v24 = vadd.f32 %v1781_v61, %v1616_v49 }
 0x142   : > { %v2451_v3 = vadd.f32 %v18407_v55, %v2413_v41  ;;  %v2331_v20 = vrot.slane %v2216_v38, 2  ;;  %v822_v51 = vmul.f32 %v17846_v9, %v18606_v7  ;;  %v823_v42 = vmul.f32 %v17846_v9, %v18966_v36 }
 0x143   : > { %v2415_v35 = vadd.f32 %v2335_v46, %v2171_v37  ;;  %v2088_v52 = vsel %vm911_vm1, %v2085_v15, %v2087_v48  ;;  %v1369_v63 = vadd.f32 %v1337_v30, %v1292_v62  ;;  %v1928_v56 = vadd.f32 %v1896_v21, %v1860_v24 }
 0x144   : > { %v2483_v19 = vmax.f32 %v2451_v3, 0.0  ;;  %v2170_v29 = vadd.f32 %v2088_v52, %v1926_v6  ;;  %v2332_v32 = vsel %vm1156_vm2, %v2329_v25, %v2331_v20  ;;  %v923_v2 = vrot.slane %v822_v51, 1 }
 0x145   : > { %v2453_v54 = vadd.f32 %v18407_v55, %v2415_v35  ;;  %v925_v59 = vrot.slane %v823_v42, 1  ;;  %v2172_v15 = vadd.f32 %v18906_v44, %v1928_v56  ;;  %v25693_v57 = vrot.slane %v18887_v45, 2 }
 0x146   : > { %v2835_v50 = vcombine.high %v2483_v19, %v2483_v19  ;;  %v2842_v46 = vrot.slane %v2483_v19, %v25564_v39  ;;  %v2414_v58 = vadd.f32 %v2332_v32, %v2170_v29  ;;  %v25694_v53 = vrot.slane %v18873_v1, 2 }
 0x147   : > { %v18988_v34 = vmax.f32 %v2453_v54, 0.0  ;;  %v672_v6 = vmul.f32 %v17851_v11, %v18606_v7  ;;  %v25696_v25 = vrot.slane %v18424_v31, 1  ;;  %v1067_v45 = vmul.f32 %v17848_v10, %v18606_v7 }
 0x148   : > { %v2337_v23 = vsel %vm1156_vm2, %v25694_v53, %v25693_v57  ;;  %v2850_v8 = vcombine.high %v2842_v46, %v2842_v46  ;;  %v3706_v41 = vsel %vm3201_vm3, %v2842_v46, -inf  ;;  %v18999_v1 = vrot.slane %v2835_v50, %v25564_v39 }
 0x149   : > { %25695 = vst [vmem:[#allocation40_spill] sm:$0xff] %v18988_v34  ;;  %v924_v43 = vsel %vm911_vm1, %v25696_v25, %v923_v2  ;;  %v2416_v44 = vadd.f32 %v2337_v23, %v2172_v15  ;;  %v19002_v62 = vadd.f32 %v18883_v5, %v1369_v63  ;;  %v2452_v49 = vadd.f32 %v18407_v55, %v2414_v58 }
 0x14a   : > { %v926_v38 = vsel %vm911_vm1, %v923_v2, %v925_v59  ;;  %v19010_v30 = vrot.slane %v18988_v34, %v25564_v39  ;;  %v3707_v37 = vrot.slane %v3706_v41, 4  ;;  %v19014_v48 = vsel %vm3201_vm3, %v2850_v8, -inf }
 0x14b   : > { %v2454_v61 = vadd.f32 %v18407_v55, %v2416_v44  ;;  %v2484_v21 = vmax.f32 %v2452_v49, 0.0  ;;  %v1028_v5 = vadd.f32 %v924_v43, %v18434_v0  ;;  %v1068_v3 = vmul.f32 %v17848_v10, %v18966_v36 }
 0x14c   : > { %25697 = vst [vmem:[#allocation42_spill] sm:$0xff] %v19010_v30  ;;  %v1029_v20 = vadd.f32 %v926_v38, %v672_v6  ;;  %v1168_v35 = vrot.slane %v1067_v45, 2  ;;  %v1391_v52 = vmul.f32 %v17853_v12, %v18606_v7  ;;  %v1392_v19 = vmul.f32 %v17853_v12, %v18966_v36 }
 0x14d   : > { %v19019_v24 = vmax.f32 %v2454_v61, 0.0  ;;  %v2852_v51 = vcombine.high %v2484_v21, %v2484_v21  ;;  %v2859_v42 = vrot.slane %v2484_v21, %v25564_v39  ;;  %v1170_v55 = vrot.slane %v1068_v3, 2 }
 0x14e   : > { %v19026_v63 = vmax.f32 %v3706_v41, %v3707_v37  ;;  %v1489_v29 = vrot.slane %v1391_v52, 1  ;;  %v1635_v59 = vmul.f32 %v17855_v13, %v18606_v7  ;;  %v25700_v15 = vrot.slane %v18437_v16, 2 }
 0x14f   : > { %25698 = vst [vmem:[#allocation43_spill] sm:$0xff] %v19019_v24  ;;  %v19031_v56 = vrot.slane %v19019_v24, %v25564_v39  ;;  %v2867_v54 = vcombine.high %v2859_v42, %v2859_v42  ;;  %v3734_v2 = vsel %vm3201_vm3, %v2859_v42, -inf  ;;  %v19039_v50 = vrot.slane %v2852_v51, %v25564_v39 }
 0x150   : > { %v3735_v46 = vrot.slane %v3734_v2, 4  ;;  %v1169_v58 = vsel %vm1156_vm2, %v25700_v15, %v1168_v35  ;;  %v1171_v57 = vsel %vm1156_vm2, %v1168_v35, %v1170_v55  ;;  %v25702_v6 = vrot.slane %v18445_v47, 1 }
 0x151   : > { %25699 = vst [vmem:[#allocation48_spill] sm:$0xff] %v19031_v56  ;;  %v19047_v53 = vsel %vm3201_vm3, %v19031_v56, -inf  ;;  %v19049_v23 = vadd.f32 %v1169_v58, %v1028_v5  ;;  %v1491_v43 = vrot.slane %v1392_v19, 1  ;;  %v19055_v41 = vsel %vm3201_vm3, %v2867_v54, -inf  ;;  %v25706_v54 = vld [vmem:[#allocation8_spill] sm:$0xff] }
 0x152   : > { %25701 = vst [vmem:[#allocation44_spill] sm:$0xff] %v19047_v53  ;;  %v1490_v25 = vsel %vm911_vm1, %v25702_v6, %v1489_v29  ;;  %v3736_v8 = vmax.f32 %v3734_v2, %v3735_v46  ;;  %25703 = vst [vmem:[#allocation45_spill] sm:$0xff] %v19055_v41  ;;  %v19057_v16 = vadd.f32 %v1171_v57, %v1029_v20  ;;  %v1733_v49 = vrot.slane %v1635_v59, 2  ;;  %v25708_v58 = vld [vmem:[#allocation80_spill] sm:$0xff] }
 0x153   : > { %v1636_v44 = vmul.f32 %v17855_v13, %v18966_v36  ;;  %v1492_v45 = vsel %vm911_vm1, %v1489_v29, %v1491_v43  ;;  %v1944_v38 = vmul.f32 %v17857_v14, %v18606_v7  ;;  %v1945_v47 = vmul.f32 %v17857_v14, %v18966_v36  ;;  %v25709_v57 = vld [vmem:[#allocation76_spill] sm:$0xff] }
 0x154   : > { %v3737_v37 = vrot.slane %v3736_v8, 2  ;;  %v1597_v61 = vadd.f32 %v1490_v25, %v18473_v33  ;;  %v2188_v5 = vmul.f32 %v18694_v60, %v18606_v7  ;;  %v2189_v52 = vmul.f32 %v18694_v60, %v18966_v36 }
 0x155   : > { %v1735_v21 = vrot.slane %v1636_v44, 2  ;;  %v2040_v20 = vrot.slane %v1944_v38, 1  ;;  %v2042_v35 = vrot.slane %v1945_v47, 1  ;;  %v1598_v42 = vadd.f32 %v1492_v45, %v18829_v4  ;;  %v25712_v47 = vld [vmem:[#allocation72_spill] sm:$0xff] }
 0x156   : > { %v25704_v55 = vrot.slane %v18452_v28, 2  ;;  %v2284_v33 = vrot.slane %v2188_v5, 2  ;;  %v19077_v29 = vmax.f32 %v3736_v8, %v3737_v37  ;;  %v25707_v7 = vrot.slane %v25706_v54, 1  ;;  %v25711_v8 = vld [vmem:[#allocation79_spill] sm:$0xff] }
 0x157   : > { %v2043_v59 = vsel %vm911_vm1, %v2040_v20, %v2042_v35  ;;  %v2286_v46 = vrot.slane %v2189_v52, 2  ;;  %v1736_v36 = vsel %vm1156_vm2, %v1733_v49, %v1735_v21  ;;  %v25710_v6 = vrot.slane %v25709_v57, 2 }
 0x158   : > { %v1734_v19 = vsel %vm1156_vm2, %v25704_v55, %v1733_v49  ;;  %25705 = vst [vmem:[#allocation51_spill] sm:$0xff] %v19077_v29  ;;  %v2041_v2 = vsel %vm911_vm1, %v25707_v7, %v2040_v20  ;;  %v2152_v28 = vadd.f32 %v2043_v59, %v18847_v22  ;;  %v19094_v44 = vmul.f32 %v17846_v9, %v25711_v8 }
 0x159   : > { %v19084_v15 = vadd.f32 %v1734_v19, %v1597_v61  ;;  %v2151_v4 = vadd.f32 %v2041_v2, %v25708_v58  ;;  %v2285_v25 = vsel %vm1156_vm2, %v25710_v6, %v2284_v33  ;;  %v2287_v43 = vsel %vm1156_vm2, %v2284_v33, %v2286_v46  ;;  %v25713_v19 = vld [vmem:[#allocation65_spill] sm:$0xff]  ;;  %v25715_v58 = vld [vmem:[#allocation68_spill] sm:$0xff]  ;;  %v25718_v6 = vld [vmem:[#allocation70_spill] sm:$0xff] }
 0x15a   : > { %v19098_v45 = vmul.f32 %v17848_v10, %v25711_v8  ;;  %v2396_v38 = vadd.f32 %v2287_v43, %v2152_v28  ;;  %v1370_v37 = vadd.f32 %v25712_v47, %v18867_v27  ;;  %v19104_v22 = vmul.f32 %v17853_v12, %v25711_v8  ;;  %v19120_v27 = vld [vmem:[%s25147_s2] ss:$0 sm:$0xff]  ;;  %v25716_v28 = vld [vmem:[#allocation69_spill] sm:$0xff] }
 0x15b   : > { %v2395_v49 = vadd.f32 %v2285_v25, %v2151_v4  ;;  %v19106_v61 = vadd.f32 %v1736_v36, %v1598_v42  ;;  %v19110_v21 = vmul.f32 %v17851_v11, %v25711_v8  ;;  %v978_v5 = vrot.slane %v19094_v44, 1  ;;  %v25720_v44 = vld [vmem:[#allocation41_spill] sm:$0xff] }
 0x15c   : > { %v19115_v20 = vmul.f32 %v17855_v13, %v25711_v8  ;;  %v2434_v52 = vadd.f32 %v19120_v27, %v2396_v38  ;;  %v25261_v42 = vrot.slane %v19104_v22, 1  ;;  %v1861_v55 = vadd.f32 %v18893_v26, %v18959_v40  ;;  %v25721_v38 = vld [vmem:[#allocation73_spill] sm:$0xff] }
 0x15d   : > { %v2433_v35 = vadd.f32 %v19120_v27, %v2395_v49  ;;  %v25714_v33 = vrot.slane %v25713_v19, 1  ;;  %v25260_v7 = vrot.slane %v19098_v45, 2  ;;  %v1339_v2 = vmul.f32 %v17859_v17, %v25711_v8 }
 0x15e   : > { %v25259_v59 = vrot.slane %v19115_v20, 2  ;;  %v2466_v36 = vmax.f32 %v2434_v52, 0.0  ;;  %v25717_v57 = vrot.slane %v25716_v28, 1  ;;  %v25719_v25 = vrot.slane %v25718_v6, 2  ;;  %v25724_v28 = vld [vmem:[#allocation39_spill] sm:$0xff] }
 0x15f   : > { %v979_v54 = vsel %vm911_vm1, %v25714_v33, %v978_v5  ;;  %v2465_v46 = vmax.f32 %v2433_v35, 0.0  ;;  %v1862_v49 = vadd.f32 %v25720_v44, %v19002_v62  ;;  %v1929_v47 = vadd.f32 %v25721_v38, %v1861_v55 }
 0x160   : > { %v1050_v4 = vadd.f32 %v979_v54, %v25715_v58  ;;  %v1545_v26 = vsel %vm911_vm1, %v25717_v57, %v25261_v42  ;;  %v1789_v43 = vsel %vm1156_vm2, %v25719_v25, %v25259_v59  ;;  %v2546_v19 = vcombine.high %v2466_v36, %v2466_v36  ;;  %v648_v42 = vpop.permute.xlu1 %647 }
 0x161   : > { %v1619_v40 = vadd.f32 %v1545_v26, %v1370_v37  ;;  %v2529_v35 = vcombine.high %v2465_v46, %v2465_v46  ;;  %v2536_v52 = vrot.slane %v2465_v46, %v25564_v39  ;;  %v2553_v33 = vrot.slane %v2466_v36, %v25564_v39  ;;  %v25722_v37 = vld [vmem:[#allocation67_spill] sm:$0xff] }
 0x162   : > { %v25723_v54 = vrot.slane %v25722_v37, 2  ;;  %v1371_v57 = vadd.f32 %v1339_v2, %v25724_v28  ;;  %v1977_v62 = vmul.f32 %v17857_v14, %v25711_v8  ;;  %v1898_v46 = vmul.f32 %v17861_v18, %v25711_v8 }
 0x163   : > { %v19156_v26 = vadd.f32 %v1789_v43, %v1619_v40  ;;  %v2544_v55 = vcombine.high %v2536_v52, %v2536_v52  ;;  %v2561_v6 = vcombine.high %v2553_v33, %v2553_v33  ;;  %v3202_v36 = vsel %vm3201_vm3, %v2536_v52, -inf  ;;  %v799_v40 = vpop.permute.xlu0 %798  ;;  %v25728_v52 = vld [vmem:[#allocation74_spill] sm:$0xff] }
 0x164   : > { %v1224_v58 = vsel %vm1156_vm2, %v25723_v54, %v25260_v7  ;;  %v3230_v44 = vsel %vm3201_vm3, %v2553_v33, -inf  ;;  %v2095_v38 = vrot.slane %v1977_v62, 1  ;;  %v2221_v2 = vmul.f32 %v18694_v60, %v25711_v8 }
 0x165   : > { %v19160_v25 = vadd.f32 %v1224_v58, %v1050_v4  ;;  %v19169_v43 = vrot.slane %v2529_v35, %v25564_v39  ;;  %v19172_v37 = vrot.slane %v2546_v19, %v25564_v39  ;;  %v3231_v4 = vrot.slane %v3230_v44, 4  ;;  %v25731_v19 = vld [vmem:[#allocation75_spill] sm:$0xff] }
 0x166   : > { %v1930_v54 = vadd.f32 %v1898_v46, %v1862_v49  ;;  %v3203_v58 = vrot.slane %v3202_v36, 4  ;;  %v19175_v28 = vsel %vm3201_vm3, %v2544_v55, -inf  ;;  %v25729_v3 = vrot.slane %v25728_v52, 1 }
 0x167   : > { %25725 = vst [vmem:[#allocation47_spill] sm:$0xff] %v19169_v43  ;;  %25726 = vst [vmem:[#allocation46_spill] sm:$0xff] %v19172_v37  ;;  %v2339_v62 = vrot.slane %v2221_v2, 2  ;;  %v3232_v32 = vmax.f32 %v3230_v44, %v3231_v4  ;;  %v19181_v8 = vsel %vm3201_vm3, %v2561_v6, -inf  ;;  %v856_v31 = vmul.f32 %v17846_v9, %v799_v40 }
 0x168   : > { %25727 = vst [vmem:[#allocation49_spill] sm:$0xff] %v19175_v28  ;;  %v2096_v33 = vsel %vm911_vm1, %v25729_v3, %v2095_v38  ;;  %25730 = vst [vmem:[#allocation61_spill] sm:$0xff] %v19181_v8  ;;  %v25732_v51 = vrot.slane %v25731_v19, 2  ;;  %v1101_v46 = vmul.f32 %v17848_v10, %v799_v40  ;;  %v1425_v55 = vmul.f32 %v17853_v12, %v799_v40 }
 0x169   : > { %v2173_v35 = vadd.f32 %v2096_v33, %v1929_v47  ;;  %v1669_v52 = vmul.f32 %v17855_v13, %v799_v40  ;;  %v3233_v0 = vrot.slane %v3232_v32, 2  ;;  %v980_v2 = vrot.slane %v856_v31, 1 }
 0x16a   : > { %v2340_v49 = vsel %vm1156_vm2, %v25732_v51, %v2339_v62  ;;  %v1978_v44 = vmul.f32 %v17857_v14, %v799_v40  ;;  %v1225_v47 = vrot.slane %v1101_v46, 2  ;;  %v1546_v4 = vrot.slane %v1425_v55, 1 }
 0x16b   : > { %v2417_v3 = vadd.f32 %v2340_v49, %v2173_v35  ;;  %v2222_v33 = vmul.f32 %v18694_v60, %v799_v40  ;;  %v981_v51 = vsel %vm911_vm1, %v978_v5, %v980_v2  ;;  %v1790_v59 = vrot.slane %v1669_v52, 2 }
 0x16c   : > { %v2097_v7 = vrot.slane %v1978_v44, 1  ;;  %v19195_v53 = vmax.f32 %v3202_v36, %v3203_v58  ;;  %v19197_v56 = vmax.f32 %v3232_v32, %v3233_v0  ;;  %v1051_v35 = vadd.f32 %v981_v51, %v19110_v21 }
 0x16d   : > { %v2455_v19 = vadd.f32 %v19120_v27, %v2417_v3  ;;  %v25735_v46 = vrot.slane %v19104_v22, 1  ;;  %v2341_v3 = vrot.slane %v2222_v33, 2  ;;  %v25736_v5 = vrot.slane %v19098_v45, 2 }
 0x16e   : > { %25733 = vst [vmem:[#allocation50_spill] sm:$0xff] %v19195_v53  ;;  %25734 = vst [vmem:[#allocation52_spill] sm:$0xff] %v19197_v56  ;;  %v2098_v55 = vsel %vm911_vm1, %v2095_v38, %v2097_v7  ;;  %v19209_v0 = vmul.f32 %v17846_v9, %v648_v42  ;;  %v25737_v2 = vrot.slane %v19115_v20, 2  ;;  %v19219_v45 = vmul.f32 %v17848_v10, %v648_v42 }
 0x16f   : > { %v2487_v49 = vmax.f32 %v2455_v19, 0.0  ;;  %v1547_v40 = vsel %vm911_vm1, %v25735_v46, %v1546_v4  ;;  %v1226_v52 = vsel %vm1156_vm2, %v25736_v5, %v1225_v47  ;;  %v2174_v58 = vadd.f32 %v2098_v55, %v1930_v54 }
 0x170   : > { %v1620_v36 = vadd.f32 %v1547_v40, %v1371_v57  ;;  %v1791_v22 = vsel %vm1156_vm2, %v25737_v2, %v1790_v59  ;;  %v2342_v44 = vsel %vm1156_vm2, %v2339_v62, %v2341_v3  ;;  %v19216_v7 = vadd.f32 %v1226_v52, %v1051_v35 }
 0x171   : > { %v2903_v32 = vcombine.high %v2487_v49, %v2487_v49  ;;  %v2910_v21 = vrot.slane %v2487_v49, %v25564_v39  ;;  %v2418_v38 = vadd.f32 %v2342_v44, %v2174_v58  ;;  %v1340_v57 = vmul.f32 %v17859_v17, %v648_v42  ;;  %v749_v58 = vpop.permute.xlu0 %748 }
 0x172   : > { %v19224_v4 = vmul.f32 %v17851_v11, %v648_v42  ;;  %v19227_v20 = vmul.f32 %v17853_v12, %v648_v42  ;;  %v19229_v33 = vadd.f32 %v1791_v22, %v1620_v36  ;;  %v19240_v49 = vmul.f32 %v17855_v13, %v648_v42 }
 0x173   : > { %v2918_v54 = vcombine.high %v2910_v21, %v2910_v21  ;;  %v3818_v47 = vsel %vm3201_vm3, %v2910_v21, -inf  ;;  %v2456_v62 = vadd.f32 %v19120_v27, %v2418_v38  ;;  %v19234_v51 = vrot.slane %v2903_v32, %v25564_v39 }
 0x174   : > { %v3819_v59 = vrot.slane %v3818_v47, 4  ;;  %v1899_v46 = vmul.f32 %v17861_v18, %v648_v42  ;;  %v19245_v3 = vadd.f32 %v1340_v57, %v19160_v25  ;;  %v19248_v5 = vmul.f32 %v17857_v14, %v648_v42  ;;  %v25741_v25 = vld [vmem:[#allocation100_spill] sm:$0xff] }
 0x175   : > { %25738 = vst [vmem:[#allocation62_spill] sm:$0xff] %v19234_v51  ;;  %v19237_v35 = vsel %vm3201_vm3, %v2918_v54, -inf  ;;  %v2488_v40 = vmax.f32 %v2456_v62, 0.0  ;;  %v19260_v22 = vmul.f32 %v18694_v60, %v648_v42  ;;  %v825_v44 = vmul.f32 %v17846_v9, %v25741_v25  ;;  %v25748_v51 = vld [vmem:[#allocation16_spill] sm:$0xff] }
 0x176   : > { %25739 = vst [vmem:[#allocation8_spill] sm:$0xff] %v19237_v35  ;;  %v19250_v52 = vmax.f32 %v3818_v47, %v3819_v59  ;;  %v19257_v2 = vadd.f32 %v1899_v46, %v19156_v26  ;;  %v674_v57 = vmul.f32 %v17851_v11, %v25741_v25  ;;  %v1070_v54 = vmul.f32 %v17848_v10, %v25741_v25  ;;  %v25742_v47 = vld [vmem:[#allocation21_spill] sm:$0xff]  ;;  %v25747_v35 = vld [vmem:[#allocation38_spill] sm:$0xff] }
 0x177   : > { %v2927_v21 = vrot.slane %v2488_v40, %v25564_v39  ;;  %v2920_v38 = vcombine.high %v2488_v40, %v2488_v40  ;;  %v1350_v59 = vadd.f32 %v25742_v47, %v19049_v23  ;;  %v928_v42 = vrot.slane %v825_v44, 1  ;;  %v25744_v23 = vld [vmem:[#allocation19_spill] sm:$0xff] }
 0x178   : > { %25740 = vst [vmem:[#allocation80_spill] sm:$0xff] %v19250_v52  ;;  %v1173_v31 = vrot.slane %v1070_v54, 2  ;;  %v1319_v40 = vmul.f32 %v17859_v17, %v25741_v25  ;;  %v1394_v6 = vmul.f32 %v17853_v12, %v25741_v25  ;;  %v25745_v47 = vrot.slane %v25744_v23, 1 }
 0x179   : > { %v2935_v62 = vcombine.high %v2927_v21, %v2927_v21  ;;  %v3846_v26 = vsel %vm3201_vm3, %v2927_v21, -inf  ;;  %v1638_v44 = vmul.f32 %v17855_v13, %v25741_v25  ;;  %v19286_v54 = vrot.slane %v2920_v38, %v25564_v39  ;;  %v25750_v38 = vld [vmem:[#allocation81_spill] sm:$0xff] }
 0x17a   : > { %v3847_v36 = vrot.slane %v3846_v26, 4  ;;  %v929_v21 = vsel %vm911_vm1, %v25745_v47, %v928_v42  ;;  %v1351_v32 = vadd.f32 %v1319_v40, %v19057_v16  ;;  %v1494_v52 = vrot.slane %v1394_v6, 1  ;;  %v25751_v40 = vld [vmem:[#allocation18_spill] sm:$0xff] }
 0x17b   : > { %v19277_v55 = vsel %vm3201_vm3, %v2935_v62, -inf  ;;  %25746 = vst [vmem:[#allocation79_spill] sm:$0xff] %v19286_v54  ;;  %v1878_v62 = vmul.f32 %v17861_v18, %v25741_v25  ;;  %v1030_v23 = vadd.f32 %v929_v21, %v25747_v35  ;;  %v1738_v47 = vrot.slane %v1638_v44, 2  ;;  %v25753_v21 = vld [vmem:[#allocation35_spill] sm:$0xff] }
 0x17c   : > { %25743 = vst [vmem:[#allocation76_spill] sm:$0xff] %v19277_v55  ;;  %v19288_v46 = vmax.f32 %v3846_v26, %v3847_v36  ;;  %v25749_v24 = vrot.slane %v25748_v51, 2  ;;  %v1909_v36 = vadd.f32 %v25750_v38, %v19084_v15  ;;  %v1947_v16 = vmul.f32 %v17857_v14, %v25741_v25 }
 0x17d   : > { %v2191_v26 = vmul.f32 %v18694_v60, %v25741_v25  ;;  %v25752_v54 = vrot.slane %v25751_v40, 1  ;;  %v1910_v6 = vadd.f32 %v1878_v62, %v19106_v61  ;;  %v826_v35 = vmul.f32 %v17846_v9, %v749_v58  ;;  %v25755_v62 = vld [vmem:[#allocation20_spill] sm:$0xff] }
 0x17e   : > { %v1174_v30 = vsel %vm1156_vm2, %v25749_v24, %v1173_v31  ;;  %v1071_v51 = vmul.f32 %v17848_v10, %v749_v58  ;;  %v25754_v44 = vrot.slane %v25753_v21, 2  ;;  %v2045_v38 = vrot.slane %v1947_v16, 1 }
 0x17f   : > { %v1495_v19 = vsel %vm911_vm1, %v25752_v54, %v1494_v52  ;;  %v2289_v55 = vrot.slane %v2191_v26, 2  ;;  %v930_v34 = vrot.slane %v826_v35, 1  ;;  %v1395_v25 = vmul.f32 %v17853_v12, %v749_v58  ;;  %v25757_v35 = vld [vmem:[#allocation82_spill] sm:$0xff] }
 0x180   : > { %v1599_v24 = vadd.f32 %v1495_v19, %v1350_v59  ;;  %v1739_v15 = vsel %vm1156_vm2, %v25754_v44, %v1738_v47  ;;  %v1175_v8 = vrot.slane %v1071_v51, 2  ;;  %v1639_v40 = vmul.f32 %v17855_v13, %v749_v58 }
 0x181   : > { %v3849_v54 = vrot.slane %v19288_v46, 2  ;;  %v25756_v56 = vrot.slane %v25755_v62, 1  ;;  %v1948_v59 = vmul.f32 %v17857_v14, %v749_v58  ;;  %v1275_v21 = vadd.f32 %v1174_v30, %v1030_v23  ;;  %v25759_v30 = vld [vmem:[#allocation23_spill] sm:$0xff] }
 0x182   : > { %v19316_v61 = vadd.f32 %v1739_v15, %v1599_v24  ;;  %v931_v16 = vsel %vm911_vm1, %v928_v42, %v930_v34  ;;  %v1496_v26 = vrot.slane %v1395_v25, 1  ;;  %v25758_v51 = vrot.slane %v25757_v35, 2  ;;  %v19327_v15 = vpop.permute.xlu1 %753 }
 0x183   : > { %v2046_v19 = vsel %vm911_vm1, %v25756_v56, %v2045_v38  ;;  %v1740_v53 = vrot.slane %v1639_v40, 2  ;;  %v2047_v37 = vrot.slane %v1948_v59, 1  ;;  %v2192_v24 = vmul.f32 %v18694_v60, %v749_v58 }
 0x184   : > { %v2153_v44 = vadd.f32 %v2046_v19, %v1909_v36  ;;  %v2290_v28 = vsel %vm1156_vm2, %v25758_v51, %v2289_v55  ;;  %v1176_v56 = vsel %vm1156_vm2, %v1173_v31, %v1175_v8  ;;  %v1497_v43 = vsel %vm911_vm1, %v1494_v52, %v1496_v26  ;;  %v25762_v51 = vld [vmem:[#allocation87_spill] sm:$0xff] }
 0x185   : > { %v828_v23 = vmul.f32 %v17846_v9, %v25759_v30  ;;  %v1031_v34 = vadd.f32 %v931_v16, %v674_v57  ;;  %v1600_v42 = vadd.f32 %v1497_v43, %v1351_v32  ;;  %v1741_v36 = vsel %vm1156_vm2, %v1738_v47, %v1740_v53  ;;  %v25760_v47 = vld [vmem:[#allocation83_spill] sm:$0xff] }
 0x186   : > { %v2397_v62 = vadd.f32 %v2290_v28, %v2153_v44  ;;  %v2048_v25 = vsel %vm911_vm1, %v2045_v38, %v2047_v37  ;;  %v2291_v60 = vrot.slane %v2192_v24, 2  ;;  %v829_v28 = vmul.f32 %v17846_v9, %v19327_v15 }
 0x187   : > { %v2154_v19 = vadd.f32 %v2048_v25, %v1910_v6  ;;  %v19338_v58 = vadd.f32 %v1741_v36, %v1600_v42  ;;  %v933_v8 = vrot.slane %v828_v23, 1  ;;  %v1073_v31 = vmul.f32 %v17848_v10, %v25759_v30 }
 0x188   : > { %v2435_v40 = vadd.f32 %v19120_v27, %v2397_v62  ;;  %v1074_v43 = vmul.f32 %v17848_v10, %v19327_v15  ;;  %v2292_v53 = vsel %vm1156_vm2, %v2289_v55, %v2291_v60  ;;  %v676_v37 = vmul.f32 %v17851_v11, %v25759_v30 }
 0x189   : > { %v935_v32 = vrot.slane %v829_v28, 1  ;;  %v2398_v57 = vadd.f32 %v2292_v53, %v2154_v19  ;;  %v25761_v6 = vrot.slane %v25760_v47, 1  ;;  %v1178_v59 = vrot.slane %v1073_v31, 2 }
 0x18a   : > { %v2467_v52 = vmax.f32 %v2435_v40, 0.0  ;;  %v1180_v44 = vrot.slane %v1074_v43, 2  ;;  %v19354_v55 = vmax.f32 %v19288_v46, %v3849_v54  ;;  %v1276_v62 = vadd.f32 %v1176_v56, %v1031_v34  ;;  %v25764_v40 = vld [vmem:[#allocation84_spill] sm:$0xff]  ;;  %v25766_v46 = vld [vmem:[#allocation90_spill] sm:$0xff] }
 0x18b   : > { %v934_v38 = vsel %vm911_vm1, %v25761_v6, %v933_v8  ;;  %v936_v35 = vsel %vm911_vm1, %v933_v8, %v935_v32  ;;  %v2436_v23 = vadd.f32 %v19120_v27, %v2398_v57  ;;  %v25765_v19 = vrot.slane %v25764_v40, 2 }
 0x18c   : > { %v2563_v16 = vcombine.high %v2467_v52, %v2467_v52  ;;  %v2570_v26 = vrot.slane %v2467_v52, %v25564_v39  ;;  %v1032_v24 = vadd.f32 %v934_v38, %v25762_v51  ;;  %25763 = vst [vmem:[#allocation72_spill] sm:$0xff] %v19354_v55  ;;  %v1033_v42 = vadd.f32 %v936_v35, %v676_v37 }
 0x18d   : > { %v1179_v60 = vsel %vm1156_vm2, %v25765_v19, %v1178_v59  ;;  %v1321_v28 = vmul.f32 %v17859_v17, %v25759_v30  ;;  %v2468_v31 = vmax.f32 %v2436_v23, 0.0  ;;  %v1181_v43 = vsel %vm1156_vm2, %v1178_v59, %v1180_v44  ;;  %v25770_v23 = vld [vmem:[#allocation88_spill] sm:$0xff] }
 0x18e   : > { %v2578_v36 = vcombine.high %v2570_v26, %v2570_v26  ;;  %v3258_v25 = vsel %vm3201_vm3, %v2570_v26, -inf  ;;  %v1352_v54 = vadd.f32 %v25766_v46, %v1275_v21  ;;  %v19366_v56 = vrot.slane %v2563_v16, %v25564_v39 }
 0x18f   : > { %v3259_v8 = vrot.slane %v3258_v25, 4  ;;  %v19368_v34 = vadd.f32 %v1179_v60, %v1032_v24  ;;  %v1397_v52 = vmul.f32 %v17853_v12, %v25759_v30  ;;  %v1398_v53 = vmul.f32 %v17853_v12, %v19327_v15 }
 0x190   : > { %25767 = vst [vmem:[#allocation65_spill] sm:$0xff] %v19366_v56  ;;  %v19375_v37 = vsel %vm3201_vm3, %v2578_v36, -inf  ;;  %v2580_v32 = vcombine.high %v2468_v31, %v2468_v31  ;;  %v2587_v57 = vrot.slane %v2468_v31, %v25564_v39  ;;  %v19378_v47 = vadd.f32 %v1181_v43, %v1033_v42  ;;  %v25866_v56 = vld [vmem:[#allocation96_spill] sm:$0xff] }
 0x191   : > { %25768 = vst [vmem:[#allocation68_spill] sm:$0xff] %v19375_v37  ;;  %v1499_v21 = vrot.slane %v1397_v52, 1  ;;  %v1501_v6 = vrot.slane %v1398_v53, 1  ;;  %v1641_v38 = vmul.f32 %v17855_v13, %v25759_v30  ;;  %v1642_v59 = vmul.f32 %v17855_v13, %v19327_v15  ;;  %v25776_v52 = vld [vmem:[#allocation93_spill] sm:$0xff]  ;;  %v25820_v37 = vld [vmem:[#allocation63_spill] sm:$0xff] }
 0x192   : > { %v19384_v44 = vmax.f32 %v3258_v25, %v3259_v8  ;;  %v2595_v16 = vcombine.high %v2587_v57, %v2587_v57  ;;  %v3286_v26 = vsel %vm3201_vm3, %v2587_v57, -inf  ;;  %v1353_v35 = vadd.f32 %v1321_v28, %v1276_v62  ;;  %v25774_v62 = vld [vmem:[#allocation91_spill] sm:$0xff]  ;;  %v19403_v57 = vpop.permute.xlu0 %651 }
 0x193   : > { %v3287_v24 = vrot.slane %v3286_v26, 4  ;;  %v25771_v42 = vrot.slane %v25770_v23, 1  ;;  %v1743_v40 = vrot.slane %v1641_v38, 2  ;;  %v19392_v19 = vrot.slane %v2580_v32, %v25564_v39 }
 0x194   : > { %25769 = vst [vmem:[#allocation69_spill] sm:$0xff] %v19384_v44  ;;  %v19395_v60 = vsel %vm3201_vm3, %v2595_v16, -inf  ;;  %v1745_v8 = vrot.slane %v1642_v59, 2  ;;  %v1502_v43 = vsel %vm911_vm1, %v1499_v21, %v1501_v6  ;;  %v25775_v28 = vrot.slane %v25774_v62, 2  ;;  %v19411_v59 = vpop.permute.xlu1 %803 }
 0x195   : > { %v1500_v36 = vsel %vm911_vm1, %v25771_v42, %v1499_v21  ;;  %25772 = vst [vmem:[#allocation70_spill] sm:$0xff] %v19392_v19  ;;  %25773 = vst [vmem:[#allocation41_spill] sm:$0xff] %v19395_v60  ;;  %v3288_v31 = vmax.f32 %v3286_v26, %v3287_v24  ;;  %v1911_v53 = vadd.f32 %v25776_v52, %v19316_v61  ;;  %v19420_v26 = vld [vmem:[%s25146_s1 + $0x8] ss:$0 sm:$0xff]  ;;  %v25779_v21 = vld [vmem:[#allocation94_spill] sm:$0xff]  ;;  %v25867_v41 = vrot.slane %v25866_v56, 4 }
 0x196   : > { %v1601_v25 = vadd.f32 %v1500_v36, %v1352_v54  ;;  %v1744_v46 = vsel %vm1156_vm2, %v25775_v28, %v1743_v40  ;;  %v1602_v38 = vadd.f32 %v1502_v43, %v1353_v35  ;;  %v1880_v16 = vmul.f32 %v17861_v18, %v25759_v30  ;;  %v25777_v28 = vld [vmem:[#allocation92_spill] sm:$0xff] }
 0x197   : > { %v1950_v54 = vmul.f32 %v17857_v14, %v25759_v30  ;;  %v1746_v6 = vsel %vm1156_vm2, %v1743_v40, %v1745_v8  ;;  %v1951_v61 = vmul.f32 %v17857_v14, %v19327_v15  ;;  %v2194_v35 = vmul.f32 %v19420_v26, %v25759_v30 }
 0x198   : > { %v19405_v32 = vadd.f32 %v1744_v46, %v1601_v25  ;;  %v1912_v24 = vadd.f32 %v1880_v16, %v19338_v58  ;;  %v2195_v42 = vmul.f32 %v19420_v26, %v19327_v15  ;;  %v19429_v36 = vmul.f32 %v17846_v9, %v19403_v57 }
 0x199   : > { %v2050_v23 = vrot.slane %v1950_v54, 1  ;;  %v3289_v40 = vrot.slane %v3288_v31, 2  ;;  %v2052_v25 = vrot.slane %v1951_v61, 1  ;;  %v2294_v8 = vrot.slane %v2194_v35, 2 }
 0x19a   : > { %v859_v43 = vmul.f32 %v17846_v9, %v19411_v59  ;;  %v19433_v62 = vadd.f32 %v1746_v6, %v1602_v38  ;;  %v25778_v30 = vrot.slane %v25777_v28, 1  ;;  %v2296_v46 = vrot.slane %v2195_v42, 2 }
 0x19b   : > { %v19440_v15 = vmul.f32 %v17848_v10, %v19403_v57  ;;  %v2053_v52 = vsel %vm911_vm1, %v2050_v23, %v2052_v25  ;;  %v25285_v54 = vrot.slane %v19429_v36, 1  ;;  %v25780_v51 = vrot.slane %v25779_v21, 2 }
 0x19c   : > { %v2051_v58 = vsel %vm911_vm1, %v25778_v30, %v2050_v23  ;;  %v985_v61 = vrot.slane %v859_v43, 1  ;;  %v2156_v35 = vadd.f32 %v2053_v52, %v1912_v24  ;;  %v2297_v6 = vsel %vm1156_vm2, %v2294_v8, %v2296_v46 }
 0x19d   : > { %v2155_v16 = vadd.f32 %v2051_v58, %v1911_v53  ;;  %v2295_v38 = vsel %vm1156_vm2, %v25780_v51, %v2294_v8  ;;  %v1104_v42 = vmul.f32 %v17848_v10, %v19411_v59  ;;  %v1341_v53 = vmul.f32 %v17859_v17, %v19403_v57 }
 0x19e   : > { %v986_v30 = vsel %vm911_vm1, %v25285_v54, %v985_v61  ;;  %v1427_v24 = vmul.f32 %v17853_v12, %v19403_v57  ;;  %v2400_v23 = vadd.f32 %v2297_v6, %v2156_v35  ;;  %v696_v51 = vmul.f32 %v17851_v11, %v19403_v57 }
 0x19f   : > { %v2399_v28 = vadd.f32 %v2295_v38, %v2155_v16  ;;  %v1428_v25 = vmul.f32 %v17853_v12, %v19411_v59  ;;  %v1230_v43 = vrot.slane %v1104_v42, 2  ;;  %v1671_v46 = vmul.f32 %v17855_v13, %v19403_v57 }
 0x1a0   : > { %v1549_v58 = vrot.slane %v1427_v24, 1  ;;  %v2438_v52 = vadd.f32 %v19120_v27, %v2400_v23  ;;  %v1053_v16 = vadd.f32 %v986_v30, %v696_v51  ;;  %v1672_v35 = vmul.f32 %v17855_v13, %v19411_v59 }
 0x1a1   : > { %v2437_v8 = vadd.f32 %v19120_v27, %v2399_v28  ;;  %v1551_v61 = vrot.slane %v1428_v25, 1  ;;  %v1373_v6 = vadd.f32 %v1341_v53, %v19216_v7  ;;  %v25781_v54 = vrot.slane %v19227_v20, 1 }
 0x1a2   : > { %v1793_v28 = vrot.slane %v1671_v46, 2  ;;  %v2470_v42 = vmax.f32 %v2438_v52, 0.0  ;;  %v1795_v60 = vrot.slane %v1672_v35, 2  ;;  %v19474_v23 = vmax.f32 %v3288_v31, %v3289_v40 }
 0x1a3   : > { %v2469_v38 = vmax.f32 %v2437_v8, 0.0  ;;  %v1550_v21 = vsel %vm911_vm1, %v25781_v54, %v1549_v58  ;;  %v1552_v24 = vsel %vm911_vm1, %v1549_v58, %v1551_v61  ;;  %v25783_v25 = vrot.slane %v19440_v15, 2 }
 0x1a4   : > { %v1621_v55 = vadd.f32 %v1550_v21, %v19245_v3  ;;  %25782 = vst [vmem:[#allocation73_spill] sm:$0xff] %v19474_v23  ;;  %v2614_v53 = vcombine.high %v2470_v42, %v2470_v42  ;;  %v2621_v20 = vrot.slane %v2470_v42, %v25564_v39  ;;  %v1622_v8 = vadd.f32 %v1552_v24, %v1373_v6  ;;  %v4298_v21 = vld [vmem:[%s25148_s3 + $0x38] sm:$0xff]  ;;  %v4297_v6 = vld [vmem:[%s25148_s3 + $0x30] sm:$0xff]  ;;  %v759_v23 = vpop.permute.xlu0 %758 }
 0x1a5   : > { %v2597_v30 = vcombine.high %v2469_v38, %v2469_v38  ;;  %v2604_v51 = vrot.slane %v2469_v38, %v25564_v39  ;;  %v1231_v7 = vsel %vm1156_vm2, %v25783_v25, %v1230_v43  ;;  %v25784_v3 = vrot.slane %v19240_v49, 2  ;;  %17581 = vmatprep.subr.mxu1 %v4298_v21  ;;  %16769 = vmatprep.subr.mxu0 %v4298_v21 }
 0x1a6   : > { %v19481_v54 = vadd.f32 %v1231_v7, %v1053_v16  ;;  %v1796_v40 = vsel %vm1156_vm2, %v1793_v28, %v1795_v60  ;;  %v2629_v43 = vcombine.high %v2621_v20, %v2621_v20  ;;  %v3342_v61 = vsel %vm3201_vm3, %v2621_v20, -inf  ;;  %17585 = vmatpush3.msra.mxu1 %v4298_v21  ;;  %16770 = vmatpush3.msra.mxu0 %v4298_v21  ;;  %v4295_v20 = vld [vmem:[%s25148_s3 + $0x20] sm:$0xff] }
 0x1a7   : > { %v2612_v46 = vcombine.high %v2604_v51, %v2604_v51  ;;  %v3314_v58 = vsel %vm3201_vm3, %v2604_v51, -inf  ;;  %v1794_v31 = vsel %vm1156_vm2, %v25784_v3, %v1793_v28  ;;  %v19495_v35 = vrot.slane %v2597_v30, %v25564_v39  ;;  %17582 = vmatprep.subr.mxu1 %v4297_v6  ;;  %v4296_v30 = vld [vmem:[%s25148_s3 + $0x28] sm:$0xff]  ;;  %16771 = vmatprep.subr.mxu0 %v4297_v6 }
 0x1a8   : > { %v3315_v52 = vrot.slane %v3314_v58, 4  ;;  %v19492_v16 = vadd.f32 %v1794_v31, %v1621_v55  ;;  %v3343_v49 = vrot.slane %v3342_v61, 4  ;;  %v1900_v38 = vmul.f32 %v17861_v18, %v19403_v57  ;;  %17586 = vmatpush3.msra.mxu1 %v4297_v6  ;;  %16772 = vmatpush3.msra.mxu0 %v4297_v6 }
 0x1a9   : > { %25785 = vst [vmem:[#allocation67_spill] sm:$0xff] %v19495_v35  ;;  %v1980_v60 = vmul.f32 %v17857_v14, %v19403_v57  ;;  %v19505_v55 = vrot.slane %v2614_v53, %v25564_v39  ;;  %v19508_v28 = vsel %vm3201_vm3, %v2612_v46, -inf  ;;  %v19510_v42 = vadd.f32 %v1796_v40, %v1622_v8  ;;  %17583 = vmatprep.subr.mxu1 %v4296_v30 }
 0x1aa   : > { %25787 = vst [vmem:[#allocation74_spill] sm:$0xff] %v19508_v28  ;;  %v1981_v24 = vmul.f32 %v17857_v14, %v19411_v59  ;;  %v19517_v51 = vmax.f32 %v3314_v58, %v3315_v52  ;;  %v3344_v25 = vmax.f32 %v3342_v61, %v3343_v49  ;;  %v19520_v7 = vsel %vm3201_vm3, %v2629_v43, -inf  ;;  %16773 = vmatprep.subr.mxu0 %v4296_v30  ;;  %v25791_v43 = vld [vmem:[#allocation30_spill] sm:$0xff]  ;;  %v25807_v28 = vld [vmem:[#allocation103_spill] sm:$0xff] }
 0x1ab   : > { %25786 = vst [vmem:[#allocation39_spill] sm:$0xff] %v19505_v55  ;;  %25789 = vst [vmem:[#allocation100_spill] sm:$0xff] %v19520_v7  ;;  %v2100_v53 = vrot.slane %v1980_v60, 1  ;;  %v1932_v8 = vadd.f32 %v1900_v38, %v19229_v33  ;;  %v2224_v3 = vmul.f32 %v19420_v26, %v19403_v57  ;;  %v2225_v58 = vmul.f32 %v19420_v26, %v19411_v59 }
 0x1ac   : > { %25788 = vst [vmem:[#allocation75_spill] sm:$0xff] %v19517_v51  ;;  %v2102_v46 = vrot.slane %v1981_v24, 1  ;;  %v3345_v31 = vrot.slane %v3344_v25, 2  ;;  %v25790_v40 = vrot.slane %v19248_v5, 1  ;;  %v19535_v52 = vmul.f32 %v17846_v9, %v25791_v43  ;;  %17587 = vmatpush3.msra.mxu1 %v4296_v30  ;;  %16774 = vmatpush3.msra.mxu0 %v4296_v30  ;;  %v25802_v5 = vld [vmem:[#allocation11_spill] sm:$0xff] }
 0x1ad   : > { %v19539_v33 = vmul.f32 %v17848_v10, %v25791_v43  ;;  %v2344_v61 = vrot.slane %v2224_v3, 2  ;;  %v2346_v49 = vrot.slane %v2225_v58, 2  ;;  %17584 = vmatprep.subr.mxu1 %v4295_v20  ;;  %16775 = vmatprep.subr.mxu0 %v4295_v20  ;;  %v25792_v30 = vrot.slane %v19260_v22, 2 }
 0x1ae   : > { %v2101_v21 = vsel %vm911_vm1, %v25790_v40, %v2100_v53  ;;  %v2103_v57 = vsel %vm911_vm1, %v2100_v53, %v2102_v46  ;;  %v25290_v60 = vrot.slane %v19535_v52, 1  ;;  %17588 = vmatpush3.msra.mxu1 %v4295_v20  ;;  %16776 = vmatpush3.msra.mxu0 %v4295_v20  ;;  %v19553_v46 = vmul.f32 %v17851_v11, %v25791_v43  ;;  %v25794_v40 = vld [vmem:[#allocation97_spill] sm:$0xff] }
 0x1af   : > { %v2175_v59 = vadd.f32 %v2101_v21, %v19257_v2  ;;  %v2176_v38 = vadd.f32 %v2103_v57, %v1932_v8  ;;  %v25289_v6 = vrot.slane %v19539_v33, 2  ;;  %v2345_v53 = vsel %vm1156_vm2, %v25792_v30, %v2344_v61  ;;  %v25796_v57 = vld [vmem:[#allocation101_spill] sm:$0xff] }
 0x1b0   : > { %v2347_v2 = vsel %vm1156_vm2, %v2344_v61, %v2346_v49  ;;  %v19555_v3 = vmax.f32 %v3344_v25, %v3345_v31  ;;  %v25795_v20 = vrot.slane %v25794_v40, 1  ;;  %v1323_v30 = vmul.f32 %v17859_v17, %v25791_v43  ;;  %v25797_v61 = vld [vmem:[#allocation104_spill] sm:$0xff] }
 0x1b1   : > { %v2419_v8 = vadd.f32 %v2345_v53, %v2175_v59  ;;  %v2420_v58 = vadd.f32 %v2347_v2, %v2176_v38  ;;  %v1354_v49 = vadd.f32 %v25797_v61, %v19368_v34  ;;  %v19569_v25 = vmul.f32 %v17853_v12, %v25791_v43  ;;  %v25798_v38 = vld [vmem:[#allocation98_spill] sm:$0xff] }
 0x1b2   : > { %25793 = vst [vmem:[#allocation21_spill] sm:$0xff] %v19555_v3  ;;  %v939_v21 = vsel %vm911_vm1, %v25795_v20, %v25290_v60  ;;  %v25799_v53 = vrot.slane %v25798_v38, 2  ;;  %v19580_v40 = vmul.f32 %v17855_v13, %v25791_v43  ;;  %v25800_v34 = vld [vmem:[#allocation10_spill] sm:$0xff]  ;;  %v1355_v38 = vadd.f32 %v1323_v30, %v19378_v47 }
 0x1b3   : > { %v1034_v22 = vadd.f32 %v939_v21, %v25796_v57  ;;  %v2457_v31 = vadd.f32 %v19120_v27, %v2419_v8  ;;  %v2458_v59 = vadd.f32 %v19120_v27, %v2420_v58  ;;  %v19584_v21 = vmul.f32 %v17859_v17, %v25800_v34  ;;  %v25801_v8 = vld [vmem:[#allocation105_spill] sm:$0xff]  ;;  %v25803_v60 = vld [vmem:[#allocation102_spill] sm:$0xff] }
 0x1b4   : > { %v1184_v2 = vsel %vm1156_vm2, %v25799_v53, %v25289_v6  ;;  %v1504_v57 = vrot.slane %v19569_v25, 1  ;;  %v1913_v58 = vadd.f32 %v25801_v8, %v19405_v32  ;;  %v25804_v7 = vrot.slane %v25803_v60, 1  ;;  %v25805_v8 = vld [vmem:[#allocation53_spill] sm:$0xff] }
 0x1b5   : > { %v1279_v20 = vadd.f32 %v1184_v2, %v1034_v22  ;;  %v2489_v61 = vmax.f32 %v2457_v31, 0.0  ;;  %v2490_v24 = vmax.f32 %v2458_v59, 0.0  ;;  %v1882_v2 = vmul.f32 %v17861_v18, %v25791_v43 }
 0x1b6   : > { %v1505_v22 = vsel %vm911_vm1, %v25804_v7, %v1504_v57  ;;  %v19599_v25 = vmul.f32 %v17857_v14, %v25791_v43  ;;  %v19606_v60 = vmul.f32 %v17861_v18, %v25800_v34  ;;  %v19610_v7 = vmul.f32 %v19420_v26, %v25791_v43 }
 0x1b7   : > { %v1356_v6 = vadd.f32 %v25802_v5, %v1279_v20  ;;  %v2937_v32 = vcombine.high %v2489_v61, %v2489_v61  ;;  %v2944_v31 = vrot.slane %v2489_v61, %v25564_v39  ;;  %v2954_v59 = vcombine.high %v2490_v24, %v2490_v24 }
 0x1b8   : > { %v2961_v47 = vrot.slane %v2490_v24, %v25564_v39  ;;  %v1603_v30 = vadd.f32 %v1505_v22, %v1354_v49  ;;  %v25806_v3 = vrot.slane %v19580_v40, 2  ;;  %v25808_v61 = vrot.slane %v25807_v28, 2  ;;  %v25809_v22 = vld [vmem:[#allocation54_spill] sm:$0xff] }
 0x1b9   : > { %v1605_v5 = vadd.f32 %v25805_v8, %v1356_v6  ;;  %v2952_v20 = vcombine.high %v2944_v31, %v2944_v31  ;;  %v3874_v6 = vsel %vm3201_vm3, %v2944_v31, -inf  ;;  %v19622_v43 = vrot.slane %v2937_v32, %v25564_v39  ;;  %v25813_v31 = vld [vmem:[#allocation12_spill] sm:$0xff] }
 0x1ba   : > { %v2969_v53 = vcombine.high %v2961_v47, %v2961_v47  ;;  %v1749_v51 = vsel %vm1156_vm2, %v25808_v61, %v25806_v3  ;;  %v3902_v49 = vsel %vm3201_vm3, %v2961_v47, -inf  ;;  %v19625_v55 = vrot.slane %v2954_v59, %v25564_v39  ;;  %v25814_v47 = vld [vmem:[#allocation9_spill] sm:$0xff]  ;;  %v25817_v59 = vld [vmem:[#allocation106_spill] sm:$0xff] }
 0x1bb   : > { %v1847_v34 = vadd.f32 %v1749_v51, %v1603_v30  ;;  %v1849_v8 = vadd.f32 %v25809_v22, %v1605_v5  ;;  %25810 = vst [vmem:[#allocation19_spill] sm:$0xff] %v19622_v43  ;;  %v3903_v35 = vrot.slane %v3902_v49, 4  ;;  %v1914_v28 = vadd.f32 %v1882_v2, %v19433_v62  ;;  %v25819_v43 = vld [vmem:[#allocation55_spill] sm:$0xff] }
 0x1bc   : > { %25811 = vst [vmem:[#allocation38_spill] sm:$0xff] %v19625_v55  ;;  %v3875_v3 = vrot.slane %v3874_v6, 4  ;;  %v19629_v61 = vsel %vm3201_vm3, %v2952_v20, -inf  ;;  %v19634_v5 = vsel %vm3201_vm3, %v2969_v53, -inf  ;;  %v25816_v32 = vrot.slane %v19599_v25, 1 }
 0x1bd   : > { %25812 = vst [vmem:[#allocation16_spill] sm:$0xff] %v19629_v61  ;;  %v1915_v24 = vadd.f32 %v25813_v31, %v1847_v34  ;;  %v1917_v51 = vadd.f32 %v25814_v47, %v1849_v8  ;;  %v3904_v30 = vmax.f32 %v3902_v49, %v3903_v35  ;;  %25815 = vst [vmem:[#allocation81_spill] sm:$0xff] %v19634_v5  ;;  %v25818_v22 = vrot.slane %v25817_v59, 1  ;;  %v25821_v49 = vld [vmem:[#allocation107_spill] sm:$0xff]  ;;  %v25823_v59 = vld [vmem:[#allocation56_spill] sm:$0xff] }
 0x1be   : > { %v2299_v62 = vrot.slane %v19610_v7, 2  ;;  %v832_v34 = vmul.f32 %v17846_v9, %v759_v23  ;;  %v25822_v53 = vrot.slane %v25821_v49, 2  ;;  %v1077_v31 = vmul.f32 %v17848_v10, %v759_v23  ;;  %v25859_v5 = vld [vmem:[#allocation15_spill] sm:$0xff] }
 0x1bf   : > { %v2056_v55 = vsel %vm911_vm1, %v25818_v22, %v25816_v32  ;;  %v2159_v20 = vadd.f32 %v25819_v43, %v1915_v24  ;;  %v2161_v44 = vadd.f32 %v25820_v37, %v1917_v51  ;;  %v1401_v47 = vmul.f32 %v17853_v12, %v759_v23 }
 0x1c0   : > { %v2157_v2 = vadd.f32 %v2056_v55, %v1913_v58  ;;  %v2300_v8 = vsel %vm1156_vm2, %v25822_v53, %v2299_v62  ;;  %v25824_v55 = vld [vmem:[#allocation64_spill] sm:$0xff]  ;;  %v940_v24 = vrot.slane %v832_v34, 1  ;;  %v3905_v43 = vrot.slane %v3904_v30, 2 }
 0x1c1   : > { %v2403_v7 = vadd.f32 %v25823_v59, %v2159_v20  ;;  %v2405_v58 = vadd.f32 %v25824_v55, %v2161_v44  ;;  %v1185_v37 = vrot.slane %v1077_v31, 2  ;;  %v1506_v51 = vrot.slane %v1401_v47, 1 }
 0x1c2   : > { %v2401_v32 = vadd.f32 %v2300_v8, %v2157_v2  ;;  %v1645_v22 = vmul.f32 %v17855_v13, %v759_v23  ;;  %v25825_v61 = vrot.slane %v19535_v52, 1  ;;  %v25826_v44 = vrot.slane %v19539_v33, 2 }
 0x1c3   : > { %v2441_v53 = vadd.f32 %v19120_v27, %v2403_v7  ;;  %v1507_v8 = vsel %vm911_vm1, %v1504_v57, %v1506_v51  ;;  %v19668_v7 = vmax.f32 %v3874_v6, %v3875_v3  ;;  %v19670_v52 = vmax.f32 %v3904_v30, %v3905_v43 }
 0x1c4   : > { %v2439_v49 = vadd.f32 %v19120_v27, %v2401_v32  ;;  %v941_v2 = vsel %vm911_vm1, %v25825_v61, %v940_v24  ;;  %v1186_v34 = vsel %vm1156_vm2, %v25826_v44, %v1185_v37  ;;  %v1750_v31 = vrot.slane %v1645_v22, 2  ;;  %v19673_v24 = vpop.permute.xlu0 %656 }
 0x1c5   : > { %v1035_v20 = vadd.f32 %v941_v2, %v19553_v46  ;;  %v19665_v59 = vmax.f32 %v2441_v53, 0.0  ;;  %v1604_v55 = vadd.f32 %v1507_v8, %v1355_v38  ;;  %v1954_v32 = vmul.f32 %v17857_v14, %v759_v23  ;;  %25828 = vst [vmem:[#allocation35_spill] sm:$0xff] %v19668_v7  ;;  %25829 = vst [vmem:[#allocation20_spill] sm:$0xff] %v19670_v52  ;;  %v25832_v2 = vld [vmem:[#allocation57_spill] sm:$0xff] }
 0x1c6   : > { %v2471_v47 = vmax.f32 %v2439_v49, 0.0  ;;  %v2198_v46 = vmul.f32 %v19420_v26, %v759_v23  ;;  %v19676_v33 = vadd.f32 %v19120_v27, %v2405_v58  ;;  %v25831_v51 = vrot.slane %v19580_v40, 2 }
 0x1c7   : > { %25827 = vst [vmem:[#allocation18_spill] sm:$0xff] %v19665_v59  ;;  %v1280_v61 = vadd.f32 %v1186_v34, %v1035_v20  ;;  %v2057_v30 = vrot.slane %v1954_v32, 1  ;;  %v1901_v58 = vmul.f32 %v17861_v18, %v19673_v24  ;;  %v25833_v44 = vrot.slane %v19599_v25, 1  ;;  %v25838_v25 = vld [vmem:[#allocation59_spill] sm:$0xff] }
 0x1c8   : > { %25830 = vst [vmem:[#allocation82_spill] sm:$0xff] %v19676_v33  ;;  %v2631_v57 = vcombine.high %v2471_v47, %v2471_v47  ;;  %v2638_v37 = vrot.slane %v2471_v47, %v25564_v39  ;;  %v1751_v38 = vsel %vm1156_vm2, %v25831_v51, %v1750_v31  ;;  %v2301_v43 = vrot.slane %v2198_v46, 2 }
 0x1c9   : > { %v1357_v6 = vadd.f32 %v19584_v21, %v1280_v61  ;;  %v1848_v3 = vadd.f32 %v1751_v38, %v1604_v55  ;;  %v2058_v21 = vsel %vm911_vm1, %v25833_v44, %v2057_v30  ;;  %v19695_v34 = vrot.slane %v19665_v59, %v25564_v39  ;;  %v25841_v30 = vld [vmem:[#allocation13_spill] sm:$0xff] }
 0x1ca   : > { %v2646_v22 = vcombine.high %v2638_v37, %v2638_v37  ;;  %v3370_v49 = vsel %vm3201_vm3, %v2638_v37, -inf  ;;  %v2158_v31 = vadd.f32 %v2058_v21, %v1914_v28  ;;  %v19702_v47 = vmul.f32 %v17857_v14, %v19673_v24  ;;  %v25840_v28 = vld [vmem:[#allocation77_spill] sm:$0xff] }
 0x1cb   : > { %v3371_v53 = vrot.slane %v3370_v49, 4  ;;  %v1606_v20 = vadd.f32 %v25832_v2, %v1357_v6  ;;  %v1916_v40 = vadd.f32 %v19606_v60, %v1848_v3  ;;  %25834 = vst [vmem:[#allocation23_spill] sm:$0xff] %v19695_v34  ;;  %v19705_v55 = vrot.slane %v2631_v57, %v25564_v39  ;;  %v25837_v60 = vld [vmem:[#allocation58_spill] sm:$0xff] }
 0x1cc   : > { %v19698_v8 = vsel %vm3201_vm3, %v2646_v22, -inf  ;;  %v2302_v46 = vsel %vm1156_vm2, %v2299_v62, %v2301_v43  ;;  %v19713_v38 = vadd.f32 %v1901_v58, %v19492_v16  ;;  %v2749_v6 = vcombine.high %v25840_v28, %v25840_v28  ;;  %v25842_v22 = vld [vmem:[#allocation60_spill] sm:$0xff]  ;;  %v25843_v43 = vld [vmem:[#allocation14_spill] sm:$0xff] }
 0x1cd   : > { %25835 = vst [vmem:[#allocation83_spill] sm:$0xff] %v19698_v8  ;;  %25836 = vst [vmem:[#allocation87_spill] sm:$0xff] %v19705_v55  ;;  %v1850_v32 = vadd.f32 %v25837_v60, %v1606_v20  ;;  %v2160_v61 = vadd.f32 %v25838_v25, %v1916_v40  ;;  %v19710_v37 = vmax.f32 %v3370_v49, %v3371_v53  ;;  %v25844_v49 = vld [vmem:[#allocation78_spill] sm:$0xff]  ;;  %v3552_v25 = vsel %vm3201_vm3, %v25840_v28, -inf  ;;  %v25861_v8 = vld [vmem:[#allocation89_spill] sm:$0xff] }
 0x1ce   : > { %v2402_v51 = vadd.f32 %v2302_v46, %v2158_v31  ;;  %v19724_v62 = vmul.f32 %v19420_v26, %v19673_v24  ;;  %v2766_v16 = vcombine.high %v25843_v43, %v25843_v43  ;;  %v3541_v58 = vrot.slane %v25844_v49, 2  ;;  %v25845_v53 = vld [vmem:[#allocation66_spill] sm:$0xff] }
 0x1cf   : > { %25839 = vst [vmem:[#allocation84_spill] sm:$0xff] %v19710_v37  ;;  %v1918_v57 = vadd.f32 %v25841_v30, %v1850_v32  ;;  %v2404_v2 = vadd.f32 %v25842_v22, %v2160_v61  ;;  %v25846_v31 = vld [vmem:[#allocation22_spill] sm:$0xff]  ;;  %v3559_v30 = vsel %vm3201_vm3, %v2749_v6, -inf  ;;  %v25848_v22 = vld [vmem:[#allocation71_spill] sm:$0xff]  ;;  %v25860_v52 = vrot.slane %v25859_v5, 4 }
 0x1d0   : > { %v2440_v40 = vadd.f32 %v19120_v27, %v2402_v51  ;;  %v25847_v60 = vrot.slane %v25846_v31, 4  ;;  %v3542_v46 = vmax.f32 %v25844_v49, %v3541_v58  ;;  %v3553_v51 = vrot.slane %v3552_v25, 4 }
 0x1d1   : > { %v2162_v44 = vadd.f32 %v25845_v53, %v1918_v57  ;;  %v2442_v21 = vadd.f32 %v19120_v27, %v2404_v2  ;;  %v25850_v57 = vld [vmem:[#allocation85_spill] sm:$0xff]  ;;  %v3560_v20 = vrot.slane %v3559_v30, 4 }
 0x1d2   : > { %v3547_v32 = vmax.f32 %v25846_v31, %v25847_v60  ;;  %v2472_v61 = vmax.f32 %v2440_v40, 0.0  ;;  %v2783_v2 = vcombine.high %v25850_v57, %v25850_v57  ;;  %v3554_v60 = vmax.f32 %v3552_v25, %v3553_v51 }
 0x1d3   : > { %v2406_v23 = vadd.f32 %v25848_v22, %v2162_v44  ;;  %v19739_v35 = vmax.f32 %v2442_v21, 0.0  ;;  %v3543_v6 = vrot.slane %v3542_v46, 1  ;;  %v25853_v22 = vld [vmem:[#allocation95_spill] sm:$0xff] }
 0x1d4   : > { %v3548_v53 = vrot.slane %v3547_v32, 2  ;;  %v2648_v3 = vcombine.high %v2472_v61, %v2472_v61  ;;  %v2655_v31 = vrot.slane %v2472_v61, %v25564_v39  ;;  %v3555_v40 = vrot.slane %v3554_v60, 2 }
 0x1d5   : > { %25849 = vst [vmem:[#allocation90_spill] sm:$0xff] %v19739_v35  ;;  %v19746_v28 = vrot.slane %v19739_v35, %v25564_v39  ;;  %v19750_v58 = vadd.f32 %v19120_v27, %v2406_v23  ;;  %v3561_v23 = vmax.f32 %v3559_v30, %v3560_v20  ;;  %v19771_v25 = vmax.f32 %v3542_v46, %v3543_v6 }
 0x1d6   : > { %v3549_v49 = vmax.f32 %v3547_v32, %v3548_v53  ;;  %v2663_v44 = vcombine.high %v2655_v31, %v2655_v31  ;;  %v3398_v21 = vsel %vm3201_vm3, %v2655_v31, -inf  ;;  %v19762_v32 = vrot.slane %v2648_v3, %v25564_v39  ;;  %v25857_v53 = vld [vmem:[#allocation17_spill] sm:$0xff] }
 0x1d7   : > { %25851 = vst [vmem:[#allocation88_spill] sm:$0xff] %v19746_v28  ;;  %25852 = vst [vmem:[#allocation91_spill] sm:$0xff] %v19750_v58  ;;  %v3399_v61 = vrot.slane %v3398_v21, 4  ;;  %v19759_v51 = vsel %vm3201_vm3, %v19746_v28, -inf  ;;  %v25858_v31 = vrot.slane %v25857_v53, 2  ;;  %v3556_v58 = vmax.f32 %v3554_v60, %v3555_v40 }
 0x1d8   : > { %25854 = vst [vmem:[#allocation93_spill] sm:$0xff] %v19759_v51  ;;  %25855 = vst [vmem:[#allocation92_spill] sm:$0xff] %v19762_v32  ;;  %v19765_v27 = vsel %vm3201_vm3, %v2663_v44, -inf  ;;  %v3550_v35 = vrot.slane %v3549_v49, 1  ;;  %v3562_v28 = vrot.slane %v3561_v23, 2  ;;  %v3575_v3 = vmax.f32 %v25859_v5, %v25860_v52 }
 0x1d9   : > { %25856 = vst [vmem:[#allocation94_spill] sm:$0xff] %v19765_v27  ;;  %v3570_v34 = vmax.f32 %v25857_v53, %v25858_v31  ;;  %v3580_v44 = vsel %vm3201_vm3, %v25843_v43, -inf  ;;  %v19778_v20 = vmax.f32 %v3398_v21, %v3399_v61  ;;  %v3587_v31 = vsel %vm3201_vm3, %v2766_v16, -inf  ;;  %v25862_v21 = vld [vmem:[#allocation86_spill] sm:$0xff] }
 0x1da   : > { %v3581_v53 = vrot.slane %v3580_v44, 4  ;;  %v3557_v46 = vrot.slane %v3556_v58, 1  ;;  %v3563_v6 = vmax.f32 %v3561_v23, %v3562_v28  ;;  %v3576_v59 = vrot.slane %v3575_v3, 2 }
 0x1db   : > { %v3571_v33 = vrot.slane %v3570_v34, 1  ;;  %v3588_v60 = vrot.slane %v3587_v31, 4  ;;  %v3551_v40 = vmax.f32 %v3549_v49, %v3550_v35  ;;  %v3597_v5 = vrot.slane %v25861_v8, 2 }
 0x1dc   : > { %v3582_v7 = vmax.f32 %v3580_v44, %v3581_v53  ;;  %v3564_v52 = vrot.slane %v3563_v6, 1  ;;  %v3577_v37 = vmax.f32 %v3575_v3, %v3576_v59  ;;  %v25863_v61 = vrot.slane %v25862_v21, 4 }
 0x1dd   : > { %v19782_v51 = vmax.f32 %v3570_v34, %v3571_v33  ;;  %v3589_v43 = vmax.f32 %v3587_v31, %v3588_v60  ;;  %v3598_v16 = vmax.f32 %v25861_v8, %v3597_v5  ;;  %v3608_v28 = vsel %vm3201_vm3, %v25850_v57, -inf }
 0x1de   : > { %v3603_v30 = vmax.f32 %v25862_v21, %v25863_v61  ;;  %v3583_v27 = vrot.slane %v3582_v7, 2  ;;  %v3615_v35 = vsel %vm3201_vm3, %v2783_v2, -inf  ;;  %v3558_v33 = vmax.f32 %v3556_v58, %v3557_v46  ;;  %v25864_v21 = vld [vmem:[#allocation99_spill] sm:$0xff] }
 0x1df   : > { %v3578_v34 = vrot.slane %v3577_v37, 1  ;;  %v3590_v49 = vrot.slane %v3589_v43, 2  ;;  %v3599_v53 = vrot.slane %v3598_v16, 1  ;;  %v3609_v59 = vrot.slane %v3608_v28, 4 }
 0x1e0   : > { %v3604_v23 = vrot.slane %v3603_v30, 2  ;;  %v3584_v44 = vmax.f32 %v3582_v7, %v3583_v27  ;;  %v3616_v3 = vrot.slane %v3615_v35, 4  ;;  %v3565_v31 = vmax.f32 %v3563_v6, %v3564_v52 }
 0x1e1   : > { %v3591_v60 = vmax.f32 %v3589_v43, %v3590_v49  ;;  %v25865_v61 = vrot.slane %v25864_v21, 2  ;;  %v3579_v5 = vmax.f32 %v3577_v37, %v3578_v34  ;;  %v3610_v57 = vmax.f32 %v3608_v28, %v3609_v59 }
 0x1e2   : > { %v3605_v32 = vmax.f32 %v3603_v30, %v3604_v23  ;;  %v3585_v55 = vrot.slane %v3584_v44, 1  ;;  %v3617_v19 = vmax.f32 %v3615_v35, %v3616_v3  ;;  %v3631_v7 = vmax.f32 %v25866_v56, %v25867_v41 }
 0x1e3   : > { %v3626_v8 = vmax.f32 %v25864_v21, %v25865_v61  ;;  %v3592_v2 = vrot.slane %v3591_v60, 1  ;;  %v3600_v27 = vmax.f32 %v3598_v16, %v3599_v53  ;;  %v3611_v29 = vrot.slane %v3610_v57, 2 }
 0x1e4   : > { %v3606_v58 = vrot.slane %v3605_v32, 1  ;;  %v3618_v6 = vrot.slane %v3617_v19, 2  ;;  %v3636_v30 = vsel %vm3201_vm3, %v25853_v22, -inf  ;;  %v3586_v52 = vmax.f32 %v3584_v44, %v3585_v55 }
 0x1e5   : > { %v3627_v46 = vrot.slane %v3626_v8, 1  ;;  %v3593_v43 = vmax.f32 %v3591_v60, %v3592_v2  ;;  %v3632_v37 = vrot.slane %v3631_v7, 2  ;;  %v3612_v34 = vmax.f32 %v3610_v57, %v3611_v29 }
 0x1e6   : > { %v3607_v49 = vmax.f32 %v3605_v32, %v3606_v58  ;;  %v3619_v28 = vmax.f32 %v3617_v19, %v3618_v6  ;;  %v3637_v35 = vrot.slane %v3636_v30, 4  ;;  %v25868_v23 = vcombine.high %v25853_v22, %v25853_v22 }
 0x1e7   : > { %v3628_v3 = vmax.f32 %v3626_v8, %v3627_v46  ;;  %v3633_v41 = vmax.f32 %v3631_v7, %v3632_v37  ;;  %v3613_v16 = vrot.slane %v3612_v34, 1  ;;  %v4171_v29 = vsel %vm4098_vm4, %v19771_v25, -inf }
 0x1e8   : > { %v3643_v59 = vsel %vm3201_vm3, %v25868_v23, -inf  ;;  %v3620_v53 = vrot.slane %v3619_v28, 1  ;;  %v3638_v21 = vmax.f32 %v3636_v30, %v3637_v35  ;;  %v4172_v19 = vsel %vm4098_vm4, %v3600_v27, -inf }
 0x1e9   : > { %v3644_v56 = vrot.slane %v3643_v59, 4  ;;  %v3634_v55 = vrot.slane %v3633_v41, 1  ;;  %v3614_v32 = vmax.f32 %v3612_v34, %v3613_v16  ;;  %v4174_v61 = vsel %vm4098_vm4, %v3551_v40, -inf }
 0x1ea   : > { %v3621_v60 = vmax.f32 %v3619_v28, %v3620_v53  ;;  %v3639_v22 = vrot.slane %v3638_v21, 2  ;;  %v4175_v2 = vsel %vm4098_vm4, %v3607_v49, -inf  ;;  %v4177_v58 = vsel %vm4098_vm4, %v3558_v33, -inf }
 0x1eb   : > { %v3645_v44 = vmax.f32 %v3643_v59, %v3644_v56  ;;  %v3635_v8 = vmax.f32 %v3633_v41, %v3634_v55  ;;  %v4173_v7 = vmax.f32 %v4171_v29, %v4172_v19  ;;  %v4178_v6 = vsel %vm4098_vm4, %v3614_v32, -inf  ;;  %v19818_v56 = vpop.permute.xlu1 %660 }
 0x1ec   : > { %v3640_v46 = vmax.f32 %v3638_v21, %v3639_v22  ;;  %v4180_v30 = vsel %vm4098_vm4, %v3565_v31, -inf  ;;  %v4176_v37 = vmax.f32 %v4174_v61, %v4175_v2  ;;  %v4179_v27 = vmax.f32 %v4177_v58, %v4178_v6 }
 0x1ed   : > { %v3646_v57 = vrot.slane %v3645_v44, 2  ;;  %v4181_v34 = vsel %vm4098_vm4, %v3621_v60, -inf  ;;  %v4183_v40 = vsel %vm4098_vm4, %v19782_v51, -inf  ;;  %v4184_v49 = vsel %vm4098_vm4, %v3628_v3, -inf }
 0x1ee   : > { %v3641_v28 = vrot.slane %v3640_v46, 1  ;;  %v4182_v35 = vmax.f32 %v4180_v30, %v4181_v34  ;;  %v4185_v33 = vmax.f32 %v4183_v40, %v4184_v49  ;;  %v4186_v59 = vsel %vm4098_vm4, %v3579_v5, -inf }
 0x1ef   : > { %v3647_v25 = vmax.f32 %v3645_v44, %v3646_v57  ;;  %v4187_v41 = vsel %vm4098_vm4, %v3635_v8, -inf  ;;  %v4189_v53 = vsel %vm4098_vm4, %v3586_v52, -inf  ;;  %v4192_v55 = vsel %vm4098_vm4, %v3593_v43, -inf  ;;  %v1304_v30 = vpop.permute.xlu1 %1303 }
 0x1f0   : > { %v3642_v31 = vmax.f32 %v3640_v46, %v3641_v28  ;;  %v4188_v16 = vmax.f32 %v4186_v59, %v4187_v41  ;;  %v4420_v5 = vsel %vm4392_vm5, %v4176_v37, %v4173_v7  ;;  %v19828_v52 = vmul.f32 %v17846_v9, %v19818_v56 }
 0x1f1   : > { %v3648_v23 = vrot.slane %v3647_v25, 1  ;;  %v4421_v29 = vsel %vm4394_vm6, %v4179_v27, %v4420_v5  ;;  %v19833_v32 = vmul.f32 %v17848_v10, %v19818_v56  ;;  %v19837_v60 = vmul.f32 %v17853_v12, %v19818_v56 }
 0x1f2   : > { %v4190_v51 = vsel %vm4098_vm4, %v3642_v31, -inf  ;;  %v4422_v43 = vsel %vm4396_vm7, %v4182_v35, %v4421_v29  ;;  %v3401_v22 = vrot.slane %v19778_v20, 2  ;;  %v988_v8 = vrot.slane %v19828_v52, 1 }
 0x1f3   : > { %v3649_v21 = vmax.f32 %v3647_v25, %v3648_v23  ;;  %v4191_v3 = vmax.f32 %v4189_v53, %v4190_v51  ;;  %v4423_v61 = vsel %vm4398_vm8, %v4185_v33, %v4422_v43  ;;  %v19845_v2 = vmul.f32 %v17855_v13, %v19818_v56 }
 0x1f4   : > { %v4424_v57 = vsel %vm4400_vm9, %v4188_v16, %v4423_v61  ;;  %v697_v58 = vmul.f32 %v17851_v11, %v19673_v24  ;;  %v860_v46 = vmul.f32 %v17846_v9, %v19673_v24  ;;  %v1233_v6 = vrot.slane %v19833_v32, 2 }
 0x1f5   : > { %v4193_v44 = vsel %vm4098_vm4, %v3649_v21, -inf  ;;  %v4425_v7 = vsel %vm4402_vm10, %v4191_v3, %v4424_v57  ;;  %v25869_v25 = vrot.slane %v19429_v36, 1  ;;  %v25870_v37 = vrot.slane %v19209_v0, 1 }
 0x1f6   : > { %v4194_v19 = vmax.f32 %v4192_v55, %v4193_v44  ;;  %v1105_v34 = vmul.f32 %v17848_v10, %v19673_v24  ;;  %v1554_v35 = vrot.slane %v19837_v60, 1  ;;  %v987_v40 = vrot.slane %v860_v46, 1 }
 0x1f7   : > { %v984_v27 = vsel %vm911_vm1, %v25870_v37, %v25869_v25  ;;  %v25871_v33 = vrot.slane %v19440_v15, 2  ;;  %v25872_v59 = vrot.slane %v19219_v45, 2  ;;  %v1342_v41 = vmul.f32 %v17859_v17, %v19673_v24  ;;  %v809_v25 = vpop.permute.xlu0 %808 }
 0x1f8   : > { %v4426_v28 = vsel %vm4404_vm11, %v4194_v19, %v4425_v7  ;;  %v1052_v49 = vadd.f32 %v984_v27, %v19224_v4  ;;  %v1232_v0 = vrot.slane %v1105_v34, 2  ;;  %v989_v31 = vsel %vm911_vm1, %v987_v40, %v988_v8 }
 0x1f9   : > { %v4458_v23 = vrot.slane %v4426_v28, 7  ;;  %v1229_v36 = vsel %vm1156_vm2, %v25872_v59, %v25871_v33  ;;  %v1429_v53 = vmul.f32 %v17853_v12, %v19673_v24  ;;  %v19876_v4 = vmul.f32 %v17853_v12, %v1304_v30 }
 0x1fa   : > { %v1297_v16 = vadd.f32 %v1229_v36, %v1052_v49  ;;  %v1054_v21 = vadd.f32 %v989_v31, %v697_v58  ;;  %v1234_v55 = vsel %vm1156_vm2, %v1232_v0, %v1233_v6  ;;  %v1798_v29 = vrot.slane %v19845_v2, 2 }
 0x1fb   : > { %v19879_v15 = vsel %vm401_vm0, 0.0, %v4458_v23  ;;  %v19882_v45 = vsel %vm401_vm0, %v4458_v23, 0.0  ;;  %v1553_v44 = vrot.slane %v1429_v53, 1  ;;  %v1673_v43 = vmul.f32 %v17855_v13, %v19673_v24 }
 0x1fc   : > { %v4513_v51 = vrot.slane %v19879_v15, 1  ;;  %v4514_v5 = vrot.slane %v19882_v45, 1  ;;  %v1374_v3 = vadd.f32 %v1342_v41, %v1297_v16  ;;  %v1299_v19 = vadd.f32 %v1234_v55, %v1054_v21  ;;  %v1381_v55 = vpop.permute.xlu1 %1380 }
 0x1fd   : > { %v19893_v61 = vmul.f32 %v17855_v13, %v1304_v30  ;;  %v1344_v58 = vmul.f32 %v17859_v17, %v1304_v30  ;;  %v1555_v46 = vsel %vm911_vm1, %v1553_v44, %v1554_v35  ;;  %v19903_v7 = vmul.f32 %v17857_v14, %v1304_v30 }
 0x1fe   : > { %v19896_v57 = vsel %vm911_vm1, %v4513_v51, %v4514_v5  ;;  %v19906_v37 = vmax.f32 %v19778_v20, %v3401_v22  ;;  %v1558_v24 = vrot.slane %v19876_v4, 1  ;;  %v1623_v27 = vadd.f32 %v1555_v46, %v1374_v3 }
 0x1ff   : > { %25873 = vst [vmem:[#allocation30_spill] sm:$0xff] %v19896_v57  ;;  %16783 = vmatprep.mubr.msk.f32.mxu1 %vm4098_vm4, %v19896_v57  ;;  %v1797_v34 = vrot.slane %v1673_v43, 2  ;;  %v19911_v28 = vadd.f32 %v1344_v58, %v1299_v19  ;;  %v1903_v40 = vmul.f32 %v17861_v18, %v1304_v30  ;;  %v19915_v49 = vmul.f32 %v19420_v26, %v1304_v30 }
 0x200   : > { %v1983_v23 = vmul.f32 %v17857_v14, %v19818_v56  ;;  %v1802_v20 = vrot.slane %v19893_v61, 2  ;;  %v2227_v22 = vmul.f32 %v19420_v26, %v19818_v56  ;;  %v862_v33 = vmul.f32 %v17846_v9, %v809_v25 }
 0x201   : > { %v1107_v59 = vmul.f32 %v17848_v10, %v809_v25  ;;  %v1799_v36 = vsel %vm1156_vm2, %v1797_v34, %v1798_v29  ;;  %v2109_v0 = vrot.slane %v19903_v7, 1  ;;  %v1902_v30 = vmul.f32 %v17861_v18, %v19818_v56 }
 0x202   : > { %v2105_v41 = vrot.slane %v1983_v23, 1  ;;  %v1867_v31 = vadd.f32 %v1799_v36, %v1623_v27  ;;  %v2353_v16 = vrot.slane %v19915_v49, 2  ;;  %v2349_v53 = vrot.slane %v2227_v22, 2  ;;  %v25886_v49 = vld [vmem:[#allocation25_spill] sm:$0xff] }
 0x203   : > { %v1431_v21 = vmul.f32 %v17853_v12, %v809_v25  ;;  %v1934_v9 = vadd.f32 %v1902_v30, %v19510_v42  ;;  %v25874_v10 = vrot.slane %v19702_v47, 1  ;;  %v990_v5 = vrot.slane %v862_v33, 1 }
 0x204   : > { %v1984_v3 = vmul.f32 %v17857_v14, %v809_v25  ;;  %v1235_v19 = vrot.slane %v1107_v59, 2  ;;  %v1675_v58 = vmul.f32 %v17855_v13, %v809_v25  ;;  %v25875_v46 = vrot.slane %v19724_v62, 2 }
 0x205   : > { %v2106_v51 = vsel %vm911_vm1, %v25874_v10, %v2105_v41  ;;  %v1556_v43 = vrot.slane %v1431_v21, 1  ;;  %v2228_v42 = vmul.f32 %v19420_v26, %v809_v25  ;;  %v1434_v47 = vmul.f32 %v17853_v12, %v1381_v55  ;;  %v19960_v25 = vld [vmem:[%s25147_s2] ss:$0 sm:$0xff] }
 0x206   : > { %v2177_v44 = vadd.f32 %v2106_v51, %v19713_v38  ;;  %v2350_v27 = vsel %vm1156_vm2, %v25875_v46, %v2349_v53  ;;  %v2107_v34 = vrot.slane %v1984_v3, 1  ;;  %v19944_v23 = vadd.f32 %v1903_v40, %v1867_v31 }
 0x207   : > { %v1678_v33 = vmul.f32 %v17855_v13, %v1381_v55  ;;  %v19948_v38 = vmul.f32 %v17857_v14, %v1381_v55  ;;  %v991_v59 = vsel %vm911_vm1, %v988_v8, %v990_v5  ;;  %v2351_v36 = vrot.slane %v2228_v42, 2  ;;  %v1308_v8 = vpop.permute.xlu0 %1307 }
 0x208   : > { %v2421_v22 = vadd.f32 %v2350_v27, %v2177_v44  ;;  %v2108_v62 = vsel %vm911_vm1, %v2105_v41, %v2107_v34  ;;  %v19955_v30 = vmul.f32 %v19420_v26, %v1381_v55  ;;  %v1557_v31 = vsel %vm911_vm1, %v1554_v35, %v1556_v43 }
 0x209   : > { %v1800_v52 = vrot.slane %v1675_v58, 2  ;;  %v2178_v21 = vadd.f32 %v2108_v62, %v1934_v9  ;;  %v2352_v41 = vsel %vm1156_vm2, %v2349_v53, %v2351_v36  ;;  %v1561_v10 = vrot.slane %v1434_v47, 1 }
 0x20a   : > { %v2459_v40 = vadd.f32 %v19960_v25, %v2421_v22  ;;  %v1805_v51 = vrot.slane %v1678_v33, 2  ;;  %v698_v26 = vmul.f32 %v17851_v11, %v19818_v56  ;;  %v2112_v3 = vrot.slane %v19948_v38, 1 }
 0x20b   : > { %v2422_v5 = vadd.f32 %v2352_v41, %v2178_v21  ;;  %v2356_v44 = vrot.slane %v19955_v30, 2  ;;  %v1343_v60 = vmul.f32 %v17859_v17, %v19818_v56  ;;  %v1433_v35 = vmul.f32 %v17853_v12, %v1308_v8 }
 0x20c   : > { %v2491_v55 = vmax.f32 %v2459_v40, 0.0  ;;  %v1055_v46 = vadd.f32 %v991_v59, %v698_v26  ;;  %v1677_v9 = vmul.f32 %v17855_v13, %v1308_v8  ;;  %v1236_v11 = vsel %vm1156_vm2, %v1233_v6, %v1235_v19 }
 0x20d   : > { %v2460_v58 = vadd.f32 %v19960_v25, %v2422_v5  ;;  %v1375_v34 = vadd.f32 %v1343_v60, %v19481_v54  ;;  %v1345_v42 = vmul.f32 %v17859_v17, %v1308_v8  ;;  %v1559_v47 = vrot.slane %v1433_v35, 1  ;;  %v17612_v35 = vld [vmem:[%s25146_s1 + $0x8] ss:$0 sm:$0xff] }
 0x20e   : > { %v2971_v53 = vcombine.high %v2491_v55, %v2491_v55  ;;  %v2978_v43 = vrot.slane %v2491_v55, %v25564_v39  ;;  %v1300_v27 = vadd.f32 %v1236_v11, %v1055_v46  ;;  %v1803_v13 = vrot.slane %v1677_v9, 2 }
 0x20f   : > { %v2492_v22 = vmax.f32 %v2460_v58, 0.0  ;;  %v1624_v38 = vadd.f32 %v1557_v31, %v1375_v34  ;;  %v1560_v32 = vsel %vm911_vm1, %v1558_v24, %v1559_v47  ;;  %v1801_v17 = vsel %vm1156_vm2, %v1798_v29, %v1800_v52 }
 0x210   : > { %v2986_v56 = vcombine.high %v2978_v43, %v2978_v43  ;;  %v3930_v12 = vsel %vm3201_vm3, %v2978_v43, -inf  ;;  %v1377_v59 = vadd.f32 %v1345_v42, %v1300_v27  ;;  %v19987_v6 = vrot.slane %v2971_v53, %v25564_v39  ;;  %v25877_v53 = vld [vmem:[#allocation28_spill] sm:$0xff]  ;;  %v25878_v27 = vld [vmem:[#allocation31_spill] sm:$0xff]  ;;  %v25879_v42 = vld [vmem:[#allocation34_spill] sm:$0xff] }
 0x211   : > { %v3931_v33 = vrot.slane %v3930_v12, 4  ;;  %v2995_v54 = vrot.slane %v2492_v22, %v25564_v39  ;;  %v1904_v19 = vmul.f32 %v17861_v18, %v1308_v8  ;;  %v1868_v36 = vadd.f32 %v1801_v17, %v1624_v38 }
 0x212   : > { %v19995_v62 = vsel %vm3201_vm3, %v2986_v56, -inf  ;;  %v1562_v40 = vsel %vm911_vm1, %v1559_v47, %v1561_v10  ;;  %v1625_v4 = vadd.f32 %v1560_v32, %v19911_v28  ;;  %v2988_v24 = vcombine.high %v2492_v22, %v2492_v22 }
 0x213   : > { %v3003_v31 = vcombine.high %v2995_v54, %v2995_v54  ;;  %v3958_v21 = vsel %vm3201_vm3, %v2995_v54, -inf  ;;  %v1626_v41 = vadd.f32 %v1562_v40, %v1377_v59  ;;  %v20000_v26 = vmax.f32 %v3930_v12, %v3931_v33  ;;  %v25880_v12 = vld [vmem:[#allocation24_spill] sm:$0xff] }
 0x214   : > { %v3959_v2 = vrot.slane %v3958_v21, 4  ;;  %v1804_v18 = vsel %vm1156_vm2, %v1802_v20, %v1803_v13  ;;  %v1806_v29 = vsel %vm1156_vm2, %v1803_v13, %v1805_v51  ;;  %v1986_v28 = vmul.f32 %v17857_v14, %v1308_v8  ;;  %v25876_v51 = vld [vmem:[#allocation29_spill] sm:$0xff]  ;;  %v25881_v13 = vld [vmem:[#allocation27_spill] sm:$0xff] }
 0x215   : > { %v20007_v52 = vsel %vm3201_vm3, %v3003_v31, -inf  ;;  %v1869_v10 = vadd.f32 %v1804_v18, %v1625_v4  ;;  %v1870_v55 = vadd.f32 %v1806_v29, %v1626_v41  ;;  %v1936_v60 = vadd.f32 %v1904_v19, %v1868_v36  ;;  %v25883_v19 = vld [vmem:[#allocation36_spill] sm:$0xff] }
 0x216   : > { %v3960_v46 = vmax.f32 %v3958_v21, %v3959_v2  ;;  %v2230_v61 = vmul.f32 %v17612_v35, %v1308_v8  ;;  %v20015_v20 = vrot.slane %v2988_v24, %v25564_v39  ;;  %v2110_v58 = vrot.slane %v1986_v28, 1  ;;  %v25884_v24 = vld [vmem:[#allocation32_spill] sm:$0xff] }
 0x217   : > { %v1937_v9 = vadd.f32 %v25876_v51, %v1869_v10  ;;  %v1938_v43 = vadd.f32 %v25877_v53, %v1870_v55  ;;  %v2817_v34 = vcombine.high %v25878_v27, %v25878_v27  ;;  %v2834_v47 = vcombine.high %v25879_v42, %v25879_v42 }
 0x218   : > { %v2354_v14 = vrot.slane %v2230_v61, 2  ;;  %v2111_v8 = vsel %vm911_vm1, %v2109_v0, %v2110_v58  ;;  %v2113_v56 = vsel %vm911_vm1, %v2110_v58, %v2112_v3  ;;  %v3961_v38 = vrot.slane %v3960_v46, 2  ;;  %v25882_v0 = vld [vmem:[#allocation26_spill] sm:$0xff] }
 0x219   : > { %v2181_v22 = vadd.f32 %v25880_v12, %v1937_v9  ;;  %v2182_v33 = vadd.f32 %v25881_v13, %v1938_v43  ;;  %v2179_v59 = vadd.f32 %v2111_v8, %v19944_v23  ;;  %v2180_v32 = vadd.f32 %v2113_v56, %v1936_v60 }
 0x21a   : > { %v2851_v54 = vcombine.high %v18999_v1, %v18999_v1  ;;  %v2355_v17 = vsel %vm1156_vm2, %v2353_v16, %v2354_v14  ;;  %v2357_v7 = vsel %vm1156_vm2, %v2354_v14, %v2356_v44  ;;  %v3653_v36 = vrot.slane %v25883_v19, 2 }
 0x21b   : > { %v2425_v3 = vadd.f32 %v25882_v0, %v2181_v22  ;;  %v2423_v40 = vadd.f32 %v2355_v17, %v2179_v59  ;;  %v2424_v4 = vadd.f32 %v2357_v7, %v2180_v32  ;;  %v25885_v23 = vrot.slane %v25884_v24, 4 }
 0x21c   : > { %v3664_v21 = vsel %vm3201_vm3, %v25878_v27, -inf  ;;  %v2426_v41 = vadd.f32 %v25886_v49, %v2182_v33  ;;  %v3654_v30 = vmax.f32 %v25883_v19, %v3653_v36  ;;  %v3671_v10 = vsel %vm3201_vm3, %v2817_v34, -inf }
 0x21d   : > { %v3659_v31 = vmax.f32 %v25884_v24, %v25885_v23  ;;  %v2463_v16 = vadd.f32 %v19960_v25, %v2425_v3  ;;  %v3665_v44 = vrot.slane %v3664_v21, 4  ;;  %v2461_v2 = vadd.f32 %v19960_v25, %v2423_v40 }
 0x21e   : > { %v2462_v18 = vadd.f32 %v19960_v25, %v2424_v4  ;;  %v2868_v28 = vcombine.high %v19039_v50, %v19039_v50  ;;  %v3655_v60 = vrot.slane %v3654_v30, 1  ;;  %v20054_v61 = vmax.f32 %v3960_v46, %v3961_v38  ;;  %v25888_v46 = vld [vmem:[#allocation37_spill] sm:$0xff] }
 0x21f   : > { %v3660_v29 = vrot.slane %v3659_v31, 2  ;;  %v2495_v55 = vmax.f32 %v2463_v16, 0.0  ;;  %v3666_v35 = vmax.f32 %v3664_v21, %v3665_v44  ;;  %v2493_v51 = vmax.f32 %v2461_v2, 0.0 }
 0x220   : > { %v20056_v9 = vmax.f32 %v2462_v18, 0.0  ;;  %v20059_v43 = vadd.f32 %v19960_v25, %v2426_v41  ;;  %v3672_v27 = vrot.slane %v3671_v10, 4  ;;  %v3683_v12 = vrot.slane %v25888_v46, 1 }
 0x221   : > { %v3661_v53 = vmax.f32 %v3659_v31, %v3660_v29  ;;  %v3039_v58 = vcombine.high %v2495_v55, %v2495_v55  ;;  %v20062_v14 = vrot.slane %v2495_v55, %v25564_v39  ;;  %v3005_v34 = vcombine.high %v2493_v51, %v2493_v51  ;;  %v25893_v55 = vld [vmem:[#allocation45_spill] sm:$0xff] }
 0x222   : > { %v3012_v8 = vrot.slane %v2493_v51, %v25564_v39  ;;  %v20067_v56 = vrot.slane %v20056_v9, %v25564_v39  ;;  %v20074_v25 = vmax.f32 %v3654_v30, %v3655_v60  ;;  %v3667_v33 = vrot.slane %v3666_v35, 2  ;;  %v25889_v30 = vld [vmem:[#allocation33_spill] sm:$0xff] }
 0x223   : > { %25887 = vst [vmem:[#allocation97_spill] sm:$0xff] %v20062_v14  ;;  %v20072_v22 = vsel %vm3201_vm3, %v20062_v14, -inf  ;;  %v3662_v13 = vrot.slane %v3661_v53, 1  ;;  %v20077_v38 = vrot.slane %v3005_v34, %v25564_v39  ;;  %v20085_v0 = vrot.slane %v3039_v58, %v25564_v39  ;;  %v25949_v14 = vld [vmem:[#allocation94_spill] sm:$0xff] }
 0x224   : > { %v3020_v59 = vcombine.high %v3012_v8, %v3012_v8  ;;  %v3986_v17 = vsel %vm3201_vm3, %v3012_v8, -inf  ;;  %v20096_v4 = vsel %vm3201_vm3, %v20067_v56, -inf  ;;  %v3668_v49 = vmax.f32 %v3666_v35, %v3667_v33 }
 0x225   : > { %v3987_v19 = vrot.slane %v3986_v17, 4  ;;  %v20092_v40 = vsel %vm3201_vm3, %v20077_v38, -inf  ;;  %v20101_v21 = vmax.f32 %v3661_v53, %v3662_v13  ;;  %v3673_v16 = vmax.f32 %v3671_v10, %v3672_v27 }
 0x226   : > { %v3993_v36 = vsel %vm3201_vm3, %v3020_v59, -inf  ;;  %v25890_v44 = vrot.slane %v25889_v30, 4  ;;  %v3692_v18 = vsel %vm3201_vm3, %v25879_v42, -inf  ;;  %v4001_v29 = vrot.slane %v20092_v40, 4 }
 0x227   : > { %v20099_v23 = vmax.f32 %v3986_v17, %v3987_v19  ;;  %v3994_v31 = vrot.slane %v3993_v36, 4  ;;  %v3669_v60 = vrot.slane %v3668_v49, 1  ;;  %v20113_v51 = vmax.f32 %v25888_v46, %v3683_v12 }
 0x228   : > { %v3687_v2 = vmax.f32 %v25889_v30, %v25890_v44  ;;  %v3674_v35 = vrot.slane %v3673_v16, 2  ;;  %v3693_v58 = vrot.slane %v3692_v18, 4  ;;  %v3699_v10 = vsel %vm3201_vm3, %v2834_v47, -inf }
 0x229   : > { %v20120_v34 = vmax.f32 %v3993_v36, %v3994_v31  ;;  %v20122_v8 = vmax.f32 %v3668_v49, %v3669_v60  ;;  %v3700_v13 = vrot.slane %v3699_v10, 4  ;;  %v3709_v46 = vrot.slane %v19026_v63, 2 }
 0x22a   : > { %v3688_v53 = vrot.slane %v3687_v2, 2  ;;  %v3675_v33 = vmax.f32 %v3673_v16, %v3674_v35  ;;  %v3694_v17 = vmax.f32 %v3692_v18, %v3693_v58  ;;  %v25891_v19 = vrot.slane %v19014_v48, 4 }
 0x22b   : > { %v3701_v12 = vmax.f32 %v3699_v10, %v3700_v13  ;;  %v3720_v42 = vsel %vm3201_vm3, %v18999_v1, -inf  ;;  %v3727_v47 = vsel %vm3201_vm3, %v2851_v54, -inf  ;;  %v3710_v16 = vmax.f32 %v19026_v63, %v3709_v46  ;;  %v25892_v54 = vld [vmem:[#allocation51_spill] sm:$0xff]  ;;  %v20142_v46 = vld [vmem:[%s25148_s3 + $0x18] sm:$0xff] }
 0x22c   : > { %v3689_v59 = vmax.f32 %v3687_v2, %v3688_v53  ;;  %v3715_v30 = vmax.f32 %v19014_v48, %v25891_v19  ;;  %v3676_v36 = vrot.slane %v3675_v33, 1  ;;  %v3695_v49 = vrot.slane %v3694_v17, 2  ;;  %16789 = vmatprep.subr.mxu1 %v20142_v46 }
 0x22d   : > { %v3702_v44 = vrot.slane %v3701_v12, 2  ;;  %v3721_v18 = vrot.slane %v3720_v42, 4  ;;  %v3728_v60 = vrot.slane %v3727_v47, 4  ;;  %v3711_v58 = vrot.slane %v3710_v16, 1 }
 0x22e   : > { %v3690_v31 = vrot.slane %v3689_v59, 1  ;;  %v3716_v2 = vrot.slane %v3715_v30, 2  ;;  %v3677_v35 = vmax.f32 %v3675_v33, %v3676_v36  ;;  %v3696_v48 = vmax.f32 %v3694_v17, %v3695_v49  ;;  %v20147_v33 = vld [vmem:[%s25148_s3 + $0x58] sm:$0xff] }
 0x22f   : > { %v3703_v10 = vmax.f32 %v3701_v12, %v3702_v44  ;;  %v3722_v19 = vmax.f32 %v3720_v42, %v3721_v18  ;;  %v3729_v3 = vmax.f32 %v3727_v47, %v3728_v60  ;;  %v3712_v24 = vmax.f32 %v3710_v16, %v3711_v58  ;;  %16809 = vmatprep.subr.mxu0 %v20147_v33 }
 0x230   : > { %v3691_v53 = vmax.f32 %v3689_v59, %v3690_v31  ;;  %v3717_v13 = vmax.f32 %v3715_v30, %v3716_v2  ;;  %v3697_v1 = vrot.slane %v3696_v48, 1  ;;  %v3739_v7 = vrot.slane %v25892_v54, 1 }
 0x231   : > { %v25894_v41 = vrot.slane %v25893_v55, 4  ;;  %v3704_v59 = vrot.slane %v3703_v10, 1  ;;  %v3723_v12 = vrot.slane %v3722_v19, 2  ;;  %v3730_v30 = vrot.slane %v3729_v3, 2 }
 0x232   : > { %v3718_v17 = vrot.slane %v3717_v13, 1  ;;  %v3698_v42 = vmax.f32 %v3696_v48, %v3697_v1  ;;  %v3748_v47 = vsel %vm3201_vm3, %v19039_v50, -inf  ;;  %v3755_v18 = vsel %vm3201_vm3, %v2868_v28, -inf }
 0x233   : > { %v3743_v63 = vmax.f32 %v25893_v55, %v25894_v41  ;;  %v3740_v41 = vmax.f32 %v25892_v54, %v3739_v7  ;;  %v3705_v36 = vmax.f32 %v3703_v10, %v3704_v59  ;;  %v3724_v49 = vmax.f32 %v3722_v19, %v3723_v12 }
 0x234   : > { %v3719_v31 = vmax.f32 %v3717_v13, %v3718_v17  ;;  %v3731_v16 = vmax.f32 %v3729_v3, %v3730_v30  ;;  %v3749_v2 = vrot.slane %v3748_v47, 4  ;;  %v4195_v60 = vsel %vm4098_vm4, %v20074_v25, -inf }
 0x235   : > { %v3744_v55 = vrot.slane %v3743_v63, 2  ;;  %v3725_v48 = vrot.slane %v3724_v49, 1  ;;  %v3756_v58 = vrot.slane %v3755_v18, 4  ;;  %v4196_v1 = vsel %vm4098_vm4, %v3712_v24, -inf }
 0x236   : > { %v3732_v7 = vrot.slane %v3731_v16, 1  ;;  %v3750_v10 = vmax.f32 %v3748_v47, %v3749_v2  ;;  %v4197_v13 = vmax.f32 %v4195_v60, %v4196_v1  ;;  %v4198_v3 = vsel %vm4098_vm4, %v20101_v21, -inf }
 0x237   : > { %v3745_v44 = vmax.f32 %v3743_v63, %v3744_v55  ;;  %v3726_v19 = vmax.f32 %v3724_v49, %v3725_v48  ;;  %v3757_v59 = vmax.f32 %v3755_v18, %v3756_v58  ;;  %v4199_v50 = vsel %vm4098_vm4, %v3719_v31, -inf }
 0x238   : > { %v3733_v63 = vmax.f32 %v3731_v16, %v3732_v7  ;;  %v3751_v17 = vrot.slane %v3750_v10, 2  ;;  %v4200_v12 = vmax.f32 %v4198_v3, %v4199_v50  ;;  %v4201_v25 = vsel %vm4098_vm4, %v20122_v8, -inf }
 0x239   : > { %v3746_v54 = vrot.slane %v3745_v44, 1  ;;  %v3758_v30 = vrot.slane %v3757_v59, 2  ;;  %v4202_v24 = vsel %vm4098_vm4, %v3726_v19, -inf  ;;  %v4204_v55 = vsel %vm4098_vm4, %v3677_v35, -inf  ;;  %v25896_v19 = vld [vmem:[#allocation47_spill] sm:$0xff] }
 0x23a   : > { %v4205_v47 = vsel %vm4098_vm4, %v3733_v63, -inf  ;;  %v3752_v2 = vmax.f32 %v3750_v10, %v3751_v17  ;;  %v4203_v21 = vmax.f32 %v4201_v25, %v4202_v24  ;;  %v4207_v16 = vsel %vm4098_vm4, %v20113_v51, -inf }
 0x23b   : > { %v3747_v28 = vmax.f32 %v3745_v44, %v3746_v54  ;;  %v4206_v49 = vmax.f32 %v4204_v55, %v4205_v47  ;;  %v3759_v31 = vmax.f32 %v3757_v59, %v3758_v30  ;;  %v4208_v44 = vsel %vm4098_vm4, %v3740_v41, -inf  ;;  %v25895_v54 = vld [vmem:[#allocation4_spill] sm:$0xff]  ;;  %v25897_v59 = vld [vmem:[#allocation5_spill] sm:$0xff]  ;;  %v25902_v30 = vld [vmem:[#allocation50_spill] sm:$0xff] }
 0x23c   : > { %v4210_v18 = vsel %vm4098_vm4, %v3691_v53, -inf  ;;  %v20177_v60 = vmax.f32 %v20092_v40, %v4001_v29  ;;  %v3753_v35 = vrot.slane %v3752_v2, 1  ;;  %v4209_v48 = vmax.f32 %v4207_v16, %v4208_v44 }
 0x23d   : > { %v4211_v8 = vsel %vm4098_vm4, %v3747_v28, -inf  ;;  %v3760_v58 = vrot.slane %v3759_v31, 1  ;;  %v4213_v1 = vsel %vm4098_vm4, %v3698_v42, -inf  ;;  %v4427_v51 = vsel %vm4392_vm5, %v4200_v12, %v4197_v13  ;;  %v25900_v13 = vld [vmem:[#allocation46_spill] sm:$0xff]  ;;  %v25901_v12 = vld [vmem:[#allocation65_spill] sm:$0xff] }
 0x23e   : > { %v4212_v7 = vmax.f32 %v4210_v18, %v4211_v8  ;;  %v25331_v10 = vrot.slane %v25895_v54, 1  ;;  %v3754_v41 = vmax.f32 %v3752_v2, %v3753_v35  ;;  %v4216_v53 = vsel %vm4098_vm4, %v3705_v36, -inf }
 0x23f   : > { %v4428_v3 = vsel %vm4394_vm6, %v4203_v21, %v4427_v51  ;;  %v2545_v63 = vcombine.high %v25896_v19, %v25896_v19  ;;  %v3761_v40 = vmax.f32 %v3759_v31, %v3760_v58  ;;  %v25898_v50 = vrot.slane %v25897_v59, 1  ;;  %v25903_v21 = vld [vmem:[#allocation49_spill] sm:$0xff] }
 0x240   : > { %v4429_v29 = vsel %vm4396_vm7, %v4206_v49, %v4428_v3  ;;  %v2562_v28 = vcombine.high %v25900_v13, %v25900_v13  ;;  %v4214_v36 = vsel %vm4098_vm4, %v3754_v41, -inf  ;;  %v2579_v25 = vcombine.high %v25901_v12, %v25901_v12  ;;  %v25905_v41 = vld [vmem:[#allocation52_spill] sm:$0xff] }
 0x241   : > { %v20192_v42 = vsel %vm911_vm1, %v25331_v10, %v25898_v50  ;;  %v4430_v17 = vsel %vm4398_vm8, %v4209_v48, %v4429_v29  ;;  %v3205_v24 = vrot.slane %v25902_v30, 2  ;;  %v4215_v55 = vmax.f32 %v4213_v1, %v4214_v36 }
 0x242   : > { %25899 = vst [vmem:[#allocation101_spill] sm:$0xff] %v20192_v42  ;;  %16777 = vmatprep.mubr.msk.f32.mxu0 %vm4098_vm4, %v20192_v42  ;;  %v4217_v47 = vsel %vm4098_vm4, %v3761_v40, -inf  ;;  %v4431_v2 = vsel %vm4400_vm9, %v4212_v7, %v4430_v17  ;;  %v25904_v49 = vrot.slane %v25903_v21, 4  ;;  %v3216_v18 = vsel %vm3201_vm3, %v25896_v19, -inf  ;;  %v25906_v40 = vld [vmem:[#allocation61_spill] sm:$0xff] }
 0x243   : > { %v4218_v31 = vmax.f32 %v4216_v53, %v4217_v47  ;;  %v3206_v44 = vmax.f32 %v25902_v30, %v3205_v24  ;;  %v3223_v8 = vsel %vm3201_vm3, %v2545_v63, -inf  ;;  %v4432_v35 = vsel %vm4402_vm10, %v4215_v55, %v4431_v2  ;;  %v25908_v30 = vld [vmem:[#allocation70_spill] sm:$0xff] }
 0x244   : > { %v3211_v16 = vmax.f32 %v25903_v21, %v25904_v49  ;;  %v3217_v58 = vrot.slane %v3216_v18, 4  ;;  %v3224_v1 = vrot.slane %v3223_v8, 4  ;;  %v3235_v3 = vrot.slane %v25905_v41, 1 }
 0x245   : > { %v4433_v51 = vsel %vm4404_vm11, %v4218_v31, %v4432_v35  ;;  %v3207_v7 = vrot.slane %v3206_v44, 1  ;;  %v25907_v29 = vrot.slane %v25906_v40, 4  ;;  %v3244_v47 = vsel %vm3201_vm3, %v25900_v13, -inf }
 0x246   : > { %v3212_v48 = vrot.slane %v3211_v16, 2  ;;  %v4459_v50 = vrot.slane %v4433_v51, 7  ;;  %v3218_v17 = vmax.f32 %v3216_v18, %v3217_v58  ;;  %v3225_v19 = vmax.f32 %v3223_v8, %v3224_v1 }
 0x247   : > { %v3239_v53 = vmax.f32 %v25906_v40, %v25907_v29  ;;  %v20220_v24 = vmax.f32 %v3206_v44, %v3207_v7  ;;  %v3245_v58 = vrot.slane %v3244_v47, 4  ;;  %v3251_v13 = vsel %vm3201_vm3, %v2562_v28, -inf  ;;  %v4293_v29 = vld [vmem:[%s25148_s3 + $0x10] sm:$0xff] }
 0x248   : > { %v3213_v36 = vmax.f32 %v3211_v16, %v3212_v48  ;;  %v20225_v2 = vsel %vm401_vm0, 0.0, %v4459_v50  ;;  %v20228_v21 = vsel %vm401_vm0, %v4459_v50, 0.0  ;;  %v3219_v31 = vrot.slane %v3218_v17, 2 }
 0x249   : > { %v3240_v55 = vrot.slane %v3239_v53, 2  ;;  %v4516_v16 = vrot.slane %v20225_v2, 1  ;;  %v4517_v18 = vrot.slane %v20228_v21, 1  ;;  %v3226_v8 = vrot.slane %v3225_v19, 2 }
 0x24a   : > { %v3214_v49 = vrot.slane %v3213_v36, 1  ;;  %v3220_v44 = vmax.f32 %v3218_v17, %v3219_v31  ;;  %v20233_v48 = vmax.f32 %v25905_v41, %v3235_v3  ;;  %v3252_v40 = vrot.slane %v3251_v13, 4  ;;  %v25910_v41 = vld [vmem:[#allocation69_spill] sm:$0xff]  ;;  %v25911_v17 = vld [vmem:[#allocation68_spill] sm:$0xff] }
 0x24b   : > { %v3241_v35 = vmax.f32 %v3239_v53, %v3240_v55  ;;  %v20237_v1 = vsel %vm911_vm1, %v4516_v16, %v4517_v18  ;;  %v3227_v51 = vmax.f32 %v3225_v19, %v3226_v8  ;;  %v3246_v50 = vmax.f32 %v3244_v47, %v3245_v58 }
 0x24c   : > { %25909 = vst [vmem:[#allocation104_spill] sm:$0xff] %v20237_v1  ;;  %16784 = vmatmul.mubr.msk.f32.vlgmr.msra.gmra.mxu1 %vm4098_vm4, %v20237_v1  ;;  %v3221_v53 = vrot.slane %v3220_v44, 1  ;;  %v3261_v3 = vrot.slane %v25910_v41, 2  ;;  %v25912_v55 = vrot.slane %v25911_v17, 4  ;;  %v3215_v31 = vmax.f32 %v3213_v36, %v3214_v49 }
 0x24d   : > { %v3242_v7 = vrot.slane %v3241_v35, 1  ;;  %v3228_v16 = vrot.slane %v3227_v51, 1  ;;  %v3253_v19 = vmax.f32 %v3251_v13, %v3252_v40  ;;  %v3272_v18 = vsel %vm3201_vm3, %v25901_v12, -inf  ;;  %16790 = vmatpush3.msra.mxu1 %v20142_v46  ;;  %v25913_v46 = vld [vmem:[#allocation73_spill] sm:$0xff] }
 0x24e   : > { %v3267_v28 = vmax.f32 %v25911_v17, %v25912_v55  ;;  %v3247_v10 = vrot.slane %v3246_v50, 2  ;;  %v3262_v32 = vmax.f32 %v25910_v41, %v3261_v3  ;;  %16791 = vmatprep.subr.mxu1 %v4293_v29  ;;  %v3222_v58 = vmax.f32 %v3220_v44, %v3221_v53  ;;  %v4292_v44 = vld [vmem:[%s25148_s3 + $0x8] sm:$0xff] }
 0x24f   : > { %v20251_v8 = vmax.f32 %v3241_v35, %v3242_v7  ;;  %v3254_v27 = vrot.slane %v3253_v19, 2  ;;  %v3273_v11 = vrot.slane %v3272_v18, 4  ;;  %v3279_v17 = vsel %vm3201_vm3, %v2579_v25, -inf  ;;  %16792 = vmatpush3.msra.mxu1 %v4293_v29  ;;  %v25914_v7 = vld [vmem:[#allocation41_spill] sm:$0xff]  ;;  %v4291_v25 = vld [vmem:[%s25148_s3] sm:$0xff] }
 0x250   : > { %v3268_v47 = vrot.slane %v3267_v28, 2  ;;  %v3248_v36 = vmax.f32 %v3246_v50, %v3247_v10  ;;  %v3263_v49 = vrot.slane %v3262_v32, 1  ;;  %v3280_v40 = vrot.slane %v3279_v17, 4  ;;  %16793 = vmatprep.subr.mxu1 %v4292_v44 }
 0x251   : > { %v3255_v12 = vmax.f32 %v3253_v19, %v3254_v27  ;;  %v3274_v55 = vmax.f32 %v3272_v18, %v3273_v11  ;;  %v3291_v35 = vrot.slane %v25913_v46, 1  ;;  %v25915_v5 = vrot.slane %v25914_v7, 4  ;;  %16794 = vmatpush3.msra.mxu1 %v4292_v44 }
 0x252   : > { %v3269_v13 = vmax.f32 %v3267_v28, %v3268_v47  ;;  %v3249_v10 = vrot.slane %v3248_v36, 1  ;;  %v3264_v29 = vmax.f32 %v3262_v32, %v3263_v49  ;;  %v3281_v50 = vmax.f32 %v3279_v17, %v3280_v40  ;;  %16795 = vmatprep.subr.mxu1 %v4291_v25 }
 0x253   : > { %v3295_v41 = vmax.f32 %v25914_v7, %v25915_v5  ;;  %v3229_v11 = vmax.f32 %v3227_v51, %v3228_v16  ;;  %v3256_v27 = vrot.slane %v3255_v12, 1  ;;  %v3275_v3 = vrot.slane %v3274_v55, 2  ;;  %16796 = vmatpush3.msra.mxu1 %v4291_v25 }
 0x254   : > { %v3270_v53 = vrot.slane %v3269_v13, 1  ;;  %v3282_v5 = vrot.slane %v3281_v50, 2  ;;  %v3292_v18 = vmax.f32 %v25913_v46, %v3291_v35  ;;  %v3300_v47 = vsel %vm3201_vm3, %v25908_v30, -inf }
 0x255   : > { %v3296_v28 = vrot.slane %v3295_v41, 2  ;;  %v3250_v7 = vmax.f32 %v3248_v36, %v3249_v10  ;;  %v3276_v63 = vmax.f32 %v3274_v55, %v3275_v3  ;;  %v3301_v32 = vrot.slane %v3300_v47, 4 }
 0x256   : > { %v3271_v19 = vmax.f32 %v3269_v13, %v3270_v53  ;;  %v3283_v17 = vmax.f32 %v3281_v50, %v3282_v5  ;;  %v25916_v51 = vcombine.high %v25908_v30, %v25908_v30  ;;  %v4099_v49 = vsel %vm4098_vm4, %v20220_v24, -inf }
 0x257   : > { %v3297_v42 = vmax.f32 %v3295_v41, %v3296_v28  ;;  %v4100_v13 = vsel %vm4098_vm4, %v3264_v29, -inf  ;;  %v3277_v40 = vrot.slane %v3276_v63, 1  ;;  %v3302_v35 = vmax.f32 %v3300_v47, %v3301_v32 }
 0x258   : > { %v3307_v16 = vsel %vm3201_vm3, %v25916_v51, -inf  ;;  %v3257_v36 = vmax.f32 %v3255_v12, %v3256_v27  ;;  %v3284_v55 = vrot.slane %v3283_v17, 1  ;;  %v4101_v41 = vmax.f32 %v4099_v49, %v4100_v13 }
 0x259   : > { %v3298_v46 = vrot.slane %v3297_v42, 1  ;;  %v3308_v44 = vrot.slane %v3307_v16, 4  ;;  %v4103_v25 = vsel %vm4098_vm4, %v3271_v19, -inf  ;;  %v3278_v10 = vmax.f32 %v3276_v63, %v3277_v40 }
 0x25a   : > { %v3303_v53 = vrot.slane %v3302_v35, 2  ;;  %v4102_v30 = vsel %vm4098_vm4, %v3215_v31, -inf  ;;  %v3285_v3 = vmax.f32 %v3283_v17, %v3284_v55  ;;  %v4105_v24 = vsel %vm4098_vm4, %v3222_v58, -inf }
 0x25b   : > { %v3309_v50 = vmax.f32 %v3307_v16, %v3308_v44  ;;  %v3299_v28 = vmax.f32 %v3297_v42, %v3298_v46  ;;  %v4104_v5 = vmax.f32 %v4102_v30, %v4103_v25  ;;  %v4106_v47 = vsel %vm4098_vm4, %v3278_v10, -inf  ;;  %v25917_v44 = vld [vmem:[#allocation40_spill] sm:$0xff]  ;;  %v25919_v10 = vld [vmem:[#allocation42_spill] sm:$0xff] }
 0x25c   : > { %v3304_v29 = vmax.f32 %v3302_v35, %v3303_v53  ;;  %v4108_v12 = vsel %vm4098_vm4, %v3229_v11, -inf  ;;  %v4107_v27 = vmax.f32 %v4105_v24, %v4106_v47  ;;  %v4109_v32 = vsel %vm4098_vm4, %v3285_v3, -inf  ;;  %v25920_v53 = vld [vmem:[#allocation43_spill] sm:$0xff] }
 0x25d   : > { %v3310_v51 = vrot.slane %v3309_v50, 2  ;;  %v4111_v63 = vsel %vm4098_vm4, %v20233_v48, -inf  ;;  %v4112_v19 = vsel %vm4098_vm4, %v3292_v18, -inf  ;;  %v4110_v42 = vmax.f32 %v4108_v12, %v4109_v32  ;;  %v25923_v32 = vld [vmem:[#allocation62_spill] sm:$0xff] }
 0x25e   : > { %v3305_v31 = vrot.slane %v3304_v29, 1  ;;  %v4113_v16 = vmax.f32 %v4111_v63, %v4112_v19  ;;  %v4114_v58 = vsel %vm4098_vm4, %v20251_v8, -inf  ;;  %v4115_v49 = vsel %vm4098_vm4, %v3299_v28, -inf }
 0x25f   : > { %v3311_v17 = vmax.f32 %v3309_v50, %v3310_v51  ;;  %v4117_v13 = vsel %vm4098_vm4, %v3250_v7, -inf  ;;  %v4393_v11 = vsel %vm4392_vm5, %v4104_v5, %v4101_v41  ;;  %v4116_v35 = vmax.f32 %v4114_v58, %v4115_v49  ;;  %v25922_v51 = vld [vmem:[#allocation48_spill] sm:$0xff] }
 0x260   : > { %v3306_v40 = vmax.f32 %v3304_v29, %v3305_v31  ;;  %v4395_v48 = vsel %vm4394_vm6, %v4107_v27, %v4393_v11  ;;  %v25918_v55 = vcombine.high %v25917_v44, %v25917_v44  ;;  %v2884_v8 = vcombine.high %v25919_v10, %v25919_v10 }
 0x261   : > { %v3312_v46 = vrot.slane %v3311_v17, 1  ;;  %v4397_v18 = vsel %vm4396_vm7, %v4110_v42, %v4395_v48  ;;  %v25921_v7 = vcombine.high %v25920_v53, %v25920_v53  ;;  %v4120_v3 = vsel %vm4098_vm4, %v3257_v36, -inf }
 0x262   : > { %v2883_v25 = vrot.slane %v25918_v55, %v25564_v39  ;;  %v4118_v30 = vsel %vm4098_vm4, %v3306_v40, -inf  ;;  %v4399_v28 = vsel %vm4398_vm8, %v4113_v16, %v4397_v18  ;;  %v2901_v47 = vcombine.high %v25922_v51, %v25922_v51  ;;  %v25926_v51 = vld [vmem:[#allocation79_spill] sm:$0xff] }
 0x263   : > { %v2900_v41 = vrot.slane %v25921_v7, %v25564_v39  ;;  %v3313_v50 = vmax.f32 %v3311_v17, %v3312_v46  ;;  %v4119_v5 = vmax.f32 %v4117_v13, %v4118_v30  ;;  %v4401_v24 = vsel %vm4400_vm9, %v4116_v35, %v4399_v28  ;;  %v25924_v13 = vld [vmem:[#allocation44_spill] sm:$0xff] }
 0x264   : > { %v2885_v29 = vcombine.high %v2883_v25, %v2883_v25  ;;  %v2919_v63 = vcombine.high %v25923_v32, %v25923_v32  ;;  %v3762_v19 = vsel %vm3201_vm3, %v25919_v10, -inf  ;;  %v3769_v42 = vsel %vm3201_vm3, %v2884_v8, -inf }
 0x265   : > { %v4121_v12 = vsel %vm4098_vm4, %v3313_v50, -inf  ;;  %v2902_v27 = vcombine.high %v2900_v41, %v2900_v41  ;;  %v4403_v36 = vsel %vm4402_vm10, %v4119_v5, %v4401_v24  ;;  %v3763_v17 = vrot.slane %v3762_v19, 4 }
 0x266   : > { %v4122_v31 = vmax.f32 %v4120_v3, %v4121_v12  ;;  %v3770_v16 = vrot.slane %v3769_v42, 4  ;;  %v3776_v58 = vsel %vm3201_vm3, %v2883_v25, -inf  ;;  %v3783_v49 = vsel %vm3201_vm3, %v2885_v29, -inf  ;;  %v25932_v12 = vld [vmem:[#allocation76_spill] sm:$0xff] }
 0x267   : > { %v25925_v11 = vrot.slane %v25924_v13, 4  ;;  %v3764_v35 = vmax.f32 %v3762_v19, %v3763_v17  ;;  %v3777_v48 = vrot.slane %v3776_v58, 4  ;;  %v3784_v18 = vrot.slane %v3783_v49, 4 }
 0x268   : > { %v4405_v46 = vsel %vm4404_vm11, %v4122_v31, %v4403_v36  ;;  %v3771_v55 = vmax.f32 %v3769_v42, %v3770_v16  ;;  %v3797_v53 = vsel %vm3201_vm3, %v2901_v47, -inf  ;;  %v25933_v1 = vrot.slane %v25932_v12, 4 }
 0x269   : > { %v3792_v40 = vmax.f32 %v25924_v13, %v25925_v11  ;;  %v4455_v44 = vrot.slane %v4405_v46, 7  ;;  %v3765_v8 = vrot.slane %v3764_v35, 2  ;;  %v3778_v7 = vmax.f32 %v3776_v58, %v3777_v48  ;;  %v4301_v13 = vld [vmem:[%s25148_s3 + $0x50] sm:$0xff] }
 0x26a   : > { %v3785_v50 = vmax.f32 %v3783_v49, %v3784_v18  ;;  %v3798_v25 = vrot.slane %v3797_v53, 4  ;;  %v3772_v28 = vrot.slane %v3771_v55, 2  ;;  %v3804_v49 = vsel %vm3201_vm3, %v2900_v41, -inf  ;;  %v4300_v41 = vld [vmem:[%s25148_s3 + $0x48] sm:$0xff] }
 0x26b   : > { %v3793_v10 = vrot.slane %v3792_v40, 2  ;;  %v20322_v30 = vsel %vm401_vm0, 0.0, %v4455_v44  ;;  %v20325_v3 = vsel %vm401_vm0, %v4455_v44, 0.0  ;;  %v3766_v47 = vmax.f32 %v3764_v35, %v3765_v8 }
 0x26c   : > { %v4504_v24 = vrot.slane %v20322_v30, 1  ;;  %v4505_v29 = vrot.slane %v20325_v3, 1  ;;  %v3773_v19 = vmax.f32 %v3771_v55, %v3772_v28  ;;  %v3779_v31 = vrot.slane %v3778_v7, 2  ;;  %v25928_v28 = vld [vmem:[#allocation80_spill] sm:$0xff] }
 0x26d   : > { %v3794_v5 = vmax.f32 %v3792_v40, %v3793_v10  ;;  %v3786_v36 = vrot.slane %v3785_v50, 2  ;;  %v3767_v16 = vrot.slane %v3766_v47, 1  ;;  %v3799_v58 = vmax.f32 %v3797_v53, %v3798_v25 }
 0x26e   : > { %v20332_v42 = vsel %vm911_vm1, %v4504_v24, %v4505_v29  ;;  %v3774_v11 = vrot.slane %v3773_v19, 1  ;;  %v3780_v40 = vmax.f32 %v3778_v7, %v3779_v31  ;;  %v3805_v44 = vrot.slane %v3804_v49, 4  ;;  %v25929_v24 = vld [vmem:[#allocation8_spill] sm:$0xff] }
 0x26f   : > { %v3795_v17 = vrot.slane %v3794_v5, 1  ;;  %25927 = vst [vmem:[#allocation98_spill] sm:$0xff] %v20332_v42  ;;  %16778 = vmatmul.mubr.msk.f32.vlgmr.msra.gmra.mxu0 %vm4098_vm4, %v20332_v42  ;;  %v3787_v46 = vmax.f32 %v3785_v50, %v3786_v36  ;;  %v3768_v48 = vmax.f32 %v3766_v47, %v3767_v16  ;;  %v3800_v18 = vrot.slane %v3799_v58, 2 }
 0x270   : > { %v3811_v55 = vsel %vm3201_vm3, %v2902_v27, -inf  ;;  %16810 = vmatpush3.msra.mxu0 %v20147_v33  ;;  %v3775_v10 = vmax.f32 %v3773_v19, %v3774_v11  ;;  %v3781_v53 = vrot.slane %v3780_v40, 1  ;;  %v3806_v50 = vmax.f32 %v3804_v49, %v3805_v44 }
 0x271   : > { %v20340_v35 = vmax.f32 %v3794_v5, %v3795_v17  ;;  %v3788_v8 = vrot.slane %v3787_v46, 1  ;;  %v3812_v25 = vrot.slane %v3811_v55, 4  ;;  %16811 = vmatprep.subr.mxu0 %v4301_v13  ;;  %v3801_v7 = vmax.f32 %v3799_v58, %v3800_v18 }
 0x272   : > { %v3821_v5 = vrot.slane %v25928_v28, 2  ;;  %v25930_v29 = vrot.slane %v25929_v24, 4  ;;  %16812 = vmatpush3.msra.mxu0 %v4301_v13  ;;  %v3782_v27 = vmax.f32 %v3780_v40, %v3781_v53  ;;  %v3832_v19 = vsel %vm3201_vm3, %v25923_v32, -inf  ;;  %v25931_v40 = vld [vmem:[#allocation72_spill] sm:$0xff] }
 0x273   : > { %v20351_v33 = vmax.f32 %v3787_v46, %v3788_v8  ;;  %v3813_v31 = vmax.f32 %v3811_v55, %v3812_v25  ;;  %16813 = vmatprep.subr.mxu0 %v4300_v41  ;;  %v3802_v36 = vrot.slane %v3801_v7, 1  ;;  %v3807_v17 = vrot.slane %v3806_v50, 2 }
 0x274   : > { %v3827_v47 = vmax.f32 %v25929_v24, %v25930_v29  ;;  %v3822_v16 = vmax.f32 %v25928_v28, %v3821_v5  ;;  %16814 = vmatpush3.msra.mxu0 %v4300_v41  ;;  %v3833_v11 = vrot.slane %v3832_v19, 4  ;;  %v3839_v13 = vsel %vm3201_vm3, %v2919_v63, -inf }
 0x275   : > { %v3814_v49 = vrot.slane %v3813_v31, 2  ;;  %v3851_v46 = vrot.slane %v25931_v40, 1  ;;  %v3803_v18 = vmax.f32 %v3801_v7, %v3802_v36  ;;  %v3808_v44 = vmax.f32 %v3806_v50, %v3807_v17 }
 0x276   : > { %v3828_v58 = vrot.slane %v3827_v47, 2  ;;  %v3823_v55 = vrot.slane %v3822_v16, 1  ;;  %v3834_v25 = vmax.f32 %v3832_v19, %v3833_v11  ;;  %v3840_v24 = vrot.slane %v3839_v13, 4 }
 0x277   : > { %v3815_v8 = vmax.f32 %v3813_v31, %v3814_v49  ;;  %v3852_v28 = vmax.f32 %v25931_v40, %v3851_v46  ;;  %v3809_v5 = vrot.slane %v3808_v44, 1  ;;  %v3855_v32 = vmax.f32 %v25932_v12, %v25933_v1  ;;  %v4299_v40 = vld [vmem:[%s25148_s3 + $0x40] sm:$0xff] }
 0x278   : > { %v3829_v53 = vmax.f32 %v3827_v47, %v3828_v58  ;;  %v3824_v41 = vmax.f32 %v3822_v16, %v3823_v55  ;;  %v3835_v63 = vrot.slane %v3834_v25, 2  ;;  %v3841_v42 = vmax.f32 %v3839_v13, %v3840_v24  ;;  %16815 = vmatprep.subr.mxu0 %v4299_v40 }
 0x279   : > { %v3816_v57 = vrot.slane %v3815_v8, 1  ;;  %v3860_v7 = vsel %vm3201_vm3, %v25926_v51, -inf  ;;  %v3810_v50 = vmax.f32 %v3808_v44, %v3809_v5  ;;  %v3856_v31 = vrot.slane %v3855_v32, 2  ;;  %16816 = vmatpush3.msra.mxu0 %v4299_v40 }
 0x27a   : > { %v3830_v29 = vrot.slane %v3829_v53, 1  ;;  %v3861_v19 = vrot.slane %v3860_v7, 4  ;;  %v3836_v17 = vmax.f32 %v3834_v25, %v3835_v63  ;;  %v3842_v58 = vrot.slane %v3841_v42, 2 }
 0x27b   : > { %v3817_v36 = vmax.f32 %v3815_v8, %v3816_v57  ;;  %v25934_v16 = vcombine.high %v25926_v51, %v25926_v51  ;;  %v3857_v11 = vmax.f32 %v3855_v32, %v3856_v31  ;;  %v4219_v13 = vsel %vm4098_vm4, %v3768_v48, -inf  ;;  %v20378_v57 = vld [vmem:[%s25148_s3 + $0x78] sm:$0xff] }
 0x27c   : > { %v3831_v47 = vmax.f32 %v3829_v53, %v3830_v29  ;;  %v3862_v1 = vmax.f32 %v3860_v7, %v3861_v19  ;;  %v3837_v46 = vrot.slane %v3836_v17, 1  ;;  %v3843_v44 = vmax.f32 %v3841_v42, %v3842_v58  ;;  %16829 = vmatprep.subr.mxu1 %v20378_v57  ;;  %v4310_v48 = vld [vmem:[%s25148_s3 + $0x98] sm:$0xff] }
 0x27d   : > { %v3867_v49 = vsel %vm3201_vm3, %v25934_v16, -inf  ;;  %v4220_v51 = vsel %vm4098_vm4, %v3824_v41, -inf  ;;  %v4222_v55 = vsel %vm4098_vm4, %v3775_v10, -inf  ;;  %v3858_v53 = vrot.slane %v3857_v11, 1  ;;  %16849 = vmatprep.subr.mxu0 %v4310_v48  ;;  %v25935_v48 = vld [vmem:[#allocation67_spill] sm:$0xff] }
 0x27e   : > { %v3868_v12 = vrot.slane %v3867_v49, 4  ;;  %v3863_v8 = vrot.slane %v3862_v1, 2  ;;  %v4221_v24 = vmax.f32 %v4219_v13, %v4220_v51  ;;  %v3838_v5 = vmax.f32 %v3836_v17, %v3837_v46 }
 0x27f   : > { %v3844_v29 = vrot.slane %v3843_v44, 1  ;;  %v4223_v42 = vsel %vm4098_vm4, %v3831_v47, -inf  ;;  %v4225_v41 = vsel %vm4098_vm4, %v3782_v27, -inf  ;;  %v3859_v10 = vmax.f32 %v3857_v11, %v3858_v53 }
 0x280   : > { %v3869_v25 = vmax.f32 %v3867_v49, %v3868_v12  ;;  %v3864_v32 = vmax.f32 %v3862_v1, %v3863_v8  ;;  %v4224_v7 = vmax.f32 %v4222_v55, %v4223_v42  ;;  %v4226_v19 = vsel %vm4098_vm4, %v3838_v5, -inf }
 0x281   : > { %v3845_v31 = vmax.f32 %v3843_v44, %v3844_v29  ;;  %v4228_v58 = vsel %vm4098_vm4, %v20351_v33, -inf  ;;  %v4231_v16 = vsel %vm4098_vm4, %v20340_v35, -inf  ;;  %v4227_v12 = vmax.f32 %v4225_v41, %v4226_v19  ;;  %v25937_v41 = vld [vmem:[#allocation87_spill] sm:$0xff] }
 0x282   : > { %v3870_v63 = vrot.slane %v3869_v25, 2  ;;  %v3865_v17 = vrot.slane %v3864_v32, 1  ;;  %v4232_v47 = vsel %vm4098_vm4, %v3852_v28, -inf  ;;  %v4234_v1 = vsel %vm4098_vm4, %v3803_v18, -inf }
 0x283   : > { %v4229_v27 = vsel %vm4098_vm4, %v3845_v31, -inf  ;;  %v4233_v11 = vmax.f32 %v4231_v16, %v4232_v47  ;;  %v4235_v13 = vsel %vm4098_vm4, %v3859_v10, -inf  ;;  %v4237_v33 = vsel %vm4098_vm4, %v3810_v50, -inf  ;;  %v25940_v31 = vld [vmem:[#allocation74_spill] sm:$0xff] }
 0x284   : > { %v3871_v49 = vmax.f32 %v3869_v25, %v3870_v63  ;;  %v3866_v40 = vmax.f32 %v3864_v32, %v3865_v17  ;;  %v4230_v44 = vmax.f32 %v4228_v58, %v4229_v27  ;;  %v4236_v51 = vmax.f32 %v4234_v1, %v4235_v13  ;;  %v25936_v25 = vld [vmem:[#allocation39_spill] sm:$0xff] }
 0x285   : > { %v4240_v35 = vsel %vm4098_vm4, %v3817_v36, -inf  ;;  %v4434_v55 = vsel %vm4392_vm5, %v4224_v7, %v4221_v24  ;;  %v2613_v28 = vcombine.high %v25935_v48, %v25935_v48  ;;  %v2630_v5 = vcombine.high %v25936_v25, %v25936_v25  ;;  %v25938_v36 = vld [vmem:[#allocation92_spill] sm:$0xff]  ;;  %v25939_v63 = vld [vmem:[#allocation75_spill] sm:$0xff] }
 0x286   : > { %v3872_v46 = vrot.slane %v3871_v49, 1  ;;  %v4238_v8 = vsel %vm4098_vm4, %v3866_v40, -inf  ;;  %v4435_v18 = vsel %vm4394_vm6, %v4227_v12, %v4434_v55  ;;  %v2647_v50 = vcombine.high %v25937_v41, %v25937_v41 }
 0x287   : > { %v4239_v29 = vmax.f32 %v4237_v33, %v4238_v8  ;;  %v4436_v42 = vsel %vm4396_vm7, %v4230_v44, %v4435_v18  ;;  %v3317_v7 = vrot.slane %v25939_v63, 2  ;;  %v25941_v19 = vrot.slane %v25940_v31, 4  ;;  %v25943_v33 = vld [vmem:[#allocation100_spill] sm:$0xff] }
 0x288   : > { %v3873_v53 = vmax.f32 %v3871_v49, %v3872_v46  ;;  %v4437_v32 = vsel %vm4398_vm8, %v4233_v11, %v4436_v42  ;;  %v3328_v49 = vsel %vm3201_vm3, %v25935_v48, -inf  ;;  %v3335_v12 = vsel %vm3201_vm3, %v2613_v28, -inf  ;;  %v25942_v46 = vld [vmem:[#allocation21_spill] sm:$0xff] }
 0x289   : > { %v3323_v58 = vmax.f32 %v25940_v31, %v25941_v19  ;;  %v4438_v17 = vsel %vm4400_vm9, %v4236_v51, %v4437_v32  ;;  %v3318_v27 = vmax.f32 %v25939_v63, %v3317_v7  ;;  %v3329_v11 = vrot.slane %v3328_v49, 4 }
 0x28a   : > { %v4241_v10 = vsel %vm4098_vm4, %v3873_v53, -inf  ;;  %v4439_v47 = vsel %vm4402_vm10, %v4239_v29, %v4438_v17  ;;  %v3336_v40 = vrot.slane %v3335_v12, 4  ;;  %v3347_v44 = vrot.slane %v25942_v46, 1 }
 0x28b   : > { %v4242_v16 = vmax.f32 %v4240_v35, %v4241_v10  ;;  %v3324_v1 = vrot.slane %v3323_v58, 2  ;;  %v25944_v35 = vrot.slane %v25943_v33, 4  ;;  %v3319_v53 = vrot.slane %v3318_v27, 1 }
 0x28c   : > { %v3330_v8 = vmax.f32 %v3328_v49, %v3329_v11  ;;  %v3337_v28 = vmax.f32 %v3335_v12, %v3336_v40  ;;  %v20429_v18 = vmax.f32 %v25942_v46, %v3347_v44  ;;  %v3356_v42 = vsel %vm3201_vm3, %v25936_v25, -inf  ;;  %v25946_v46 = vld [vmem:[#allocation84_spill] sm:$0xff] }
 0x28d   : > { %v4440_v13 = vsel %vm4404_vm11, %v4242_v16, %v4439_v47  ;;  %v3351_v51 = vmax.f32 %v25943_v33, %v25944_v35  ;;  %v3325_v48 = vmax.f32 %v3323_v58, %v3324_v1  ;;  %v3320_v63 = vmax.f32 %v3318_v27, %v3319_v53  ;;  %v25947_v33 = vld [vmem:[#allocation83_spill] sm:$0xff] }
 0x28e   : > { %v4460_v55 = vrot.slane %v4440_v13, 7  ;;  %v3331_v58 = vrot.slane %v3330_v8, 2  ;;  %v3338_v16 = vrot.slane %v3337_v28, 2  ;;  %v3357_v12 = vrot.slane %v3356_v42, 4 }
 0x28f   : > { %v3352_v29 = vrot.slane %v3351_v51, 2  ;;  %v3326_v7 = vrot.slane %v3325_v48, 1  ;;  %v3363_v47 = vsel %vm3201_vm3, %v2630_v5, -inf  ;;  %v3373_v44 = vrot.slane %v25946_v46, 2 }
 0x290   : > { %v20434_v10 = vsel %vm401_vm0, 0.0, %v4460_v55  ;;  %v20437_v32 = vsel %vm401_vm0, %v4460_v55, 0.0  ;;  %v3332_v1 = vmax.f32 %v3330_v8, %v3331_v58  ;;  %v3339_v11 = vmax.f32 %v3337_v28, %v3338_v16 }
 0x291   : > { %v4519_v31 = vrot.slane %v20434_v10, 1  ;;  %v4520_v19 = vrot.slane %v20437_v32, 1  ;;  %v3327_v17 = vmax.f32 %v3325_v48, %v3326_v7  ;;  %v3353_v49 = vmax.f32 %v3351_v51, %v3352_v29 }
 0x292   : > { %v3364_v13 = vrot.slane %v3363_v47, 4  ;;  %v3358_v40 = vmax.f32 %v3356_v42, %v3357_v12  ;;  %v25948_v35 = vrot.slane %v25947_v33, 4  ;;  %v3333_v55 = vrot.slane %v3332_v1, 1 }
 0x293   : > { %v20443_v25 = vsel %vm911_vm1, %v4519_v31, %v4520_v19  ;;  %v3354_v27 = vrot.slane %v3353_v49, 1  ;;  %v3340_v53 = vrot.slane %v3339_v11, 1  ;;  %v3384_v48 = vsel %vm3201_vm3, %v25937_v41, -inf }
 0x294   : > { %25945 = vst [vmem:[#allocation10_spill] sm:$0xff] %v20443_v25  ;;  %16786 = vmatprep.mubr.msk.f32.mxu1 %vm4098_vm4, %v20443_v25  ;;  %v3379_v51 = vmax.f32 %v25947_v33, %v25948_v35  ;;  %v3365_v5 = vmax.f32 %v3363_v47, %v3364_v13  ;;  %v3359_v28 = vrot.slane %v3358_v40, 2  ;;  %v3374_v29 = vmax.f32 %v25946_v46, %v3373_v44 }
 0x295   : > { %v3355_v8 = vmax.f32 %v3353_v49, %v3354_v27  ;;  %v3334_v31 = vmax.f32 %v3332_v1, %v3333_v55  ;;  %v3341_v19 = vmax.f32 %v3339_v11, %v3340_v53  ;;  %v3385_v58 = vrot.slane %v3384_v48, 4 }
 0x296   : > { %v3380_v7 = vrot.slane %v3379_v51, 2  ;;  %v3366_v42 = vrot.slane %v3365_v5, 2  ;;  %v3360_v16 = vmax.f32 %v3358_v40, %v3359_v28  ;;  %v3375_v12 = vrot.slane %v3374_v29, 1 }
 0x297   : > { %v3391_v33 = vsel %vm3201_vm3, %v2647_v50, -inf  ;;  %v3386_v25 = vmax.f32 %v3384_v48, %v3385_v58  ;;  %v3403_v13 = vrot.slane %v19906_v37, 1  ;;  %v25950_v46 = vrot.slane %v25949_v14, 4 }
 0x298   : > { %v3381_v24 = vmax.f32 %v3379_v51, %v3380_v7  ;;  %v3367_v35 = vmax.f32 %v3365_v5, %v3366_v42  ;;  %v3392_v47 = vrot.slane %v3391_v33, 4  ;;  %v3361_v41 = vrot.slane %v3360_v16, 1 }
 0x299   : > { %v3376_v49 = vmax.f32 %v3374_v29, %v3375_v12  ;;  %v3407_v1 = vmax.f32 %v25949_v14, %v25950_v46  ;;  %v3387_v44 = vrot.slane %v3386_v25, 2  ;;  %v3404_v40 = vmax.f32 %v19906_v37, %v3403_v13 }
 0x29a   : > { %v3382_v27 = vrot.slane %v3381_v24, 1  ;;  %v3368_v11 = vrot.slane %v3367_v35, 1  ;;  %v3393_v55 = vmax.f32 %v3391_v33, %v3392_v47  ;;  %v3362_v51 = vmax.f32 %v3360_v16, %v3361_v41 }
 0x29b   : > { %v3408_v50 = vrot.slane %v3407_v1, 2  ;;  %v3412_v5 = vsel %vm3201_vm3, %v25938_v36, -inf  ;;  %v3388_v28 = vmax.f32 %v3386_v25, %v3387_v44  ;;  %v25951_v58 = vcombine.high %v25938_v36, %v25938_v36 }
 0x29c   : > { %v3383_v53 = vmax.f32 %v3381_v24, %v3382_v27  ;;  %v3369_v48 = vmax.f32 %v3367_v35, %v3368_v11  ;;  %v3394_v7 = vrot.slane %v3393_v55, 2  ;;  %v3413_v29 = vrot.slane %v3412_v5, 4 }
 0x29d   : > { %v3409_v42 = vmax.f32 %v3407_v1, %v3408_v50  ;;  %v3419_v14 = vsel %vm3201_vm3, %v25951_v58, -inf  ;;  %v4123_v12 = vsel %vm4098_vm4, %v3320_v63, -inf  ;;  %v4124_v37 = vsel %vm4098_vm4, %v3376_v49, -inf }
 0x29e   : > { %v3389_v16 = vrot.slane %v3388_v28, 1  ;;  %v3395_v24 = vmax.f32 %v3393_v55, %v3394_v7  ;;  %v3414_v33 = vmax.f32 %v3412_v5, %v3413_v29  ;;  %v3420_v47 = vrot.slane %v3419_v14, 4 }
 0x29f   : > { %v3410_v13 = vrot.slane %v3409_v42, 1  ;;  %v4125_v41 = vmax.f32 %v4123_v12, %v4124_v37  ;;  %v4126_v25 = vsel %vm4098_vm4, %v3327_v17, -inf  ;;  %v4127_v35 = vsel %vm4098_vm4, %v3383_v53, -inf }
 0x2a0   : > { %v3390_v27 = vmax.f32 %v3388_v28, %v3389_v16  ;;  %v3396_v46 = vrot.slane %v3395_v24, 1  ;;  %v3415_v1 = vrot.slane %v3414_v33, 2  ;;  %v3421_v36 = vmax.f32 %v3419_v14, %v3420_v47 }
 0x2a1   : > { %v3411_v11 = vmax.f32 %v3409_v42, %v3410_v13  ;;  %v4128_v44 = vmax.f32 %v4126_v25, %v4127_v35  ;;  %v4129_v63 = vsel %vm4098_vm4, %v3334_v31, -inf  ;;  %v4132_v49 = vsel %vm4098_vm4, %v3341_v19, -inf  ;;  %v25953_v25 = vld [vmem:[#allocation38_spill] sm:$0xff] }
 0x2a2   : > { %v3397_v50 = vmax.f32 %v3395_v24, %v3396_v46  ;;  %v3416_v55 = vmax.f32 %v3414_v33, %v3415_v1  ;;  %v3422_v5 = vrot.slane %v3421_v36, 2  ;;  %v4130_v7 = vsel %vm4098_vm4, %v3390_v27, -inf }
 0x2a3   : > { %v4131_v29 = vmax.f32 %v4129_v63, %v4130_v7  ;;  %v4135_v17 = vsel %vm4098_vm4, %v20429_v18, -inf  ;;  %v4136_v53 = vsel %vm4098_vm4, %v3404_v40, -inf  ;;  %v4138_v28 = vsel %vm4098_vm4, %v3355_v8, -inf  ;;  %v25952_v8 = vld [vmem:[#allocation19_spill] sm:$0xff]  ;;  %v25955_v63 = vld [vmem:[#allocation16_spill] sm:$0xff] }
 0x2a4   : > { %v3417_v58 = vrot.slane %v3416_v55, 1  ;;  %v3423_v42 = vmax.f32 %v3421_v36, %v3422_v5  ;;  %v4133_v14 = vsel %vm4098_vm4, %v3397_v50, -inf  ;;  %v4137_v31 = vmax.f32 %v4135_v17, %v4136_v53 }
 0x2a5   : > { %v4134_v12 = vmax.f32 %v4132_v49, %v4133_v14  ;;  %v4139_v19 = vsel %vm4098_vm4, %v3411_v11, -inf  ;;  %v4141_v37 = vsel %vm4098_vm4, %v3362_v51, -inf  ;;  %v4144_v16 = vsel %vm4098_vm4, %v3369_v48, -inf  ;;  %v25954_v11 = vld [vmem:[#allocation35_spill] sm:$0xff] }
 0x2a6   : > { %v3418_v24 = vmax.f32 %v3416_v55, %v3417_v58  ;;  %v3424_v33 = vrot.slane %v3423_v42, 1  ;;  %v4140_v47 = vmax.f32 %v4138_v28, %v4139_v19  ;;  %v4406_v18 = vsel %vm4392_vm5, %v4128_v44, %v4125_v41  ;;  %v25958_v19 = vld [vmem:[#allocation81_spill] sm:$0xff] }
 0x2a7   : > { %v4407_v40 = vsel %vm4394_vm6, %v4131_v29, %v4406_v18  ;;  %v2953_v13 = vcombine.high %v25952_v8, %v25952_v8  ;;  %v2970_v35 = vcombine.high %v25953_v25, %v25953_v25  ;;  %v2987_v27 = vcombine.high %v19987_v6, %v19987_v6 }
 0x2a8   : > { %v3425_v46 = vmax.f32 %v3423_v42, %v3424_v33  ;;  %v4142_v51 = vsel %vm4098_vm4, %v3418_v24, -inf  ;;  %v4408_v48 = vsel %vm4396_vm7, %v4134_v12, %v4407_v40  ;;  %v3004_v1 = vcombine.high %v20015_v20, %v20015_v20 }
 0x2a9   : > { %v4143_v41 = vmax.f32 %v4141_v37, %v4142_v51  ;;  %v4409_v36 = vsel %vm4398_vm8, %v4137_v31, %v4408_v48  ;;  %v3877_v44 = vrot.slane %v25954_v11, 2  ;;  %v25956_v49 = vrot.slane %v25955_v63, 4  ;;  %v25957_v31 = vld [vmem:[#allocation20_spill] sm:$0xff] }
 0x2aa   : > { %v4145_v55 = vsel %vm4098_vm4, %v3425_v46, -inf  ;;  %v4410_v5 = vsel %vm4400_vm9, %v4140_v47, %v4409_v36  ;;  %v3888_v7 = vsel %vm3201_vm3, %v25952_v8, -inf  ;;  %v3895_v29 = vsel %vm3201_vm3, %v2953_v13, -inf }
 0x2ab   : > { %v3883_v50 = vmax.f32 %v25955_v63, %v25956_v49  ;;  %v4146_v17 = vmax.f32 %v4144_v16, %v4145_v55  ;;  %v4411_v53 = vsel %vm4402_vm10, %v4143_v41, %v4410_v5  ;;  %v3878_v28 = vmax.f32 %v25954_v11, %v3877_v44 }
 0x2ac   : > { %v3889_v42 = vrot.slane %v3888_v7, 4  ;;  %v3896_v14 = vrot.slane %v3895_v29, 4  ;;  %v3907_v12 = vrot.slane %v25957_v31, 1  ;;  %v25959_v37 = vrot.slane %v25958_v19, 4 }
 0x2ad   : > { %v3884_v58 = vrot.slane %v3883_v50, 2  ;;  %v4412_v33 = vsel %vm4404_vm11, %v4146_v17, %v4411_v53  ;;  %v3879_v47 = vrot.slane %v3878_v28, 1  ;;  %v3916_v16 = vsel %vm3201_vm3, %v25953_v25, -inf }
 0x2ae   : > { %v3911_v24 = vmax.f32 %v25958_v19, %v25959_v37  ;;  %v4456_v40 = vrot.slane %v4412_v33, 7  ;;  %v3890_v8 = vmax.f32 %v3888_v7, %v3889_v42  ;;  %v3897_v13 = vmax.f32 %v3895_v29, %v3896_v14 }
 0x2af   : > { %v3885_v18 = vmax.f32 %v3883_v50, %v3884_v58  ;;  %v20513_v46 = vmax.f32 %v25957_v31, %v3907_v12  ;;  %v20515_v51 = vmax.f32 %v3878_v28, %v3879_v47  ;;  %v3917_v36 = vrot.slane %v3916_v16, 4 }
 0x2b0   : > { %v3912_v41 = vrot.slane %v3911_v24, 2  ;;  %v20518_v11 = vsel %vm401_vm0, 0.0, %v4456_v40  ;;  %v20521_v44 = vsel %vm401_vm0, %v4456_v40, 0.0  ;;  %v3891_v63 = vrot.slane %v3890_v8, 2 }
 0x2b1   : > { %v3886_v48 = vrot.slane %v3885_v18, 1  ;;  %v3898_v49 = vrot.slane %v3897_v13, 2  ;;  %v4507_v25 = vrot.slane %v20518_v11, 1  ;;  %v4508_v50 = vrot.slane %v20521_v44, 1 }
 0x2b2   : > { %v3913_v5 = vmax.f32 %v3911_v24, %v3912_v41  ;;  %v3892_v7 = vmax.f32 %v3890_v8, %v3891_v63  ;;  %v3918_v17 = vmax.f32 %v3916_v16, %v3917_v36  ;;  %v3923_v53 = vsel %vm3201_vm3, %v2970_v35, -inf }
 0x2b3   : > { %v3887_v55 = vmax.f32 %v3885_v18, %v3886_v48  ;;  %v3899_v29 = vmax.f32 %v3897_v13, %v3898_v49  ;;  %v20527_v28 = vsel %vm911_vm1, %v4507_v25, %v4508_v50  ;;  %v3924_v42 = vrot.slane %v3923_v53, 4 }
 0x2b4   : > { %v3914_v58 = vrot.slane %v3913_v5, 1  ;;  %v3933_v14 = vrot.slane %v20000_v26, 2  ;;  %16780 = vmatprep.mubr.msk.f32.mxu0 %vm4098_vm4, %v20527_v28  ;;  %v3893_v31 = vrot.slane %v3892_v7, 1  ;;  %v3919_v19 = vrot.slane %v3918_v17, 2 }
 0x2b5   : > { %v3900_v12 = vrot.slane %v3899_v29, 1  ;;  %v25960_v37 = vrot.slane %v19995_v62, 4  ;;  %v3925_v35 = vmax.f32 %v3923_v53, %v3924_v42  ;;  %v3944_v18 = vsel %vm3201_vm3, %v19987_v6, -inf }
 0x2b6   : > { %v20535_v33 = vmax.f32 %v3913_v5, %v3914_v58  ;;  %v3934_v47 = vmax.f32 %v20000_v26, %v3933_v14  ;;  %v3894_v16 = vmax.f32 %v3892_v7, %v3893_v31  ;;  %v3920_v8 = vmax.f32 %v3918_v17, %v3919_v19 }
 0x2b7   : > { %v3939_v24 = vmax.f32 %v19995_v62, %v25960_v37  ;;  %v3901_v40 = vmax.f32 %v3899_v29, %v3900_v12  ;;  %v3926_v48 = vrot.slane %v3925_v35, 2  ;;  %v3945_v36 = vrot.slane %v3944_v18, 4 }
 0x2b8   : > { %v3935_v41 = vrot.slane %v3934_v47, 1  ;;  %v3951_v62 = vsel %vm3201_vm3, %v2987_v27, -inf  ;;  %v3921_v63 = vrot.slane %v3920_v8, 1  ;;  %v3963_v26 = vrot.slane %v20054_v61, 1 }
 0x2b9   : > { %v3940_v13 = vrot.slane %v3939_v24, 2  ;;  %v3952_v25 = vrot.slane %v3951_v62, 4  ;;  %v3927_v50 = vmax.f32 %v3925_v35, %v3926_v48  ;;  %v3946_v53 = vmax.f32 %v3944_v18, %v3945_v36 }
 0x2ba   : > { %v3936_v5 = vmax.f32 %v3934_v47, %v3935_v41  ;;  %v25961_v7 = vrot.slane %v20007_v52, 4  ;;  %v3922_v17 = vmax.f32 %v3920_v8, %v3921_v63  ;;  %v3964_v14 = vmax.f32 %v20054_v61, %v3963_v26 }
 0x2bb   : > { %v3941_v49 = vmax.f32 %v3939_v24, %v3940_v13  ;;  %v3953_v42 = vmax.f32 %v3951_v62, %v3952_v25  ;;  %v3928_v6 = vrot.slane %v3927_v50, 1  ;;  %v3947_v31 = vrot.slane %v3946_v53, 2 }
 0x2bc   : > { %v3967_v29 = vmax.f32 %v20007_v52, %v25961_v7  ;;  %v3972_v12 = vsel %vm3201_vm3, %v20015_v20, -inf  ;;  %v3979_v35 = vsel %vm3201_vm3, %v3004_v1, -inf  ;;  %v4243_v48 = vsel %vm4098_vm4, %v20515_v51, -inf }
 0x2bd   : > { %v3942_v58 = vrot.slane %v3941_v49, 1  ;;  %v3954_v37 = vrot.slane %v3953_v42, 2  ;;  %v3973_v24 = vrot.slane %v3972_v12, 4  ;;  %v3929_v52 = vmax.f32 %v3927_v50, %v3928_v6 }
 0x2be   : > { %v3968_v27 = vrot.slane %v3967_v29, 2  ;;  %v3948_v47 = vmax.f32 %v3946_v53, %v3947_v31  ;;  %v3980_v8 = vrot.slane %v3979_v35, 4  ;;  %v4244_v41 = vsel %vm4098_vm4, %v3936_v5, -inf }
 0x2bf   : > { %v3943_v19 = vmax.f32 %v3941_v49, %v3942_v58  ;;  %v3955_v13 = vmax.f32 %v3953_v42, %v3954_v37  ;;  %v3974_v61 = vmax.f32 %v3972_v12, %v3973_v24  ;;  %v4245_v49 = vmax.f32 %v4243_v48, %v4244_v41  ;;  %v25962_v48 = vld [vmem:[#allocation82_spill] sm:$0xff] }
 0x2c0   : > { %v3969_v18 = vmax.f32 %v3967_v29, %v3968_v27  ;;  %v3949_v36 = vrot.slane %v3948_v47, 1  ;;  %v3981_v63 = vmax.f32 %v3979_v35, %v3980_v8  ;;  %v4246_v20 = vsel %vm4098_vm4, %v3887_v55, -inf }
 0x2c1   : > { %v3956_v25 = vrot.slane %v3955_v13, 1  ;;  %v3975_v26 = vrot.slane %v3974_v61, 2  ;;  %v4247_v1 = vsel %vm4098_vm4, %v3943_v19, -inf  ;;  %v4249_v51 = vsel %vm4098_vm4, %v3894_v16, -inf }
 0x2c2   : > { %v3970_v62 = vrot.slane %v3969_v18, 1  ;;  %v3950_v50 = vmax.f32 %v3948_v47, %v3949_v36  ;;  %v3982_v7 = vrot.slane %v3981_v63, 2  ;;  %v4248_v29 = vmax.f32 %v4246_v20, %v4247_v1  ;;  %v25963_v36 = vld [vmem:[#allocation91_spill] sm:$0xff] }
 0x2c3   : > { %v3957_v58 = vmax.f32 %v3955_v13, %v3956_v25  ;;  %v3976_v42 = vmax.f32 %v3974_v61, %v3975_v26  ;;  %v4252_v5 = vsel %vm4098_vm4, %v3901_v40, -inf  ;;  %v4255_v27 = vsel %vm4098_vm4, %v20513_v46, -inf  ;;  %v25966_v1 = vld [vmem:[#allocation23_spill] sm:$0xff] }
 0x2c4   : > { %v3971_v53 = vmax.f32 %v3969_v18, %v3970_v62  ;;  %v3983_v6 = vmax.f32 %v3981_v63, %v3982_v7  ;;  %v4250_v31 = vsel %vm4098_vm4, %v3950_v50, -inf  ;;  %v4256_v55 = vsel %vm4098_vm4, %v3964_v14, -inf }
 0x2c5   : > { %v3977_v12 = vrot.slane %v3976_v42, 1  ;;  %v4251_v19 = vmax.f32 %v4249_v51, %v4250_v31  ;;  %v4253_v37 = vsel %vm4098_vm4, %v3957_v58, -inf  ;;  %v4257_v24 = vmax.f32 %v4255_v27, %v4256_v55 }
 0x2c6   : > { %v3984_v35 = vrot.slane %v3983_v6, 1  ;;  %v4254_v47 = vmax.f32 %v4252_v5, %v4253_v37  ;;  %v4258_v16 = vsel %vm4098_vm4, %v20535_v33, -inf  ;;  %v4259_v40 = vsel %vm4098_vm4, %v3971_v53, -inf  ;;  %v25964_v33 = vld [vmem:[#allocation18_spill] sm:$0xff]  ;;  %v25969_v5 = vld [vmem:[#allocation88_spill] sm:$0xff] }
 0x2c7   : > { %v3978_v18 = vmax.f32 %v3976_v42, %v3977_v12  ;;  %v4260_v8 = vmax.f32 %v4258_v16, %v4259_v40  ;;  %v4261_v13 = vsel %vm4098_vm4, %v3922_v17, -inf  ;;  %v4264_v46 = vsel %vm4098_vm4, %v3929_v52, -inf  ;;  %v25967_v53 = vld [vmem:[#allocation90_spill] sm:$0xff] }
 0x2c8   : > { %v3985_v61 = vmax.f32 %v3983_v6, %v3984_v35  ;;  %v4441_v14 = vsel %vm4392_vm5, %v4248_v29, %v4245_v49  ;;  %v2475_v41 = vmax.f32 %v25962_v48, 0.0  ;;  %v2476_v62 = vmax.f32 %v25963_v36, 0.0 }
 0x2c9   : > { %v4262_v63 = vsel %vm4098_vm4, %v3978_v18, -inf  ;;  %v4442_v25 = vsel %vm4394_vm6, %v4251_v19, %v4441_v14  ;;  %v25965_v26 = vcombine.high %v25964_v33, %v25964_v33  ;;  %v2680_v17 = vcombine.high %v25966_v1, %v25966_v1 }
 0x2ca   : > { %v4263_v52 = vmax.f32 %v4261_v13, %v4262_v63  ;;  %v4265_v50 = vsel %vm4098_vm4, %v3985_v61, -inf  ;;  %v4443_v49 = vsel %vm4396_vm7, %v4254_v47, %v4442_v25  ;;  %v25968_v7 = vcombine.high %v25967_v53, %v25967_v53 }
 0x2cb   : > { %v2679_v20 = vrot.slane %v25965_v26, %v25564_v39  ;;  %v4266_v58 = vmax.f32 %v4264_v46, %v4265_v50  ;;  %v4444_v42 = vsel %vm4398_vm8, %v4257_v24, %v4443_v49  ;;  %v2697_v6 = vcombine.high %v25969_v5, %v25969_v5 }
 0x2cc   : > { %v2696_v29 = vrot.slane %v25968_v7, %v25564_v39  ;;  %v4445_v31 = vsel %vm4400_vm9, %v4260_v8, %v4444_v42  ;;  %v2699_v55 = vcombine.high %v2475_v41, %v2475_v41  ;;  %v20594_v12 = vrot.slane %v2475_v41, %v25564_v39 }
 0x2cd   : > { %v2681_v51 = vcombine.high %v2679_v20, %v2679_v20  ;;  %v4446_v19 = vsel %vm4402_vm10, %v4263_v52, %v4445_v31  ;;  %v2716_v37 = vcombine.high %v2476_v62, %v2476_v62  ;;  %v20598_v35 = vrot.slane %v2476_v62, %v25564_v39 }
 0x2ce   : > { %v2698_v27 = vcombine.high %v2696_v29, %v2696_v29  ;;  %v3426_v24 = vsel %vm3201_vm3, %v25966_v1, -inf  ;;  %v4447_v47 = vsel %vm4404_vm11, %v4266_v58, %v4446_v19  ;;  %v20604_v16 = vrot.slane %v2699_v55, %v25564_v39 }
 0x2cf   : > { %v2714_v40 = vcombine.high %v20594_v12, %v20594_v12  ;;  %v3427_v18 = vrot.slane %v3426_v24, 4  ;;  %v4461_v8 = vrot.slane %v4447_v47, 7  ;;  %v20609_v13 = vrot.slane %v2716_v37, %v25564_v39 }
 0x2d0   : > { %v2731_v46 = vcombine.high %v20598_v35, %v20598_v35  ;;  %v3433_v61 = vsel %vm3201_vm3, %v2680_v17, -inf  ;;  %v2715_v14 = vcombine.high %v20604_v16, %v20604_v16  ;;  %v3440_v36 = vsel %vm3201_vm3, %v2679_v20, -inf  ;;  %v25970_v20 = vld [vmem:[#allocation93_spill] sm:$0xff] }
 0x2d1   : > { %v3428_v48 = vmax.f32 %v3426_v24, %v3427_v18  ;;  %v3434_v41 = vrot.slane %v3433_v61, 4  ;;  %v20618_v62 = vsel %vm401_vm0, 0.0, %v4461_v8  ;;  %v20621_v63 = vsel %vm401_vm0, %v4461_v8, 0.0 }
 0x2d2   : > { %v3441_v33 = vrot.slane %v3440_v36, 4  ;;  %v4522_v26 = vrot.slane %v20618_v62, 1  ;;  %v4523_v1 = vrot.slane %v20621_v63, 1  ;;  %v3447_v49 = vsel %vm3201_vm3, %v2681_v51, -inf }
 0x2d3   : > { %v3429_v17 = vrot.slane %v3428_v48, 2  ;;  %v3435_v52 = vmax.f32 %v3433_v61, %v3434_v41  ;;  %v25971_v53 = vrot.slane %v25970_v20, 4  ;;  %v3461_v58 = vsel %vm3201_vm3, %v2697_v6, -inf }
 0x2d4   : > { %v3442_v50 = vmax.f32 %v3440_v36, %v3441_v33  ;;  %v20633_v42 = vsel %vm911_vm1, %v4522_v26, %v4523_v1  ;;  %v3448_v55 = vrot.slane %v3447_v49, 4  ;;  %v3462_v24 = vrot.slane %v3461_v58, 4 }
 0x2d5   : > { %v3456_v7 = vmax.f32 %v25970_v20, %v25971_v53  ;;  %25972 = vst [vmem:[#allocation105_spill] sm:$0xff] %v20633_v42  ;;  %v3430_v5 = vmax.f32 %v3428_v48, %v3429_v17  ;;  %v3436_v31 = vrot.slane %v3435_v52, 2  ;;  %16787 = vmatmul.mubr.msk.f32.gmra.mxu1 %vm4098_vm4, %v20633_v42  ;;  %v3468_v51 = vsel %vm3201_vm3, %v2696_v29, -inf  ;;  %v4305_v29 = vld [vmem:[%s25148_s3 + $0x70] sm:$0xff] }
 0x2d6   : > { %v3443_v19 = vrot.slane %v3442_v50, 2  ;;  %16797 = vmatprep.mubr.msk.f32.mxu1 %vm4098_vm4, %v25895_v54  ;;  %v3449_v6 = vmax.f32 %v3447_v49, %v3448_v55  ;;  %v3469_v8 = vrot.slane %v3468_v51, 4  ;;  %v3463_v48 = vmax.f32 %v3461_v58, %v3462_v24  ;;  %v4304_v58 = vld [vmem:[%s25148_s3 + $0x68] sm:$0xff] }
 0x2d7   : > { %v3457_v37 = vrot.slane %v3456_v7, 2  ;;  %v3431_v47 = vrot.slane %v3430_v5, 1  ;;  %v3437_v18 = vmax.f32 %v3435_v52, %v3436_v31  ;;  %v3475_v36 = vsel %vm3201_vm3, %v2698_v27, -inf }
 0x2d8   : > { %v3444_v61 = vmax.f32 %v3442_v50, %v3443_v19  ;;  %v3450_v1 = vrot.slane %v3449_v6, 2  ;;  %v3470_v17 = vmax.f32 %v3468_v51, %v3469_v8  ;;  %v3464_v25 = vrot.slane %v3463_v48, 2 }
 0x2d9   : > { %v3458_v41 = vmax.f32 %v3456_v7, %v3457_v37  ;;  %v20641_v33 = vmax.f32 %v3430_v5, %v3431_v47  ;;  %v3438_v26 = vrot.slane %v3437_v18, 1  ;;  %v3476_v52 = vrot.slane %v3475_v36, 4  ;;  %16798 = vmatmul.mubr.msk.f32.vlgmr.msra.gmra.mxu1 %vm4098_vm4, %v20322_v30 }
 0x2da   : > { %v3445_v20 = vrot.slane %v3444_v61, 1  ;;  %v3451_v49 = vmax.f32 %v3449_v6, %v3450_v1  ;;  %v3471_v27 = vrot.slane %v3470_v17, 2  ;;  %v3482_v7 = vsel %vm3201_vm3, %v20594_v12, -inf  ;;  %16800 = vmatprep.mubr.msk.f32.mxu1 %vm4098_vm4, %v20518_v11  ;;  %16830 = vmatpush3.msra.mxu1 %v20378_v57  ;;  %v4303_v57 = vld [vmem:[%s25148_s3 + $0x60] sm:$0xff]  ;;  %v20676_v12 = vld [vmem:[%s25148_s3 + $0xb8] sm:$0xff] }
 0x2db   : > { %v3459_v53 = vrot.slane %v3458_v41, 1  ;;  %v20648_v50 = vmax.f32 %v3437_v18, %v3438_v26  ;;  %v3465_v55 = vmax.f32 %v3463_v48, %v3464_v25  ;;  %v3477_v19 = vmax.f32 %v3475_v36, %v3476_v52  ;;  %16831 = vmatprep.subr.mxu1 %v4305_v29 }
 0x2dc   : > { %v20658_v5 = vmax.f32 %v3444_v61, %v3445_v20  ;;  %v3452_v37 = vrot.slane %v3451_v49, 1  ;;  %v3472_v24 = vmax.f32 %v3470_v17, %v3471_v27  ;;  %v3483_v51 = vrot.slane %v3482_v7, 4  ;;  %16832 = vmatpush3.msra.mxu1 %v4305_v29 }
 0x2dd   : > { %v20660_v31 = vmax.f32 %v3458_v41, %v3459_v53  ;;  %v3489_v47 = vsel %vm3201_vm3, %v2714_v40, -inf  ;;  %v3466_v18 = vrot.slane %v3465_v55, 1  ;;  %v3478_v6 = vrot.slane %v3477_v19, 2  ;;  %16833 = vmatprep.subr.mxu1 %v4304_v58 }
 0x2de   : > { %v3490_v8 = vrot.slane %v3489_v47, 4  ;;  %v3496_v25 = vsel %vm3201_vm3, %v20604_v16, -inf  ;;  %v20671_v61 = vmax.f32 %v3451_v49, %v3452_v37  ;;  %v3473_v41 = vrot.slane %v3472_v24, 1  ;;  %16834 = vmatpush3.msra.mxu1 %v4304_v58 }
 0x2df   : > { %v3484_v48 = vmax.f32 %v3482_v7, %v3483_v51  ;;  %v3497_v36 = vrot.slane %v3496_v25, 4  ;;  %v20678_v40 = vmax.f32 %v3465_v55, %v3466_v18  ;;  %v3479_v26 = vmax.f32 %v3477_v19, %v3478_v6  ;;  %16835 = vmatprep.subr.mxu1 %v4303_v57 }
 0x2e0   : > { %v3491_v1 = vmax.f32 %v3489_v47, %v3490_v8  ;;  %v3503_v17 = vsel %vm3201_vm3, %v2715_v14, -inf  ;;  %v20684_v29 = vmax.f32 %v3472_v24, %v3473_v41  ;;  %16836 = vmatpush3.msra.mxu1 %v4303_v57  ;;  %v3510_v7 = vsel %vm3201_vm3, %v20598_v35, -inf }
 0x2e1   : > { %v3485_v20 = vrot.slane %v3484_v48, 2  ;;  %v3498_v53 = vmax.f32 %v3496_v25, %v3497_v36  ;;  %v3504_v52 = vrot.slane %v3503_v17, 4  ;;  %v3480_v49 = vrot.slane %v3479_v26, 1  ;;  %16869 = vmatprep.subr.mxu1 %v20676_v12 }
 0x2e2   : > { %v3492_v27 = vrot.slane %v3491_v1, 2  ;;  %v3517_v58 = vsel %vm3201_vm3, %v2731_v46, -inf  ;;  %v3511_v19 = vrot.slane %v3510_v7, 4  ;;  %v3524_v47 = vsel %vm3201_vm3, %v20609_v13, -inf }
 0x2e3   : > { %v3486_v16 = vmax.f32 %v3484_v48, %v3485_v20  ;;  %v3499_v14 = vrot.slane %v3498_v53, 2  ;;  %v3505_v55 = vmax.f32 %v3503_v17, %v3504_v52  ;;  %v20693_v37 = vmax.f32 %v3479_v26, %v3480_v49 }
 0x2e4   : > { %v3493_v24 = vmax.f32 %v3491_v1, %v3492_v27  ;;  %v3518_v51 = vrot.slane %v3517_v58, 4  ;;  %v3512_v8 = vmax.f32 %v3510_v7, %v3511_v19  ;;  %v3525_v46 = vrot.slane %v3524_v47, 4 }
 0x2e5   : > { %v3487_v57 = vrot.slane %v3486_v16, 1  ;;  %v3500_v18 = vmax.f32 %v3498_v53, %v3499_v14  ;;  %v3506_v6 = vrot.slane %v3505_v55, 2  ;;  %v25973_v41 = vcombine.high %v20609_v13, %v20609_v13 }
 0x2e6   : > { %v3494_v35 = vrot.slane %v3493_v24, 1  ;;  %v3519_v25 = vmax.f32 %v3517_v58, %v3518_v51  ;;  %v3513_v1 = vrot.slane %v3512_v8, 2  ;;  %v3526_v49 = vmax.f32 %v3524_v47, %v3525_v46 }
 0x2e7   : > { %v3531_v48 = vsel %vm3201_vm3, %v25973_v41, -inf  ;;  %v3488_v36 = vmax.f32 %v3486_v16, %v3487_v57  ;;  %v3501_v26 = vrot.slane %v3500_v18, 1  ;;  %v3507_v17 = vmax.f32 %v3505_v55, %v3506_v6 }
 0x2e8   : > { %v3495_v20 = vmax.f32 %v3493_v24, %v3494_v35  ;;  %v3520_v52 = vrot.slane %v3519_v25, 2  ;;  %v3532_v27 = vrot.slane %v3531_v48, 4  ;;  %v3514_v14 = vmax.f32 %v3512_v8, %v3513_v1 }
 0x2e9   : > { %v3502_v42 = vmax.f32 %v3500_v18, %v3501_v26  ;;  %v3508_v53 = vrot.slane %v3507_v17, 1  ;;  %v4147_v7 = vsel %vm4098_vm4, %v20641_v33, -inf  ;;  %v3527_v19 = vrot.slane %v3526_v49, 2 }
 0x2ea   : > { %v3521_v58 = vmax.f32 %v3519_v25, %v3520_v52  ;;  %v3533_v51 = vmax.f32 %v3531_v48, %v3532_v27  ;;  %v4148_v13 = vsel %vm4098_vm4, %v3488_v36, -inf  ;;  %v3515_v16 = vrot.slane %v3514_v14, 1 }
 0x2eb   : > { %v3509_v41 = vmax.f32 %v3507_v17, %v3508_v53  ;;  %v4149_v57 = vmax.f32 %v4147_v7, %v4148_v13  ;;  %v4150_v55 = vsel %vm4098_vm4, %v20648_v50, -inf  ;;  %v3528_v47 = vmax.f32 %v3526_v49, %v3527_v19 }
 0x2ec   : > { %v3522_v24 = vrot.slane %v3521_v58, 1  ;;  %v3534_v6 = vrot.slane %v3533_v51, 2  ;;  %v4151_v18 = vsel %vm4098_vm4, %v3495_v20, -inf  ;;  %v3516_v8 = vmax.f32 %v3514_v14, %v3515_v16 }
 0x2ed   : > { %v4152_v35 = vmax.f32 %v4150_v55, %v4151_v18  ;;  %v4153_v33 = vsel %vm4098_vm4, %v20658_v5, -inf  ;;  %v4154_v25 = vsel %vm4098_vm4, %v3502_v42, -inf  ;;  %v3529_v48 = vrot.slane %v3528_v47, 1 }
 0x2ee   : > { %v3523_v46 = vmax.f32 %v3521_v58, %v3522_v24  ;;  %v3535_v36 = vmax.f32 %v3533_v51, %v3534_v6  ;;  %v4155_v26 = vmax.f32 %v4153_v33, %v4154_v25  ;;  %v4156_v17 = vsel %vm4098_vm4, %v20671_v61, -inf }
 0x2ef   : > { %v4157_v50 = vsel %vm4098_vm4, %v3509_v41, -inf  ;;  %v4159_v1 = vsel %vm4098_vm4, %v20660_v31, -inf  ;;  %v4160_v20 = vsel %vm4098_vm4, %v3516_v8, -inf  ;;  %v3530_v52 = vmax.f32 %v3528_v47, %v3529_v48 }
 0x2f0   : > { %v3536_v49 = vrot.slane %v3535_v36, 1  ;;  %v4158_v27 = vmax.f32 %v4156_v17, %v4157_v50  ;;  %v4161_v5 = vmax.f32 %v4159_v1, %v4160_v20  ;;  %v25974_v42 = vrot.slane %v20099_v23, 2 }
 0x2f1   : > { %v4162_v14 = vsel %vm4098_vm4, %v20678_v40, -inf  ;;  %v4163_v61 = vsel %vm4098_vm4, %v3523_v46, -inf  ;;  %v4165_v7 = vsel %vm4098_vm4, %v20684_v29, -inf  ;;  %v4166_v19 = vsel %vm4098_vm4, %v3530_v52, -inf }
 0x2f2   : > { %v3990_v53 = vmax.f32 %v20099_v23, %v25974_v42  ;;  %v3537_v58 = vmax.f32 %v3535_v36, %v3536_v49  ;;  %v4164_v31 = vmax.f32 %v4162_v14, %v4163_v61  ;;  %v4413_v51 = vsel %vm4392_vm5, %v4152_v35, %v4149_v57 }
 0x2f3   : > { %v4771_v13 = vrot.slane %v20325_v3, 2  ;;  %v4167_v41 = vmax.f32 %v4165_v7, %v4166_v19  ;;  %v4414_v16 = vsel %vm4394_vm6, %v4155_v26, %v4413_v51  ;;  %v25344_v23 = vrot.slane %v25895_v54, 2 }
 0x2f4   : > { %v4168_v40 = vsel %vm4098_vm4, %v20693_v37, -inf  ;;  %v4169_v55 = vsel %vm4098_vm4, %v3537_v58, -inf  ;;  %v4415_v29 = vsel %vm4396_vm7, %v4158_v27, %v4414_v16  ;;  %v4770_v24 = vrot.slane %v20322_v30, 2 }
 0x2f5   : > { %v3996_v47 = vrot.slane %v20120_v34, 2  ;;  %v4170_v6 = vmax.f32 %v4168_v40, %v4169_v55  ;;  %v4416_v57 = vsel %vm4398_vm8, %v4161_v5, %v4415_v29  ;;  %v4773_v3 = vrot.slane %v20518_v11, 2 }
 0x2f6   : > { %v4417_v18 = vsel %vm4400_vm9, %v4164_v31, %v4416_v57  ;;  %v4774_v8 = vrot.slane %v20521_v44, 2  ;;  %v4779_v35 = vrot.slane %v19879_v15, 2  ;;  %v4780_v37 = vrot.slane %v19882_v45, 2 }
 0x2f7   : > { %v4418_v33 = vsel %vm4402_vm10, %v4167_v41, %v4417_v18  ;;  %v25975_v25 = vrot.slane %v25897_v59, 2  ;;  %v4782_v48 = vrot.slane %v20225_v2, 2  ;;  %v4783_v36 = vrot.slane %v20228_v21, 2 }
 0x2f8   : > { %v4419_v26 = vsel %vm4404_vm11, %v4170_v6, %v4418_v33  ;;  %v20753_v44 = vsel %vm1156_vm2, %v4770_v24, %v4771_v13  ;;  %v4785_v45 = vrot.slane %v20434_v10, 2  ;;  %v4786_v17 = vrot.slane %v20437_v32, 2 }
 0x2f9   : > { %v20747_v46 = vsel %vm1156_vm2, %v25344_v23, %v25975_v25  ;;  %v4457_v50 = vrot.slane %v4419_v26, 7  ;;  %v4788_v1 = vrot.slane %v20618_v62, 2  ;;  %v4789_v20 = vrot.slane %v20621_v63, 2  ;;  %v4309_v25 = vld [vmem:[%s25148_s3 + $0x90] sm:$0xff] }
 0x2fa   : > { %v2496_v52 = vmax.f32 %v20059_v43, 0.0  ;;  %v20761_v49 = vsel %vm1156_vm2, %v4773_v3, %v4774_v8  ;;  %v20764_v21 = vsel %vm1156_vm2, %v4779_v35, %v4780_v37  ;;  %v20767_v27 = vsel %vm1156_vm2, %v4782_v48, %v4783_v36 }
 0x2fb   : > { %v25976_v32 = vcombine.high %v20056_v9, %v20056_v9  ;;  %v20774_v42 = vsel %vm401_vm0, 0.0, %v4457_v50  ;;  %v4481_v63 = vsel %vm401_vm0, %v4457_v50, 0.0  ;;  %v3991_v14 = vrot.slane %v3990_v53, 1 }
 0x2fc   : > { %v3056_v43 = vcombine.high %v2496_v52, %v2496_v52  ;;  %v4510_v61 = vrot.slane %v20774_v42, 1  ;;  %v4511_v7 = vrot.slane %v4481_v63, 1  ;;  %16801 = vmatmul.mubr.msk.f32.gmra.mxu1 %vm4098_vm4, %v20774_v42  ;;  %v4776_v58 = vrot.slane %v20774_v42, 2 }
 0x2fd   : > { %v3036_v5 = vrot.slane %v25976_v32, %v25564_v39  ;;  %v4777_v31 = vrot.slane %v4481_v63, 2  ;;  %16803 = vmatprep.mubr.msk.f32.mxu1 %vm4098_vm4, %v19879_v15  ;;  %v20784_v9 = vsel %vm1156_vm2, %v4785_v45, %v4786_v17  ;;  %v20787_v19 = vsel %vm1156_vm2, %v4788_v1, %v4789_v20  ;;  %v17613_v20 = vld [vmem:[%s25148_s3 + $0x98] sm:$0xff] }
 0x2fe   : > { %v3055_v13 = vcombine.high %v20085_v0, %v20085_v0  ;;  %v20792_v41 = vsel %vm911_vm1, %v4510_v61, %v4511_v7  ;;  %v20795_v16 = vrot.slane %v2496_v52, %v25564_v39  ;;  %v20798_v40 = vmax.f32 %v20120_v34, %v3996_v47  ;;  %v4308_v52 = vld [vmem:[%s25148_s3 + $0x88] sm:$0xff] }
 0x2ff   : > { %v3038_v51 = vcombine.high %v3036_v5, %v3036_v5  ;;  %v4003_v55 = vrot.slane %v20177_v60, 2  ;;  %16781 = vmatmul.mubr.msk.f32.gmra.mxu0 %vm4098_vm4, %v20792_v41  ;;  %v20804_v29 = vrot.slane %v3056_v43, %v25564_v39  ;;  %v20806_v24 = vmax.f32 %v3990_v53, %v3991_v14  ;;  %v25981_v43 = vld [vmem:[#allocation97_spill] sm:$0xff] }
 0x300   : > { %v25977_v6 = vcombine.high %v20077_v38, %v20077_v38  ;;  %v25978_v3 = vrot.slane %v20096_v4, 4  ;;  %16817 = vmatprep.mubr.msk.f32.mxu0 %vm4098_vm4, %v20747_v46  ;;  %16804 = vmatmul.mubr.msk.f32.gmra.mxu1 %vm4098_vm4, %v20225_v2  ;;  %v20820_v47 = vsel %vm1156_vm2, %v4776_v58, %v4777_v31  ;;  %v25979_v38 = vcombine.high %v20067_v56, %v20067_v56 }
 0x301   : > { %v4004_v53 = vmax.f32 %v20177_v60, %v4003_v55  ;;  %16806 = vmatprep.mubr.msk.f32.mxu1 %vm4098_vm4, %v20434_v10  ;;  %v4028_v37 = vsel %vm3201_vm3, %v3036_v5, -inf  ;;  %v4035_v33 = vsel %vm3201_vm3, %v3038_v51, -inf  ;;  %v3071_v60 = vcombine.high %v20795_v16, %v20795_v16  ;;  %v4307_v51 = vld [vmem:[%s25148_s3 + $0x80] sm:$0xff] }
 0x302   : > { %v4007_v57 = vsel %vm3201_vm3, %v25977_v6, -inf  ;;  %v4016_v34 = vmax.f32 %v20096_v4, %v25978_v3  ;;  %v4021_v8 = vsel %vm3201_vm3, %v25979_v38, -inf  ;;  %v3998_v56 = vrot.slane %v20798_v40, 1 }
 0x303   : > { %v4008_v18 = vrot.slane %v4007_v57, 4  ;;  %v4022_v35 = vrot.slane %v4021_v8, 4  ;;  %v4029_v36 = vrot.slane %v4028_v37, 4  ;;  %16818 = vmatmul.mubr.msk.f32.vlgmr.msra.gmra.mxu0 %vm4098_vm4, %v20753_v44  ;;  %v4036_v17 = vrot.slane %v4035_v33, 4 }
 0x304   : > { %v4017_v4 = vrot.slane %v4016_v34, 2  ;;  %v25980_v50 = vrot.slane %v20072_v22, 4  ;;  %16850 = vmatpush3.msra.mxu0 %v17613_v20  ;;  %16820 = vmatprep.mubr.msk.f32.mxu0 %vm4098_vm4, %v20761_v49  ;;  %v4005_v32 = vrot.slane %v4004_v53, 1  ;;  %v25982_v14 = vcombine.high %v25981_v43, %v25981_v43 }
 0x305   : > { %v4009_v48 = vmax.f32 %v4007_v57, %v4008_v18  ;;  %v4023_v45 = vmax.f32 %v4021_v8, %v4022_v35  ;;  %v4030_v63 = vmax.f32 %v4028_v37, %v4029_v36  ;;  %16851 = vmatprep.subr.mxu0 %v4309_v25  ;;  %16807 = vmatmul.mubr.msk.f32.gmra.mxu1 %vm4098_vm4, %v20618_v62  ;;  %v4056_v3 = vsel %vm3201_vm3, %v20085_v0, -inf }
 0x306   : > { %v4018_v26 = vmax.f32 %v4016_v34, %v4017_v4  ;;  %v4044_v1 = vmax.f32 %v20072_v22, %v25980_v50  ;;  %v4049_v22 = vsel %vm3201_vm3, %v25982_v14, -inf  ;;  %v4037_v58 = vmax.f32 %v4035_v33, %v4036_v17  ;;  %16852 = vmatpush3.msra.mxu0 %v4309_v25  ;;  %16837 = vmatprep.mubr.msk.f32.mxu1 %vm4098_vm4, %v20322_v30  ;;  %v20876_v33 = vld [vmem:[%s25148_s3 + $0xd8] sm:$0xff]  ;;  %v4313_v17 = vld [vmem:[%s25148_s3 + $0xb0] sm:$0xff] }
 0x307   : > { %v4010_v5 = vrot.slane %v4009_v48, 2  ;;  %v4024_v7 = vrot.slane %v4023_v45, 2  ;;  %v4031_v6 = vrot.slane %v4030_v63, 2  ;;  %v4050_v57 = vrot.slane %v4049_v22, 4  ;;  %16821 = vmatmul.mubr.msk.f32.gmra.mxu0 %vm4098_vm4, %v20820_v47  ;;  %16853 = vmatprep.subr.mxu0 %v4308_v52 }
 0x308   : > { %v4019_v61 = vrot.slane %v4018_v26, 1  ;;  %v4045_v31 = vrot.slane %v4044_v1, 2  ;;  %v3072_v34 = vcombine.high %v20804_v29, %v20804_v29  ;;  %v4038_v38 = vrot.slane %v4037_v58, 2  ;;  %16823 = vmatprep.mubr.msk.f32.mxu0 %vm4098_vm4, %v20764_v21  ;;  %16854 = vmatpush3.msra.mxu0 %v4308_v52 }
 0x309   : > { %v4011_v55 = vmax.f32 %v4009_v48, %v4010_v5  ;;  %v4025_v18 = vmax.f32 %v4023_v45, %v4024_v7  ;;  %v20869_v4 = vmax.f32 %v4030_v63, %v4031_v6  ;;  %v4051_v35 = vmax.f32 %v4049_v22, %v4050_v57  ;;  %16855 = vmatprep.subr.mxu0 %v4307_v51  ;;  %v25983_v57 = vld [vmem:[#allocation98_spill] sm:$0xff] }
 0x30a   : > { %v4046_v30 = vmax.f32 %v4044_v1, %v4045_v31  ;;  %v4057_v37 = vrot.slane %v4056_v3, 4  ;;  %16838 = vmatmul.mubr.msk.f32.vlgmr.msra.gmra.mxu1 %vm4098_vm4, %v20518_v11  ;;  %v20879_v25 = vmax.f32 %v20798_v40, %v3998_v56  ;;  %v4063_v45 = vsel %vm3201_vm3, %v3055_v13, -inf  ;;  %16856 = vmatpush3.msra.mxu0 %v4307_v51  ;;  %v4311_v51 = vld [vmem:[%s25148_s3 + $0xa0] sm:$0xff] }
 0x30b   : > { %v4012_v8 = vrot.slane %v4011_v55, 1  ;;  %v4026_v48 = vrot.slane %v4025_v18, 1  ;;  %16840 = vmatprep.mubr.msk.f32.mxu1 %vm4098_vm4, %v20774_v42  ;;  %v20890_v50 = vmax.f32 %v4004_v53, %v4005_v32  ;;  %v20892_v1 = vmax.f32 %v4018_v26, %v4019_v61  ;;  %16824 = vmatmul.mubr.msk.f32.gmra.mxu0 %vm4098_vm4, %v20767_v27  ;;  %v4312_v53 = vld [vmem:[%s25148_s3 + $0xa8] sm:$0xff] }
 0x30c   : > { %v4047_v36 = vrot.slane %v4046_v30, 1  ;;  %v4052_v40 = vrot.slane %v4051_v35, 2  ;;  %v4058_v56 = vmax.f32 %v4056_v3, %v4057_v37  ;;  %16870 = vmatpush3.msra.mxu1 %v20676_v12  ;;  %v4033_v13 = vrot.slane %v20869_v4, 1  ;;  %16826 = vmatprep.mubr.msk.f32.mxu0 %vm4098_vm4, %v20784_v9 }
 0x30d   : > { %v20897_v0 = vmax.f32 %v4011_v55, %v4012_v8  ;;  %v20900_v20 = vmax.f32 %v4037_v58, %v4038_v38  ;;  %v4064_v52 = vrot.slane %v4063_v45, 4  ;;  %16889 = vmatprep.subr.mxu0 %v20876_v33  ;;  %v20908_v26 = vmax.f32 %v4025_v18, %v4026_v48  ;;  %16871 = vmatprep.subr.mxu1 %v4313_v17  ;;  %v4317_v48 = vld [vmem:[%s25148_s3 + $0xd0] sm:$0xff] }
 0x30e   : > { %v4053_v32 = vmax.f32 %v4051_v35, %v4052_v40  ;;  %v4059_v12 = vrot.slane %v4058_v56, 2  ;;  %v4070_v5 = vsel %vm3201_vm3, %v20795_v16, -inf  ;;  %16841 = vmatmul.mubr.msk.f32.gmra.mxu1 %vm4098_vm4, %v19879_v15  ;;  %v4048_v63 = vmax.f32 %v4046_v30, %v4047_v36  ;;  %v20933_v30 = vld [vmem:[%s25148_s3 + $0xf8] sm:$0xff] }
 0x30f   : > { %v4065_v43 = vmax.f32 %v4063_v45, %v4064_v52  ;;  %v4071_v14 = vrot.slane %v4070_v5, 4  ;;  %v4077_v22 = vsel %vm3201_vm3, %v3071_v60, -inf  ;;  %16843 = vmatprep.mubr.msk.f32.mxu1 %vm4098_vm4, %v20225_v2  ;;  %16872 = vmatpush3.msra.mxu1 %v4313_v17  ;;  %v4084_v31 = vsel %vm3201_vm3, %v20804_v29, -inf }
 0x310   : > { %v4054_v61 = vrot.slane %v4053_v32, 1  ;;  %v4060_v7 = vmax.f32 %v4058_v56, %v4059_v12  ;;  %v4078_v58 = vrot.slane %v4077_v22, 4  ;;  %16827 = vmatmul.mubr.msk.f32.gmra.mxu0 %vm4098_vm4, %v20787_v19  ;;  %16873 = vmatprep.subr.mxu1 %v4312_v53  ;;  %v4085_v55 = vrot.slane %v4084_v31, 4 }
 0x311   : > { %v4066_v16 = vrot.slane %v4065_v43, 2  ;;  %v4072_v60 = vmax.f32 %v4070_v5, %v4071_v14  ;;  %v4091_v6 = vsel %vm3201_vm3, %v3072_v34, -inf  ;;  %16857 = vmatprep.mubr.msk.f32.mxu0 %vm4098_vm4, %v25983_v57  ;;  %16874 = vmatpush3.msra.mxu1 %v4312_v53  ;;  %v4040_v8 = vrot.slane %v20900_v20, 1 }
 0x312   : > { %v4055_v3 = vmax.f32 %v4053_v32, %v4054_v61  ;;  %v4061_v18 = vrot.slane %v4060_v7, 1  ;;  %v4079_v29 = vmax.f32 %v4077_v22, %v4078_v58  ;;  %v4092_v38 = vrot.slane %v4091_v6, 4  ;;  %16844 = vmatmul.mubr.msk.f32.gmra.mxu1 %vm4098_vm4, %v20434_v10  ;;  %16875 = vmatprep.subr.mxu1 %v4311_v51 }
 0x313   : > { %v4067_v35 = vmax.f32 %v4065_v43, %v4066_v16  ;;  %v4073_v34 = vrot.slane %v4072_v60, 2  ;;  %v4086_v37 = vmax.f32 %v4084_v31, %v4085_v55  ;;  %16846 = vmatprep.mubr.msk.f32.mxu1 %vm4098_vm4, %v20618_v62  ;;  %v4034_v36 = vmax.f32 %v20869_v4, %v4033_v13  ;;  %16876 = vmatpush3.msra.mxu1 %v4311_v51  ;;  %v4316_v4 = vld [vmem:[%s25148_s3 + $0xc8] sm:$0xff]  ;;  %v25984_v51 = vld [vmem:[#allocation30_spill] sm:$0xff] }
 0x314   : > { %v4062_v45 = vmax.f32 %v4060_v7, %v4061_v18  ;;  %v4080_v17 = vrot.slane %v4079_v29, 2  ;;  %v4093_v40 = vmax.f32 %v4091_v6, %v4092_v38  ;;  %16858 = vmatmul.mubr.msk.f32.vlgmr.msra.gmra.mxu0 %vm4098_vm4, %v20527_v28  ;;  %v4267_v32 = vsel %vm4098_vm4, %v20806_v24, -inf  ;;  %16909 = vmatprep.subr.mxu1 %v20933_v30  ;;  %v25985_v6 = vld [vmem:[#allocation104_spill] sm:$0xff] }
 0x315   : > { %v4068_v56 = vrot.slane %v4067_v35, 1  ;;  %v4074_v52 = vmax.f32 %v4072_v60, %v4073_v34  ;;  %v4087_v53 = vrot.slane %v4086_v37, 2  ;;  %16890 = vmatpush3.msra.mxu0 %v20876_v33  ;;  %16860 = vmatprep.mubr.msk.f32.mxu0 %vm4098_vm4, %v20792_v41  ;;  %v4268_v5 = vsel %vm4098_vm4, %v4048_v63, -inf  ;;  %v4315_v63 = vld [vmem:[%s25148_s3 + $0xc0] sm:$0xff] }
 0x316   : > { %v4081_v13 = vmax.f32 %v4079_v29, %v4080_v17  ;;  %v4094_v12 = vrot.slane %v4093_v40, 2  ;;  %v4271_v43 = vsel %vm4098_vm4, %v4055_v3, -inf  ;;  %16891 = vmatprep.subr.mxu0 %v4317_v48  ;;  %v4270_v33 = vsel %vm4098_vm4, %v20879_v25, -inf  ;;  %v4326_v29 = vld [vmem:[%s25148_s3 + $0x118] sm:$0xff] }
 0x317   : > { %v4069_v14 = vmax.f32 %v4067_v35, %v4068_v56  ;;  %v4075_v24 = vrot.slane %v4074_v52, 1  ;;  %v4088_v22 = vmax.f32 %v4086_v37, %v4087_v53  ;;  %16892 = vmatpush3.msra.mxu0 %v4317_v48  ;;  %v4273_v58 = vsel %vm4098_vm4, %v20890_v50, -inf }
 0x318   : > { %v4082_v61 = vrot.slane %v4081_v13, 1  ;;  %v4095_v7 = vmax.f32 %v4093_v40, %v4094_v12  ;;  %v4274_v31 = vsel %vm4098_vm4, %v4062_v45, -inf  ;;  %16861 = vmatmul.mubr.msk.f32.gmra.mxu0 %vm4098_vm4, %v25984_v51  ;;  %16893 = vmatprep.subr.mxu0 %v4316_v4  ;;  %v4272_v55 = vmax.f32 %v4270_v33, %v4271_v43 }
 0x319   : > { %v4076_v16 = vmax.f32 %v4074_v52, %v4075_v24  ;;  %v4089_v60 = vrot.slane %v4088_v22, 1  ;;  %v4275_v25 = vmax.f32 %v4273_v58, %v4274_v31  ;;  %16863 = vmatprep.mubr.msk.f32.mxu0 %vm4098_vm4, %v25985_v6  ;;  %v4276_v50 = vsel %vm4098_vm4, %v20897_v0, -inf  ;;  %16894 = vmatpush3.msra.mxu0 %v4316_v4  ;;  %v25986_v52 = vld [vmem:[#allocation10_spill] sm:$0xff]  ;;  %v25987_v4 = vld [vmem:[#allocation105_spill] sm:$0xff] }
 0x31a   : > { %v4083_v57 = vmax.f32 %v4081_v13, %v4082_v61  ;;  %v4096_v3 = vrot.slane %v4095_v7, 1  ;;  %v4277_v18 = vsel %vm4098_vm4, %v4069_v14, -inf  ;;  %v4269_v35 = vmax.f32 %v4267_v32, %v4268_v5  ;;  %16895 = vmatprep.subr.mxu0 %v4315_v63 }
 0x31b   : > { %v4090_v38 = vmax.f32 %v4088_v22, %v4089_v60  ;;  %v4278_v34 = vmax.f32 %v4276_v50, %v4277_v18  ;;  %v4280_v37 = vsel %vm4098_vm4, %v4076_v16, -inf  ;;  %v4041_v48 = vmax.f32 %v20900_v20, %v4040_v8  ;;  %16896 = vmatpush3.msra.mxu0 %v4315_v63  ;;  %v4321_v16 = vld [vmem:[%s25148_s3 + $0xf0] sm:$0xff]  ;;  %v4320_v60 = vld [vmem:[%s25148_s3 + $0xe8] sm:$0xff]  ;;  %v8357_v50 = vld [vmem:[%s25150_s5 + $0x18] sm:$0xff] }
 0x31c   : > { %v4097_v45 = vmax.f32 %v4095_v7, %v4096_v3  ;;  %v4283_v17 = vsel %vm4098_vm4, %v4083_v57, -inf  ;;  %v4279_v0 = vsel %vm4098_vm4, %v20892_v1, -inf  ;;  %v4448_v56 = vsel %vm4392_vm5, %v4272_v55, %v4269_v35  ;;  %16864 = vmatmul.mubr.msk.f32.gmra.mxu0 %vm4098_vm4, %v25986_v52  ;;  %16929 = vmatprep.subr.mxu0 %v4326_v29  ;;  %v4319_v55 = vld [vmem:[%s25148_s3 + $0xe0] sm:$0xff] }
 0x31d   : > { %v4286_v40 = vsel %vm4098_vm4, %v4090_v38, -inf  ;;  %v4281_v53 = vmax.f32 %v4279_v0, %v4280_v37  ;;  %v4282_v32 = vsel %vm4098_vm4, %v20908_v26, -inf  ;;  %v4449_v8 = vsel %vm4394_vm6, %v4275_v25, %v4448_v56  ;;  %16866 = vmatprep.mubr.msk.f32.mxu0 %vm4098_vm4, %v25987_v4  ;;  %v8367_v25 = vld [vmem:[%s25150_s5 + $0x68] sm:$0xff]  ;;  %v8366_v3 = vld [vmem:[%s25150_s5 + $0x60] sm:$0xff]  ;;  %v8356_v38 = vld [vmem:[%s25150_s5 + $0x10] sm:$0xff] }
 0x31e   : > { %v4289_v20 = vsel %vm4098_vm4, %v4097_v45, -inf  ;;  %v4284_v1 = vmax.f32 %v4282_v32, %v4283_v17  ;;  %v4285_v13 = vsel %vm4098_vm4, %v4034_v36, -inf  ;;  %v4450_v12 = vsel %vm4396_vm7, %v4278_v34, %v4449_v8  ;;  %v8364_v37 = vld [vmem:[%s25150_s5 + $0x50] sm:$0xff]  ;;  %v8354_v56 = vld [vmem:[%s25150_s5] sm:$0xff] }
 0x31f   : > { %v4287_v5 = vmax.f32 %v4285_v13, %v4286_v40  ;;  %v4288_v43 = vsel %vm4098_vm4, %v4041_v48, -inf  ;;  %v4451_v14 = vsel %vm4398_vm8, %v4281_v53, %v4450_v12  ;;  %v8355_v48 = vld [vmem:[%s25150_s5 + $0x8] sm:$0xff]  ;;  %v8362_v8 = vld [vmem:[%s25150_s5 + $0x40] sm:$0xff]  ;;  %vm15582_vm3 = vcmask 523712  }
 0x320   : > { %v4290_v24 = vmax.f32 %v4288_v43, %v4289_v20  ;;  %v4452_v26 = vsel %vm4400_vm9, %v4284_v1, %v4451_v14  ;;  %v8363_v40 = vld [vmem:[%s25150_s5 + $0x48] sm:$0xff]  ;;  %v25990_v1 = vrot.slane %v25895_v54, 1  ;;  %v25992_v43 = vrot.slane %v25897_v59, 1 }
 0x321   : > { %v4453_v22 = vsel %vm4402_vm10, %v4287_v5, %v4452_v26  ;;  %vm15596_vm5 = vcmask 654912   ;;  %vm15603_vm6 = vcmask 720512   ;;  %vm15610_vm7 = vcmask 786112  }
 0x322   : > { %v4454_v33 = vsel %vm4404_vm11, %v4290_v24, %v4453_v22  ;;  %vm15617_vm8 = vcmask 851712   ;;  %vm15624_vm9 = vcmask 917312   ;;  %vm15631_vm10 = vcmask 982912  }
 0x323   : > { %v4462_v61 = vrot.slane %v4454_v33, 7  ;;  %v8377_v33 = vld [vmem:[%s25150_s5 + $0xb8] sm:$0xff]  ;;  %vm15638_vm11 = vcmask 1048512  }
 0x325   : > { %v4478_v7 = vsel %vm401_vm0, 0.0, %v4462_v61  ;;  %v4486_v58 = vsel %vm401_vm0, %v4462_v61, 0.0 }
 0x326   : > { %16847 = vmatmul.mubr.msk.f32.gmra.mxu1 %vm4098_vm4, %v4478_v7  ;;  %v5037_v36 = vrot.slane %v4478_v7, 1  ;;  %v5038_v31 = vrot.slane %v4486_v58, 1 }
 0x327   : > { %16877 = vmatprep.mubr.msk.f32.mxu1 %vm4098_vm4, %v20753_v44  ;;  %v4325_v44 = vld [vmem:[%s25148_s3 + $0x110] sm:$0xff] }
 0x328   : > { %v5039_v63 = vsel %vm911_vm1, %v5037_v36, %v5038_v31 }
 0x329   : > { %16867 = vmatmul.mubr.msk.f32.gmra.mxu0 %vm4098_vm4, %v5039_v63 }
 0x32a   : > { %16878 = vmatmul.mubr.msk.f32.vlgmr.msra.gmra.mxu1 %vm4098_vm4, %v20761_v49  ;;  %16897 = vmatprep.mubr.msk.f32.mxu0 %vm4098_vm4, %v20518_v11  ;;  %v5155_v11 = vrot.slane %v4478_v7, 2 }
 0x32b   : > { %16880 = vmatprep.mubr.msk.f32.mxu1 %vm4098_vm4, %v20820_v47  ;;  %16910 = vmatpush3.msra.mxu1 %v20933_v30  ;;  %v5156_v30 = vrot.slane %v4486_v58, 2 }
 0x32c   : > { %16911 = vmatprep.subr.mxu1 %v4321_v16 }
 0x32d   : > { %16898 = vmatmul.mubr.msk.f32.vlgmr.msra.gmra.mxu0 %vm4098_vm4, %v20774_v42  ;;  %16912 = vmatpush3.msra.mxu1 %v4321_v16  ;;  %v4324_v42 = vld [vmem:[%s25148_s3 + $0x108] sm:$0xff] }
 0x32e   : > { %16881 = vmatmul.mubr.msk.f32.gmra.mxu1 %vm4098_vm4, %v20764_v21  ;;  %16930 = vmatpush3.msra.mxu0 %v4326_v29  ;;  %v8365_v29 = vld [vmem:[%s25150_s5 + $0x58] sm:$0xff] }
 0x32f   : > { %16883 = vmatprep.mubr.msk.f32.mxu1 %vm4098_vm4, %v20767_v27  ;;  %16900 = vmatprep.mubr.msk.f32.mxu0 %vm4098_vm4, %v19879_v15  ;;  %v5157_v15 = vsel %vm1156_vm2, %v5155_v11, %v5156_v30  ;;  %v21115_v57 = vpop.f32.mrf.mxu0 }
 0x330   : > { %16931 = vmatprep.subr.mxu0 %v4325_v44  ;;  %16913 = vmatprep.subr.mxu1 %v4320_v60 }
 0x331   : > { %16901 = vmatmul.mubr.msk.f32.gmra.mxu0 %vm4098_vm4, %v20225_v2  ;;  %16914 = vmatpush3.msra.mxu1 %v4320_v60  ;;  %v4323_v2 = vld [vmem:[%s25148_s3 + $0x100] sm:$0xff]  ;;  %v21129_v35 = vpop.f32.mrf.mxu0 }
 0x332   : > { %16884 = vmatmul.mubr.msk.f32.gmra.mxu1 %vm4098_vm4, %v20784_v9  ;;  %16932 = vmatpush3.msra.mxu0 %v4325_v44 }
 0x333   : > { %16886 = vmatprep.mubr.msk.f32.mxu1 %vm4098_vm4, %v20787_v19  ;;  %16903 = vmatprep.mubr.msk.f32.mxu0 %vm4098_vm4, %v20434_v10  ;;  %v25988_v10 = vld [vmem:[#allocation101_spill] sm:$0xff] }
 0x334   : > { %16933 = vmatprep.subr.mxu0 %v4324_v42  ;;  %16915 = vmatprep.subr.mxu1 %v4319_v55 }
 0x335   : > { %16904 = vmatmul.mubr.msk.f32.gmra.mxu0 %vm4098_vm4, %v20618_v62  ;;  %16916 = vmatpush3.msra.mxu1 %v4319_v55 }
 0x336   : > { %16887 = vmatmul.mubr.msk.f32.gmra.mxu1 %vm4098_vm4, %v5157_v15  ;;  %16934 = vmatpush3.msra.mxu0 %v4324_v42 }
 0x337   : > { %16906 = vmatprep.mubr.msk.f32.mxu0 %vm4098_vm4, %v4478_v7  ;;  %16917 = vmatprep.mubr.msk.f32.mxu1 %vm4098_vm4, %v20527_v28  ;;  %v21082_v28 = vpop.f32.mrf.mxu1 }
 0x338   : > { %16935 = vmatprep.subr.mxu0 %v4323_v2 }
 0x339   : > { %16907 = vmatmul.mubr.msk.f32.gmra.mxu0 %vm4098_vm4, %v25895_v54  ;;  %v21084_v62 = vpop.f32.mrf.mxu1 }
 0x33a   : > { %16918 = vmatmul.mubr.msk.f32.vlgmr.msra.gmra.mxu1 %vm4098_vm4, %v20792_v41  ;;  %16936 = vmatpush3.msra.mxu0 %v4323_v2  ;;  %v8368_v41 = vld [vmem:[%s25150_s5 + $0x70] sm:$0xff] }
 0x33b   : > { %16920 = vmatprep.mubr.msk.f32.mxu1 %vm4098_vm4, %v25984_v51  ;;  %16937 = vmatprep.mubr.msk.f32.mxu0 %vm4098_vm4, %v20761_v49 }
 0x33d   : > { %16938 = vmatmul.mubr.msk.f32.vlgmr.msra.gmra.mxu0 %vm4098_vm4, %v20820_v47  ;;  %v8359_v47 = vld [vmem:[%s25150_s5 + $0x28] sm:$0xff] }
 0x33e   : > { %16921 = vmatmul.mubr.msk.f32.gmra.mxu1 %vm4098_vm4, %v25985_v6  ;;  %16940 = vmatprep.mubr.msk.f32.mxu0 %vm4098_vm4, %v20764_v21  ;;  %v8358_v6 = vld [vmem:[%s25150_s5 + $0x20] sm:$0xff] }
 0x33f   : > { %16923 = vmatprep.mubr.msk.f32.mxu1 %vm4098_vm4, %v25986_v52  ;;  %v25989_v52 = vld [vmem:[#allocation3_spill] sm:$0xff] }
 0x340   : > { %v9241_v53 = vrot.slane %v25989_v52, 1 }
 0x341   : > { %16941 = vmatmul.mubr.msk.f32.gmra.mxu0 %vm4098_vm4, %v20767_v27 }
 0x342   : > { %16924 = vmatmul.mubr.msk.f32.gmra.mxu1 %vm4098_vm4, %v25987_v4  ;;  %16943 = vmatprep.mubr.msk.f32.mxu0 %vm4098_vm4, %v20784_v9  ;;  %v8361_v9 = vld [vmem:[%s25150_s5 + $0x38] sm:$0xff]  ;;  %v21158_v13 = vsel %vm911_vm1, %v25990_v1, %v9241_v53  ;;  %v21167_v14 = vsel %vm911_vm1, %v9241_v53, %v25992_v43 }
 0x343   : > { %16926 = vmatprep.mubr.msk.f32.mxu1 %vm4098_vm4, %v5039_v63  ;;  %17013 = vmatprep.subr.mxu0 %v8361_v9  ;;  %25991 = vst [vmem:[#allocation11_spill] sm:$0xff] %v21158_v13  ;;  %25993 = vst [vmem:[#allocation102_spill] sm:$0xff] %v21167_v14 }
 0x344   : > { %17014 = vmatpush3.msra.mxu0 %v8361_v9 }
 0x345   : > { %16944 = vmatmul.mubr.msk.f32.gmra.mxu0 %vm4098_vm4, %v20787_v19  ;;  %v8360_v19 = vld [vmem:[%s25150_s5 + $0x30] sm:$0xff] }
 0x346   : > { %16927 = vmatmul.mubr.msk.f32.gmra.mxu1 %vm4098_vm4, %v25988_v10  ;;  %16946 = vmatprep.mubr.msk.f32.mxu0 %vm4098_vm4, %v5157_v15 }
 0x347   : > { %17015 = vmatprep.subr.mxu0 %v8360_v19  ;;  %16965 = vmatprep.mubr.msk.f32.mxu1 %vm9319_vm12, %v21158_v13  ;;  %v26001_v13 = vld [vmem:[#allocation7_spill] sm:$0xff] }
 0x348   : > { %17016 = vmatpush3.msra.mxu0 %v8360_v19 }
 0x349   : > { %16947 = vmatmul.mubr.msk.f32.gmra.mxu0 %vm4098_vm4, %v20747_v46  ;;  %v8369_v46 = vld [vmem:[%s25150_s5 + $0x78] sm:$0xff]  ;;  %17017 = vmatprep.subr.mxu0 %v8359_v47 }
 0x34a   : > { %16949 = vmatprep.subr.mxu1 %v8369_v46  ;;  %17018 = vmatpush3.msra.mxu0 %v8359_v47 }
 0x34b   : > { %16950 = vmatpush3.msra.mxu1 %v8369_v46  ;;  %17019 = vmatprep.subr.mxu0 %v8358_v6 }
 0x34c   : > { %16951 = vmatprep.subr.mxu1 %v8368_v41  ;;  %17020 = vmatpush3.msra.mxu0 %v8358_v6  ;;  %v8376_v6 = vld [vmem:[%s25150_s5 + $0xb0] sm:$0xff] }
 0x34d   : > { %16952 = vmatpush3.msra.mxu1 %v8368_v41  ;;  %17021 = vmatprep.subr.mxu0 %v8357_v50 }
 0x34e   : > { %16953 = vmatprep.subr.mxu1 %v8367_v25  ;;  %17022 = vmatpush3.msra.mxu0 %v8357_v50 }
 0x34f   : > { %16954 = vmatpush3.msra.mxu1 %v8367_v25  ;;  %17023 = vmatprep.subr.mxu0 %v8356_v38 }
 0x350   : > { %16955 = vmatprep.subr.mxu1 %v8366_v3  ;;  %17024 = vmatpush3.msra.mxu0 %v8356_v38 }
 0x351   : > { %16956 = vmatpush3.msra.mxu1 %v8366_v3  ;;  %17025 = vmatprep.subr.mxu0 %v8355_v48 }
 0x352   : > { %16957 = vmatprep.subr.mxu1 %v8365_v29  ;;  %17026 = vmatpush3.msra.mxu0 %v8355_v48 }
 0x353   : > { %16958 = vmatpush3.msra.mxu1 %v8365_v29  ;;  %17027 = vmatprep.subr.mxu0 %v8354_v56 }
 0x354   : > { %16959 = vmatprep.subr.mxu1 %v8364_v37  ;;  %17028 = vmatpush3.msra.mxu0 %v8354_v56 }
 0x355   : > { %16960 = vmatpush3.msra.mxu1 %v8364_v37  ;;  %17029 = vmatprep.mubr.msk.f32.mxu0 %vm9319_vm12, %v25895_v54 }
 0x356   : > { %16961 = vmatprep.subr.mxu1 %v8363_v40  ;;  %17030 = vmatmul.mubr.msk.f32.vlgmr.msra.gmra.mxu0 %vm9319_vm12, %v25989_v52 }
 0x357   : > { %16962 = vmatpush3.msra.mxu1 %v8363_v40 }
 0x358   : > { %16963 = vmatprep.subr.mxu1 %v8362_v8 }
 0x359   : > { %16964 = vmatpush3.msra.mxu1 %v8362_v8 }
 0x35a   : > { %16966 = vmatmul.mubr.msk.f32.vlgmr.msra.gmra.mxu1 %vm9319_vm12, %v21167_v14  ;;  %17077 = vmatprep.subr.mxu1 %v8377_v33 }
 0x35b   : > { %17078 = vmatpush3.msra.mxu1 %v8377_v33 }
 0x35c   : > { %17079 = vmatprep.subr.mxu1 %v8376_v6 }
 0x35d   : > { %17080 = vmatpush3.msra.mxu1 %v8376_v6 }
 0x395   : > { %v21086_v49 = vpop.f32.mrf.mxu1 }
 0x397   : > { %v21088_v21 = vpop.f32.mrf.mxu1 }
 0x399   : > { %v21090_v27 = vpop.f32.mrf.mxu1 }
 0x39a   : > { %v4734_v8 = vadd.f32 %v21090_v27, %v21115_v57 }
 0x39b   : > { %v21107_v51 = vpop.f32.mrf.mxu1 }
 0x39c   : > { %v4729_v43 = vadd.f32 %v21107_v51, %v21129_v35 }
 0x3bc   : > { %v16802_v18 = vpop.f32.mrf.mxu1 }
 0x3be   : > { %v21131_v34 = vpop.f32.mrf.mxu1 }
 0x3bf   : > { %v16782_v45 = vpop.f32.mrf.mxu0 }
 0x3c0   : > { %v4744_v17 = vadd.f32 %v16802_v18, %v16782_v45  ;;  %v16805_v0 = vpop.f32.mrf.mxu1 }
 0x3c1   : > { %v21146_v32 = vpop.f32.mrf.mxu0  ;;  %v4754_v36 = vadd.f32 %v16805_v0, %v21082_v28 }
 0x3c2   : > { %v21148_v20 = vpop.f32.mrf.mxu1 }
 0x3c3   : > { %v21153_v4 = vpop.f32.mrf.mxu0 }
 0x3c5   : > { %v21160_v12 = vpop.f32.mrf.mxu0  ;;  %v16808_v5 = vpop.f32.mrf.mxu1 }
 0x3c6   : > { %v4764_v24 = vadd.f32 %v16808_v5, %v21086_v49 }
 0x3c7   : > { %v16822_v26 = vpop.f32.mrf.mxu0  ;;  %v21172_v22 = vpop.f32.mrf.mxu1 }
 0x3c8   : > { %v4915_v61 = vadd.f32 %v16822_v26, %v4744_v17 }
 0x3c9   : > { %v21181_v7 = vpop.f32.mrf.mxu0 }
 0x3ca   : > { %v16839_v58 = vpop.f32.mrf.mxu1 }
 0x3cb   : > { %v16825_v31 = vpop.f32.mrf.mxu0 }
 0x3cc   : > { %v4989_v63 = vpop.f32.mrf.mxu1  ;;  %v4917_v16 = vadd.f32 %v16825_v31, %v4754_v36  ;;  %v4912_v31 = vadd.f32 %v21160_v12, %v4729_v43 }
 0x3cd   : > { %v21184_v44 = vpop.f32.mrf.mxu0 }
 0x3ce   : > { %v16842_v60 = vpop.f32.mrf.mxu1 }
 0x3cf   : > { %v5031_v11 = vadd.f32 %v16842_v60, %v4915_v61 }
 0x3d0   : > { %v16828_v42 = vpop.f32.mrf.mxu0  ;;  %v4999_v30 = vpop.f32.mrf.mxu1 }
 0x3d1   : > { %v4919_v55 = vadd.f32 %v16828_v42, %v4764_v24  ;;  %v4913_v24 = vadd.f32 %v21153_v4, %v4734_v8  ;;  %v5028_v42 = vadd.f32 %v4989_v63, %v4912_v31 }
 0x3d2   : > { %v21186_v15 = vpop.f32.mrf.mxu0  ;;  %v16845_v2 = vpop.f32.mrf.mxu1 }
 0x3d3   : > { %v5033_v10 = vadd.f32 %v16845_v2, %v4917_v16  ;;  %v5029_v16 = vadd.f32 %v16839_v58, %v4913_v24  ;;  %v4739_v2 = vadd.f32 %v21131_v34, %v21146_v32 }
 0x3d4   : > { %v16859_v49 = vpop.f32.mrf.mxu0  ;;  %v21188_v25 = vpop.f32.mrf.mxu1 }
 0x3d5   : > { %v4914_v12 = vadd.f32 %v21181_v7, %v4739_v2 }
 0x3d6   : > { %v5108_v9 = vpop.f32.mrf.mxu0 }
 0x3d7   : > { %v5147_v4 = vadd.f32 %v5108_v9, %v5028_v42  ;;  %v21221_v9 = vld [vmem:[%s25149_s4] ss:$0 sm:$0xff] }
 0x3d8   : > { %v16862_v46 = vpop.f32.mrf.mxu0 }
 0x3d9   : > { %v5150_v19 = vadd.f32 %v16862_v46, %v5031_v11 }
 0x3da   : > { %v5118_v41 = vpop.f32.mrf.mxu0 }
 0x3dc   : > { %v16865_v28 = vpop.f32.mrf.mxu0 }
 0x3dd   : > { %v5152_v47 = vadd.f32 %v16865_v28, %v5033_v10 }
 0x3de   : > { %v21193_v3 = vpop.f32.mrf.mxu0 }
 0x3e6   : > { %v16848_v50 = vpop.f32.mrf.mxu1 }
 0x3e7   : > { %v5035_v18 = vadd.f32 %v16848_v50, %v4919_v55  ;;  %v5148_v55 = vadd.f32 %v16859_v49, %v5029_v16  ;;  %v5030_v49 = vadd.f32 %v4999_v30, %v4914_v12 }
 0x3e8   : > { %v21195_v29 = vpop.f32.mrf.mxu1 }
 0x3e9   : > { %v16868_v38 = vpop.f32.mrf.mxu0 }
 0x3ea   : > { %v5154_v37 = vadd.f32 %v16868_v38, %v5035_v18  ;;  %v16879_v48 = vpop.f32.mrf.mxu1  ;;  %v5149_v18 = vadd.f32 %v5118_v41, %v5030_v49  ;;  %v4759_v41 = vadd.f32 %v21172_v22, %v21088_v21 }
 0x3eb   : > { %v21197_v45 = vpop.f32.mrf.mxu0  ;;  %v5266_v10 = vadd.f32 %v16879_v48, %v5148_v55 }
 0x3ec   : > { %v5226_v17 = vpop.f32.mrf.mxu1 }
 0x3ed   : > { %v16899_v0 = vpop.f32.mrf.mxu0 }
 0x3ee   : > { %v16882_v40 = vpop.f32.mrf.mxu1  ;;  %v5379_v28 = vadd.f32 %v16899_v0, %v5266_v10 }
 0x3ef   : > { %v5268_v56 = vadd.f32 %v16882_v40, %v5150_v19  ;;  %v5339_v53 = vpop.f32.mrf.mxu0  ;;  %v5265_v19 = vadd.f32 %v5226_v17, %v5147_v4  ;;  %v4749_v17 = vadd.f32 %v21148_v20, %v21084_v62  ;;  %v4918_v62 = vadd.f32 %v21186_v15, %v4759_v41  ;;  %v8375_v15 = vld [vmem:[%s25150_s5 + $0xa8] sm:$0xff] }
 0x3f0   : > { %v5236_v1 = vpop.f32.mrf.mxu1  ;;  %17081 = vmatprep.subr.mxu1 %v8375_v15 }
 0x3f1   : > { %v16902_v5 = vpop.f32.mrf.mxu0  ;;  %v5378_v50 = vadd.f32 %v5339_v53, %v5265_v19  ;;  %v5267_v0 = vadd.f32 %v5236_v1, %v5149_v18  ;;  %v5034_v22 = vadd.f32 %v21195_v29, %v4918_v62  ;;  %17082 = vmatpush3.msra.mxu1 %v8375_v15 }
 0x3f2   : > { %v16885_v26 = vpop.f32.mrf.mxu1  ;;  %v5381_v33 = vadd.f32 %v16902_v5, %v5268_v56  ;;  %v4916_v5 = vadd.f32 %v21184_v44, %v4749_v17 }
 0x3f3   : > { %v5270_v61 = vadd.f32 %v16885_v26, %v5152_v47  ;;  %v5349_v36 = vpop.f32.mrf.mxu0 }
 0x3f4   : > { %v21205_v60 = vpop.f32.mrf.mxu1  ;;  %v5380_v43 = vadd.f32 %v5349_v36, %v5267_v0  ;;  %v5032_v20 = vadd.f32 %v21188_v25, %v4916_v5 }
 0x3f5   : > { %v16905_v11 = vpop.f32.mrf.mxu0 }
 0x3f6   : > { %v16888_v27 = vpop.f32.mrf.mxu1  ;;  %v5383_v57 = vadd.f32 %v16905_v11, %v5270_v61  ;;  %v17627_v11 = vmov 1966171168   ;;  %v5151_v44 = vadd.f32 %v21193_v3, %v5032_v20  ;;  %v5153_v3 = vadd.f32 %v21197_v45, %v5034_v22 }
 0x3f7   : > { %v5272_v51 = vadd.f32 %v16888_v27, %v5154_v37  ;;  %v21209_v35 = vpop.f32.mrf.mxu0  ;;  %v5876_v42 = vunpack.c.l.s4 %v17627_v11 }
 0x3f8   : > { %v21211_v46 = vpop.f32.mrf.mxu1 }
 0x3f9   : > { %v16908_v58 = vpop.f32.mrf.mxu0  ;;  %v5877_v29 = vunpack.c.0.s8 %v5876_v42 }
 0x3fa   : > { %v21214_v47 = vadd.f32 %v16908_v58, %v5272_v51  ;;  %v16919_v63 = vpop.f32.mrf.mxu1 }
 0x3fb   : > { %v21216_v6 = vpop.f32.mrf.mxu0  ;;  %v5492_v34 = vadd.f32 %v16919_v63, %v5379_v28 }
 0x3fc   : > { %v5452_v32 = vpop.f32.mrf.mxu1 }
 0x3fd   : > { %v16939_v38 = vpop.f32.mrf.mxu0  ;;  %v5491_v7 = vadd.f32 %v5452_v32, %v5378_v50 }
 0x3fe   : > { %v16922_v37 = vpop.f32.mrf.mxu1  ;;  %v5605_v48 = vadd.f32 %v16939_v38, %v5492_v34  ;;  %v5271_v38 = vadd.f32 %v21211_v46, %v5153_v3 }
 0x3ff   : > { %v5565_v30 = vpop.f32.mrf.mxu0  ;;  %v5494_v40 = vadd.f32 %v16922_v37, %v5381_v33 }
 0x400   : > { %v5619_v56 = vadd.f32 %v21221_v9, %v5605_v48  ;;  %v5462_v53 = vpop.f32.mrf.mxu1  ;;  %v5604_v8 = vadd.f32 %v5565_v30, %v5491_v7  ;;  %v5384_v45 = vadd.f32 %v21216_v6, %v5271_v38 }
 0x401   : > { %v16942_v24 = vpop.f32.mrf.mxu0  ;;  %v5493_v1 = vadd.f32 %v5462_v53, %v5380_v43  ;;  %v25994_v53 = vld [vmem:[#allocation6_spill] sm:$0xff] }
 0x402   : > { %v5627_v26 = vmax.f32 %v5619_v56, 0.0  ;;  %v5618_v61 = vadd.f32 %v21221_v9, %v5604_v8  ;;  %v16925_v31 = vpop.f32.mrf.mxu1  ;;  %v5607_v16 = vadd.f32 %v16942_v24, %v5494_v40  ;;  %v21246_v8 = vsub.s32 %v5877_v29, %v25994_v53 }
 0x403   : > { %v5575_v33 = vpop.f32.mrf.mxu0  ;;  %v5496_v27 = vadd.f32 %v16925_v31, %v5383_v57  ;;  %v5269_v57 = vadd.f32 %v21205_v60, %v5151_v44 }
 0x404   : > { %v5626_v55 = vmax.f32 %v5618_v61, 0.0  ;;  %v5621_v21 = vadd.f32 %v21221_v9, %v5607_v16  ;;  %v5635_v36 = vmul.f32 0.25, %v5627_v26  ;;  %v5472_v2 = vpop.f32.mrf.mxu1  ;;  %v5606_v51 = vadd.f32 %v5575_v33, %v5493_v1  ;;  %25995 = vst [vmem:[#allocation53_spill] sm:$0xff] %v21246_v8 }
 0x405   : > { %v16945_v4 = vpop.f32.mrf.mxu0  ;;  %v5642_v25 = vmul.f32 0.75, %v5627_v26  ;;  %v5382_v50 = vadd.f32 %v21209_v35, %v5269_v57 }
 0x406   : > { %v5634_v10 = vmul.f32 0.25, %v5626_v55  ;;  %v5641_v12 = vmul.f32 0.75, %v5626_v55  ;;  %v5609_v58 = vadd.f32 %v16945_v4, %v5496_v27  ;;  %v5620_v19 = vadd.f32 %v21221_v9, %v5606_v51  ;;  %v16928_v32 = vpop.f32.mrf.mxu1 }
 0x407   : > { %v5629_v34 = vmax.f32 %v5621_v21, 0.0  ;;  %v5585_v30 = vpop.f32.mrf.mxu0  ;;  %v5495_v56 = vadd.f32 %v5472_v2, %v5382_v50  ;;  %v5498_v46 = vadd.f32 %v16928_v32, %v21214_v47 }
 0x408   : > { %v5649_v28 = vadd.f32 %v5641_v12, %v5634_v10  ;;  %v5650_v63 = vadd.f32 %v5642_v25, %v5634_v10  ;;  %v5658_v49 = vadd.f32 %v5641_v12, %v5635_v36  ;;  %v5623_v18 = vadd.f32 %v21221_v9, %v5609_v58  ;;  %v5482_v43 = vpop.f32.mrf.mxu1 }
 0x409   : > { %v5628_v0 = vmax.f32 %v5620_v19, 0.0  ;;  %v21250_v5 = vmul.f32 0.25, %v5629_v34  ;;  %v21256_v61 = vmul.f32 0.75, %v5629_v34  ;;  %v16948_v1 = vpop.f32.mrf.mxu0  ;;  %v5497_v47 = vadd.f32 %v5482_v43, %v5384_v45 }
 0x40a   : > { %v5682_v7 = vrot.slane %v5649_v28, 7  ;;  %v5683_v37 = vrot.slane %v5658_v49, 7  ;;  %v5684_v60 = vrot.slane %v5650_v63, 7  ;;  %v5731_v48 = vrot.slane %v5658_v49, 1 }
 0x40b   : > { %v5732_v17 = vrot.slane %v5650_v63, 1  ;;  %v5730_v40 = vrot.slane %v5649_v28, 1  ;;  %v5636_v62 = vmul.f32 0.25, %v5628_v0  ;;  %v5643_v20 = vmul.f32 0.75, %v5628_v0 }
 0x40c   : > { %v5763_v35 = vsel %vm911_vm1, %v5731_v48, %v5658_v49  ;;  %v5714_v24 = vsel %vm401_vm0, %v5649_v28, %v5682_v7  ;;  %v5715_v26 = vsel %vm401_vm0, %v5658_v49, %v5683_v37  ;;  %v5716_v6 = vsel %vm401_vm0, %v5650_v63, %v5684_v60 }
 0x40d   : > { %v5764_v41 = vsel %vm911_vm1, %v5732_v17, %v5650_v63  ;;  %v5827_v31 = vmul.f32 0.25, %v5763_v35  ;;  %v5762_v33 = vsel %vm911_vm1, %v5730_v40, %v5649_v28  ;;  %v21259_v11 = vmul.f32 0.75, %v5649_v28 }
 0x40e   : > { %v5828_v16 = vmul.f32 0.25, %v5764_v41  ;;  %v21261_v42 = vmul.f32 0.75, %v5658_v49  ;;  %v21263_v55 = vmul.f32 0.75, %v5650_v63  ;;  %v5651_v27 = vadd.f32 %v5643_v20, %v5635_v36  ;;  %v5595_v36 = vpop.f32.mrf.mxu0 }
 0x40f   : > { %v5652_v21 = vadd.f32 %v21256_v61, %v5636_v62  ;;  %v5659_v22 = vadd.f32 %v5642_v25, %v5636_v62  ;;  %v21266_v44 = vmul.f32 0.25, %v5714_v24  ;;  %v21268_v2 = vmul.f32 0.25, %v5715_v26 }
 0x410   : > { %v21270_v51 = vmul.f32 0.25, %v5716_v6  ;;  %v5660_v4 = vadd.f32 %v5643_v20, %v21250_v5  ;;  %v21274_v15 = vadd.f32 %v5827_v31, %v21261_v42  ;;  %v21277_v10 = vadd.f32 %v5828_v16, %v21263_v55 }
 0x411   : > { %v5685_v12 = vrot.slane %v5659_v22, 7  ;;  %v5631_v58 = vmax.f32 %v5623_v18, 0.0  ;;  %v5686_v57 = vrot.slane %v5651_v27, 7  ;;  %v5733_v19 = vrot.slane %v5659_v22, 1 }
 0x412   : > { %v5734_v25 = vrot.slane %v5651_v27, 1  ;;  %v5735_v29 = vrot.slane %v5660_v4, 1  ;;  %v21279_v3 = vmul.f32 0.25, %v5762_v33  ;;  %v5687_v28 = vrot.slane %v5660_v4, 7 }
 0x413   : > { %v5688_v63 = vrot.slane %v5652_v21, 7  ;;  %v5736_v49 = vrot.slane %v5652_v21, 1  ;;  %v5765_v50 = vsel %vm911_vm1, %v5733_v19, %v5659_v22  ;;  %v5608_v34 = vadd.f32 %v5585_v30, %v5495_v56 }
 0x414   : > { %v5611_v32 = vadd.f32 %v16948_v1, %v5498_v46  ;;  %v5610_v38 = vadd.f32 %v5595_v36, %v5497_v47  ;;  %v5766_v18 = vsel %vm911_vm1, %v5734_v25, %v5651_v27  ;;  %v5639_v37 = vmul.f32 0.25, %v5631_v58 }
 0x415   : > { %v5646_v60 = vmul.f32 0.75, %v5631_v58  ;;  %v5717_v17 = vsel %vm401_vm0, %v5659_v22, %v5685_v12  ;;  %v5718_v0 = vsel %vm401_vm0, %v5651_v27, %v5686_v57  ;;  %v5767_v45 = vsel %vm911_vm1, %v5735_v29, %v5660_v4 }
 0x416   : > { %v5719_v30 = vsel %vm401_vm0, %v5660_v4, %v5687_v28  ;;  %v5720_v40 = vsel %vm401_vm0, %v5652_v21, %v5688_v63  ;;  %v5768_v56 = vsel %vm911_vm1, %v5736_v49, %v5652_v21  ;;  %v5829_v35 = vmul.f32 0.25, %v5765_v50 }
 0x417   : > { %v5830_v41 = vmul.f32 0.25, %v5766_v18  ;;  %v5622_v46 = vadd.f32 %v21221_v9, %v5608_v34  ;;  %v5625_v43 = vadd.f32 %v21221_v9, %v5611_v32  ;;  %v5624_v24 = vadd.f32 %v21221_v9, %v5610_v38 }
 0x418   : > { %v21296_v26 = vmul.f32 0.25, %v5717_v17  ;;  %v21298_v6 = vmul.f32 0.25, %v5718_v0  ;;  %v21300_v31 = vmul.f32 0.75, %v5659_v22  ;;  %v5831_v16 = vmul.f32 0.25, %v5767_v45 }
 0x419   : > { %v21302_v62 = vmul.f32 0.75, %v5651_v27  ;;  %v5630_v20 = vmax.f32 %v5622_v46, 0.0  ;;  %v5633_v1 = vmax.f32 %v5625_v43, 0.0  ;;  %v5632_v33 = vmax.f32 %v5624_v24, 0.0 }
 0x41a   : > { %v21304_v47 = vmul.f32 0.75, %v5660_v4  ;;  %v21306_v12 = vmul.f32 0.75, %v5652_v21  ;;  %v5832_v58 = vmul.f32 0.25, %v5768_v56  ;;  %v21309_v36 = vadd.f32 %v5829_v35, %v21300_v31 }
 0x41b   : > { %v21312_v9 = vadd.f32 %v5830_v41, %v21302_v62  ;;  %v5638_v57 = vmul.f32 0.25, %v5630_v20  ;;  %v5645_v22 = vmul.f32 0.75, %v5630_v20  ;;  %v5648_v19 = vmul.f32 0.75, %v5633_v1 }
 0x41c   : > { %v21315_v27 = vadd.f32 %v5831_v16, %v21304_v47  ;;  %v5657_v25 = vmul.f32 0.25, %v5633_v1  ;;  %v5640_v29 = vmul.f32 0.25, %v5632_v33  ;;  %v5647_v28 = vmul.f32 0.75, %v5632_v33 }
 0x41d   : > { %v5653_v4 = vadd.f32 %v5645_v22, %v21250_v5  ;;  %v5654_v21 = vadd.f32 %v5646_v60, %v5638_v57  ;;  %v5661_v63 = vadd.f32 %v21256_v61, %v5638_v57  ;;  %v5662_v49 = vadd.f32 %v5645_v22, %v5639_v37 }
 0x41e   : > { %v21319_v50 = vadd.f32 %v5657_v25, %v5648_v19  ;;  %v21321_v34 = vadd.f32 %v5647_v28, %v5639_v37  ;;  %v21323_v32 = vadd.f32 %v5648_v19, %v5640_v29  ;;  %v21325_v38 = vadd.f32 %v5646_v60, %v5640_v29  ;;  %v8374_v37 = vld [vmem:[%s25150_s5 + $0xa0] sm:$0xff] }
 0x41f   : > { %v21328_v18 = vadd.f32 %v5832_v58, %v21306_v12  ;;  %v5689_v17 = vrot.slane %v5661_v63, 7  ;;  %v5690_v0 = vrot.slane %v5653_v4, 7  ;;  %v21332_v5 = vadd.f32 %v21259_v11, %v21266_v44  ;;  %17083 = vmatprep.subr.mxu1 %v8374_v37 }
 0x420   : > { %25996 = vst [vmem:[#allocation103_spill] sm:$0xff] %v21319_v50  ;;  %v5737_v45 = vrot.slane %v5661_v63, 1  ;;  %v5738_v61 = vrot.slane %v5653_v4, 1  ;;  %v5739_v56 = vrot.slane %v5662_v49, 1  ;;  %v5740_v35 = vrot.slane %v5654_v21, 1  ;;  %17084 = vmatpush3.msra.mxu1 %v8374_v37 }
 0x421   : > { %v21337_v41 = vmul.f32 0.25, %v5719_v30  ;;  %v21339_v60 = vmul.f32 0.25, %v5720_v40  ;;  %v5691_v43 = vrot.slane %v5662_v49, 7  ;;  %v5692_v24 = vrot.slane %v5654_v21, 7 }
 0x422   : > { %v5769_v44 = vsel %vm911_vm1, %v5737_v45, %v5661_v63  ;;  %v5770_v16 = vsel %vm911_vm1, %v5738_v61, %v5653_v4  ;;  %v5771_v20 = vsel %vm911_vm1, %v5739_v56, %v5662_v49  ;;  %v5772_v40 = vsel %vm911_vm1, %v5740_v35, %v5654_v21 }
 0x423   : > { %v21353_v33 = vadd.f32 %v21279_v3, %v21259_v11  ;;  %v5721_v57 = vsel %vm401_vm0, %v5661_v63, %v5689_v17  ;;  %v5722_v22 = vsel %vm401_vm0, %v5653_v4, %v5690_v0  ;;  %v5874_v19 = vcombine.high %v21332_v5, %v21332_v5 }
 0x424   : > { %v21361_v29 = vmul.f32 0.75, %v5661_v63  ;;  %v5833_v45 = vmul.f32 0.25, %v5769_v44  ;;  %v5834_v61 = vmul.f32 0.25, %v5770_v16  ;;  %v5835_v56 = vmul.f32 0.25, %v5771_v20 }
 0x425   : > { %v5723_v35 = vsel %vm401_vm0, %v5662_v49, %v5691_v43  ;;  %v5724_v11 = vsel %vm401_vm0, %v5654_v21, %v5692_v24  ;;  %v5836_v3 = vmul.f32 0.25, %v5772_v40  ;;  %v5664_v37 = vadd.f32 %v5657_v25, %v5647_v28 }
 0x426   : > { %v21365_v23 = vmul.f32 0.25, %v5721_v57  ;;  %v21367_v58 = vmul.f32 0.75, %v5653_v4  ;;  %v21369_v17 = vmul.f32 0.75, %v5662_v49  ;;  %v21372_v0 = vadd.f32 %v5833_v45, %v21361_v29 }
 0x427   : > { %v21374_v63 = vmul.f32 0.25, %v5722_v22  ;;  %v21376_v44 = vmul.f32 0.75, %v5654_v21  ;;  %v5693_v16 = vrot.slane %v21325_v38, 7  ;;  %v5694_v43 = vrot.slane %v21321_v34, 7 }
 0x428   : > { %v21380_v24 = vmul.f32 0.25, %v5723_v35  ;;  %v21382_v25 = vmul.f32 0.25, %v5724_v11  ;;  %v21385_v28 = vadd.f32 %v5834_v61, %v21367_v58  ;;  %v21388_v4 = vadd.f32 %v5835_v56, %v21369_v17 }
 0x429   : > { %v21391_v49 = vadd.f32 %v5836_v3, %v21376_v44  ;;  %v5695_v20 = vrot.slane %v5664_v37, 7  ;;  %v5696_v40 = vrot.slane %v21323_v32, 7  ;;  %v5725_v57 = vsel %vm401_vm0, %v21325_v38, %v5693_v16 }
 0x42a   : > { %v5726_v22 = vsel %vm401_vm0, %v21321_v34, %v5694_v43  ;;  %v5741_v45 = vrot.slane %v21325_v38, 1  ;;  %v5742_v61 = vrot.slane %v21321_v34, 1  ;;  %v5743_v11 = vrot.slane %v5664_v37, 1 }
 0x42b   : > { %v5727_v56 = vsel %vm401_vm0, %v5664_v37, %v5695_v20  ;;  %v5728_v35 = vsel %vm401_vm0, %v21323_v32, %v5696_v40  ;;  %v5744_v3 = vrot.slane %v21323_v32, 1  ;;  %v21419_v46 = vmul.f32 0.25, %v5725_v57 }
 0x42c   : > { %v5773_v43 = vsel %vm911_vm1, %v5741_v45, %v21325_v38  ;;  %v5774_v30 = vsel %vm911_vm1, %v5742_v61, %v21321_v34  ;;  %v5775_v40 = vsel %vm911_vm1, %v5743_v11, %v5664_v37  ;;  %v21421_v21 = vmul.f32 0.25, %v5726_v22 }
 0x42d   : > { %v5776_v1 = vsel %vm911_vm1, %v5744_v3, %v21323_v32  ;;  %v21423_v48 = vmul.f32 0.25, %v5727_v56  ;;  %v21425_v16 = vmul.f32 0.25, %v5728_v35  ;;  %v21428_v45 = vmul.f32 0.75, %v21325_v38 }
 0x42e   : > { %v5837_v61 = vmul.f32 0.25, %v5773_v43  ;;  %v5838_v7 = vmul.f32 0.25, %v5774_v30  ;;  %v5839_v53 = vmul.f32 0.25, %v5775_v40  ;;  %v5840_v20 = vmul.f32 0.25, %v5776_v1 }
 0x42f   : > { %25997 = vst [vmem:[#allocation54_spill] sm:$0xff] %v21425_v16  ;;  %v21431_v11 = vmul.f32 0.75, %v21321_v34  ;;  %v21433_v14 = vmul.f32 0.75, %v5664_v37  ;;  %v5881_v57 = vrot.slane %v21332_v5, %v21246_v8  ;;  %v6809_v22 = vrot.slane %v21353_v33, %v21246_v8 }
 0x430   : > { %v21440_v56 = vmul.f32 0.75, %v21323_v32  ;;  %v21443_v38 = vadd.f32 %v5837_v61, %v21428_v45  ;;  %v6802_v1 = vcombine.high %v21353_v33, %v21353_v33  ;;  %v5888_v34 = vrot.slane %v5874_v19, %v21246_v8 }
 0x431   : > { %25998 = vst [vmem:[#allocation12_spill] sm:$0xff] %v21433_v14  ;;  %v5889_v30 = vcombine.high %v5881_v57, %v5881_v57  ;;  %v5897_v37 = vrot.slane %v5881_v57, %v21246_v8  ;;  %v6817_v35 = vcombine.high %v6809_v22, %v6809_v22  ;;  %v6825_v5 = vrot.slane %v6809_v22, %v21246_v8 }
 0x432   : > { %25999 = vst [vmem:[#allocation9_spill] sm:$0xff] %v21440_v56  ;;  %v21451_v3 = vadd.f32 %v5838_v7, %v21431_v11  ;;  %v21454_v32 = vadd.f32 %v5839_v53, %v21433_v14  ;;  %v21457_v43 = vadd.f32 %v5840_v20, %v21440_v56  ;;  %v5890_v59 = vcombine.high %v5888_v34, %v5888_v34 }
 0x433   : > { %v5911_v19 = vrot.slane %v5889_v30, %v21246_v8  ;;  %v5919_v40 = vcombine.high %v5897_v37, %v5897_v37  ;;  %v6839_v61 = vrot.slane %v6817_v35, %v21246_v8  ;;  %v6847_v57 = vcombine.high %v6825_v5, %v6825_v5 }
 0x434   : > { %26000 = vst [vmem:[#allocation106_spill] sm:$0xff] %v21457_v43  ;;  %v7589_v22 = vrot.slane %v6825_v5, %v26001_v13  ;;  %v5904_v7 = vrot.slane %v5888_v34, %v21246_v8  ;;  %v6816_v53 = vrot.slane %v6802_v1, %v21246_v8  ;;  %v5918_v30 = vrot.slane %v5890_v59, %v21246_v8 }
 0x435   : > { %v5921_v50 = vcombine.high %v5911_v19, %v5911_v19  ;;  %v6849_v54 = vcombine.high %v6839_v61, %v6839_v61  ;;  %v7593_v20 = vrot.slane %v6839_v61, %v26001_v13  ;;  %v7597_v52 = vrot.slane %v6847_v57, %v26001_v13 }
 0x436   : > { %v8226_v33 = vsel %vm401_vm0, %v5897_v37, %v7589_v22  ;;  %v5920_v43 = vcombine.high %v5904_v7, %v5904_v7  ;;  %v6818_v35 = vcombine.high %v6816_v53, %v6816_v53  ;;  %v6832_v1 = vrot.slane %v6816_v53, %v21246_v8 }
 0x437   : > { %v7601_v56 = vrot.slane %v6849_v54, %v26001_v13  ;;  %v8227_v5 = vsel %vm401_vm0, %v5911_v19, %v7593_v20  ;;  %v8228_v34 = vsel %vm401_vm0, %v5919_v40, %v7597_v52  ;;  %v5922_v14 = vcombine.high %v5918_v30, %v5918_v30 }
 0x438   : > { %v8555_v16 = vcombine.low %v8226_v33, %v8227_v5  ;;  %v6846_v61 = vrot.slane %v6818_v35, %v21246_v8  ;;  %v5811_v57 = vadd.f32 %v21261_v42, %v21268_v2  ;;  %v6848_v59 = vcombine.high %v6832_v1, %v6832_v1 }
 0x439   : > { %v8229_v37 = vsel %vm401_vm0, %v5921_v50, %v7601_v56  ;;  %v7605_v22 = vrot.slane %v6832_v1, %v26001_v13  ;;  %v6858_v54 = vrot.slane %v21274_v15, %v21246_v8 }
 0x43a   : > { %v8556_v19 = vcombine.low %v8228_v34, %v8229_v37  ;;  %v8563_v52 = vrot.slane %v8555_v16, %v25564_v39  ;;  %v6850_v40 = vcombine.high %v6846_v61, %v6846_v61  ;;  %v7609_v33 = vrot.slane %v6846_v61, %v26001_v13 }
 0x43b   : > { %v7613_v53 = vrot.slane %v6848_v59, %v26001_v13  ;;  %v8230_v20 = vsel %vm401_vm0, %v5904_v7, %v7605_v22  ;;  %v5923_v35 = vcombine.high %v5811_v57, %v5811_v57  ;;  %v5930_v42 = vrot.slane %v5811_v57, %v21246_v8  ;;  %v8373_v22 = vld [vmem:[%s25150_s5 + $0x98] sm:$0xff] }
 0x43c   : > { %v8570_v2 = vrot.slane %v8556_v19, %v25564_v39  ;;  %v7617_v50 = vrot.slane %v6850_v40, %v26001_v13  ;;  %v8231_v56 = vsel %vm401_vm0, %v5918_v30, %v7609_v33  ;;  %v6866_v5 = vcombine.high %v6858_v54, %v6858_v54  ;;  %17085 = vmatprep.subr.mxu1 %v8373_v22 }
 0x43d   : > { %v8232_v34 = vsel %vm401_vm0, %v5920_v43, %v7613_v53  ;;  %v8572_v16 = vcombine.low %v8230_v20, %v8231_v56  ;;  %v5938_v1 = vcombine.high %v5930_v42, %v5930_v42  ;;  %v5946_v61 = vrot.slane %v5930_v42, %v21246_v8  ;;  %17086 = vmatpush3.msra.mxu1 %v8373_v22 }
 0x43e   : > { %v8571_v37 = vcombine.low %v8563_v52, %v8570_v2  ;;  %v8233_v59 = vsel %vm401_vm0, %v5922_v14, %v7617_v50  ;;  %v6874_v7 = vrot.slane %v6858_v54, %v21246_v8  ;;  %v6888_v57 = vrot.slane %v6866_v5, %v21246_v8 }
 0x43f   : > { %v8573_v19 = vcombine.low %v8232_v34, %v8233_v59  ;;  %v8580_v43 = vrot.slane %v8572_v16, %v25564_v39  ;;  %v5960_v40 = vrot.slane %v5938_v1, %v21246_v8  ;;  %v5968_v20 = vcombine.high %v5946_v61, %v5946_v61 }
 0x440   : > { %v9099_v52 = vrot.slane %v8571_v37, 7  ;;  %v6896_v33 = vcombine.high %v6874_v7, %v6874_v7  ;;  %v6898_v14 = vcombine.high %v6888_v57, %v6888_v57  ;;  %v7621_v54 = vrot.slane %v6874_v7, %v26001_v13 }
 0x441   : > { %v8587_v53 = vrot.slane %v8573_v19, %v25564_v39  ;;  %v7625_v42 = vrot.slane %v6888_v57, %v26001_v13  ;;  %v5937_v2 = vrot.slane %v5923_v35, %v21246_v8  ;;  %v5970_v56 = vcombine.high %v5960_v40, %v5960_v40 }
 0x442   : > { %v21506_v50 = vsel %vm401_vm0, 0.0, %v9099_v52  ;;  %v7629_v5 = vrot.slane %v6896_v33, %v26001_v13  ;;  %v7633_v34 = vrot.slane %v6898_v14, %v26001_v13  ;;  %v8234_v37 = vsel %vm401_vm0, %v5946_v61, %v7621_v54 }
 0x443   : > { %26002 = vst [vmem:[#allocation55_spill] sm:$0xff] %v21506_v50  ;;  %17032 = vmatprep.mubr.msk.f32.mxu0 %vm9319_vm12, %v21506_v50  ;;  %v8588_v1 = vcombine.low %v8580_v43, %v8587_v53  ;;  %v8235_v59 = vsel %vm401_vm0, %v5960_v40, %v7625_v42  ;;  %v5939_v22 = vcombine.high %v5937_v2, %v5937_v2  ;;  %v9244_v43 = vrot.slane %v21506_v50, 1 }
 0x444   : > { %v8236_v35 = vsel %vm401_vm0, %v5968_v20, %v7629_v5  ;;  %v8237_v7 = vsel %vm401_vm0, %v5970_v56, %v7633_v34  ;;  %v8589_v57 = vcombine.low %v8234_v37, %v8235_v59  ;;  %v5953_v14 = vrot.slane %v5937_v2, %v21246_v8 }
 0x445   : > { %v9100_v19 = vrot.slane %v8588_v1, 7  ;;  %v8590_v33 = vcombine.low %v8236_v35, %v8237_v7  ;;  %v26003_v16 = vcombine.high %v21274_v15, %v21274_v15  ;;  %v5967_v61 = vrot.slane %v5939_v22, %v21246_v8 }
 0x446   : > { %v5812_v40 = vadd.f32 %v21263_v55, %v21270_v51  ;;  %v6907_v54 = vrot.slane %v21277_v10, %v21246_v8  ;;  %v8597_v20 = vrot.slane %v8589_v57, %v25564_v39  ;;  %v5969_v51 = vcombine.high %v5953_v14, %v5953_v14 }
 0x447   : > { %v6865_v30 = vrot.slane %v26003_v16, %v21246_v8  ;;  %v21530_v53 = vsel %vm401_vm0, %v9099_v52, %v9100_v19  ;;  %v8604_v42 = vrot.slane %v8590_v33, %v25564_v39  ;;  %v21535_v15 = vsel %vm401_vm0, %v9100_v19, 0.0 }
 0x448   : > { %26004 = vst [vmem:[#allocation63_spill] sm:$0xff] %v21530_v53  ;;  %26005 = vst [vmem:[#allocation107_spill] sm:$0xff] %v21535_v15  ;;  %v9245_v2 = vrot.slane %v21530_v53, 1  ;;  %17033 = vmatmul.mubr.msk.f32.gmra.mxu0 %vm9319_vm12, %v21530_v53  ;;  %v9247_v55 = vrot.slane %v21535_v15, 1  ;;  %v5971_v56 = vcombine.high %v5967_v61, %v5967_v61  ;;  %v5972_v16 = vcombine.high %v5812_v40, %v5812_v40 }
 0x449   : > { %v8605_v5 = vcombine.low %v8597_v20, %v8604_v42  ;;  %v6867_v34 = vcombine.high %v6865_v30, %v6865_v30  ;;  %v6881_v52 = vrot.slane %v6865_v30, %v21246_v8  ;;  %v5979_v59 = vrot.slane %v5812_v40, %v21246_v8 }
 0x44a   : > { %v21543_v1 = vsel %vm911_vm1, %v9244_v43, %v9245_v2  ;;  %v21546_v37 = vsel %vm911_vm1, %v9245_v2, %v9247_v55  ;;  %v6915_v35 = vcombine.high %v6907_v54, %v6907_v54  ;;  %v6923_v43 = vrot.slane %v6907_v54, %v21246_v8 }
 0x44b   : > { %26006 = vst [vmem:[#allocation56_spill] sm:$0xff] %v21543_v1  ;;  %26007 = vst [vmem:[#allocation64_spill] sm:$0xff] %v21546_v37  ;;  %v21549_v7 = vrot.slane %v8605_v5, 7  ;;  %16968 = vmatprep.mubr.msk.f32.mxu1 %vm9319_vm12, %v21543_v1  ;;  %v6895_v57 = vrot.slane %v6867_v34, %v21246_v8  ;;  %v6897_v22 = vcombine.high %v6881_v52, %v6881_v52 }
 0x44c   : > { %v7637_v30 = vrot.slane %v6881_v52, %v26001_v13  ;;  %16969 = vmatmul.mubr.msk.f32.gmra.mxu1 %vm9319_vm12, %v21546_v37  ;;  %v5987_v19 = vcombine.high %v5979_v59, %v5979_v59  ;;  %v5995_v33 = vrot.slane %v5979_v59, %v21246_v8  ;;  %v6937_v40 = vrot.slane %v6915_v35, %v21246_v8 }
 0x44d   : > { %v21562_v20 = vsel %vm401_vm0, 0.0, %v21549_v7  ;;  %v6899_v42 = vcombine.high %v6895_v57, %v6895_v57  ;;  %v7641_v2 = vrot.slane %v6895_v57, %v26001_v13  ;;  %v7645_v55 = vrot.slane %v6897_v22, %v26001_v13 }
 0x44e   : > { %26008 = vst [vmem:[#allocation57_spill] sm:$0xff] %v21562_v20  ;;  %17035 = vmatprep.mubr.msk.f32.mxu0 %vm9319_vm12, %v21562_v20  ;;  %v8238_v5 = vsel %vm401_vm0, %v5953_v14, %v7637_v30  ;;  %v9249_v34 = vrot.slane %v21562_v20, 1  ;;  %v6009_v54 = vrot.slane %v5987_v19, %v21246_v8  ;;  %v6017_v52 = vcombine.high %v5995_v33, %v5995_v33 }
 0x44f   : > { %v7649_v59 = vrot.slane %v6899_v42, %v26001_v13  ;;  %v8239_v35 = vsel %vm401_vm0, %v5967_v61, %v7641_v2  ;;  %v8240_v37 = vsel %vm401_vm0, %v5969_v51, %v7645_v55  ;;  %v6945_v1 = vcombine.high %v6923_v43, %v6923_v43 }
 0x450   : > { %v8606_v57 = vcombine.low %v8238_v5, %v8239_v35  ;;  %v6019_v15 = vcombine.high %v6009_v54, %v6009_v54  ;;  %v6947_v22 = vcombine.high %v6937_v40, %v6937_v40  ;;  %v7653_v53 = vrot.slane %v6923_v43, %v26001_v13 }
 0x451   : > { %v8241_v50 = vsel %vm401_vm0, %v5971_v56, %v7649_v59  ;;  %v7657_v14 = vrot.slane %v6937_v40, %v26001_v13  ;;  %v7661_v30 = vrot.slane %v6945_v1, %v26001_v13  ;;  %v5986_v19 = vrot.slane %v5972_v16, %v21246_v8 }
 0x452   : > { %v8607_v20 = vcombine.low %v8240_v37, %v8241_v50  ;;  %v8614_v42 = vrot.slane %v8606_v57, %v25564_v39  ;;  %v7665_v61 = vrot.slane %v6947_v22, %v26001_v13  ;;  %v8242_v51 = vsel %vm401_vm0, %v5995_v33, %v7653_v53 }
 0x453   : > { %v8243_v2 = vsel %vm401_vm0, %v6009_v54, %v7657_v14  ;;  %v8244_v55 = vsel %vm401_vm0, %v6017_v52, %v7661_v30  ;;  %v5988_v43 = vcombine.high %v5986_v19, %v5986_v19  ;;  %v6002_v56 = vrot.slane %v5986_v19, %v21246_v8 }
 0x454   : > { %v8621_v40 = vrot.slane %v8607_v20, %v25564_v39  ;;  %v8245_v1 = vsel %vm401_vm0, %v6019_v15, %v7665_v61  ;;  %v8623_v5 = vcombine.low %v8242_v51, %v8243_v2  ;;  %v26009_v50 = vcombine.high %v21277_v10, %v21277_v10 }
 0x455   : > { %v8624_v37 = vcombine.low %v8244_v55, %v8245_v1  ;;  %v6016_v53 = vrot.slane %v5988_v43, %v21246_v8  ;;  %v6018_v33 = vcombine.high %v6002_v56, %v6002_v56  ;;  %v5813_v54 = vadd.f32 %v21300_v31, %v21296_v26 }
 0x456   : > { %v6914_v16 = vrot.slane %v26009_v50, %v21246_v8  ;;  %v8622_v52 = vcombine.low %v8614_v42, %v8621_v40  ;;  %v8631_v59 = vrot.slane %v8623_v5, %v25564_v39  ;;  %v6956_v42 = vrot.slane %v21309_v36, %v21246_v8 }
 0x457   : > { %v8638_v15 = vrot.slane %v8624_v37, %v25564_v39  ;;  %v6020_v57 = vcombine.high %v6016_v53, %v6016_v53  ;;  %v6021_v22 = vcombine.high %v5813_v54, %v5813_v54  ;;  %v6028_v10 = vrot.slane %v5813_v54, %v21246_v8 }
 0x458   : > { %v6916_v35 = vcombine.high %v6914_v16, %v6914_v16  ;;  %v6930_v20 = vrot.slane %v6914_v16, %v21246_v8  ;;  %v9103_v14 = vrot.slane %v8622_v52, 7 }
 0x459   : > { %v8639_v51 = vcombine.low %v8631_v59, %v8638_v15  ;;  %v6036_v26 = vcombine.high %v6028_v10, %v6028_v10  ;;  %v6044_v31 = vrot.slane %v6028_v10, %v21246_v8  ;;  %v8372_v10 = vld [vmem:[%s25150_s5 + $0x90] sm:$0xff] }
 0x45a   : > { %v6944_v30 = vrot.slane %v6916_v35, %v21246_v8  ;;  %v6946_v19 = vcombine.high %v6930_v20, %v6930_v20  ;;  %v7669_v61 = vrot.slane %v6930_v20, %v26001_v13  ;;  %v21605_v2 = vsel %vm401_vm0, %v21549_v7, %v9103_v14  ;;  %17087 = vmatprep.subr.mxu1 %v8372_v10 }
 0x45b   : > { %26010 = vst [vmem:[#allocation58_spill] sm:$0xff] %v21605_v2  ;;  %v21608_v55 = vsel %vm401_vm0, %v9103_v14, 0.0  ;;  %17036 = vmatmul.mubr.msk.f32.gmra.mxu0 %vm9319_vm12, %v21605_v2  ;;  %v9250_v1 = vrot.slane %v21605_v2, 1  ;;  %v9105_v5 = vrot.slane %v8639_v51, 7  ;;  %v6058_v52 = vrot.slane %v6036_v26, %v21246_v8  ;;  %17088 = vmatpush3.msra.mxu1 %v8372_v10 }
 0x45c   : > { %v6948_v43 = vcombine.high %v6944_v30, %v6944_v30  ;;  %v7673_v40 = vrot.slane %v6944_v30, %v26001_v13  ;;  %v9252_v50 = vrot.slane %v21608_v55, 1  ;;  %v7677_v16 = vrot.slane %v6946_v19, %v26001_v13 }
 0x45d   : > { %v8246_v7 = vsel %vm401_vm0, %v6002_v56, %v7669_v61  ;;  %v21621_v59 = vsel %vm911_vm1, %v9249_v34, %v9250_v1  ;;  %v21624_v35 = vsel %vm401_vm0, 0.0, %v9105_v5  ;;  %v6066_v14 = vcombine.high %v6044_v31, %v6044_v31 }
 0x45e   : > { %v7681_v37 = vrot.slane %v6948_v43, %v26001_v13  ;;  %v8247_v54 = vsel %vm401_vm0, %v6016_v53, %v7673_v40  ;;  %26011 = vst [vmem:[#allocation59_spill] sm:$0xff] %v21621_v59  ;;  %26012 = vst [vmem:[#allocation77_spill] sm:$0xff] %v21624_v35  ;;  %v21627_v20 = vsel %vm911_vm1, %v9250_v1, %v9252_v50  ;;  %16971 = vmatprep.mubr.msk.f32.mxu1 %vm9319_vm12, %v21621_v59 }
 0x45f   : > { %26013 = vst [vmem:[#allocation13_spill] sm:$0xff] %v21627_v20  ;;  %v8248_v15 = vsel %vm401_vm0, %v6018_v33, %v7677_v16  ;;  %17038 = vmatprep.mubr.msk.f32.mxu0 %vm9319_vm12, %v21624_v35  ;;  %v8640_v56 = vcombine.low %v8246_v7, %v8247_v54  ;;  %v9254_v53 = vrot.slane %v21624_v35, 1  ;;  %16972 = vmatmul.mubr.msk.f32.gmra.mxu1 %vm9319_vm12, %v21627_v20 }
 0x460   : > { %v8249_v34 = vsel %vm401_vm0, %v6020_v57, %v7681_v37  ;;  %v6068_v30 = vcombine.high %v6058_v52, %v6058_v52  ;;  %v6964_v19 = vcombine.high %v6956_v42, %v6956_v42  ;;  %v6972_v61 = vrot.slane %v6956_v42, %v21246_v8 }
 0x461   : > { %v8641_v33 = vcombine.low %v8248_v15, %v8249_v34  ;;  %v8648_v51 = vrot.slane %v8640_v56, %v25564_v39  ;;  %v6035_v26 = vrot.slane %v6021_v22, %v21246_v8  ;;  %v26014_v57 = vcombine.high %v21309_v36, %v21309_v36 }
 0x462   : > { %v5814_v40 = vadd.f32 %v21302_v62, %v21298_v6  ;;  %v6986_v50 = vrot.slane %v6964_v19, %v21246_v8  ;;  %v6994_v16 = vcombine.high %v6972_v61, %v6972_v61  ;;  %v7685_v42 = vrot.slane %v6972_v61, %v26001_v13 }
 0x463   : > { %v6963_v43 = vrot.slane %v26014_v57, %v21246_v8  ;;  %v8655_v1 = vrot.slane %v8641_v33, %v25564_v39  ;;  %v6037_v37 = vcombine.high %v6035_v26, %v6035_v26  ;;  %v6051_v22 = vrot.slane %v6035_v26, %v21246_v8 }
 0x464   : > { %v6996_v15 = vcombine.high %v6986_v50, %v6986_v50  ;;  %v7689_v34 = vrot.slane %v6986_v50, %v26001_v13  ;;  %v7693_v6 = vrot.slane %v6994_v16, %v26001_v13  ;;  %v8250_v62 = vsel %vm401_vm0, %v6044_v31, %v7685_v42 }
 0x465   : > { %v6965_v7 = vcombine.high %v6963_v43, %v6963_v43  ;;  %v6979_v54 = vrot.slane %v6963_v43, %v21246_v8  ;;  %v8656_v36 = vcombine.low %v8648_v51, %v8655_v1  ;;  %v6065_v56 = vrot.slane %v6037_v37, %v21246_v8 }
 0x466   : > { %v6067_v33 = vcombine.high %v6051_v22, %v6051_v22  ;;  %v7697_v61 = vrot.slane %v6996_v15, %v26001_v13  ;;  %v8251_v26 = vsel %vm401_vm0, %v6058_v52, %v7689_v34  ;;  %v8252_v57 = vsel %vm401_vm0, %v6066_v14, %v7693_v6 }
 0x467   : > { %v6993_v19 = vrot.slane %v6965_v7, %v21246_v8  ;;  %v9106_v10 = vrot.slane %v8656_v36, 7  ;;  %v8657_v51 = vcombine.low %v8250_v62, %v8251_v26  ;;  %v6069_v43 = vcombine.high %v6065_v56, %v6065_v56 }
 0x468   : > { %v6995_v1 = vcombine.high %v6979_v54, %v6979_v54  ;;  %v8253_v31 = vsel %vm401_vm0, %v6068_v30, %v7697_v61  ;;  %v7701_v37 = vrot.slane %v6979_v54, %v26001_v13 }
 0x469   : > { %v6997_v50 = vcombine.high %v6993_v19, %v6993_v19  ;;  %v21664_v16 = vsel %vm401_vm0, %v9105_v5, %v9106_v10  ;;  %v21668_v42 = vsel %vm401_vm0, %v9106_v10, 0.0  ;;  %v8658_v14 = vcombine.low %v8252_v57, %v8253_v31 }
 0x46a   : > { %26015 = vst [vmem:[#allocation60_spill] sm:$0xff] %v21664_v16  ;;  %17039 = vmatmul.mubr.msk.f32.gmra.mxu0 %vm9319_vm12, %v21664_v16  ;;  %v9255_v52 = vrot.slane %v21664_v16, 1  ;;  %v8665_v7 = vrot.slane %v8657_v51, %v25564_v39  ;;  %v9257_v36 = vrot.slane %v21668_v42, 1  ;;  %v7705_v5 = vrot.slane %v6993_v19, %v26001_v13 }
 0x46b   : > { %v7709_v15 = vrot.slane %v6995_v1, %v26001_v13  ;;  %v7713_v30 = vrot.slane %v6997_v50, %v26001_v13  ;;  %v8254_v34 = vsel %vm401_vm0, %v6051_v22, %v7701_v37  ;;  %v8672_v6 = vrot.slane %v8658_v14, %v25564_v39 }
 0x46c   : > { %v21681_v54 = vsel %vm911_vm1, %v9254_v53, %v9255_v52  ;;  %v21685_v62 = vsel %vm911_vm1, %v9255_v52, %v9257_v36  ;;  %v6070_v10 = vcombine.high %v5814_v40, %v5814_v40  ;;  %v8255_v19 = vsel %vm401_vm0, %v6065_v56, %v7705_v5 }
 0x46d   : > { %26016 = vst [vmem:[#allocation14_spill] sm:$0xff] %v21681_v54  ;;  %26017 = vst [vmem:[#allocation78_spill] sm:$0xff] %v21685_v62  ;;  %16974 = vmatprep.mubr.msk.f32.mxu1 %vm9319_vm12, %v21681_v54  ;;  %v8256_v61 = vsel %vm401_vm0, %v6067_v33, %v7709_v15  ;;  %v8257_v26 = vsel %vm401_vm0, %v6069_v43, %v7713_v30  ;;  %v6077_v22 = vrot.slane %v5814_v40, %v21246_v8 }
 0x46e   : > { %v8673_v57 = vcombine.low %v8665_v7, %v8672_v6  ;;  %16975 = vmatmul.mubr.msk.f32.gmra.mxu1 %vm9319_vm12, %v21685_v62  ;;  %v8674_v53 = vcombine.low %v8254_v34, %v8255_v19  ;;  %v8675_v51 = vcombine.low %v8256_v61, %v8257_v26  ;;  %v7005_v1 = vrot.slane %v21312_v9, %v21246_v8 }
 0x46f   : > { %v6085_v50 = vcombine.high %v6077_v22, %v6077_v22  ;;  %v6093_v31 = vrot.slane %v6077_v22, %v21246_v8  ;;  %v6084_v56 = vrot.slane %v6070_v10, %v21246_v8  ;;  %v26018_v33 = vcombine.high %v21312_v9, %v21312_v9 }
 0x470   : > { %v9108_v40 = vrot.slane %v8673_v57, 7  ;;  %v8682_v37 = vrot.slane %v8674_v53, %v25564_v39  ;;  %v8689_v52 = vrot.slane %v8675_v51, %v25564_v39  ;;  %v7013_v14 = vcombine.high %v7005_v1, %v7005_v1 }
 0x471   : > { %v7012_v43 = vrot.slane %v26018_v33, %v21246_v8  ;;  %v6107_v7 = vrot.slane %v6085_v50, %v21246_v8  ;;  %v6115_v36 = vcombine.high %v6093_v31, %v6093_v31  ;;  %v7021_v5 = vrot.slane %v7005_v1, %v21246_v8 }
 0x472   : > { %v6086_v15 = vcombine.high %v6084_v56, %v6084_v56  ;;  %v21708_v30 = vsel %vm401_vm0, 0.0, %v9108_v40  ;;  %v8690_v34 = vcombine.low %v8682_v37, %v8689_v52  ;;  %v7035_v6 = vrot.slane %v7013_v14, %v21246_v8  ;;  %v8385_v37 = vld [vmem:[%s25150_s5 + $0xf8] sm:$0xff] }
 0x473   : > { %26019 = vst [vmem:[#allocation66_spill] sm:$0xff] %v21708_v30  ;;  %v6100_v9 = vrot.slane %v6084_v56, %v21246_v8  ;;  %17041 = vmatprep.mubr.msk.f32.mxu0 %vm9319_vm12, %v21708_v30  ;;  %v9259_v10 = vrot.slane %v21708_v30, 1  ;;  %v6117_v19 = vcombine.high %v6107_v7, %v6107_v7  ;;  %v7043_v61 = vcombine.high %v7021_v5, %v7021_v5 }
 0x474   : > { %v7717_v26 = vrot.slane %v7021_v5, %v26001_v13  ;;  %v9109_v22 = vrot.slane %v8690_v34, 7  ;;  %v7045_v57 = vcombine.high %v7035_v6, %v7035_v6  ;;  %v7721_v53 = vrot.slane %v7035_v6, %v26001_v13  ;;  %17141 = vmatprep.subr.mxu0 %v8385_v37 }
 0x475   : > { %v6114_v51 = vrot.slane %v6086_v15, %v21246_v8  ;;  %v7725_v1 = vrot.slane %v7043_v61, %v26001_v13  ;;  %v6116_v56 = vcombine.high %v6100_v9, %v6100_v9  ;;  %v7014_v33 = vcombine.high %v7012_v43, %v7012_v43  ;;  %17142 = vmatpush3.msra.mxu0 %v8385_v37 }
 0x476   : > { %v8258_v50 = vsel %vm401_vm0, %v6093_v31, %v7717_v26  ;;  %v21724_v52 = vsel %vm401_vm0, %v9108_v40, %v9109_v22  ;;  %v7729_v14 = vrot.slane %v7045_v57, %v26001_v13  ;;  %v8259_v5 = vsel %vm401_vm0, %v6107_v7, %v7721_v53 }
 0x477   : > { %26020 = vst [vmem:[#allocation22_spill] sm:$0xff] %v21724_v52  ;;  %v21729_v34 = vsel %vm401_vm0, %v9109_v22, 0.0  ;;  %17042 = vmatmul.mubr.msk.f32.gmra.mxu0 %vm9319_vm12, %v21724_v52  ;;  %v9260_v31 = vrot.slane %v21724_v52, 1  ;;  %v8260_v15 = vsel %vm401_vm0, %v6115_v36, %v7725_v1  ;;  %v8691_v6 = vcombine.low %v8258_v50, %v8259_v5 }
 0x478   : > { %v9262_v61 = vrot.slane %v21729_v34, 1  ;;  %v8261_v40 = vsel %vm401_vm0, %v6117_v19, %v7729_v14  ;;  %v6118_v26 = vcombine.high %v6114_v51, %v6114_v51  ;;  %v7028_v57 = vrot.slane %v7012_v43, %v21246_v8 }
 0x479   : > { %v7042_v7 = vrot.slane %v7014_v33, %v21246_v8  ;;  %v21740_v22 = vsel %vm911_vm1, %v9259_v10, %v9260_v31  ;;  %v8692_v53 = vcombine.low %v8260_v15, %v8261_v40  ;;  %v8699_v62 = vrot.slane %v8691_v6, %v25564_v39 }
 0x47a   : > { %26021 = vst [vmem:[#allocation71_spill] sm:$0xff] %v21740_v22  ;;  %v21744_v54 = vsel %vm911_vm1, %v9260_v31, %v9262_v61  ;;  %16977 = vmatprep.mubr.msk.f32.mxu1 %vm9319_vm12, %v21740_v22  ;;  %v7044_v36 = vcombine.high %v7028_v57, %v7028_v57  ;;  %v7733_v1 = vrot.slane %v7028_v57, %v26001_v13  ;;  %v8384_v57 = vld [vmem:[%s25150_s5 + $0xf0] sm:$0xff] }
 0x47b   : > { %26022 = vst [vmem:[#allocation85_spill] sm:$0xff] %v21744_v54  ;;  %v7046_v19 = vcombine.high %v7042_v7, %v7042_v7  ;;  %v7737_v43 = vrot.slane %v7042_v7, %v26001_v13  ;;  %v8706_v50 = vrot.slane %v8692_v53, %v25564_v39  ;;  %16978 = vmatmul.mubr.msk.f32.gmra.mxu1 %vm9319_vm12, %v21744_v54 }
 0x47c   : > { %v5815_v10 = vadd.f32 %v21304_v47, %v21337_v41  ;;  %v7054_v33 = vrot.slane %v21315_v27, %v21246_v8  ;;  %v26023_v37 = vcombine.high %v21315_v27, %v21315_v27  ;;  %v7741_v5 = vrot.slane %v7044_v36, %v26001_v13  ;;  %v8371_v27 = vld [vmem:[%s25150_s5 + $0x88] sm:$0xff]  ;;  %17143 = vmatprep.subr.mxu0 %v8384_v57 }
 0x47d   : > { %v7745_v31 = vrot.slane %v7046_v19, %v26001_v13  ;;  %v8262_v15 = vsel %vm401_vm0, %v6100_v9, %v7733_v1  ;;  %v8263_v6 = vsel %vm401_vm0, %v6114_v51, %v7737_v43  ;;  %v8707_v61 = vcombine.low %v8699_v62, %v8706_v50  ;;  %17089 = vmatprep.subr.mxu1 %v8371_v27 }
 0x47e   : > { %v21761_v14 = vrot.slane %v26023_v37, %v21246_v8  ;;  %v8708_v40 = vcombine.low %v8262_v15, %v8263_v6  ;;  %v6119_v47 = vcombine.high %v5815_v10, %v5815_v10  ;;  %v6126_v41 = vrot.slane %v5815_v10, %v21246_v8  ;;  %17144 = vmatpush3.msra.mxu0 %v8384_v57 }
 0x47f   : > { %v8264_v7 = vsel %vm401_vm0, %v6116_v56, %v7741_v5  ;;  %v8265_v53 = vsel %vm401_vm0, %v6118_v26, %v7745_v31  ;;  %v7062_v9 = vcombine.high %v7054_v33, %v7054_v33  ;;  %v7070_v51 = vrot.slane %v7054_v33, %v21246_v8  ;;  %17090 = vmatpush3.msra.mxu1 %v8371_v27 }
 0x480   : > { %v9111_v62 = vrot.slane %v8707_v61, 7  ;;  %v8709_v36 = vcombine.low %v8264_v7, %v8265_v53  ;;  %v8716_v19 = vrot.slane %v8708_v40, %v25564_v39  ;;  %v6134_v1 = vcombine.high %v6126_v41, %v6126_v41 }
 0x481   : > { %v6142_v43 = vrot.slane %v6126_v41, %v21246_v8  ;;  %v7084_v50 = vrot.slane %v7062_v9, %v21246_v8  ;;  %v7092_v10 = vcombine.high %v7070_v51, %v7070_v51  ;;  %v7749_v56 = vrot.slane %v7070_v51, %v26001_v13 }
 0x482   : > { %v21782_v26 = vsel %vm401_vm0, 0.0, %v9111_v62  ;;  %v8723_v33 = vrot.slane %v8709_v36, %v25564_v39  ;;  %v6156_v37 = vrot.slane %v6134_v1, %v21246_v8  ;;  %v6133_v5 = vrot.slane %v6119_v47, %v21246_v8 }
 0x483   : > { %26024 = vst [vmem:[#allocation95_spill] sm:$0xff] %v21782_v26  ;;  %17044 = vmatprep.mubr.msk.f32.mxu0 %vm9319_vm12, %v21782_v26  ;;  %v9264_v31 = vrot.slane %v21782_v26, 1  ;;  %v6164_v15 = vcombine.high %v6142_v43, %v6142_v43  ;;  %v7094_v6 = vcombine.high %v7084_v50, %v7084_v50  ;;  %v7753_v61 = vrot.slane %v7084_v50, %v26001_v13 }
 0x484   : > { %v8724_v40 = vcombine.low %v8716_v19, %v8723_v33  ;;  %v6166_v41 = vcombine.high %v6156_v37, %v6156_v37  ;;  %v7757_v57 = vrot.slane %v7092_v10, %v26001_v13  ;;  %v8266_v27 = vsel %vm401_vm0, %v6142_v43, %v7749_v56  ;;  %v8383_v19 = vld [vmem:[%s25150_s5 + $0xe8] sm:$0xff] }
 0x485   : > { %v7761_v7 = vrot.slane %v7094_v6, %v26001_v13  ;;  %v8267_v53 = vsel %vm401_vm0, %v6156_v37, %v7753_v61  ;;  %v6135_v47 = vcombine.high %v6133_v5, %v6133_v5  ;;  %v6149_v9 = vrot.slane %v6133_v5, %v21246_v8  ;;  %17145 = vmatprep.subr.mxu0 %v8383_v19 }
 0x486   : > { %v9112_v51 = vrot.slane %v8724_v40, 7  ;;  %v8268_v36 = vsel %vm401_vm0, %v6164_v15, %v7757_v57  ;;  %v8725_v1 = vcombine.low %v8266_v27, %v8267_v53  ;;  %v7063_v50 = vcombine.high %v21761_v14, %v21761_v14  ;;  %17146 = vmatpush3.msra.mxu0 %v8383_v19 }
 0x487   : > { %v8269_v43 = vsel %vm401_vm0, %v6166_v41, %v7761_v7  ;;  %v6163_v10 = vrot.slane %v6135_v47, %v21246_v8  ;;  %v6165_v56 = vcombine.high %v6149_v9, %v6149_v9  ;;  %v7077_v33 = vrot.slane %v21761_v14, %v21246_v8 }
 0x488   : > { %v21807_v37 = vsel %vm401_vm0, %v9111_v62, %v9112_v51  ;;  %v8726_v5 = vcombine.low %v8268_v36, %v8269_v43  ;;  %v8733_v15 = vrot.slane %v8725_v1, %v25564_v39  ;;  %v21811_v6 = vsel %vm401_vm0, %v9112_v51, 0.0 }
 0x489   : > { %26025 = vst [vmem:[#allocation17_spill] sm:$0xff] %v21807_v37  ;;  %17045 = vmatmul.mubr.msk.f32.gmra.mxu0 %vm9319_vm12, %v21807_v37  ;;  %v9265_v61 = vrot.slane %v21807_v37, 1  ;;  %v9267_v40 = vrot.slane %v21811_v6, 1  ;;  %v6167_v41 = vcombine.high %v6163_v10, %v6163_v10  ;;  %v7091_v14 = vrot.slane %v7063_v50, %v21246_v8 }
 0x48a   : > { %v8740_v62 = vrot.slane %v8726_v5, %v25564_v39  ;;  %v7093_v57 = vcombine.high %v7077_v33, %v7077_v33  ;;  %v7765_v27 = vrot.slane %v7077_v33, %v26001_v13  ;;  %v5816_v7 = vadd.f32 %v21306_v12, %v21339_v60 }
 0x48b   : > { %v21823_v53 = vsel %vm911_vm1, %v9264_v31, %v9265_v61  ;;  %v21826_v47 = vsel %vm911_vm1, %v9265_v61, %v9267_v40  ;;  %v7095_v51 = vcombine.high %v7091_v14, %v7091_v14  ;;  %v7769_v36 = vrot.slane %v7091_v14, %v26001_v13 }
 0x48c   : > { %26026 = vst [vmem:[#allocation15_spill] sm:$0xff] %v21823_v53  ;;  %26027 = vst [vmem:[#allocation89_spill] sm:$0xff] %v21826_v47  ;;  %16980 = vmatprep.mubr.msk.f32.mxu1 %vm9319_vm12, %v21823_v53  ;;  %v8741_v1 = vcombine.low %v8733_v15, %v8740_v62  ;;  %v7773_v50 = vrot.slane %v7093_v57, %v26001_v13  ;;  %v8270_v19 = vsel %vm401_vm0, %v6149_v9, %v7765_v27  ;;  %v8382_v9 = vld [vmem:[%s25150_s5 + $0xe0] sm:$0xff] }
 0x48d   : > { %v6168_v43 = vcombine.high %v5816_v7, %v5816_v7  ;;  %16981 = vmatmul.mubr.msk.f32.gmra.mxu1 %vm9319_vm12, %v21826_v47  ;;  %v7777_v12 = vrot.slane %v7095_v51, %v26001_v13  ;;  %v8271_v60 = vsel %vm401_vm0, %v6163_v10, %v7769_v36  ;;  %v6175_v31 = vrot.slane %v5816_v7, %v21246_v8 }
 0x48e   : > { %v7103_v33 = vrot.slane %v21328_v18, %v21246_v8  ;;  %v9114_v5 = vrot.slane %v8741_v1, 7  ;;  %v8272_v15 = vsel %vm401_vm0, %v6165_v56, %v7773_v50  ;;  %v8742_v61 = vcombine.low %v8270_v19, %v8271_v60  ;;  %17147 = vmatprep.subr.mxu0 %v8382_v9 }
 0x48f   : > { %v6182_v40 = vrot.slane %v6168_v43, %v21246_v8  ;;  %v8273_v14 = vsel %vm401_vm0, %v6167_v41, %v7777_v12  ;;  %v6183_v62 = vcombine.high %v6175_v31, %v6175_v31  ;;  %v6191_v10 = vrot.slane %v6175_v31, %v21246_v8  ;;  %17148 = vmatpush3.msra.mxu0 %v8382_v9 }
 0x490   : > { %v7111_v57 = vcombine.high %v7103_v33, %v7103_v33  ;;  %v21848_v27 = vsel %vm401_vm0, 0.0, %v9114_v5  ;;  %v8743_v7 = vcombine.low %v8272_v15, %v8273_v14  ;;  %v8750_v56 = vrot.slane %v8742_v61, %v25564_v39 }
 0x491   : > { %26028 = vst [vmem:[#allocation86_spill] sm:$0xff] %v21848_v27  ;;  %v7119_v51 = vrot.slane %v7103_v33, %v21246_v8  ;;  %17047 = vmatprep.mubr.msk.f32.mxu0 %vm9319_vm12, %v21848_v27  ;;  %v9269_v36 = vrot.slane %v21848_v27, 1  ;;  %v6205_v41 = vrot.slane %v6183_v62, %v21246_v8  ;;  %v6213_v1 = vcombine.high %v6191_v10, %v6191_v10 }
 0x492   : > { %v7133_v50 = vrot.slane %v7111_v57, %v21246_v8  ;;  %v8757_v19 = vrot.slane %v8743_v7, %v25564_v39  ;;  %v6184_v60 = vcombine.high %v6182_v40, %v6182_v40  ;;  %v6198_v61 = vrot.slane %v6182_v40, %v21246_v8  ;;  %v8381_v57 = vld [vmem:[%s25150_s5 + $0xd8] sm:$0xff] }
 0x493   : > { %v7141_v43 = vcombine.high %v7119_v51, %v7119_v51  ;;  %v7781_v12 = vrot.slane %v7119_v51, %v26001_v13  ;;  %v6215_v31 = vcombine.high %v6205_v41, %v6205_v41  ;;  %v26029_v40 = vcombine.high %v21328_v18, %v21328_v18  ;;  %17149 = vmatprep.subr.mxu0 %v8381_v57 }
 0x494   : > { %v7143_v15 = vcombine.high %v7133_v50, %v7133_v50  ;;  %v7785_v33 = vrot.slane %v7133_v50, %v26001_v13  ;;  %v8758_v9 = vcombine.low %v8750_v56, %v8757_v19  ;;  %v6212_v47 = vrot.slane %v6184_v60, %v21246_v8  ;;  %17150 = vmatpush3.msra.mxu0 %v8381_v57 }
 0x495   : > { %v7789_v14 = vrot.slane %v7141_v43, %v26001_v13  ;;  %v8274_v62 = vsel %vm401_vm0, %v6191_v10, %v7781_v12  ;;  %v6214_v53 = vcombine.high %v6198_v61, %v6198_v61  ;;  %v7110_v56 = vrot.slane %v26029_v40, %v21246_v8 }
 0x496   : > { %v7793_v7 = vrot.slane %v7143_v15, %v26001_v13  ;;  %v8275_v51 = vsel %vm401_vm0, %v6205_v41, %v7785_v33  ;;  %v9115_v50 = vrot.slane %v8758_v9, 7  ;;  %v6216_v43 = vcombine.high %v6212_v47, %v6212_v47 }
 0x497   : > { %v8276_v10 = vsel %vm401_vm0, %v6213_v1, %v7789_v14  ;;  %v8759_v19 = vcombine.low %v8274_v62, %v8275_v51  ;;  %v7112_v60 = vcombine.high %v7110_v56, %v7110_v56  ;;  %v7126_v15 = vrot.slane %v7110_v56, %v21246_v8 }
 0x498   : > { %v8277_v12 = vsel %vm401_vm0, %v6215_v31, %v7793_v7  ;;  %v5817_v41 = vadd.f32 %v21361_v29, %v21365_v23  ;;  %v21879_v33 = vsel %vm401_vm0, %v9114_v5, %v9115_v50  ;;  %v21883_v9 = vsel %vm401_vm0, %v9115_v50, 0.0 }
 0x499   : > { %26030 = vst [vmem:[#allocation99_spill] sm:$0xff] %v21879_v33  ;;  %v8760_v18 = vcombine.low %v8276_v10, %v8277_v12  ;;  %v8767_v40 = vrot.slane %v8759_v19, %v25564_v39  ;;  %17048 = vmatmul.mubr.msk.f32.gmra.mxu0 %vm9319_vm12, %v21879_v33  ;;  %v9270_v1 = vrot.slane %v21879_v33, 1  ;;  %v9272_v31 = vrot.slane %v21883_v9, 1 }
 0x49a   : > { %v7140_v14 = vrot.slane %v7112_v60, %v21246_v8  ;;  %v7142_v62 = vcombine.high %v7126_v15, %v7126_v15  ;;  %v7797_v29 = vrot.slane %v7126_v15, %v26001_v13  ;;  %v6217_v5 = vcombine.high %v5817_v41, %v5817_v41 }
 0x49b   : > { %v8774_v23 = vrot.slane %v8760_v18, %v25564_v39  ;;  %v6224_v57 = vrot.slane %v5817_v41, %v21246_v8  ;;  %v21894_v7 = vsel %vm911_vm1, %v9269_v36, %v9270_v1  ;;  %v21897_v51 = vsel %vm911_vm1, %v9270_v1, %v9272_v31 }
 0x49c   : > { %26031 = vst [vmem:[#allocation96_spill] sm:$0xff] %v21894_v7  ;;  %26032 = vst [vmem:[#allocation29_spill] sm:$0xff] %v21897_v51  ;;  %v7144_v56 = vcombine.high %v7140_v14, %v7140_v14  ;;  %v7801_v50 = vrot.slane %v7140_v14, %v26001_v13  ;;  %16983 = vmatprep.mubr.msk.f32.mxu1 %vm9319_vm12, %v21894_v7  ;;  %v7805_v19 = vrot.slane %v7142_v62, %v26001_v13  ;;  %v8370_v62 = vld [vmem:[%s25150_s5 + $0x80] sm:$0xff] }
 0x49d   : > { %v8775_v10 = vcombine.low %v8767_v40, %v8774_v23  ;;  %v8278_v12 = vsel %vm401_vm0, %v6198_v61, %v7797_v29  ;;  %v6232_v60 = vcombine.high %v6224_v57, %v6224_v57  ;;  %16984 = vmatmul.mubr.msk.f32.gmra.mxu1 %vm9319_vm12, %v21897_v51  ;;  %v6240_v41 = vrot.slane %v6224_v57, %v21246_v8  ;;  %v8380_v61 = vld [vmem:[%s25150_s5 + $0xd0] sm:$0xff] }
 0x49e   : > { %v7809_v36 = vrot.slane %v7144_v56, %v26001_v13  ;;  %v8279_v15 = vsel %vm401_vm0, %v6212_v47, %v7801_v50  ;;  %v7152_v18 = vrot.slane %v21372_v0, %v21246_v8  ;;  %v8280_v40 = vsel %vm401_vm0, %v6214_v53, %v7805_v19  ;;  %17151 = vmatprep.subr.mxu0 %v8380_v61 }
 0x49f   : > { %v9117_v1 = vrot.slane %v8775_v10, 7  ;;  %v8776_v31 = vcombine.low %v8278_v12, %v8279_v15  ;;  %v6254_v14 = vrot.slane %v6232_v60, %v21246_v8  ;;  %v6262_v23 = vcombine.high %v6240_v41, %v6240_v41  ;;  %17091 = vmatprep.subr.mxu1 %v8370_v62  ;;  %17152 = vmatpush3.msra.mxu0 %v8380_v61 }
 0x4a0   : > { %v8281_v47 = vsel %vm401_vm0, %v6216_v43, %v7809_v36  ;;  %v7160_v29 = vcombine.high %v7152_v18, %v7152_v18  ;;  %v7168_v57 = vrot.slane %v7152_v18, %v21246_v8  ;;  %17092 = vmatpush3.msra.mxu1 %v8370_v62  ;;  %v6231_v15 = vrot.slane %v6217_v5, %v21246_v8 }
 0x4a1   : > { %v21922_v53 = vsel %vm401_vm0, 0.0, %v9117_v1  ;;  %v8777_v56 = vcombine.low %v8280_v40, %v8281_v47  ;;  %v8784_v50 = vrot.slane %v8776_v31, %v25564_v39  ;;  %v6264_v10 = vcombine.high %v6254_v14, %v6254_v14 }
 0x4a2   : > { %26033 = vst [vmem:[#allocation28_spill] sm:$0xff] %v21922_v53  ;;  %17050 = vmatprep.mubr.msk.f32.mxu0 %vm9319_vm12, %v21922_v53  ;;  %v9274_v19 = vrot.slane %v21922_v53, 1  ;;  %v7182_v43 = vrot.slane %v7160_v29, %v21246_v8  ;;  %v7190_v12 = vcombine.high %v7168_v57, %v7168_v57  ;;  %v7813_v60 = vrot.slane %v7168_v57, %v26001_v13 }
 0x4a3   : > { %v8791_v36 = vrot.slane %v8777_v56, %v25564_v39  ;;  %v26034_v18 = vcombine.high %v21372_v0, %v21372_v0  ;;  %v5818_v31 = vadd.f32 %v21367_v58, %v21374_v63  ;;  %v6233_v51 = vcombine.high %v6231_v15, %v6231_v15  ;;  %v8379_v63 = vld [vmem:[%s25150_s5 + $0xc8] sm:$0xff] }
 0x4a4   : > { %v7192_v61 = vcombine.high %v7182_v43, %v7182_v43  ;;  %v7817_v47 = vrot.slane %v7182_v43, %v26001_v13  ;;  %v7821_v29 = vrot.slane %v7190_v12, %v26001_v13  ;;  %v8282_v57 = vsel %vm401_vm0, %v6240_v41, %v7813_v60  ;;  %17153 = vmatprep.subr.mxu0 %v8379_v63 }
 0x4a5   : > { %v7159_v40 = vrot.slane %v26034_v18, %v21246_v8  ;;  %v8792_v62 = vcombine.low %v8784_v50, %v8791_v36  ;;  %v6247_v56 = vrot.slane %v6231_v15, %v21246_v8  ;;  %v6261_v41 = vrot.slane %v6233_v51, %v21246_v8  ;;  %17154 = vmatpush3.msra.mxu0 %v8379_v63  ;;  %v8378_v51 = vld [vmem:[%s25150_s5 + $0xc0] sm:$0xff] }
 0x4a6   : > { %v7825_v7 = vrot.slane %v7192_v61, %v26001_v13  ;;  %v8283_v0 = vsel %vm401_vm0, %v6254_v14, %v7817_v47  ;;  %v8284_v18 = vsel %vm401_vm0, %v6262_v23, %v7821_v29  ;;  %17155 = vmatprep.subr.mxu0 %v8378_v51 }
 0x4a7   : > { %v7161_v5 = vcombine.high %v7159_v40, %v7159_v40  ;;  %v7175_v58 = vrot.slane %v7159_v40, %v21246_v8  ;;  %v9118_v43 = vrot.slane %v8792_v62, 7  ;;  %v8793_v12 = vcombine.low %v8282_v57, %v8283_v0  ;;  %17156 = vmatpush3.msra.mxu0 %v8378_v51 }
 0x4a8   : > { %v6263_v50 = vcombine.high %v6247_v56, %v6247_v56  ;;  %v8285_v60 = vsel %vm401_vm0, %v6264_v10, %v7825_v7  ;;  %v6265_v29 = vcombine.high %v6261_v41, %v6261_v41 }
 0x4a9   : > { %v7189_v36 = vrot.slane %v7161_v5, %v21246_v8  ;;  %v7191_v15 = vcombine.high %v7175_v58, %v7175_v58  ;;  %v7829_v14 = vrot.slane %v7175_v58, %v26001_v13  ;;  %v21954_v23 = vsel %vm401_vm0, %v9117_v1, %v9118_v43 }
 0x4aa   : > { %26035 = vst [vmem:[#allocation31_spill] sm:$0xff] %v21954_v23  ;;  %v8794_v40 = vcombine.low %v8284_v18, %v8285_v60  ;;  %v8801_v61 = vrot.slane %v8793_v12, %v25564_v39  ;;  %v21958_v47 = vsel %vm401_vm0, %v9118_v43, 0.0  ;;  %17051 = vmatmul.mubr.msk.f32.gmra.mxu0 %vm9319_vm12, %v21954_v23  ;;  %v9275_v7 = vrot.slane %v21954_v23, 1  ;;  %v8393_v18 = vld [vmem:[%s25150_s5 + $0x138] sm:$0xff] }
 0x4ab   : > { %v9277_v10 = vrot.slane %v21958_v47, 1  ;;  %v7193_v1 = vcombine.high %v7189_v36, %v7189_v36  ;;  %v7833_v62 = vrot.slane %v7189_v36, %v26001_v13  ;;  %v7837_v5 = vrot.slane %v7191_v15, %v26001_v13  ;;  %17205 = vmatprep.subr.mxu1 %v8393_v18 }
 0x4ac   : > { %v8808_v57 = vrot.slane %v8794_v40, %v25564_v39  ;;  %v8286_v0 = vsel %vm401_vm0, %v6247_v56, %v7829_v14  ;;  %v21975_v58 = vsel %vm911_vm1, %v9274_v19, %v9275_v7  ;;  %v6266_v12 = vcombine.high %v5818_v31, %v5818_v31 }
 0x4ad   : > { %26036 = vst [vmem:[#allocation34_spill] sm:$0xff] %v21975_v58  ;;  %v21978_v63 = vsel %vm911_vm1, %v9275_v7, %v9277_v10  ;;  %v7841_v43 = vrot.slane %v7193_v1, %v26001_v13  ;;  %16986 = vmatprep.mubr.msk.f32.mxu1 %vm9319_vm12, %v21975_v58  ;;  %v8287_v56 = vsel %vm401_vm0, %v6261_v41, %v7833_v62 }
 0x4ae   : > { %26037 = vst [vmem:[#allocation24_spill] sm:$0xff] %v21978_v63  ;;  %v8809_v60 = vcombine.low %v8801_v61, %v8808_v57  ;;  %v8288_v36 = vsel %vm401_vm0, %v6263_v50, %v7837_v5  ;;  %v6273_v15 = vrot.slane %v5818_v31, %v21246_v8  ;;  %16987 = vmatmul.mubr.msk.f32.gmra.mxu1 %vm9319_vm12, %v21978_v63 }
 0x4af   : > { %v8289_v19 = vsel %vm401_vm0, %v6265_v29, %v7841_v43  ;;  %v8810_v14 = vcombine.low %v8286_v0, %v8287_v56  ;;  %v7201_v40 = vrot.slane %v21385_v28, %v21246_v8  ;;  %v6280_v51 = vrot.slane %v6266_v12, %v21246_v8 }
 0x4b0   : > { %v9120_v7 = vrot.slane %v8809_v60, 7  ;;  %v8811_v10 = vcombine.low %v8288_v36, %v8289_v19  ;;  %v6281_v61 = vcombine.high %v6273_v15, %v6273_v15  ;;  %v6289_v41 = vrot.slane %v6273_v15, %v21246_v8 }
 0x4b1   : > { %v8818_v50 = vrot.slane %v8810_v14, %v25564_v39  ;;  %v7209_v1 = vcombine.high %v7201_v40, %v7201_v40  ;;  %v7217_v31 = vrot.slane %v7201_v40, %v21246_v8  ;;  %v6282_v57 = vcombine.high %v6280_v51, %v6280_v51 }
 0x4b2   : > { %v21996_v62 = vsel %vm401_vm0, 0.0, %v9120_v7  ;;  %v8825_v29 = vrot.slane %v8811_v10, %v25564_v39  ;;  %v6303_v5 = vrot.slane %v6281_v61, %v21246_v8  ;;  %v6311_v0 = vcombine.high %v6289_v41, %v6289_v41 }
 0x4b3   : > { %26038 = vst [vmem:[#allocation27_spill] sm:$0xff] %v21996_v62  ;;  %17053 = vmatprep.mubr.msk.f32.mxu0 %vm9319_vm12, %v21996_v62  ;;  %v9279_v18 = vrot.slane %v21996_v62, 1  ;;  %v7231_v43 = vrot.slane %v7209_v1, %v21246_v8  ;;  %v7239_v12 = vcombine.high %v7217_v31, %v7217_v31  ;;  %v7845_v60 = vrot.slane %v7217_v31, %v26001_v13 }
 0x4b4   : > { %v8826_v56 = vcombine.low %v8818_v50, %v8825_v29  ;;  %v6313_v36 = vcombine.high %v6303_v5, %v6303_v5  ;;  %v6296_v15 = vrot.slane %v6280_v51, %v21246_v8  ;;  %v6310_v19 = vrot.slane %v6282_v57, %v21246_v8 }
 0x4b5   : > { %v7241_v14 = vcombine.high %v7231_v43, %v7231_v43  ;;  %v7849_v40 = vrot.slane %v7231_v43, %v26001_v13  ;;  %v7853_v10 = vrot.slane %v7239_v12, %v26001_v13  ;;  %v8290_v61 = vsel %vm401_vm0, %v6289_v41, %v7845_v60 }
 0x4b6   : > { %v9121_v63 = vrot.slane %v8826_v56, 7  ;;  %v6312_v58 = vcombine.high %v6296_v15, %v6296_v15  ;;  %v6314_v54 = vcombine.high %v6310_v19, %v6310_v19  ;;  %v26039_v1 = vcombine.high %v21385_v28, %v21385_v28 }
 0x4b7   : > { %v7857_v31 = vrot.slane %v7241_v14, %v26001_v13  ;;  %v8291_v51 = vsel %vm401_vm0, %v6303_v5, %v7849_v40  ;;  %v8292_v57 = vsel %vm401_vm0, %v6311_v0, %v7853_v10  ;;  %v5819_v29 = vadd.f32 %v21369_v17, %v21380_v24 }
 0x4b8   : > { %v7208_v50 = vrot.slane %v26039_v1, %v21246_v8  ;;  %v22020_v43 = vsel %vm401_vm0, %v9120_v7, %v9121_v63  ;;  %v8827_v41 = vcombine.low %v8290_v61, %v8291_v51  ;;  %v22023_v12 = vsel %vm401_vm0, %v9121_v63, 0.0 }
 0x4b9   : > { %26040 = vst [vmem:[#allocation26_spill] sm:$0xff] %v22020_v43  ;;  %17054 = vmatmul.mubr.msk.f32.gmra.mxu0 %vm9319_vm12, %v22020_v43  ;;  %v9280_v28 = vrot.slane %v22020_v43, 1  ;;  %v8293_v5 = vsel %vm401_vm0, %v6313_v36, %v7857_v31  ;;  %v9282_v0 = vrot.slane %v22023_v12, 1  ;;  %v6315_v14 = vcombine.high %v5819_v29, %v5819_v29 }
 0x4ba   : > { %v7210_v60 = vcombine.high %v7208_v50, %v7208_v50  ;;  %v7224_v56 = vrot.slane %v7208_v50, %v21246_v8  ;;  %v8828_v17 = vcombine.low %v8292_v57, %v8293_v5  ;;  %v8835_v24 = vrot.slane %v8827_v41, %v25564_v39 }
 0x4bb   : > { %v22034_v63 = vsel %vm911_vm1, %v9279_v18, %v9280_v28  ;;  %v22037_v40 = vsel %vm911_vm1, %v9280_v28, %v9282_v0  ;;  %v6322_v31 = vrot.slane %v5819_v29, %v21246_v8  ;;  %v7250_v57 = vrot.slane %v21388_v4, %v21246_v8 }
 0x4bc   : > { %v7238_v7 = vrot.slane %v7210_v60, %v21246_v8  ;;  %26041 = vst [vmem:[#allocation36_spill] sm:$0xff] %v22034_v63  ;;  %26042 = vst [vmem:[#allocation32_spill] sm:$0xff] %v22037_v40  ;;  %v7240_v10 = vcombine.high %v7224_v56, %v7224_v56  ;;  %v7861_v61 = vrot.slane %v7224_v56, %v26001_v13  ;;  %16989 = vmatprep.mubr.msk.f32.mxu1 %vm9319_vm12, %v22034_v63 }
 0x4bd   : > { %v8842_v36 = vrot.slane %v8828_v17, %v25564_v39  ;;  %16990 = vmatmul.mubr.msk.f32.gmra.mxu1 %vm9319_vm12, %v22037_v40  ;;  %v6329_v41 = vrot.slane %v6315_v14, %v21246_v8  ;;  %v6330_v0 = vcombine.high %v6322_v31, %v6322_v31  ;;  %v6338_v17 = vrot.slane %v6322_v31, %v21246_v8 }
 0x4be   : > { %v7242_v1 = vcombine.high %v7238_v7, %v7238_v7  ;;  %v7865_v50 = vrot.slane %v7238_v7, %v26001_v13  ;;  %v7869_v18 = vrot.slane %v7240_v10, %v26001_v13  ;;  %v8294_v51 = vsel %vm401_vm0, %v6296_v15, %v7861_v61 }
 0x4bf   : > { %v8843_v60 = vcombine.low %v8835_v24, %v8842_v36  ;;  %v7258_v7 = vcombine.high %v7250_v57, %v7250_v57  ;;  %v6352_v61 = vrot.slane %v6330_v0, %v21246_v8  ;;  %v7266_v40 = vrot.slane %v7250_v57, %v21246_v8 }
 0x4c0   : > { %v7873_v28 = vrot.slane %v7242_v1, %v26001_v13  ;;  %v8295_v5 = vsel %vm401_vm0, %v6310_v19, %v7865_v50  ;;  %v8296_v29 = vsel %vm401_vm0, %v6312_v58, %v7869_v18  ;;  %v6360_v36 = vcombine.high %v6338_v17, %v6338_v17 }
 0x4c1   : > { %v8844_v56 = vcombine.low %v8294_v51, %v8295_v5  ;;  %v9123_v10 = vrot.slane %v8843_v60, 7  ;;  %v7280_v19 = vrot.slane %v7258_v7, %v21246_v8  ;;  %v6362_v58 = vcombine.high %v6352_v61, %v6352_v61 }
 0x4c2   : > { %v8297_v15 = vsel %vm401_vm0, %v6314_v54, %v7873_v28  ;;  %v7288_v50 = vcombine.high %v7266_v40, %v7266_v40  ;;  %v7877_v31 = vrot.slane %v7266_v40, %v26001_v13  ;;  %v6331_v5 = vcombine.high %v6329_v41, %v6329_v41 }
 0x4c3   : > { %v8845_v14 = vcombine.low %v8296_v29, %v8297_v15  ;;  %v8852_v24 = vrot.slane %v8844_v56, %v25564_v39  ;;  %v22062_v1 = vsel %vm401_vm0, 0.0, %v9123_v10  ;;  %v7290_v51 = vcombine.high %v7280_v19, %v7280_v19 }
 0x4c4   : > { %26043 = vst [vmem:[#allocation25_spill] sm:$0xff] %v22062_v1  ;;  %17056 = vmatprep.mubr.msk.f32.mxu0 %vm9319_vm12, %v22062_v1  ;;  %v9284_v18 = vrot.slane %v22062_v1, 1  ;;  %v7881_v57 = vrot.slane %v7280_v19, %v26001_v13  ;;  %v7885_v60 = vrot.slane %v7288_v50, %v26001_v13  ;;  %v8298_v28 = vsel %vm401_vm0, %v6338_v17, %v7877_v31 }
 0x4c5   : > { %v8859_v54 = vrot.slane %v8845_v14, %v25564_v39  ;;  %v6345_v0 = vrot.slane %v6329_v41, %v21246_v8  ;;  %v7889_v40 = vrot.slane %v7290_v51, %v26001_v13  ;;  %v26044_v7 = vcombine.high %v21388_v4, %v21388_v4 }
 0x4c6   : > { %v8299_v56 = vsel %vm401_vm0, %v6352_v61, %v7881_v57  ;;  %v8300_v14 = vsel %vm401_vm0, %v6360_v36, %v7885_v60  ;;  %v6359_v50 = vrot.slane %v6331_v5, %v21246_v8  ;;  %v5820_v4 = vadd.f32 %v21376_v44, %v21382_v25 }
 0x4c7   : > { %v8860_v29 = vcombine.low %v8852_v24, %v8859_v54  ;;  %v7257_v15 = vrot.slane %v26044_v7, %v21246_v8  ;;  %v8861_v19 = vcombine.low %v8298_v28, %v8299_v56  ;;  %v6361_v63 = vcombine.high %v6345_v0, %v6345_v0 }
 0x4c8   : > { %v8301_v31 = vsel %vm401_vm0, %v6362_v58, %v7889_v40  ;;  %v6363_v51 = vcombine.high %v6359_v50, %v6359_v50  ;;  %v6364_v56 = vcombine.high %v5820_v4, %v5820_v4 }
 0x4c9   : > { %v9124_v17 = vrot.slane %v8860_v29, 7  ;;  %v7259_v41 = vcombine.high %v7257_v15, %v7257_v15  ;;  %v7273_v24 = vrot.slane %v7257_v15, %v21246_v8  ;;  %v8862_v54 = vcombine.low %v8300_v14, %v8301_v31 }
 0x4ca   : > { %v8869_v61 = vrot.slane %v8861_v19, %v25564_v39 }
 0x4cb   : > { %v22087_v57 = vsel %vm401_vm0, %v9123_v10, %v9124_v17  ;;  %v22090_v36 = vsel %vm401_vm0, %v9124_v17, 0.0  ;;  %v7287_v60 = vrot.slane %v7259_v41, %v21246_v8  ;;  %v7289_v28 = vcombine.high %v7273_v24, %v7273_v24 }
 0x4cc   : > { %26045 = vst [vmem:[#allocation37_spill] sm:$0xff] %v22087_v57  ;;  %17057 = vmatmul.mubr.msk.f32.gmra.mxu0 %vm9319_vm12, %v22087_v57  ;;  %v9285_v58 = vrot.slane %v22087_v57, 1  ;;  %v8876_v5 = vrot.slane %v8862_v54, %v25564_v39  ;;  %v9287_v29 = vrot.slane %v22090_v36, 1  ;;  %v7893_v44 = vrot.slane %v7273_v24, %v26001_v13 }
 0x4cd   : > { %v7291_v25 = vcombine.high %v7287_v60, %v7287_v60  ;;  %v7897_v10 = vrot.slane %v7287_v60, %v26001_v13  ;;  %v7901_v40 = vrot.slane %v7289_v28, %v26001_v13  ;;  %v6371_v24 = vrot.slane %v5820_v4, %v21246_v8 }
 0x4ce   : > { %v22102_v7 = vsel %vm911_vm1, %v9284_v18, %v9285_v58  ;;  %v8877_v15 = vcombine.low %v8869_v61, %v8876_v5  ;;  %v22105_v14 = vsel %vm911_vm1, %v9285_v58, %v9287_v29  ;;  %v8302_v19 = vsel %vm401_vm0, %v6345_v0, %v7893_v44 }
 0x4cf   : > { %26046 = vst [vmem:[#allocation33_spill] sm:$0xff] %v22102_v7  ;;  %26047 = vst [vmem:[#allocation51_spill] sm:$0xff] %v22105_v14  ;;  %16992 = vmatprep.mubr.msk.f32.mxu1 %vm9319_vm12, %v22102_v7  ;;  %v7905_v17 = vrot.slane %v7291_v25, %v26001_v13  ;;  %v8303_v31 = vsel %vm401_vm0, %v6359_v50, %v7897_v10  ;;  %v8304_v41 = vsel %vm401_vm0, %v6361_v63, %v7901_v40 }
 0x4d0   : > { %v9126_v54 = vrot.slane %v8877_v15, 7  ;;  %16993 = vmatmul.mubr.msk.f32.gmra.mxu1 %vm9319_vm12, %v22105_v14  ;;  %v8878_v18 = vcombine.low %v8302_v19, %v8303_v31  ;;  %v7299_v61 = vrot.slane %v21391_v49, %v21246_v8  ;;  %v6378_v0 = vrot.slane %v6364_v56, %v21246_v8 }
 0x4d1   : > { %v8305_v60 = vsel %vm401_vm0, %v6363_v51, %v7905_v17  ;;  %v6379_v28 = vcombine.high %v6371_v24, %v6371_v24  ;;  %v6387_v58 = vrot.slane %v6371_v24, %v21246_v8  ;;  %v26048_v63 = vcombine.high %v21391_v49, %v21391_v49 }
 0x4d2   : > { %v22126_v4 = vsel %vm401_vm0, 0.0, %v9126_v54  ;;  %v8879_v5 = vcombine.low %v8304_v41, %v8305_v60  ;;  %v8886_v29 = vrot.slane %v8878_v18, %v25564_v39  ;;  %v7307_v44 = vcombine.high %v7299_v61, %v7299_v61 }
 0x4d3   : > { %v7306_v50 = vrot.slane %v26048_v63, %v21246_v8  ;;  %26049 = vst [vmem:[#allocation45_spill] sm:$0xff] %v22126_v4  ;;  %17059 = vmatprep.mubr.msk.f32.mxu0 %vm9319_vm12, %v22126_v4  ;;  %v9289_v51 = vrot.slane %v22126_v4, 1  ;;  %v6401_v25 = vrot.slane %v6379_v28, %v21246_v8  ;;  %v6409_v10 = vcombine.high %v6387_v58, %v6387_v58 }
 0x4d4   : > { %v7315_v40 = vrot.slane %v7299_v61, %v21246_v8  ;;  %v8893_v49 = vrot.slane %v8879_v5, %v25564_v39  ;;  %v7329_v56 = vrot.slane %v7307_v44, %v21246_v8  ;;  %v6380_v15 = vcombine.high %v6378_v0, %v6378_v0 }
 0x4d5   : > { %v6394_v19 = vrot.slane %v6378_v0, %v21246_v8  ;;  %v6411_v17 = vcombine.high %v6401_v25, %v6401_v25  ;;  %v7308_v24 = vcombine.high %v7306_v50, %v7306_v50  ;;  %v7322_v44 = vrot.slane %v7306_v50, %v21246_v8 }
 0x4d6   : > { %v7337_v31 = vcombine.high %v7315_v40, %v7315_v40  ;;  %v7909_v41 = vrot.slane %v7315_v40, %v26001_v13  ;;  %v8894_v18 = vcombine.low %v8886_v29, %v8893_v49  ;;  %v7339_v60 = vcombine.high %v7329_v56, %v7329_v56 }
 0x4d7   : > { %v7913_v63 = vrot.slane %v7329_v56, %v26001_v13  ;;  %v6408_v28 = vrot.slane %v6380_v15, %v21246_v8  ;;  %v6410_v14 = vcombine.high %v6394_v19, %v6394_v19  ;;  %v7336_v56 = vrot.slane %v7308_v24, %v21246_v8 }
 0x4d8   : > { %v7917_v61 = vrot.slane %v7337_v31, %v26001_v13  ;;  %v8306_v5 = vsel %vm401_vm0, %v6387_v58, %v7909_v41  ;;  %v9127_v7 = vrot.slane %v8894_v18, 7  ;;  %v7921_v0 = vrot.slane %v7339_v60, %v26001_v13 }
 0x4d9   : > { %v8307_v22 = vsel %vm401_vm0, %v6401_v25, %v7913_v63  ;;  %v6412_v40 = vcombine.high %v6408_v28, %v6408_v28  ;;  %v7338_v20 = vcombine.high %v7322_v44, %v7322_v44  ;;  %v7925_v50 = vrot.slane %v7322_v44, %v26001_v13 }
 0x4da   : > { %v8308_v29 = vsel %vm401_vm0, %v6409_v10, %v7917_v61  ;;  %v8895_v49 = vcombine.low %v8306_v5, %v8307_v22  ;;  %v22148_v15 = vsel %vm401_vm0, %v9126_v54, %v9127_v7  ;;  %v8309_v58 = vsel %vm401_vm0, %v6411_v17, %v7921_v0  ;;  %v22175_v5 = vld [vmem:[%s25150_s5 + $0x178] sm:$0xff] }
 0x4db   : > { %26050 = vst [vmem:[#allocation47_spill] sm:$0xff] %v22148_v15  ;;  %v22152_v31 = vsel %vm401_vm0, %v9127_v7, 0.0  ;;  %17060 = vmatmul.mubr.msk.f32.gmra.mxu0 %vm9319_vm12, %v22148_v15  ;;  %v9290_v25 = vrot.slane %v22148_v15, 1  ;;  %v8896_v10 = vcombine.low %v8308_v29, %v8309_v58  ;;  %v7340_v24 = vcombine.high %v7336_v56, %v7336_v56  ;;  %17269 = vmatprep.subr.mxu0 %v22175_v5 }
 0x4dc   : > { %v8903_v22 = vrot.slane %v8895_v49, %v25564_v39  ;;  %v9292_v41 = vrot.slane %v22152_v31, 1  ;;  %v7929_v54 = vrot.slane %v7336_v56, %v26001_v13  ;;  %v7933_v17 = vrot.slane %v7338_v20, %v26001_v13 }
 0x4dd   : > { %v8310_v7 = vsel %vm401_vm0, %v6394_v19, %v7925_v50  ;;  %v22164_v18 = vsel %vm911_vm1, %v9289_v51, %v9290_v25  ;;  %v8910_v60 = vrot.slane %v8896_v10, %v25564_v39  ;;  %v5821_v61 = vadd.f32 %v21428_v45, %v21419_v46 }
 0x4de   : > { %26051 = vst [vmem:[#allocation46_spill] sm:$0xff] %v22164_v18  ;;  %v22168_v63 = vsel %vm911_vm1, %v9290_v25, %v9292_v41  ;;  %16995 = vmatprep.mubr.msk.f32.mxu1 %vm9319_vm12, %v22164_v18  ;;  %v7937_v20 = vrot.slane %v7340_v24, %v26001_v13  ;;  %v8311_v51 = vsel %vm401_vm0, %v6408_v28, %v7929_v54 }
 0x4df   : > { %26052 = vst [vmem:[#allocation65_spill] sm:$0xff] %v22168_v63  ;;  %v8312_v19 = vsel %vm401_vm0, %v6410_v14, %v7933_v17  ;;  %v7348_v44 = vrot.slane %v21443_v38, %v21246_v8  ;;  %v8911_v0 = vcombine.low %v8903_v22, %v8910_v60  ;;  %16996 = vmatmul.mubr.msk.f32.gmra.mxu1 %vm9319_vm12, %v22168_v63 }
 0x4e0   : > { %v8912_v46 = vcombine.low %v8310_v7, %v8311_v51  ;;  %v6413_v45 = vcombine.high %v5821_v61, %v5821_v61  ;;  %v6420_v29 = vrot.slane %v5821_v61, %v21246_v8  ;;  %v8313_v49 = vsel %vm401_vm0, %v6412_v40, %v7937_v20 }
 0x4e1   : > { %v7356_v56 = vcombine.high %v7348_v44, %v7348_v44  ;;  %v7364_v58 = vrot.slane %v7348_v44, %v21246_v8  ;;  %v26053_v14 = vcombine.high %v21443_v38, %v21443_v38  ;;  %v9129_v50 = vrot.slane %v8911_v0, 7 }
 0x4e2   : > { %v8913_v25 = vcombine.low %v8312_v19, %v8313_v49  ;;  %v8920_v10 = vrot.slane %v8912_v46, %v25564_v39  ;;  %v6428_v22 = vcombine.high %v6420_v29, %v6420_v29  ;;  %v6436_v41 = vrot.slane %v6420_v29, %v21246_v8 }
 0x4e3   : > { %v7355_v28 = vrot.slane %v26053_v14, %v21246_v8  ;;  %v7378_v24 = vrot.slane %v7356_v56, %v21246_v8  ;;  %v7386_v40 = vcombine.high %v7364_v58, %v7364_v58  ;;  %v7941_v54 = vrot.slane %v7364_v58, %v26001_v13 }
 0x4e4   : > { %v22199_v17 = vsel %vm401_vm0, 0.0, %v9129_v50  ;;  %v8927_v38 = vrot.slane %v8913_v25, %v25564_v39  ;;  %v6450_v7 = vrot.slane %v6428_v22, %v21246_v8  ;;  %v6427_v60 = vrot.slane %v6413_v45, %v21246_v8 }
 0x4e5   : > { %17062 = vmatprep.mubr.msk.f32.mxu0 %vm9319_vm12, %v22199_v17  ;;  %v9294_v61 = vrot.slane %v22199_v17, 1  ;;  %v6458_v20 = vcombine.high %v6436_v41, %v6436_v41  ;;  %v7388_v51 = vcombine.high %v7378_v24, %v7378_v24  ;;  %v7945_v19 = vrot.slane %v7378_v24, %v26001_v13 }
 0x4e6   : > { %v8928_v44 = vcombine.low %v8920_v10, %v8927_v38  ;;  %v6460_v0 = vcombine.high %v6450_v7, %v6450_v7  ;;  %v7949_v46 = vrot.slane %v7386_v40, %v26001_v13  ;;  %v8314_v29 = vsel %vm401_vm0, %v6436_v41, %v7941_v54 }
 0x4e7   : > { %v7953_v49 = vrot.slane %v7388_v51, %v26001_v13  ;;  %v8315_v56 = vsel %vm401_vm0, %v6450_v7, %v7945_v19  ;;  %v6429_v45 = vcombine.high %v6427_v60, %v6427_v60  ;;  %v6443_v58 = vrot.slane %v6427_v60, %v21246_v8 }
 0x4e8   : > { %v9130_v14 = vrot.slane %v8928_v44, 7  ;;  %v8316_v25 = vsel %vm401_vm0, %v6458_v20, %v7949_v46  ;;  %v8929_v22 = vcombine.low %v8314_v29, %v8315_v56  ;;  %v7357_v63 = vcombine.high %v7355_v28, %v7355_v28 }
 0x4e9   : > { %v8317_v24 = vsel %vm401_vm0, %v6460_v0, %v7953_v49  ;;  %v6457_v10 = vrot.slane %v6429_v45, %v21246_v8  ;;  %v6459_v38 = vcombine.high %v6443_v58, %v6443_v58  ;;  %v7371_v40 = vrot.slane %v7355_v28, %v21246_v8 }
 0x4ea   : > { %v22218_v41 = vsel %vm401_vm0, %v9129_v50, %v9130_v14  ;;  %v8930_v54 = vcombine.low %v8316_v25, %v8317_v24  ;;  %v8937_v7 = vrot.slane %v8929_v22, %v25564_v39  ;;  %v22222_v60 = vsel %vm401_vm0, %v9130_v14, 0.0 }
 0x4eb   : > { %17063 = vmatmul.mubr.msk.f32.gmra.mxu0 %vm9319_vm12, %v22218_v41  ;;  %v9295_v20 = vrot.slane %v22218_v41, 1  ;;  %v9297_v51 = vrot.slane %v22222_v60, 1  ;;  %v6461_v19 = vcombine.high %v6457_v10, %v6457_v10  ;;  %v7385_v44 = vrot.slane %v7357_v63, %v21246_v8 }
 0x4ec   : > { %v8944_v28 = vrot.slane %v8930_v54, %v25564_v39  ;;  %v7387_v50 = vcombine.high %v7371_v40, %v7371_v40  ;;  %v7957_v0 = vrot.slane %v7371_v40, %v26001_v13  ;;  %v5822_v46 = vadd.f32 %v21431_v11, %v21421_v21 }
 0x4ed   : > { %v22234_v29 = vsel %vm911_vm1, %v9294_v61, %v9295_v20  ;;  %v22237_v49 = vsel %vm911_vm1, %v9295_v20, %v9297_v51  ;;  %v7389_v56 = vcombine.high %v7385_v44, %v7385_v44  ;;  %v7961_v45 = vrot.slane %v7385_v44, %v26001_v13 }
 0x4ee   : > { %26054 = vst [vmem:[#allocation50_spill] sm:$0xff] %v22234_v29  ;;  %26055 = vst [vmem:[#allocation49_spill] sm:$0xff] %v22237_v49  ;;  %16998 = vmatprep.mubr.msk.f32.mxu1 %vm9319_vm12, %v22234_v29  ;;  %v8945_v63 = vcombine.low %v8937_v7, %v8944_v28  ;;  %v7965_v14 = vrot.slane %v7387_v50, %v26001_v13  ;;  %v8318_v25 = vsel %vm401_vm0, %v6443_v58, %v7957_v0 }
 0x4ef   : > { %v6462_v22 = vcombine.high %v5822_v46, %v5822_v46  ;;  %16999 = vmatmul.mubr.msk.f32.gmra.mxu1 %vm9319_vm12, %v22237_v49  ;;  %v7969_v21 = vrot.slane %v7389_v56, %v26001_v13  ;;  %v8319_v11 = vsel %vm401_vm0, %v6457_v10, %v7961_v45  ;;  %v6469_v61 = vrot.slane %v5822_v46, %v21246_v8 }
 0x4f0   : > { %v7397_v24 = vrot.slane %v21451_v3, %v21246_v8  ;;  %v9132_v40 = vrot.slane %v8945_v63, 7  ;;  %v8320_v54 = vsel %vm401_vm0, %v6459_v38, %v7965_v14  ;;  %v8946_v7 = vcombine.low %v8318_v25, %v8319_v11 }
 0x4f1   : > { %v6476_v20 = vrot.slane %v6462_v22, %v21246_v8  ;;  %v8321_v58 = vsel %vm401_vm0, %v6461_v19, %v7969_v21  ;;  %v6477_v51 = vcombine.high %v6469_v61, %v6469_v61  ;;  %v6485_v44 = vrot.slane %v6469_v61, %v21246_v8 }
 0x4f2   : > { %v7405_v28 = vcombine.high %v7397_v24, %v7397_v24  ;;  %v22256_v50 = vsel %vm401_vm0, 0.0, %v9132_v40  ;;  %v8947_v10 = vcombine.low %v8320_v54, %v8321_v58  ;;  %v8954_v0 = vrot.slane %v8946_v7, %v25564_v39 }
 0x4f3   : > { %v7413_v46 = vrot.slane %v7397_v24, %v21246_v8  ;;  %17065 = vmatprep.mubr.msk.f32.mxu0 %vm9319_vm12, %v22256_v50  ;;  %v9299_v38 = vrot.slane %v22256_v50, 1  ;;  %v6499_v56 = vrot.slane %v6477_v51, %v21246_v8  ;;  %v6507_v19 = vcombine.high %v6485_v44, %v6485_v44 }
 0x4f4   : > { %v7427_v45 = vrot.slane %v7405_v28, %v21246_v8  ;;  %v8961_v63 = vrot.slane %v8947_v10, %v25564_v39  ;;  %v6478_v22 = vcombine.high %v6476_v20, %v6476_v20  ;;  %v6492_v24 = vrot.slane %v6476_v20, %v21246_v8 }
 0x4f5   : > { %v7435_v14 = vcombine.high %v7413_v46, %v7413_v46  ;;  %v7973_v25 = vrot.slane %v7413_v46, %v26001_v13  ;;  %v6509_v21 = vcombine.high %v6499_v56, %v6499_v56  ;;  %v26056_v46 = vcombine.high %v21451_v3, %v21451_v3 }
 0x4f6   : > { %v7437_v11 = vcombine.high %v7427_v45, %v7427_v45  ;;  %v7977_v61 = vrot.slane %v7427_v45, %v26001_v13  ;;  %v8962_v54 = vcombine.low %v8954_v0, %v8961_v63  ;;  %v6506_v51 = vrot.slane %v6478_v22, %v21246_v8  ;;  %v26057_v22 = vld [vmem:[#allocation12_spill] sm:$0xff] }
 0x4f7   : > { %v7981_v7 = vrot.slane %v7435_v14, %v26001_v13  ;;  %v8322_v58 = vsel %vm401_vm0, %v6485_v44, %v7973_v25  ;;  %v6508_v49 = vcombine.high %v6492_v24, %v6492_v24  ;;  %v7404_v29 = vrot.slane %v26056_v46, %v21246_v8 }
 0x4f8   : > { %v7985_v28 = vrot.slane %v7437_v11, %v26001_v13  ;;  %v8323_v10 = vsel %vm401_vm0, %v6499_v56, %v7977_v61  ;;  %v9133_v45 = vrot.slane %v8962_v54, 7  ;;  %v6510_v63 = vcombine.high %v6506_v51, %v6506_v51 }
 0x4f9   : > { %v8324_v20 = vsel %vm401_vm0, %v6507_v19, %v7981_v7  ;;  %v8963_v0 = vcombine.low %v8322_v58, %v8323_v10  ;;  %v7406_v44 = vcombine.high %v7404_v29, %v7404_v29  ;;  %v7420_v25 = vrot.slane %v7404_v29, %v21246_v8 }
 0x4fa   : > { %v8325_v14 = vsel %vm401_vm0, %v6509_v21, %v7985_v28  ;;  %v5823_v11 = vadd.f32 %v26057_v22, %v21423_v48  ;;  %v22284_v56 = vsel %vm401_vm0, %v9132_v40, %v9133_v45  ;;  %v22288_v54 = vsel %vm401_vm0, %v9133_v45, 0.0 }
 0x4fb   : > { %v8964_v61 = vcombine.low %v8324_v20, %v8325_v14  ;;  %v8971_v3 = vrot.slane %v8963_v0, %v25564_v39  ;;  %26058 = vst [vmem:[#allocation52_spill] sm:$0xff] %v22288_v54  ;;  %17066 = vmatmul.mubr.msk.f32.gmra.mxu0 %vm9319_vm12, %v22284_v56  ;;  %v9300_v19 = vrot.slane %v22284_v56, 1  ;;  %v9302_v21 = vrot.slane %v22288_v54, 1 }
 0x4fc   : > { %v7434_v29 = vrot.slane %v7406_v44, %v21246_v8  ;;  %v7436_v7 = vcombine.high %v7420_v25, %v7420_v25  ;;  %v7989_v40 = vrot.slane %v7420_v25, %v26001_v13  ;;  %v6511_v58 = vcombine.high %v5823_v11, %v5823_v11 }
 0x4fd   : > { %v8978_v48 = vrot.slane %v8964_v61, %v25564_v39  ;;  %v6518_v28 = vrot.slane %v5823_v11, %v21246_v8  ;;  %v22299_v10 = vsel %vm911_vm1, %v9299_v38, %v9300_v19  ;;  %v22302_v46 = vsel %vm911_vm1, %v9300_v19, %v9302_v21 }
 0x4fe   : > { %26059 = vst [vmem:[#allocation61_spill] sm:$0xff] %v22299_v10  ;;  %26060 = vst [vmem:[#allocation70_spill] sm:$0xff] %v22302_v46  ;;  %v7438_v45 = vcombine.high %v7434_v29, %v7434_v29  ;;  %v7993_v20 = vrot.slane %v7434_v29, %v26001_v13  ;;  %17001 = vmatprep.mubr.msk.f32.mxu1 %vm9319_vm12, %v22299_v10  ;;  %v7997_v14 = vrot.slane %v7436_v7, %v26001_v13 }
 0x4ff   : > { %v8979_v0 = vcombine.low %v8971_v3, %v8978_v48  ;;  %v8326_v44 = vsel %vm401_vm0, %v6492_v24, %v7989_v40  ;;  %v6526_v25 = vcombine.high %v6518_v28, %v6518_v28  ;;  %17002 = vmatmul.mubr.msk.f32.gmra.mxu1 %vm9319_vm12, %v22302_v46  ;;  %v6534_v11 = vrot.slane %v6518_v28, %v21246_v8 }
 0x500   : > { %v8001_v38 = vrot.slane %v7438_v45, %v26001_v13  ;;  %v8327_v22 = vsel %vm401_vm0, %v6506_v51, %v7993_v20  ;;  %v7446_v61 = vrot.slane %v21454_v32, %v21246_v8  ;;  %v8328_v3 = vsel %vm401_vm0, %v6508_v49, %v7997_v14 }
 0x501   : > { %v9135_v19 = vrot.slane %v8979_v0, 7  ;;  %v8980_v21 = vcombine.low %v8326_v44, %v8327_v22  ;;  %v6548_v29 = vrot.slane %v6526_v25, %v21246_v8  ;;  %v6556_v7 = vcombine.high %v6534_v11, %v6534_v11 }
 0x502   : > { %v8329_v24 = vsel %vm401_vm0, %v6510_v63, %v8001_v38  ;;  %v7454_v48 = vcombine.high %v7446_v61, %v7446_v61  ;;  %v7462_v40 = vrot.slane %v7446_v61, %v21246_v8  ;;  %v6525_v25 = vrot.slane %v6511_v58, %v21246_v8  ;;  %v26062_v61 = vld [vmem:[#allocation54_spill] sm:$0xff] }
 0x503   : > { %v22321_v45 = vsel %vm401_vm0, 0.0, %v9135_v19  ;;  %v8981_v51 = vcombine.low %v8328_v3, %v8329_v24  ;;  %v8988_v28 = vrot.slane %v8980_v21, %v25564_v39  ;;  %v6558_v20 = vcombine.high %v6548_v29, %v6548_v29  ;;  %v26063_v3 = vld [vmem:[#allocation9_spill] sm:$0xff] }
 0x504   : > { %17068 = vmatprep.mubr.msk.f32.mxu0 %vm9319_vm12, %v22321_v45  ;;  %v9304_v49 = vrot.slane %v22321_v45, 1  ;;  %v7476_v0 = vrot.slane %v7454_v48, %v21246_v8  ;;  %v7484_v14 = vcombine.high %v7462_v40, %v7462_v40  ;;  %v8005_v63 = vrot.slane %v7462_v40, %v26001_v13 }
 0x505   : > { %v8995_v44 = vrot.slane %v8981_v51, %v25564_v39  ;;  %v26061_v38 = vcombine.high %v21454_v32, %v21454_v32  ;;  %v5824_v21 = vadd.f32 %v26063_v3, %v26062_v61  ;;  %v6527_v18 = vcombine.high %v6525_v25, %v6525_v25 }
 0x506   : > { %v7486_v24 = vcombine.high %v7476_v0, %v7476_v0  ;;  %v8009_v46 = vrot.slane %v7476_v0, %v26001_v13  ;;  %v8013_v48 = vrot.slane %v7484_v14, %v26001_v13  ;;  %v8330_v10 = vsel %vm401_vm0, %v6534_v11, %v8005_v63 }
 0x507   : > { %v7453_v22 = vrot.slane %v26061_v38, %v21246_v8  ;;  %v8996_v40 = vcombine.low %v8988_v28, %v8995_v44  ;;  %v6541_v51 = vrot.slane %v6525_v25, %v21246_v8  ;;  %v6555_v0 = vrot.slane %v6527_v18, %v21246_v8 }
 0x508   : > { %v8017_v59 = vrot.slane %v7486_v24, %v26001_v13  ;;  %v8331_v32 = vsel %vm401_vm0, %v6548_v29, %v8009_v46  ;;  %v8332_v38 = vsel %vm401_vm0, %v6556_v7, %v8013_v48 }
 0x509   : > { %v7455_v58 = vcombine.high %v7453_v22, %v7453_v22  ;;  %v7469_v61 = vrot.slane %v7453_v22, %v21246_v8  ;;  %v9136_v3 = vrot.slane %v8996_v40, 7  ;;  %v8997_v54 = vcombine.low %v8330_v10, %v8331_v32 }
 0x50a   : > { %v6557_v14 = vcombine.high %v6541_v51, %v6541_v51  ;;  %v8333_v11 = vsel %vm401_vm0, %v6558_v20, %v8017_v59  ;;  %v6559_v10 = vcombine.high %v6555_v0, %v6555_v0  ;;  %v6560_v32 = vcombine.high %v5824_v21, %v5824_v21 }
 0x50b   : > { %v7483_v28 = vrot.slane %v7455_v58, %v21246_v8  ;;  %v7485_v63 = vcombine.high %v7469_v61, %v7469_v61  ;;  %v8021_v44 = vrot.slane %v7469_v61, %v26001_v13  ;;  %v22350_v25 = vsel %vm401_vm0, %v9135_v19, %v9136_v3 }
 0x50c   : > { %v8998_v46 = vcombine.low %v8332_v38, %v8333_v11  ;;  %v9005_v29 = vrot.slane %v8997_v54, %v25564_v39  ;;  %v22354_v7 = vsel %vm401_vm0, %v9136_v3, 0.0  ;;  %17069 = vmatmul.mubr.msk.f32.gmra.mxu0 %vm9319_vm12, %v22350_v25  ;;  %v9305_v18 = vrot.slane %v22350_v25, 1 }
 0x50d   : > { %v9307_v59 = vrot.slane %v22354_v7, 1  ;;  %v7487_v20 = vcombine.high %v7483_v28, %v7483_v28  ;;  %v8025_v19 = vrot.slane %v7483_v28, %v26001_v13  ;;  %v8029_v24 = vrot.slane %v7485_v63, %v26001_v13  ;;  %v26066_v28 = vld [vmem:[#allocation106_spill] sm:$0xff] }
 0x50e   : > { %v9012_v22 = vrot.slane %v8998_v46, %v25564_v39  ;;  %v8334_v54 = vsel %vm401_vm0, %v6541_v51, %v8021_v44  ;;  %v22365_v48 = vsel %vm911_vm1, %v9304_v49, %v9305_v18  ;;  %v6567_v11 = vrot.slane %v5824_v21, %v21246_v8 }
 0x50f   : > { %26064 = vst [vmem:[#allocation69_spill] sm:$0xff] %v22365_v48  ;;  %v22368_v40 = vsel %vm911_vm1, %v9305_v18, %v9307_v59  ;;  %v8033_v58 = vrot.slane %v7487_v20, %v26001_v13  ;;  %17004 = vmatprep.mubr.msk.f32.mxu1 %vm9319_vm12, %v22365_v48  ;;  %v8335_v61 = vsel %vm401_vm0, %v6555_v0, %v8025_v19 }
 0x510   : > { %26065 = vst [vmem:[#allocation68_spill] sm:$0xff] %v22368_v40  ;;  %v9013_v38 = vcombine.low %v9005_v29, %v9012_v22  ;;  %v8336_v3 = vsel %vm401_vm0, %v6557_v14, %v8029_v24  ;;  %17005 = vmatmul.mubr.msk.f32.gmra.mxu1 %vm9319_vm12, %v22368_v40  ;;  %v9014_v51 = vcombine.low %v8334_v54, %v8335_v61 }
 0x511   : > { %v8337_v49 = vsel %vm401_vm0, %v6559_v10, %v8033_v58  ;;  %v7495_v63 = vrot.slane %v26066_v28, %v21246_v8  ;;  %v6574_v44 = vrot.slane %v6560_v32, %v21246_v8  ;;  %v6575_v29 = vcombine.high %v6567_v11, %v6567_v11 }
 0x512   : > { %v9138_v46 = vrot.slane %v9013_v38, 7  ;;  %v9015_v18 = vcombine.low %v8336_v3, %v8337_v49  ;;  %v6583_v0 = vrot.slane %v6567_v11, %v21246_v8  ;;  %v7488_v14 = vcombine.high %v26066_v28, %v26066_v28 }
 0x513   : > { %v9022_v21 = vrot.slane %v9014_v51, %v25564_v39  ;;  %v7503_v59 = vcombine.high %v7495_v63, %v7495_v63  ;;  %v7511_v20 = vrot.slane %v7495_v63, %v21246_v8  ;;  %v6597_v19 = vrot.slane %v6575_v29, %v21246_v8 }
 0x514   : > { %v22388_v10 = vsel %vm401_vm0, 0.0, %v9138_v46  ;;  %v9029_v22 = vrot.slane %v9015_v18, %v25564_v39  ;;  %v6576_v24 = vcombine.high %v6574_v44, %v6574_v44  ;;  %v6605_v3 = vcombine.high %v6583_v0, %v6583_v0 }
 0x515   : > { %17071 = vmatprep.mubr.msk.f32.mxu0 %vm9319_vm12, %v22388_v10  ;;  %v7525_v54 = vrot.slane %v7503_v59, %v21246_v8  ;;  %v7533_v58 = vcombine.high %v7511_v20, %v7511_v20  ;;  %v8037_v32 = vrot.slane %v7511_v20, %v26001_v13  ;;  %v9309_v61 = vrot.slane %v22388_v10, 1 }
 0x516   : > { %v9030_v38 = vcombine.low %v9022_v21, %v9029_v22  ;;  %v6607_v11 = vcombine.high %v6597_v19, %v6597_v19  ;;  %v6590_v18 = vrot.slane %v6574_v44, %v21246_v8  ;;  %v6604_v29 = vrot.slane %v6576_v24, %v21246_v8 }
 0x517   : > { %v7535_v49 = vcombine.high %v7525_v54, %v7525_v54  ;;  %v8041_v51 = vrot.slane %v7525_v54, %v26001_v13  ;;  %v8045_v28 = vrot.slane %v7533_v58, %v26001_v13  ;;  %v7502_v59 = vrot.slane %v7488_v14, %v21246_v8 }
 0x518   : > { %v9139_v63 = vrot.slane %v9030_v38, 7  ;;  %v8338_v21 = vsel %vm401_vm0, %v6583_v0, %v8037_v32 }
 0x519   : > { %v8049_v40 = vrot.slane %v7535_v49, %v26001_v13  ;;  %v8339_v20 = vsel %vm401_vm0, %v6597_v19, %v8041_v51  ;;  %v8340_v22 = vsel %vm401_vm0, %v6605_v3, %v8045_v28  ;;  %v7504_v44 = vcombine.high %v7502_v59, %v7502_v59 }
 0x51a   : > { %v22407_v48 = vsel %vm401_vm0, %v9138_v46, %v9139_v63  ;;  %v9031_v54 = vcombine.low %v8338_v21, %v8339_v20  ;;  %v22410_v58 = vsel %vm401_vm0, %v9139_v63, 0.0  ;;  %v7518_v19 = vrot.slane %v7502_v59, %v21246_v8 }
 0x51b   : > { %17072 = vmatmul.mubr.msk.f32.gmra.mxu0 %vm9319_vm12, %v22407_v48  ;;  %v9310_v14 = vrot.slane %v22407_v48, 1  ;;  %v8341_v24 = vsel %vm401_vm0, %v6607_v11, %v8049_v40  ;;  %v9312_v0 = vrot.slane %v22410_v58, 1  ;;  %v7532_v46 = vrot.slane %v7504_v44, %v21246_v8 }
 0x51c   : > { %v9032_v32 = vcombine.low %v8340_v22, %v8341_v24  ;;  %v9039_v3 = vrot.slane %v9031_v54, %v25564_v39  ;;  %v7534_v49 = vcombine.high %v7518_v19, %v7518_v19  ;;  %v8053_v51 = vrot.slane %v7518_v19, %v26001_v13 }
 0x51d   : > { %v22420_v38 = vsel %vm911_vm1, %v9309_v61, %v9310_v14  ;;  %v22428_v11 = vsel %vm911_vm1, %v9310_v14, %v9312_v0  ;;  %v7536_v28 = vcombine.high %v7532_v46, %v7532_v46  ;;  %v8057_v63 = vrot.slane %v7532_v46, %v26001_v13 }
 0x51e   : > { %26067 = vst [vmem:[#allocation73_spill] sm:$0xff] %v22420_v38  ;;  %17007 = vmatprep.mubr.msk.f32.mxu1 %vm9319_vm12, %v22420_v38  ;;  %v9046_v40 = vrot.slane %v9032_v32, %v25564_v39  ;;  %26068 = vst [vmem:[#allocation41_spill] sm:$0xff] %v22428_v11  ;;  %v6606_v61 = vcombine.high %v6590_v18, %v6590_v18  ;;  %v6608_v59 = vcombine.high %v6604_v29, %v6604_v29  ;;  %v8388_v38 = vld [vmem:[%s25150_s5 + $0x110] sm:$0xff] }
 0x51f   : > { %17008 = vmatmul.mubr.msk.f32.gmra.mxu1 %vm9319_vm12, %v22428_v11  ;;  %v8061_v21 = vrot.slane %v7534_v49, %v26001_v13  ;;  %v8065_v22 = vrot.slane %v7536_v28, %v26001_v13  ;;  %v8342_v54 = vsel %vm401_vm0, %v6590_v18, %v8053_v51  ;;  %v8343_v44 = vsel %vm401_vm0, %v6604_v29, %v8057_v63  ;;  %v26069_v29 = vld [vmem:[#allocation3_spill] sm:$0xff] }
 0x520   : > { %v9047_v20 = vcombine.low %v9039_v3, %v9046_v40  ;;  %v9048_v24 = vcombine.low %v8342_v54, %v8343_v44  ;;  %v9898_v40 = vrot.slane %v26069_v29, 2  ;;  %v26072_v44 = vld [vmem:[#allocation4_spill] sm:$0xff]  ;;  %v8390_v11 = vld [vmem:[%s25150_s5 + $0x120] sm:$0xff] }
 0x521   : > { %v8344_v0 = vsel %vm401_vm0, %v6606_v61, %v8061_v21  ;;  %v8345_v19 = vsel %vm401_vm0, %v6608_v59, %v8065_v22  ;;  %v22460_v22 = vpop.f32.mrf.mxu0 }
 0x522   : > { %v9141_v14 = vrot.slane %v9047_v20, 7  ;;  %v9049_v32 = vcombine.low %v8344_v0, %v8345_v19  ;;  %v9056_v3 = vrot.slane %v9048_v24, %v25564_v39  ;;  %v26070_v20 = vld [vmem:[#allocation55_spill] sm:$0xff]  ;;  %v26073_v24 = vrot.slane %v26072_v44, 2 }
 0x523   : > { %v26076_v19 = vld [vmem:[#allocation63_spill] sm:$0xff]  ;;  %v9901_v29 = vrot.slane %v26070_v20, 2 }
 0x524   : > { %v22440_v46 = vsel %vm401_vm0, 0.0, %v9141_v14  ;;  %v9063_v49 = vrot.slane %v9049_v32, %v25564_v39  ;;  %v9902_v32 = vrot.slane %v26076_v19, 2  ;;  %v26083_v44 = vld [vmem:[#allocation107_spill] sm:$0xff] }
 0x525   : > { %17074 = vmatprep.mubr.msk.f32.mxu0 %vm9319_vm12, %v22440_v46  ;;  %v9314_v61 = vrot.slane %v22440_v46, 1 }
 0x526   : > { %v9064_v18 = vcombine.low %v9056_v3, %v9063_v49  ;;  %v8400_v3 = vld [vmem:[%s25150_s5 + $0x170] sm:$0xff]  ;;  %v26077_v49 = vld [vmem:[#allocation103_spill] sm:$0xff] }
 0x528   : > { %v9142_v51 = vrot.slane %v9064_v18, 7  ;;  %v5745_v18 = vrot.slane %v26077_v49, 1 }
 0x52a   : > { %v22448_v28 = vsel %vm401_vm0, %v9141_v14, %v9142_v51  ;;  %v22451_v63 = vsel %vm401_vm0, %v9142_v51, 0.0  ;;  %v22468_v14 = vsel %vm1156_vm2, %v26073_v24, %v9898_v40  ;;  %v26078_v51 = vld [vmem:[#allocation57_spill] sm:$0xff]  ;;  %v22493_v24 = vpop.f32.mrf.mxu1 }
 0x52b   : > { %17075 = vmatmul.mubr.msk.f32.gmra.mxu0 %vm9319_vm12, %v22448_v28  ;;  %v9315_v59 = vrot.slane %v22448_v28, 1  ;;  %v9317_v21 = vrot.slane %v22451_v63, 1  ;;  %26074 = vst [vmem:[#allocation42_spill] sm:$0xff] %v22468_v14 }
 0x52c   : > { %17157 = vmatprep.mubr.msk.f32.mxu0 %vm9319_vm12, %v26070_v20  ;;  %v22513_v20 = vpop.f32.mrf.mxu1 }
 0x52d   : > { %v22463_v54 = vsel %vm911_vm1, %v9314_v61, %v9315_v59  ;;  %v22473_v0 = vsel %vm911_vm1, %v9315_v59, %v9317_v21  ;;  %v26079_v61 = vld [vmem:[#allocation5_spill] sm:$0xff]  ;;  %26084 = vst [vmem:[#allocation44_spill] sm:$0xff] %v22513_v20  ;;  %v8391_v20 = vld [vmem:[%s25150_s5 + $0x128] sm:$0xff] }
 0x52e   : > { %26071 = vst [vmem:[#allocation40_spill] sm:$0xff] %v22463_v54  ;;  %17010 = vmatprep.mubr.msk.f32.mxu1 %vm9319_vm12, %v22463_v54  ;;  %26075 = vst [vmem:[#allocation43_spill] sm:$0xff] %v22473_v0  ;;  %v26080_v59 = vrot.slane %v26079_v61, 2  ;;  %v8392_v54 = vld [vmem:[%s25150_s5 + $0x130] sm:$0xff]  ;;  %v17614_v61 = vld [vmem:[%s25150_s5 + $0x138] sm:$0xff] }
 0x52f   : > { %17011 = vmatmul.mubr.msk.f32.gmra.mxu1 %vm9319_vm12, %v22473_v0  ;;  %17158 = vmatmul.mubr.msk.f32.vlgmr.msra.gmra.mxu0 %vm9319_vm12, %v26076_v19  ;;  %v22495_v19 = vpop.f32.mrf.mxu0  ;;  %v9904_v0 = vrot.slane %v26083_v44, 2  ;;  %v5777_v44 = vsel %vm911_vm1, %v5745_v18, %v26077_v49  ;;  %v5697_v18 = vrot.slane %v26077_v49, 7 }
 0x530   : > { %17160 = vmatprep.mubr.msk.f32.mxu0 %vm9319_vm12, %v26078_v51  ;;  %17093 = vmatprep.mubr.msk.f32.mxu1 %vm9319_vm12, %v22468_v14  ;;  %v22491_v21 = vsel %vm1156_vm2, %v9898_v40, %v26080_v59  ;;  %26082 = vst [vmem:[#allocation62_spill] sm:$0xff] %v22495_v19  ;;  %v22510_v40 = vsel %vm1156_vm2, %v9901_v29, %v9902_v32  ;;  %v9906_v29 = vrot.slane %v26078_v51, 2  ;;  %v9914_v51 = vrot.slane %v21668_v42, 2 }
 0x531   : > { %26081 = vst [vmem:[#allocation48_spill] sm:$0xff] %v22491_v21  ;;  %17270 = vmatpush3.msra.mxu0 %v22175_v5  ;;  %v22503_v14 = vpop.f32.mrf.mxu0  ;;  %v9907_v5 = vrot.slane %v21605_v2, 2  ;;  %v22531_v19 = vsel %vm1156_vm2, %v9902_v32, %v9904_v0 }
 0x532   : > { %17271 = vmatprep.subr.mxu0 %v8400_v3 }
 0x533   : > { %17094 = vmatmul.mubr.msk.f32.vlgmr.msra.gmra.mxu1 %vm9319_vm12, %v22491_v21  ;;  %17161 = vmatmul.mubr.msk.f32.gmra.mxu0 %vm9319_vm12, %v21605_v2  ;;  %v22525_v59 = vpop.f32.mrf.mxu0  ;;  %v22527_v21 = vpop.f32.mrf.mxu1  ;;  %v8399_v2 = vld [vmem:[%s25150_s5 + $0x168] sm:$0xff]  ;;  %v22545_v0 = vsel %vm1156_vm2, %v9906_v29, %v9907_v5  ;;  %v5729_v29 = vsel %vm401_vm0, %v26077_v49, %v5697_v18 }
 0x534   : > { %17206 = vmatpush3.msra.mxu1 %v17614_v61  ;;  %17096 = vmatprep.mubr.msk.f32.mxu1 %vm9319_vm12, %v22510_v40  ;;  %26085 = vst [vmem:[#allocation79_spill] sm:$0xff] %v22525_v59  ;;  %v9909_v61 = vrot.slane %v21608_v55, 2  ;;  %v5841_v59 = vmul.f32 0.25, %v5777_v44  ;;  %v9912_v55 = vrot.slane %v21664_v16, 2  ;;  %v9911_v44 = vrot.slane %v21624_v35, 2 }
 0x535   : > { %17163 = vmatprep.mubr.msk.f32.mxu0 %vm9319_vm12, %v21624_v35  ;;  %17207 = vmatprep.subr.mxu1 %v8392_v54  ;;  %v22554_v32 = vpop.f32.mrf.mxu1  ;;  %v5793_v18 = vmul.f32 0.25, %v5729_v29 }
 0x536   : > { %17208 = vmatpush3.msra.mxu1 %v8392_v54  ;;  %17272 = vmatpush3.msra.mxu0 %v8400_v3  ;;  %v22552_v54 = vpop.f32.mrf.mxu0  ;;  %26086 = vst [vmem:[#allocation80_spill] sm:$0xff] %v22554_v32  ;;  %v5809_v3 = vmul.f32 0.75, %v26077_v49  ;;  %v8398_v32 = vld [vmem:[%s25150_s5 + $0x160] sm:$0xff]  ;;  %v22577_v42 = vsel %vm1156_vm2, %v9911_v44, %v9912_v55  ;;  %v9917_v49 = vrot.slane %v21724_v52, 2  ;;  %v22590_v44 = vsel %vm1156_vm2, %v9912_v55, %v9914_v51 }
 0x537   : > { %17097 = vmatmul.mubr.msk.f32.gmra.mxu1 %vm9319_vm12, %v22531_v19  ;;  %17164 = vmatmul.mubr.msk.f32.gmra.mxu0 %vm9319_vm12, %v21664_v16  ;;  %v22561_v16 = vsel %vm1156_vm2, %v9907_v5, %v9909_v61  ;;  %v22570_v35 = vpop.f32.mrf.mxu1  ;;  %v9916_v61 = vrot.slane %v21708_v30, 2 }
 0x538   : > { %17099 = vmatprep.mubr.msk.f32.mxu1 %vm9319_vm12, %v22545_v0  ;;  %17166 = vmatprep.mubr.msk.f32.mxu0 %vm9319_vm12, %v21708_v30  ;;  %v5857_v5 = vadd.f32 %v5841_v59, %v5809_v3  ;;  %v9919_v59 = vrot.slane %v21729_v34, 2  ;;  %v9922_v34 = vrot.slane %v21807_v37, 2  ;;  %v5825_v30 = vadd.f32 %v5809_v3, %v5793_v18 }
 0x539   : > { %17209 = vmatprep.subr.mxu1 %v8391_v20  ;;  %17273 = vmatprep.subr.mxu0 %v8399_v2  ;;  %v22604_v51 = vsel %vm1156_vm2, %v9916_v61, %v9917_v49 }
 0x53a   : > { %17210 = vmatpush3.msra.mxu1 %v8391_v20  ;;  %17274 = vmatpush3.msra.mxu0 %v8399_v2  ;;  %v22584_v2 = vpop.f32.mrf.mxu0  ;;  %v22586_v20 = vpop.f32.mrf.mxu1  ;;  %v7544_v55 = vrot.slane %v5857_v5, %v21246_v8  ;;  %v22614_v61 = vsel %vm1156_vm2, %v9917_v49, %v9919_v59  ;;  %v6609_v18 = vcombine.high %v5825_v30, %v5825_v30  ;;  %v9929_v59 = vrot.slane %v21883_v9, 2 }
 0x53b   : > { %17100 = vmatmul.mubr.msk.f32.gmra.mxu1 %vm9319_vm12, %v22561_v16  ;;  %17167 = vmatmul.mubr.msk.f32.gmra.mxu0 %vm9319_vm12, %v21724_v52  ;;  %26087 = vst [vmem:[#allocation8_spill] sm:$0xff] %v22584_v2  ;;  %26088 = vst [vmem:[#allocation72_spill] sm:$0xff] %v22586_v20  ;;  %v8389_v52 = vld [vmem:[%s25150_s5 + $0x118] sm:$0xff]  ;;  %v9921_v20 = vrot.slane %v21782_v26, 2 }
 0x53c   : > { %17102 = vmatprep.mubr.msk.f32.mxu1 %vm9319_vm12, %v22577_v42  ;;  %17169 = vmatprep.mubr.msk.f32.mxu0 %vm9319_vm12, %v21782_v26  ;;  %v8397_v2 = vld [vmem:[%s25150_s5 + $0x158] sm:$0xff]  ;;  %v16976_v29 = vpop.f32.mrf.mxu1  ;;  %v22625_v26 = vadd.f32 %v22460_v22, %v22493_v24  ;;  %v7552_v22 = vcombine.high %v7544_v55, %v7544_v55 }
 0x53d   : > { %17211 = vmatprep.subr.mxu1 %v8390_v11  ;;  %17275 = vmatprep.subr.mxu0 %v8398_v32 }
 0x53e   : > { %17212 = vmatpush3.msra.mxu1 %v8390_v11  ;;  %17276 = vmatpush3.msra.mxu0 %v8398_v32  ;;  %v7537_v11 = vcombine.high %v5857_v5, %v5857_v5  ;;  %v17040_v32 = vpop.f32.mrf.mxu0  ;;  %v8396_v5 = vld [vmem:[%s25150_s5 + $0x150] sm:$0xff]  ;;  %26089 = vst [vmem:[#allocation76_spill] sm:$0xff] %v22625_v26  ;;  %v22627_v3 = vpop.f32.mrf.mxu1  ;;  %v22658_v26 = vadd.f32 %v22503_v14, %v22527_v21  ;;  %v9931_v14 = vrot.slane %v21922_v53, 2 }
 0x53f   : > { %17103 = vmatmul.mubr.msk.f32.gmra.mxu1 %vm9319_vm12, %v22590_v44  ;;  %17170 = vmatmul.mubr.msk.f32.gmra.mxu0 %vm9319_vm12, %v21807_v37  ;;  %v9924_v37 = vrot.slane %v21811_v6, 2  ;;  %26090 = vst [vmem:[#allocation67_spill] sm:$0xff] %v22627_v3  ;;  %v9927_v6 = vrot.slane %v21879_v33, 2  ;;  %v6616_v3 = vrot.slane %v5825_v30, %v21246_v8  ;;  %v9932_v30 = vrot.slane %v21954_v23, 2 }
 0x540   : > { %17105 = vmatprep.mubr.msk.f32.mxu1 %vm9319_vm12, %v22604_v51  ;;  %17172 = vmatprep.mubr.msk.f32.mxu0 %vm9319_vm12, %v21848_v27  ;;  %v7551_v49 = vrot.slane %v7537_v11, %v21246_v8  ;;  %v22642_v24 = vpop.f32.mrf.mxu0  ;;  %v8387_v11 = vld [vmem:[%s25150_s5 + $0x108] sm:$0xff]  ;;  %26092 = vst [vmem:[#allocation87_spill] sm:$0xff] %v22658_v26  ;;  %v22678_v21 = vrot.slane %v7552_v22, %v21246_v8 }
 0x541   : > { %17213 = vmatprep.subr.mxu1 %v8389_v52  ;;  %17277 = vmatprep.subr.mxu0 %v8397_v2  ;;  %26091 = vst [vmem:[#allocation39_spill] sm:$0xff] %v22642_v24  ;;  %v8395_v24 = vld [vmem:[%s25150_s5 + $0x148] sm:$0xff]  ;;  %v6623_v26 = vrot.slane %v6609_v18, %v21246_v8  ;;  %v22691_v22 = vrot.slane %v7544_v55, %v21246_v8 }
 0x542   : > { %17214 = vmatpush3.msra.mxu1 %v8389_v52  ;;  %17278 = vmatpush3.msra.mxu0 %v8397_v2  ;;  %v22634_v52 = vsel %vm1156_vm2, %v9921_v20, %v9922_v34  ;;  %v9926_v2 = vrot.slane %v21848_v27, 2  ;;  %v22646_v20 = vsel %vm1156_vm2, %v9922_v34, %v9924_v37  ;;  %v16979_v37 = vpop.f32.mrf.mxu1  ;;  %v22670_v34 = vadd.f32 %v22552_v54, %v22570_v35 }
 0x543   : > { %17106 = vmatmul.mubr.msk.f32.gmra.mxu1 %vm9319_vm12, %v22614_v61  ;;  %17173 = vmatmul.mubr.msk.f32.gmra.mxu0 %vm9319_vm12, %v21879_v33  ;;  %v22682_v35 = vadd.f32 %v17040_v32, %v16976_v29  ;;  %v8394_v29 = vld [vmem:[%s25150_s5 + $0x140] sm:$0xff]  ;;  %v22704_v32 = vsel %vm1156_vm2, %v9931_v14, %v9932_v30  ;;  %v7584_v18 = vcombine.high %v22678_v21, %v22678_v21 }
 0x544   : > { %17108 = vmatprep.mubr.msk.f32.mxu1 %vm9319_vm12, %v22634_v52  ;;  %17175 = vmatprep.mubr.msk.f32.mxu0 %vm9319_vm12, %v21922_v53  ;;  %v22665_v9 = vsel %vm1156_vm2, %v9926_v2, %v9927_v6  ;;  %26093 = vst [vmem:[#allocation92_spill] sm:$0xff] %v22670_v34  ;;  %v9934_v2 = vrot.slane %v21958_v47, 2  ;;  %v22687_v34 = vsel %vm1156_vm2, %v9927_v6, %v9929_v59  ;;  %v8386_v47 = vld [vmem:[%s25150_s5 + $0x100] sm:$0xff]  ;;  %v9936_v6 = vrot.slane %v21996_v62, 2 }
 0x545   : > { %17215 = vmatprep.subr.mxu1 %v8388_v38  ;;  %17279 = vmatprep.subr.mxu0 %v8396_v5  ;;  %26094 = vst [vmem:[#allocation75_spill] sm:$0xff] %v22682_v35  ;;  %v6624_v53 = vcombine.high %v6616_v3, %v6616_v3 }
 0x546   : > { %17216 = vmatpush3.msra.mxu1 %v8388_v38  ;;  %17280 = vmatpush3.msra.mxu0 %v8396_v5  ;;  %v7553_v38 = vcombine.high %v7551_v49, %v7551_v49  ;;  %v17043_v5 = vpop.f32.mrf.mxu0  ;;  %v22718_v59 = vsel %vm1156_vm2, %v9932_v30, %v9934_v2  ;;  %v22733_v30 = vld [vmem:[%s25150_s5 + $0x1b8] sm:$0xff]  ;;  %v9944_v2 = vrot.slane %v22090_v36, 2  ;;  %v8081_v36 = vrot.slane %v7584_v18, %v26001_v13 }
 0x547   : > { %17109 = vmatmul.mubr.msk.f32.gmra.mxu1 %vm9319_vm12, %v22646_v20  ;;  %17176 = vmatmul.mubr.msk.f32.gmra.mxu0 %vm9319_vm12, %v21954_v23  ;;  %v22684_v54 = vadd.f32 %v17043_v5, %v16979_v37  ;;  %v9937_v23 = vrot.slane %v22020_v43, 2  ;;  %v6625_v37 = vcombine.high %v6623_v26, %v6623_v26  ;;  %v6646_v5 = vrot.slane %v6624_v53, %v21246_v8 }
 0x548   : > { %17111 = vmatprep.mubr.msk.f32.mxu1 %vm9319_vm12, %v22665_v9  ;;  %17178 = vmatprep.mubr.msk.f32.mxu0 %vm9319_vm12, %v21996_v62  ;;  %v22707_v55 = vrot.slane %v7553_v38, %v21246_v8  ;;  %v22722_v38 = vrot.slane %v7551_v49, %v21246_v8  ;;  %v22738_v49 = vld [vmem:[%s25150_s5 + $0x1f8] sm:$0xff]  ;;  %v9941_v53 = vrot.slane %v22062_v1, 2  ;;  %v6639_v18 = vrot.slane %v6623_v26, %v21246_v8 }
 0x549   : > { %17217 = vmatprep.subr.mxu1 %v8387_v11  ;;  %17281 = vmatprep.subr.mxu0 %v8395_v24  ;;  %26095 = vst [vmem:[#allocation74_spill] sm:$0xff] %v22684_v54  ;;  %v22725_v14 = vsel %vm1156_vm2, %v9936_v6, %v9937_v23  ;;  %v22749_v6 = vpop.f32.mrf.mxu0  ;;  %v22751_v54 = vpop.f32.mrf.mxu1  ;;  %v9946_v26 = vrot.slane %v22126_v4, 2 }
 0x54a   : > { %17218 = vmatpush3.msra.mxu1 %v8387_v11  ;;  %17282 = vmatpush3.msra.mxu0 %v8395_v24  ;;  %v9939_v24 = vrot.slane %v22023_v12, 2  ;;  %v9942_v11 = vrot.slane %v22087_v57, 2  ;;  %26096 = vst [vmem:[#allocation21_spill] sm:$0xff] %v22725_v14  ;;  %v7582_v12 = vcombine.high %v22691_v22, %v22691_v22  ;;  %26097 = vst [vmem:[#allocation100_spill] sm:$0xff] %v22749_v6 }
 0x54b   : > { %17112 = vmatmul.mubr.msk.f32.gmra.mxu1 %vm9319_vm12, %v22687_v34  ;;  %17179 = vmatmul.mubr.msk.f32.gmra.mxu0 %vm9319_vm12, %v22020_v43  ;;  %26098 = vst [vmem:[#allocation84_spill] sm:$0xff] %v22751_v54  ;;  %v6653_v6 = vrot.slane %v6625_v37, %v21246_v8  ;;  %v7583_v54 = vcombine.high %v22722_v38, %v22722_v38  ;;  %v17046_v62 = vpop.f32.mrf.mxu0 }
 0x54c   : > { %17114 = vmatprep.mubr.msk.f32.mxu1 %vm9319_vm12, %v22704_v32  ;;  %17181 = vmatprep.mubr.msk.f32.mxu0 %vm9319_vm12, %v22062_v1  ;;  %v22758_v35 = vsel %vm1156_vm2, %v9937_v23, %v9939_v24  ;;  %v6656_v1 = vcombine.high %v6646_v5, %v6646_v5  ;;  %v8073_v23 = vrot.slane %v22678_v21, %v26001_v13 }
 0x54d   : > { %17219 = vmatprep.subr.mxu1 %v8386_v47  ;;  %17283 = vmatprep.subr.mxu0 %v8394_v29  ;;  %26099 = vst [vmem:[#allocation83_spill] sm:$0xff] %v22758_v35  ;;  %v8077_v24 = vrot.slane %v7582_v12, %v26001_v13  ;;  %v22779_v37 = vsel %vm1156_vm2, %v9942_v11, %v9944_v2  ;;  %v16982_v33 = vpop.f32.mrf.mxu1  ;;  %v9949_v2 = vrot.slane %v22152_v31, 2 }
 0x54e   : > { %17220 = vmatpush3.msra.mxu1 %v8386_v47  ;;  %17284 = vmatpush3.msra.mxu0 %v8394_v29  ;;  %v6632_v47 = vrot.slane %v6616_v3, %v21246_v8  ;;  %v7585_v29 = vcombine.high %v22707_v55, %v22707_v55  ;;  %v22762_v3 = vsel %vm1156_vm2, %v9941_v53, %v9942_v11 }
 0x54f   : > { %17115 = vmatmul.mubr.msk.f32.gmra.mxu1 %vm9319_vm12, %v22718_v59  ;;  %17182 = vmatmul.mubr.msk.f32.gmra.mxu0 %vm9319_vm12, %v22087_v57  ;;  %26100 = vst [vmem:[#allocation94_spill] sm:$0xff] %v22762_v3  ;;  %v9947_v57 = vrot.slane %v22148_v15, 2  ;;  %26101 = vst [vmem:[#allocation19_spill] sm:$0xff] %v22779_v37  ;;  %v8069_v21 = vrot.slane %v22691_v22, %v26001_v13  ;;  %v8349_v12 = vsel %vm401_vm0, %v6656_v1, %v8081_v36 }
 0x550   : > { %17117 = vmatprep.mubr.msk.f32.mxu1 %vm9319_vm12, %v22725_v14  ;;  %17184 = vmatprep.mubr.msk.f32.mxu0 %vm9319_vm12, %v22126_v4  ;;  %v6654_v53 = vcombine.high %v6632_v47, %v6632_v47  ;;  %v8097_v43 = vrot.slane %v7585_v29, %v26001_v13  ;;  %v22790_v11 = vadd.f32 %v17046_v62, %v16982_v33  ;;  %v9952_v33 = vrot.slane %v22218_v41, 2 }
 0x551   : > { %17333 = vmatprep.subr.mxu1 %v22733_v30  ;;  %17397 = vmatprep.subr.mxu0 %v22738_v49  ;;  %v6657_v29 = vcombine.high %v6653_v6, %v6653_v6  ;;  %v8089_v8 = vrot.slane %v22707_v55, %v26001_v13  ;;  %v22797_v27 = vsel %vm1156_vm2, %v9946_v26, %v9947_v57  ;;  %v9951_v55 = vrot.slane %v22199_v17, 2 }
 0x552   : > { %26102 = vst [vmem:[#allocation38_spill] sm:$0xff] %v22797_v27  ;;  %v8347_v4 = vsel %vm401_vm0, %v6646_v5, %v8073_v23  ;;  %v6655_v22 = vcombine.high %v6639_v18, %v6639_v18  ;;  %v8085_v1 = vrot.slane %v22722_v38, %v26001_v13  ;;  %v22818_v23 = vsel %vm1156_vm2, %v9947_v57, %v9949_v2  ;;  %v22850_v2 = vpop.f32.mrf.mxu0 }
 0x553   : > { %17118 = vmatmul.mubr.msk.f32.gmra.mxu1 %vm9319_vm12, %v22758_v35  ;;  %17185 = vmatmul.mubr.msk.f32.gmra.mxu0 %vm9319_vm12, %v22148_v15  ;;  %v8093_v15 = vrot.slane %v7583_v54, %v26001_v13  ;;  %v8353_v31 = vsel %vm401_vm0, %v6657_v29, %v8097_v43  ;;  %v8346_v54 = vsel %vm401_vm0, %v6632_v47, %v8069_v21  ;;  %v9954_v13 = vrot.slane %v22222_v60, 2  ;;  %v22852_v29 = vpop.f32.mrf.mxu1 }
 0x554   : > { %17120 = vmatprep.mubr.msk.f32.mxu1 %vm9319_vm12, %v22762_v3  ;;  %17187 = vmatprep.mubr.msk.f32.mxu0 %vm9319_vm12, %v22199_v17  ;;  %v8348_v3 = vsel %vm401_vm0, %v6654_v53, %v8077_v24  ;;  %v9065_v5 = vcombine.low %v8346_v54, %v8347_v4  ;;  %v8351_v36 = vsel %vm401_vm0, %v6653_v6, %v8089_v8  ;;  %v9957_v4 = vrot.slane %v22284_v56, 2  ;;  %v26106_v24 = vld [vmem:[#allocation52_spill] sm:$0xff] }
 0x555   : > { %v9066_v62 = vcombine.low %v8348_v3, %v8349_v12  ;;  %v8352_v3 = vsel %vm401_vm0, %v6655_v22, %v8093_v15  ;;  %26103 = vst [vmem:[#allocation35_spill] sm:$0xff] %v22818_v23  ;;  %v22826_v38 = vsel %vm1156_vm2, %v9951_v55, %v9952_v33  ;;  %v8350_v15 = vsel %vm401_vm0, %v6639_v18, %v8085_v1 }
 0x556   : > { %v9083_v43 = vcombine.low %v8352_v3, %v8353_v31  ;;  %26104 = vst [vmem:[#allocation16_spill] sm:$0xff] %v22826_v38  ;;  %v9082_v57 = vcombine.low %v8350_v15, %v8351_v36  ;;  %v9956_v60 = vrot.slane %v22256_v50, 2  ;;  %v9073_v47 = vrot.slane %v9065_v5, %v25564_v39  ;;  %26108 = vst [vmem:[#allocation82_spill] sm:$0xff] %v22850_v2 }
 0x557   : > { %17121 = vmatmul.mubr.msk.f32.gmra.mxu1 %vm9319_vm12, %v22779_v37  ;;  %17188 = vmatmul.mubr.msk.f32.gmra.mxu0 %vm9319_vm12, %v22218_v41  ;;  %v9080_v8 = vrot.slane %v9066_v62, %v25564_v39  ;;  %v22838_v6 = vsel %vm1156_vm2, %v9952_v33, %v9954_v13  ;;  %v9959_v53 = vrot.slane %v26106_v24, 2  ;;  %v9962_v21 = vrot.slane %v22350_v25, 2  ;;  %26109 = vst [vmem:[#allocation91_spill] sm:$0xff] %v22852_v29  ;;  %v26141_v29 = vld [vmem:[#allocation32_spill] sm:$0xff] }
 0x558   : > { %17123 = vmatprep.mubr.msk.f32.mxu1 %vm9319_vm12, %v22797_v27  ;;  %17190 = vmatprep.mubr.msk.f32.mxu0 %vm9319_vm12, %v22256_v50  ;;  %26105 = vst [vmem:[#allocation20_spill] sm:$0xff] %v22838_v6  ;;  %v9097_v26 = vrot.slane %v9083_v43, %v25564_v39  ;;  %v22847_v18 = vsel %vm1156_vm2, %v9956_v60, %v9957_v4  ;;  %v9961_v33 = vrot.slane %v22321_v45, 2  ;;  %v9964_v1 = vrot.slane %v22354_v7, 2 }
 0x559   : > { %26107 = vst [vmem:[#allocation81_spill] sm:$0xff] %v22847_v18  ;;  %v9081_v12 = vcombine.low %v9073_v47, %v9080_v8  ;;  %v9090_v22 = vrot.slane %v9082_v57, %v25564_v39  ;;  %v22861_v62 = vsel %vm1156_vm2, %v9957_v4, %v9959_v53  ;;  %v9967_v55 = vrot.slane %v22407_v48, 2  ;;  %v17049_v5 = vpop.f32.mrf.mxu0 }
 0x55a   : > { %26110 = vst [vmem:[#allocation18_spill] sm:$0xff] %v22861_v62  ;;  %v22869_v54 = vsel %vm1156_vm2, %v9961_v33, %v9962_v21  ;;  %v9966_v3 = vrot.slane %v22388_v10, 2  ;;  %v22880_v13 = vsel %vm1156_vm2, %v9962_v21, %v9964_v1  ;;  %v9969_v43 = vrot.slane %v22410_v58, 2 }
 0x55b   : > { %17124 = vmatmul.mubr.msk.f32.gmra.mxu1 %vm9319_vm12, %v22818_v23  ;;  %17191 = vmatmul.mubr.msk.f32.gmra.mxu0 %vm9319_vm12, %v22284_v56  ;;  %v9098_v31 = vcombine.low %v9090_v22, %v9097_v26  ;;  %26111 = vst [vmem:[#allocation23_spill] sm:$0xff] %v22869_v54  ;;  %v9144_v39 = vrot.slane %v9081_v12, 7  ;;  %26113 = vst [vmem:[#allocation88_spill] sm:$0xff] %v22880_v13  ;;  %v9972_v57 = vrot.slane %v22448_v28, 2  ;;  %v9971_v58 = vrot.slane %v22440_v46, 2  ;;  %v22930_v21 = vpop.f32.mrf.mxu0  ;;  %v26119_v22 = vld [vmem:[#allocation56_spill] sm:$0xff] }
 0x55c   : > { %17126 = vmatprep.mubr.msk.f32.mxu1 %vm9319_vm12, %v22826_v38  ;;  %17193 = vmatprep.mubr.msk.f32.mxu0 %vm9319_vm12, %v22321_v45  ;;  %v22890_v8 = vsel %vm1156_vm2, %v9966_v3, %v9967_v55  ;;  %v22902_v60 = vsel %vm1156_vm2, %v9967_v55, %v9969_v43  ;;  %v9974_v24 = vrot.slane %v22451_v63, 2  ;;  %v8416_v63 = vld [vmem:[%s25150_s5 + $0x1f0] sm:$0xff]  ;;  %26117 = vst [vmem:[#allocation30_spill] sm:$0xff] %v22930_v21  ;;  %v8414_v3 = vld [vmem:[%s25150_s5 + $0x1e0] sm:$0xff] }
 0x55d   : > { %v16985_v36 = vpop.f32.mrf.mxu1  ;;  %v22883_v4 = vrot.slane %v9098_v31, 7  ;;  %26114 = vst [vmem:[#allocation93_spill] sm:$0xff] %v22890_v8  ;;  %v22893_v15 = vsel %vm401_vm0, 0.0, %v9144_v39  ;;  %26115 = vst [vmem:[#allocation97_spill] sm:$0xff] %v22902_v60  ;;  %v22914_v53 = vsel %vm1156_vm2, %v9971_v58, %v9972_v57  ;;  %v26121_v31 = vld [vmem:[#allocation59_spill] sm:$0xff]  ;;  %v26125_v43 = vld [vmem:[#allocation78_spill] sm:$0xff] }
 0x55e   : > { %v22876_v7 = vadd.f32 %v17049_v5, %v16985_v36  ;;  %26116 = vst [vmem:[#allocation98_spill] sm:$0xff] %v22914_v53  ;;  %v22921_v26 = vsel %vm1156_vm2, %v9972_v57, %v9974_v24  ;;  %v26124_v5 = vld [vmem:[#allocation14_spill] sm:$0xff]  ;;  %v26126_v57 = vld [vmem:[#allocation71_spill] sm:$0xff]  ;;  %v26137_v21 = vld [vmem:[#allocation36_spill] sm:$0xff] }
 0x55f   : > { %17127 = vmatmul.mubr.msk.f32.gmra.mxu1 %vm9319_vm12, %v22838_v6  ;;  %17194 = vmatmul.mubr.msk.f32.gmra.mxu0 %vm9319_vm12, %v22350_v25  ;;  %v22906_v47 = vsel %vm401_vm0, %v9144_v39, %v22883_v4  ;;  %v22932_v12 = vpop.f32.mrf.mxu1  ;;  %v8415_v39 = vld [vmem:[%s25150_s5 + $0x1e8] sm:$0xff]  ;;  %v8406_v36 = vld [vmem:[%s25150_s5 + $0x1a0] sm:$0xff] }
 0x560   : > { %17129 = vmatprep.mubr.msk.f32.mxu1 %vm9319_vm12, %v22847_v18  ;;  %17196 = vmatprep.mubr.msk.f32.mxu0 %vm9319_vm12, %v22388_v10  ;;  %26112 = vst [vmem:[#allocation90_spill] sm:$0xff] %v22876_v7  ;;  %26118 = vst [vmem:[#allocation104_spill] sm:$0xff] %v22932_v12  ;;  %v26138_v12 = vld [vmem:[#allocation94_spill] sm:$0xff] }
 0x563   : > { %17130 = vmatmul.mubr.msk.f32.gmra.mxu1 %vm9319_vm12, %v22861_v62  ;;  %17197 = vmatmul.mubr.msk.f32.gmra.mxu0 %vm9319_vm12, %v22407_v48 }
 0x564   : > { %17132 = vmatprep.mubr.msk.f32.mxu1 %vm9319_vm12, %v22869_v54  ;;  %17199 = vmatprep.mubr.msk.f32.mxu0 %vm9319_vm12, %v22440_v46 }
 0x567   : > { %17133 = vmatmul.mubr.msk.f32.gmra.mxu1 %vm9319_vm12, %v22880_v13  ;;  %17200 = vmatmul.mubr.msk.f32.gmra.mxu0 %vm9319_vm12, %v22448_v28 }
 0x568   : > { %17135 = vmatprep.mubr.msk.f32.mxu1 %vm9319_vm12, %v22890_v8  ;;  %17202 = vmatprep.mubr.msk.f32.mxu0 %vm9319_vm12, %v22893_v15 }
 0x56a   : > { %v17052_v33 = vpop.f32.mrf.mxu0 }
 0x56b   : > { %17136 = vmatmul.mubr.msk.f32.gmra.mxu1 %vm9319_vm12, %v22902_v60  ;;  %17203 = vmatmul.mubr.msk.f32.gmra.mxu0 %vm9319_vm12, %v22906_v47 }
 0x56c   : > { %17138 = vmatprep.mubr.msk.f32.mxu1 %vm9319_vm12, %v22914_v53  ;;  %17285 = vmatprep.mubr.msk.f32.mxu0 %vm9319_vm12, %v22510_v40  ;;  %v26120_v40 = vld [vmem:[#allocation64_spill] sm:$0xff]  ;;  %v22981_v58 = vpop.f32.mrf.mxu0 }
 0x56d   : > { %26127 = vst [vmem:[#allocation105_spill] sm:$0xff] %v22981_v58  ;;  %v26133_v58 = vld [vmem:[#allocation96_spill] sm:$0xff] }
 0x56e   : > { %v16988_v1 = vpop.f32.mrf.mxu1 }
 0x56f   : > { %17139 = vmatmul.mubr.msk.f32.gmra.mxu1 %vm9319_vm12, %v22921_v26  ;;  %17286 = vmatmul.mubr.msk.f32.vlgmr.msra.gmra.mxu0 %vm9319_vm12, %v22531_v19  ;;  %v8408_v19 = vld [vmem:[%s25150_s5 + $0x1b0] sm:$0xff]  ;;  %v22949_v55 = vadd.f32 %v17052_v33, %v16988_v1 }
 0x570   : > { %17221 = vmatprep.mubr.msk.f32.mxu1 %vm9319_vm12, %v26119_v22  ;;  %17288 = vmatprep.mubr.msk.f32.mxu0 %vm9319_vm12, %v22545_v0  ;;  %v22983_v24 = vpop.f32.mrf.mxu1  ;;  %v8413_v22 = vld [vmem:[%s25150_s5 + $0x1d8] sm:$0xff] }
 0x571   : > { %17398 = vmatpush3.msra.mxu0 %v22738_v49  ;;  %26122 = vst [vmem:[#allocation10_spill] sm:$0xff] %v22949_v55  ;;  %v8407_v49 = vld [vmem:[%s25150_s5 + $0x1a8] sm:$0xff]  ;;  %26128 = vst [vmem:[#allocation101_spill] sm:$0xff] %v22983_v24 }
 0x572   : > { %17399 = vmatprep.subr.mxu0 %v8416_v63  ;;  %v26136_v24 = vld [vmem:[#allocation24_spill] sm:$0xff]  ;;  %v26143_v55 = vld [vmem:[#allocation51_spill] sm:$0xff] }
 0x573   : > { %17222 = vmatmul.mubr.msk.f32.vlgmr.msra.gmra.mxu1 %vm9319_vm12, %v26120_v40  ;;  %17289 = vmatmul.mubr.msk.f32.gmra.mxu0 %vm9319_vm12, %v22561_v16  ;;  %v26130_v40 = vld [vmem:[#allocation15_spill] sm:$0xff] }
 0x574   : > { %17334 = vmatpush3.msra.mxu1 %v22733_v30  ;;  %17224 = vmatprep.mubr.msk.f32.mxu1 %vm9319_vm12, %v26121_v31  ;;  %v26123_v30 = vld [vmem:[#allocation13_spill] sm:$0xff] }
 0x575   : > { %17291 = vmatprep.mubr.msk.f32.mxu0 %vm9319_vm12, %v22577_v42  ;;  %17335 = vmatprep.subr.mxu1 %v8408_v19 }
 0x576   : > { %17336 = vmatpush3.msra.mxu1 %v8408_v19  ;;  %17400 = vmatpush3.msra.mxu0 %v8416_v63  ;;  %v8405_v63 = vld [vmem:[%s25150_s5 + $0x198] sm:$0xff] }
 0x577   : > { %17225 = vmatmul.mubr.msk.f32.gmra.mxu1 %vm9319_vm12, %v26123_v30  ;;  %17292 = vmatmul.mubr.msk.f32.gmra.mxu0 %vm9319_vm12, %v22590_v44  ;;  %v26129_v19 = vld [vmem:[#allocation85_spill] sm:$0xff] }
 0x578   : > { %17227 = vmatprep.mubr.msk.f32.mxu1 %vm9319_vm12, %v26124_v5  ;;  %17294 = vmatprep.mubr.msk.f32.mxu0 %vm9319_vm12, %v22604_v51 }
 0x579   : > { %17337 = vmatprep.subr.mxu1 %v8407_v49  ;;  %17401 = vmatprep.subr.mxu0 %v8415_v39  ;;  %v17055_v33 = vpop.f32.mrf.mxu0 }
 0x57a   : > { %17338 = vmatpush3.msra.mxu1 %v8407_v49  ;;  %17402 = vmatpush3.msra.mxu0 %v8415_v39  ;;  %v8404_v49 = vld [vmem:[%s25150_s5 + $0x190] sm:$0xff] }
 0x57b   : > { %17228 = vmatmul.mubr.msk.f32.gmra.mxu1 %vm9319_vm12, %v26125_v43  ;;  %17295 = vmatmul.mubr.msk.f32.gmra.mxu0 %vm9319_vm12, %v22614_v61  ;;  %v8412_v39 = vld [vmem:[%s25150_s5 + $0x1d0] sm:$0xff] }
 0x57c   : > { %17230 = vmatprep.mubr.msk.f32.mxu1 %vm9319_vm12, %v26126_v57  ;;  %17297 = vmatprep.mubr.msk.f32.mxu0 %vm9319_vm12, %v22634_v52 }
 0x57d   : > { %17339 = vmatprep.subr.mxu1 %v8406_v36  ;;  %17403 = vmatprep.subr.mxu0 %v8414_v3  ;;  %v16991_v1 = vpop.f32.mrf.mxu1 }
 0x57e   : > { %17340 = vmatpush3.msra.mxu1 %v8406_v36  ;;  %17404 = vmatpush3.msra.mxu0 %v8414_v3  ;;  %v23005_v36 = vadd.f32 %v17055_v33, %v16991_v1  ;;  %v26132_v3 = vld [vmem:[#allocation89_spill] sm:$0xff]  ;;  %v26135_v1 = vld [vmem:[#allocation34_spill] sm:$0xff] }
 0x57f   : > { %17231 = vmatmul.mubr.msk.f32.gmra.mxu1 %vm9319_vm12, %v26129_v19  ;;  %17298 = vmatmul.mubr.msk.f32.gmra.mxu0 %vm9319_vm12, %v22646_v20  ;;  %v26134_v33 = vld [vmem:[#allocation29_spill] sm:$0xff]  ;;  %v23050_v2 = vpop.f32.mrf.mxu1 }
 0x580   : > { %17233 = vmatprep.mubr.msk.f32.mxu1 %vm9319_vm12, %v26130_v40  ;;  %17300 = vmatprep.mubr.msk.f32.mxu0 %vm9319_vm12, %v22665_v9  ;;  %26131 = vst [vmem:[#allocation7_spill] sm:$0xff] %v23005_v36  ;;  %26140 = vst [vmem:[#allocation54_spill] sm:$0xff] %v23050_v2  ;;  %v26142_v36 = vld [vmem:[#allocation33_spill] sm:$0xff]  ;;  %v26145_v2 = vld [vmem:[#allocation46_spill] sm:$0xff] }
 0x581   : > { %17341 = vmatprep.subr.mxu1 %v8405_v63  ;;  %17405 = vmatprep.subr.mxu0 %v8413_v22 }
 0x582   : > { %17342 = vmatpush3.msra.mxu1 %v8405_v63  ;;  %17406 = vmatpush3.msra.mxu0 %v8413_v22  ;;  %v8403_v63 = vld [vmem:[%s25150_s5 + $0x188] sm:$0xff] }
 0x583   : > { %17234 = vmatmul.mubr.msk.f32.gmra.mxu1 %vm9319_vm12, %v26132_v3  ;;  %17301 = vmatmul.mubr.msk.f32.gmra.mxu0 %vm9319_vm12, %v22687_v34  ;;  %v8411_v22 = vld [vmem:[%s25150_s5 + $0x1c8] sm:$0xff] }
 0x584   : > { %17236 = vmatprep.mubr.msk.f32.mxu1 %vm9319_vm12, %v26133_v58  ;;  %17303 = vmatprep.mubr.msk.f32.mxu0 %vm9319_vm12, %v22704_v32 }
 0x585   : > { %17343 = vmatprep.subr.mxu1 %v8404_v49  ;;  %17407 = vmatprep.subr.mxu0 %v8412_v39 }
 0x586   : > { %17344 = vmatpush3.msra.mxu1 %v8404_v49  ;;  %17408 = vmatpush3.msra.mxu0 %v8412_v39  ;;  %v8402_v49 = vld [vmem:[%s25150_s5 + $0x180] sm:$0xff] }
 0x587   : > { %17237 = vmatmul.mubr.msk.f32.gmra.mxu1 %vm9319_vm12, %v26134_v33  ;;  %17304 = vmatmul.mubr.msk.f32.gmra.mxu0 %vm9319_vm12, %v22718_v59  ;;  %v8410_v39 = vld [vmem:[%s25150_s5 + $0x1c0] sm:$0xff] }
 0x588   : > { %17239 = vmatprep.mubr.msk.f32.mxu1 %vm9319_vm12, %v26135_v1  ;;  %17306 = vmatprep.mubr.msk.f32.mxu0 %vm9319_vm12, %v22725_v14  ;;  %v26161_v14 = vld [vmem:[#allocation43_spill] sm:$0xff] }
 0x589   : > { %17345 = vmatprep.subr.mxu1 %v8403_v63  ;;  %17409 = vmatprep.subr.mxu0 %v8411_v22 }
 0x58a   : > { %17346 = vmatpush3.msra.mxu1 %v8403_v63  ;;  %17410 = vmatpush3.msra.mxu0 %v8411_v22  ;;  %v23046_v63 = vld [vmem:[%s25150_s5 + $0x238] sm:$0xff]  ;;  %v23048_v22 = vpop.f32.mrf.mxu0 }
 0x58b   : > { %17240 = vmatmul.mubr.msk.f32.gmra.mxu1 %vm9319_vm12, %v26136_v24  ;;  %17307 = vmatmul.mubr.msk.f32.gmra.mxu0 %vm9319_vm12, %v22758_v35  ;;  %26139 = vst [vmem:[#allocation12_spill] sm:$0xff] %v23048_v22 }
 0x58c   : > { %17242 = vmatprep.mubr.msk.f32.mxu1 %vm9319_vm12, %v26137_v21  ;;  %17309 = vmatprep.mubr.msk.f32.mxu0 %vm9319_vm12, %v26138_v12 }
 0x58d   : > { %17347 = vmatprep.subr.mxu1 %v8402_v49  ;;  %17411 = vmatprep.subr.mxu0 %v8410_v39 }
 0x58e   : > { %17348 = vmatpush3.msra.mxu1 %v8402_v49  ;;  %17412 = vmatpush3.msra.mxu0 %v8410_v39  ;;  %v17058_v49 = vpop.f32.mrf.mxu0 }
 0x58f   : > { %17243 = vmatmul.mubr.msk.f32.gmra.mxu1 %vm9319_vm12, %v26141_v29  ;;  %17310 = vmatmul.mubr.msk.f32.gmra.mxu0 %vm9319_vm12, %v22779_v37  ;;  %v26146_v37 = vld [vmem:[#allocation65_spill] sm:$0xff] }
 0x590   : > { %17245 = vmatprep.mubr.msk.f32.mxu1 %vm9319_vm12, %v26142_v36  ;;  %17312 = vmatprep.mubr.msk.f32.mxu0 %vm9319_vm12, %v22797_v27  ;;  %v16994_v39 = vpop.f32.mrf.mxu1  ;;  %v26147_v27 = vld [vmem:[#allocation50_spill] sm:$0xff] }
 0x591   : > { %17461 = vmatprep.subr.mxu1 %v23046_v63  ;;  %v23065_v22 = vadd.f32 %v17058_v49, %v16994_v39  ;;  %v26148_v49 = vld [vmem:[#allocation49_spill] sm:$0xff] }
 0x592   : > { %v26149_v39 = vld [vmem:[#allocation61_spill] sm:$0xff] }
 0x593   : > { %17246 = vmatmul.mubr.msk.f32.gmra.mxu1 %vm9319_vm12, %v26143_v55  ;;  %17313 = vmatmul.mubr.msk.f32.gmra.mxu0 %vm9319_vm12, %v22818_v23  ;;  %26144 = vst [vmem:[#allocation9_spill] sm:$0xff] %v23065_v22  ;;  %v23087_v22 = vpop.f32.mrf.mxu0 }
 0x594   : > { %17248 = vmatprep.mubr.msk.f32.mxu1 %vm9319_vm12, %v26145_v2  ;;  %17315 = vmatprep.mubr.msk.f32.mxu0 %vm9319_vm12, %v22826_v38  ;;  %26150 = vst [vmem:[#allocation106_spill] sm:$0xff] %v23087_v22  ;;  %v26152_v38 = vld [vmem:[#allocation70_spill] sm:$0xff]  ;;  %v10827_v22 = vrot.slane %v22906_v47, 2 }
 0x597   : > { %17249 = vmatmul.mubr.msk.f32.gmra.mxu1 %vm9319_vm12, %v26146_v37  ;;  %17316 = vmatmul.mubr.msk.f32.gmra.mxu0 %vm9319_vm12, %v22838_v6  ;;  %v23089_v6 = vpop.f32.mrf.mxu1 }
 0x598   : > { %17251 = vmatprep.mubr.msk.f32.mxu1 %vm9319_vm12, %v26147_v27  ;;  %17318 = vmatprep.mubr.msk.f32.mxu0 %vm9319_vm12, %v22847_v18  ;;  %26151 = vst [vmem:[#allocation55_spill] sm:$0xff] %v23089_v6  ;;  %v26153_v18 = vld [vmem:[#allocation69_spill] sm:$0xff]  ;;  %v26155_v6 = vld [vmem:[#allocation68_spill] sm:$0xff] }
 0x59b   : > { %17252 = vmatmul.mubr.msk.f32.gmra.mxu1 %vm9319_vm12, %v26148_v49  ;;  %17319 = vmatmul.mubr.msk.f32.gmra.mxu0 %vm9319_vm12, %v22861_v62  ;;  %v17061_v62 = vpop.f32.mrf.mxu0 }
 0x59c   : > { %17254 = vmatprep.mubr.msk.f32.mxu1 %vm9319_vm12, %v26149_v39  ;;  %17321 = vmatprep.mubr.msk.f32.mxu0 %vm9319_vm12, %v22869_v54  ;;  %v9210_v54 = vsel %vm401_vm0, %v22883_v4, 0.0  ;;  %v26157_v4 = vld [vmem:[#allocation41_spill] sm:$0xff]  ;;  %vm15561_vm0 = vcmask 326912  }
 0x59d   : > { %v10563_v35 = vrot.slane %v9210_v54, 1 }
 0x59f   : > { %17255 = vmatmul.mubr.msk.f32.gmra.mxu1 %vm9319_vm12, %v26152_v38  ;;  %17322 = vmatmul.mubr.msk.f32.gmra.mxu0 %vm9319_vm12, %v22880_v13  ;;  %v16997_v23 = vpop.f32.mrf.mxu1  ;;  %v26156_v13 = vld [vmem:[#allocation73_spill] sm:$0xff] }
 0x5a0   : > { %17257 = vmatprep.mubr.msk.f32.mxu1 %vm9319_vm12, %v26153_v18  ;;  %17324 = vmatprep.mubr.msk.f32.mxu0 %vm9319_vm12, %v22890_v8  ;;  %v23099_v12 = vadd.f32 %v17061_v62, %v16997_v23  ;;  %v10826_v23 = vrot.slane %v22893_v15, 2  ;;  %v10829_v62 = vrot.slane %v9210_v54, 2  ;;  %v10561_v8 = vrot.slane %v22906_v47, 1 }
 0x5a2   : > { %26154 = vst [vmem:[#allocation63_spill] sm:$0xff] %v23099_v12  ;;  %v23119_v12 = vsel %vm1156_vm2, %v10826_v23, %v10827_v22  ;;  %v23127_v7 = vsel %vm1156_vm2, %v10827_v22, %v10829_v62  ;;  %v23142_v22 = vpop.f32.mrf.mxu1  ;;  %v23145_v54 = vsel %vm911_vm1, %v10561_v8, %v10563_v35  ;;  %v8424_v35 = vld [vmem:[%s25150_s5 + $0x230] sm:$0xff]  ;;  %vm15575_vm2 = vcmask 458112  }
 0x5a3   : > { %17258 = vmatmul.mubr.msk.f32.gmra.mxu1 %vm9319_vm12, %v26155_v6  ;;  %17325 = vmatmul.mubr.msk.f32.gmra.mxu0 %vm9319_vm12, %v22902_v60  ;;  %26158 = vst [vmem:[#allocation103_spill] sm:$0xff] %v23119_v12  ;;  %v26159_v60 = vld [vmem:[#allocation40_spill] sm:$0xff]  ;;  %26160 = vst [vmem:[#allocation5_spill] sm:$0xff] %v23127_v7 }
 0x5a4   : > { %17260 = vmatprep.mubr.msk.f32.mxu1 %vm9319_vm12, %v26156_v13  ;;  %17327 = vmatprep.mubr.msk.f32.mxu0 %vm9319_vm12, %v22914_v53  ;;  %v10560_v53 = vrot.slane %v22893_v15, 1 }
 0x5a6   : > { %v23134_v23 = vsel %vm911_vm1, %v10560_v53, %v10561_v8  ;;  %v26162_v53 = vld [vmem:[#allocation57_spill] sm:$0xff]  ;;  %v26163_v8 = vld [vmem:[#allocation58_spill] sm:$0xff]  ;;  %vm15568_vm1 = vcmask 392512  }
 0x5a7   : > { %17261 = vmatmul.mubr.msk.f32.gmra.mxu1 %vm9319_vm12, %v26157_v4  ;;  %17328 = vmatmul.mubr.msk.f32.gmra.mxu0 %vm9319_vm12, %v22921_v26 }
 0x5a8   : > { %17263 = vmatprep.mubr.msk.f32.mxu1 %vm9319_vm12, %v26159_v60  ;;  %17330 = vmatprep.mubr.msk.f32.mxu0 %vm9319_vm12, %v23119_v12  ;;  %v23140_v12 = vpop.f32.mrf.mxu0 }
 0x5ab   : > { %17264 = vmatmul.mubr.msk.f32.gmra.mxu1 %vm9319_vm12, %v26161_v14  ;;  %17331 = vmatmul.mubr.msk.f32.gmra.mxu0 %vm9319_vm12, %v23127_v7 }
 0x5ac   : > { %17266 = vmatprep.mubr.msk.f32.mxu1 %vm9319_vm12, %v23134_v23  ;;  %17413 = vmatprep.mubr.msk.f32.mxu0 %vm9319_vm12, %v26121_v31  ;;  %v17064_v31 = vpop.f32.mrf.mxu0 }
 0x5af   : > { %17267 = vmatmul.mubr.msk.f32.gmra.mxu1 %vm9319_vm12, %v23145_v54  ;;  %17414 = vmatmul.mubr.msk.f32.vlgmr.msra.gmra.mxu0 %vm9319_vm12, %v26123_v30  ;;  %v17000_v62 = vpop.f32.mrf.mxu1  ;;  %v26164_v30 = vld [vmem:[#allocation77_spill] sm:$0xff] }
 0x5b0   : > { %17349 = vmatprep.mubr.msk.f32.mxu1 %vm9319_vm12, %v26162_v53  ;;  %17416 = vmatprep.mubr.msk.f32.mxu0 %vm9319_vm12, %v26124_v5  ;;  %v23155_v7 = vadd.f32 %v17064_v31, %v17000_v62  ;;  %v8423_v5 = vld [vmem:[%s25150_s5 + $0x228] sm:$0xff]  ;;  %v8421_v62 = vld [vmem:[%s25150_s5 + $0x218] sm:$0xff] }
 0x5b1   : > { %v26165_v53 = vld [vmem:[#allocation60_spill] sm:$0xff]  ;;  %v26168_v31 = vld [vmem:[#allocation95_spill] sm:$0xff] }
 0x5b3   : > { %17350 = vmatmul.mubr.msk.f32.vlgmr.msra.gmra.mxu1 %vm9319_vm12, %v26163_v8  ;;  %17417 = vmatmul.mubr.msk.f32.gmra.mxu0 %vm9319_vm12, %v26125_v43  ;;  %v26166_v43 = vld [vmem:[#allocation66_spill] sm:$0xff] }
 0x5b4   : > { %17462 = vmatpush3.msra.mxu1 %v23046_v63  ;;  %17352 = vmatprep.mubr.msk.f32.mxu1 %vm9319_vm12, %v26164_v30  ;;  %v26167_v63 = vld [vmem:[#allocation22_spill] sm:$0xff] }
 0x5b5   : > { %17419 = vmatprep.mubr.msk.f32.mxu0 %vm9319_vm12, %v26126_v57  ;;  %17463 = vmatprep.subr.mxu1 %v8424_v35  ;;  %v8422_v57 = vld [vmem:[%s25150_s5 + $0x220] sm:$0xff] }
 0x5b6   : > { %17464 = vmatpush3.msra.mxu1 %v8424_v35  ;;  %v26169_v35 = vld [vmem:[#allocation17_spill] sm:$0xff] }
 0x5b7   : > { %17353 = vmatmul.mubr.msk.f32.gmra.mxu1 %vm9319_vm12, %v26165_v53  ;;  %17420 = vmatmul.mubr.msk.f32.gmra.mxu0 %vm9319_vm12, %v26129_v19  ;;  %v23191_v19 = vpop.f32.mrf.mxu0  ;;  %v26171_v53 = vld [vmem:[#allocation99_spill] sm:$0xff] }
 0x5b8   : > { %17355 = vmatprep.mubr.msk.f32.mxu1 %vm9319_vm12, %v26166_v43  ;;  %17422 = vmatprep.mubr.msk.f32.mxu0 %vm9319_vm12, %v26130_v40  ;;  %v23193_v40 = vpop.f32.mrf.mxu1  ;;  %v26173_v43 = vld [vmem:[#allocation31_spill] sm:$0xff] }
 0x5b9   : > { %17465 = vmatprep.subr.mxu1 %v8423_v5 }
 0x5ba   : > { %17466 = vmatpush3.msra.mxu1 %v8423_v5  ;;  %v8420_v5 = vld [vmem:[%s25150_s5 + $0x210] sm:$0xff] }
 0x5bb   : > { %17356 = vmatmul.mubr.msk.f32.gmra.mxu1 %vm9319_vm12, %v26167_v63  ;;  %17423 = vmatmul.mubr.msk.f32.gmra.mxu0 %vm9319_vm12, %v26132_v3  ;;  %v26170_v3 = vld [vmem:[#allocation86_spill] sm:$0xff]  ;;  %v26176_v63 = vld [vmem:[#allocation25_spill] sm:$0xff] }
 0x5bc   : > { %17358 = vmatprep.mubr.msk.f32.mxu1 %vm9319_vm12, %v26168_v31  ;;  %17425 = vmatprep.mubr.msk.f32.mxu0 %vm9319_vm12, %v26133_v58  ;;  %v17067_v58 = vpop.f32.mrf.mxu0  ;;  %v26177_v31 = vld [vmem:[#allocation37_spill] sm:$0xff] }
 0x5bd   : > { %17467 = vmatprep.subr.mxu1 %v8422_v57 }
 0x5be   : > { %17468 = vmatpush3.msra.mxu1 %v8422_v57  ;;  %v26174_v57 = vld [vmem:[#allocation27_spill] sm:$0xff] }
 0x5bf   : > { %17359 = vmatmul.mubr.msk.f32.gmra.mxu1 %vm9319_vm12, %v26169_v35  ;;  %17426 = vmatmul.mubr.msk.f32.gmra.mxu0 %vm9319_vm12, %v26134_v33  ;;  %v17003_v8 = vpop.f32.mrf.mxu1  ;;  %v26172_v33 = vld [vmem:[#allocation28_spill] sm:$0xff] }
 0x5c0   : > { %17361 = vmatprep.mubr.msk.f32.mxu1 %vm9319_vm12, %v26170_v3  ;;  %17428 = vmatprep.mubr.msk.f32.mxu0 %vm9319_vm12, %v26135_v1  ;;  %v23206_v30 = vadd.f32 %v17067_v58, %v17003_v8  ;;  %v8419_v1 = vld [vmem:[%s25150_s5 + $0x208] sm:$0xff] }
 0x5c1   : > { %17469 = vmatprep.subr.mxu1 %v8421_v62  ;;  %v26179_v3 = vld [vmem:[#allocation47_spill] sm:$0xff] }
 0x5c2   : > { %17470 = vmatpush3.msra.mxu1 %v8421_v62  ;;  %v26178_v62 = vld [vmem:[#allocation45_spill] sm:$0xff]  ;;  %v26185_v8 = vld [vmem:[#allocation87_spill] sm:$0xff] }
 0x5c3   : > { %17362 = vmatmul.mubr.msk.f32.gmra.mxu1 %vm9319_vm12, %v26171_v53  ;;  %17429 = vmatmul.mubr.msk.f32.gmra.mxu0 %vm9319_vm12, %v26136_v24  ;;  %v26175_v24 = vld [vmem:[#allocation26_spill] sm:$0xff] }
 0x5c4   : > { %17364 = vmatprep.mubr.msk.f32.mxu1 %vm9319_vm12, %v26172_v33  ;;  %17431 = vmatprep.mubr.msk.f32.mxu0 %vm9319_vm12, %v26137_v21  ;;  %v8418_v21 = vld [vmem:[%s25150_s5 + $0x200] sm:$0xff] }
 0x5c5   : > { %17471 = vmatprep.subr.mxu1 %v8420_v5 }
 0x5c6   : > { %17472 = vmatpush3.msra.mxu1 %v8420_v5 }
 0x5c7   : > { %17365 = vmatmul.mubr.msk.f32.gmra.mxu1 %vm9319_vm12, %v26173_v43  ;;  %17432 = vmatmul.mubr.msk.f32.gmra.mxu0 %vm9319_vm12, %v26141_v29  ;;  %v23241_v29 = vpop.f32.mrf.mxu0  ;;  %v26186_v43 = vld [vmem:[#allocation92_spill] sm:$0xff] }
 0x5c8   : > { %17367 = vmatprep.mubr.msk.f32.mxu1 %vm9319_vm12, %v26174_v57  ;;  %17434 = vmatprep.mubr.msk.f32.mxu0 %vm9319_vm12, %v26142_v36  ;;  %v23243_v36 = vpop.f32.mrf.mxu1 }
 0x5c9   : > { %17473 = vmatprep.subr.mxu1 %v8419_v1 }
 0x5ca   : > { %17474 = vmatpush3.msra.mxu1 %v8419_v1 }
 0x5cb   : > { %17368 = vmatmul.mubr.msk.f32.gmra.mxu1 %vm9319_vm12, %v26175_v24  ;;  %17435 = vmatmul.mubr.msk.f32.gmra.mxu0 %vm9319_vm12, %v26143_v55 }
 0x5cc   : > { %17370 = vmatprep.mubr.msk.f32.mxu1 %vm9319_vm12, %v26176_v63  ;;  %17437 = vmatprep.mubr.msk.f32.mxu0 %vm9319_vm12, %v26145_v2  ;;  %v17070_v55 = vpop.f32.mrf.mxu0 }
 0x5cd   : > { %17475 = vmatprep.subr.mxu1 %v8418_v21 }
 0x5ce   : > { %17476 = vmatpush3.msra.mxu1 %v8418_v21 }
 0x5cf   : > { %17371 = vmatmul.mubr.msk.f32.gmra.mxu1 %vm9319_vm12, %v26177_v31  ;;  %17438 = vmatmul.mubr.msk.f32.gmra.mxu0 %vm9319_vm12, %v26146_v37 }
 0x5d0   : > { %17373 = vmatprep.mubr.msk.f32.mxu1 %vm9319_vm12, %v26178_v62  ;;  %17440 = vmatprep.mubr.msk.f32.mxu0 %vm9319_vm12, %v26147_v27  ;;  %v17006_v2 = vpop.f32.mrf.mxu1  ;;  %v23271_v27 = vpop.f32.mrf.mxu0 }
 0x5d1   : > { %v23253_v35 = vadd.f32 %v17070_v55, %v17006_v2 }
 0x5d2   : > { %v23273_v37 = vpop.f32.mrf.mxu1 }
 0x5d3   : > { %17374 = vmatmul.mubr.msk.f32.gmra.mxu1 %vm9319_vm12, %v26179_v3  ;;  %17441 = vmatmul.mubr.msk.f32.gmra.mxu0 %vm9319_vm12, %v26148_v49  ;;  %v26184_v49 = vld [vmem:[#allocation76_spill] sm:$0xff] }
 0x5d4   : > { %17376 = vmatprep.mubr.msk.f32.mxu1 %vm9319_vm12, %v22199_v17  ;;  %17443 = vmatprep.mubr.msk.f32.mxu0 %vm9319_vm12, %v26149_v39 }
 0x5d7   : > { %17377 = vmatmul.mubr.msk.f32.gmra.mxu1 %vm9319_vm12, %v22218_v41  ;;  %17444 = vmatmul.mubr.msk.f32.gmra.mxu0 %vm9319_vm12, %v26152_v38 }
 0x5d8   : > { %17379 = vmatprep.mubr.msk.f32.mxu1 %vm9319_vm12, %v22256_v50  ;;  %17446 = vmatprep.mubr.msk.f32.mxu0 %vm9319_vm12, %v26153_v18 }
 0x5db   : > { %17380 = vmatmul.mubr.msk.f32.gmra.mxu1 %vm9319_vm12, %v22284_v56  ;;  %17447 = vmatmul.mubr.msk.f32.gmra.mxu0 %vm9319_vm12, %v26155_v6  ;;  %v17073_v17 = vpop.f32.mrf.mxu0  ;;  %v26183_v6 = vld [vmem:[#allocation3_spill] sm:$0xff] }
 0x5dc   : > { %17382 = vmatprep.mubr.msk.f32.mxu1 %vm9319_vm12, %v22321_v45  ;;  %17449 = vmatprep.mubr.msk.f32.mxu0 %vm9319_vm12, %v26156_v13  ;;  %v26180_v45 = vld [vmem:[#allocation11_spill] sm:$0xff] }
 0x5dd   : > { %v23305_v56 = vpop.f32.mrf.mxu0 }
 0x5df   : > { %v17009_v41 = vpop.f32.mrf.mxu1  ;;  %17383 = vmatmul.mubr.msk.f32.gmra.mxu1 %vm9319_vm12, %v22350_v25  ;;  %17450 = vmatmul.mubr.msk.f32.gmra.mxu0 %vm9319_vm12, %v26157_v4 }
 0x5e0   : > { %v23287_v50 = vadd.f32 %v17073_v17, %v17009_v41  ;;  %17385 = vmatprep.mubr.msk.f32.mxu1 %vm9319_vm12, %v22388_v10  ;;  %17452 = vmatprep.mubr.msk.f32.mxu0 %vm9319_vm12, %v26159_v60  ;;  %v26181_v10 = vld [vmem:[#allocation102_spill] sm:$0xff] }
 0x5e1   : > { %v26188_v41 = vld [vmem:[#allocation74_spill] sm:$0xff] }
 0x5e3   : > { %17386 = vmatmul.mubr.msk.f32.gmra.mxu1 %vm9319_vm12, %v22407_v48  ;;  %17453 = vmatmul.mubr.msk.f32.gmra.mxu0 %vm9319_vm12, %v26161_v14  ;;  %v23313_v48 = vpop.f32.mrf.mxu1 }
 0x5e4   : > { %17388 = vmatprep.mubr.msk.f32.mxu1 %vm9319_vm12, %v22440_v46  ;;  %17455 = vmatprep.mubr.msk.f32.mxu0 %vm9319_vm12, %v23134_v23  ;;  %v26182_v46 = vld [vmem:[#allocation4_spill] sm:$0xff] }
 0x5e7   : > { %17389 = vmatmul.mubr.msk.f32.gmra.mxu1 %vm9319_vm12, %v22448_v28  ;;  %17456 = vmatmul.mubr.msk.f32.gmra.mxu0 %vm9319_vm12, %v23145_v54 }
 0x5e8   : > { %17391 = vmatprep.mubr.msk.f32.mxu1 %vm9319_vm12, %v22893_v15  ;;  %17458 = vmatprep.mubr.msk.f32.mxu0 %vm9319_vm12, %v26180_v45 }
 0x5eb   : > { %v17076_v25 = vpop.f32.mrf.mxu0  ;;  %17392 = vmatmul.mubr.msk.f32.gmra.mxu1 %vm9319_vm12, %v22906_v47  ;;  %17459 = vmatmul.mubr.msk.f32.gmra.mxu0 %vm9319_vm12, %v26181_v10 }
 0x5ec   : > { %17394 = vmatprep.mubr.msk.f32.mxu1 %vm9319_vm12, %v26182_v46 }
 0x5ed   : > { %v23319_v28 = vpop.f32.mrf.mxu0 }
 0x5ef   : > { %v17012_v14 = vpop.f32.mrf.mxu1  ;;  %v17159_v38 = vpop.f32.mrf.mxu0  ;;  %17395 = vmatmul.mubr.msk.f32.gmra.mxu1 %vm9319_vm12, %v26183_v6 }
 0x5f0   : > { %v23323_v18 = vadd.f32 %v17076_v25, %v17012_v14  ;;  %17477 = vmatprep.mubr.msk.f32.mxu1 %vm9319_vm12, %v22545_v0 }
 0x5f1   : > { %v23327_v13 = vpop.f32.mrf.mxu1  ;;  %v23329_v15 = vpop.f32.mrf.mxu0 }
 0x5f3   : > { %v17095_v60 = vpop.f32.mrf.mxu1  ;;  %v17162_v47 = vpop.f32.mrf.mxu0  ;;  %17478 = vmatmul.mubr.msk.f32.vlgmr.msra.gmra.mxu1 %vm9319_vm12, %v22561_v16 }
 0x5f4   : > { %v10266_v39 = vadd.f32 %v17095_v60, %v26184_v49  ;;  %17480 = vmatprep.mubr.msk.f32.mxu1 %vm9319_vm12, %v22577_v42  ;;  %v26190_v49 = vld [vmem:[#allocation83_spill] sm:$0xff] }
 0x5f5   : > { %v23336_v4 = vpop.f32.mrf.mxu1  ;;  %v23338_v23 = vpop.f32.mrf.mxu0 }
 0x5f6   : > { %v23340_v54 = vadd.f32 %v17159_v38, %v10266_v39  ;;  %v26189_v38 = vld [vmem:[#allocation21_spill] sm:$0xff]  ;;  %v26191_v39 = vld [vmem:[#allocation90_spill] sm:$0xff] }
 0x5f7   : > { %v17098_v0 = vpop.f32.mrf.mxu1  ;;  %v17165_v58 = vpop.f32.mrf.mxu0  ;;  %17481 = vmatmul.mubr.msk.f32.gmra.mxu1 %vm9319_vm12, %v22590_v44  ;;  %v11936_v44 = vld [vmem:[%s25152_s7 + $0x18] sm:$0xff] }
 0x5f8   : > { %v10268_v5 = vadd.f32 %v17098_v0, %v26185_v8  ;;  %17483 = vmatprep.mubr.msk.f32.mxu1 %vm9319_vm12, %v22604_v51  ;;  %17525 = vmatprep.subr.mxu0 %v11936_v44 }
 0x5f9   : > { %v23347_v16 = vpop.f32.mrf.mxu1  ;;  %v23349_v53 = vpop.f32.mrf.mxu0  ;;  %17526 = vmatpush3.msra.mxu0 %v11936_v44 }
 0x5fa   : > { %v23351_v42 = vadd.f32 %v17162_v47, %v10268_v5 }
 0x5fb   : > { %v17101_v33 = vpop.f32.mrf.mxu1  ;;  %v17168_v1 = vpop.f32.mrf.mxu0  ;;  %17484 = vmatmul.mubr.msk.f32.gmra.mxu1 %vm9319_vm12, %v22614_v61  ;;  %v26187_v61 = vld [vmem:[#allocation75_spill] sm:$0xff] }
 0x5fc   : > { %v10270_v57 = vadd.f32 %v17101_v33, %v26186_v43  ;;  %17486 = vmatprep.mubr.msk.f32.mxu1 %vm9319_vm12, %v22634_v52  ;;  %v26193_v43 = vld [vmem:[#allocation19_spill] sm:$0xff] }
 0x5fd   : > { %v23361_v51 = vpop.f32.mrf.mxu1  ;;  %v23363_v21 = vpop.f32.mrf.mxu0 }
 0x5fe   : > { %v23365_v24 = vadd.f32 %v17165_v58, %v10270_v57  ;;  %v26192_v58 = vld [vmem:[#allocation94_spill] sm:$0xff] }
 0x5ff   : > { %v17104_v63 = vpop.f32.mrf.mxu1  ;;  %v17171_v31 = vpop.f32.mrf.mxu0  ;;  %17487 = vmatmul.mubr.msk.f32.gmra.mxu1 %vm9319_vm12, %v22646_v20  ;;  %v26194_v57 = vld [vmem:[#allocation10_spill] sm:$0xff] }
 0x600   : > { %v10272_v62 = vadd.f32 %v17104_v63, %v26187_v61  ;;  %17489 = vmatprep.mubr.msk.f32.mxu1 %vm9319_vm12, %v22665_v9  ;;  %v26195_v63 = vld [vmem:[#allocation38_spill] sm:$0xff] }
 0x601   : > { %v23372_v52 = vpop.f32.mrf.mxu1  ;;  %v23374_v55 = vpop.f32.mrf.mxu0 }
 0x602   : > { %v23376_v2 = vadd.f32 %v17168_v1, %v10272_v62 }
 0x603   : > { %v17107_v3 = vpop.f32.mrf.mxu1  ;;  %v17174_v17 = vpop.f32.mrf.mxu0  ;;  %17490 = vmatmul.mubr.msk.f32.gmra.mxu1 %vm9319_vm12, %v22687_v34 }
 0x604   : > { %v10274_v45 = vadd.f32 %v17107_v3, %v26188_v41  ;;  %17492 = vmatprep.mubr.msk.f32.mxu1 %vm9319_vm12, %v22704_v32  ;;  %v26196_v41 = vld [vmem:[#allocation35_spill] sm:$0xff] }
 0x605   : > { %v23383_v20 = vpop.f32.mrf.mxu1  ;;  %v23385_v25 = vpop.f32.mrf.mxu0 }
 0x606   : > { %v23387_v9 = vadd.f32 %v17171_v31, %v10274_v45  ;;  %v26197_v45 = vld [vmem:[#allocation54_spill] sm:$0xff] }
 0x607   : > { %v17110_v10 = vpop.f32.mrf.mxu1  ;;  %v17177_v46 = vpop.f32.mrf.mxu0  ;;  %17493 = vmatmul.mubr.msk.f32.gmra.mxu1 %vm9319_vm12, %v22718_v59  ;;  %v11935_v59 = vld [vmem:[%s25152_s7 + $0x10] sm:$0xff] }
 0x608   : > { %v10276_v14 = vadd.f32 %v17110_v10, %v22790_v11  ;;  %17495 = vmatprep.mubr.msk.f32.mxu1 %vm9319_vm12, %v26189_v38  ;;  %17527 = vmatprep.subr.mxu0 %v11935_v59  ;;  %v26198_v10 = vld [vmem:[#allocation12_spill] sm:$0xff] }
 0x609   : > { %v23394_v34 = vpop.f32.mrf.mxu1  ;;  %v23396_v6 = vpop.f32.mrf.mxu0  ;;  %17528 = vmatpush3.msra.mxu0 %v11935_v59 }
 0x60a   : > { %v23398_v32 = vadd.f32 %v17174_v17, %v10276_v14  ;;  %v26199_v14 = vld [vmem:[#allocation7_spill] sm:$0xff] }
 0x60b   : > { %v17113_v60 = vpop.f32.mrf.mxu1  ;;  %v17180_v47 = vpop.f32.mrf.mxu0  ;;  %17496 = vmatmul.mubr.msk.f32.gmra.mxu1 %vm9319_vm12, %v26190_v49 }
 0x60c   : > { %v10278_v0 = vadd.f32 %v17113_v60, %v26191_v39  ;;  %17498 = vmatprep.mubr.msk.f32.mxu1 %vm9319_vm12, %v26192_v58  ;;  %v26200_v60 = vld [vmem:[#allocation16_spill] sm:$0xff] }
 0x60d   : > { %v23408_v11 = vpop.f32.mrf.mxu1  ;;  %v23410_v8 = vpop.f32.mrf.mxu0 }
 0x60e   : > { %v23412_v5 = vadd.f32 %v17177_v46, %v10278_v0  ;;  %v9820_v46 = vadd.f32 %v26198_v10, %v26197_v45  ;;  %v26205_v45 = vld [vmem:[#allocation81_spill] sm:$0xff] }
 0x60f   : > { %v17116_v33 = vpop.f32.mrf.mxu1  ;;  %v17183_v1 = vpop.f32.mrf.mxu0  ;;  %17499 = vmatmul.mubr.msk.f32.gmra.mxu1 %vm9319_vm12, %v26193_v43  ;;  %v26202_v43 = vld [vmem:[#allocation55_spill] sm:$0xff] }
 0x610   : > { %v10280_v44 = vadd.f32 %v17116_v33, %v26194_v57  ;;  %17501 = vmatprep.mubr.msk.f32.mxu1 %vm9319_vm12, %v26195_v63  ;;  %v26201_v33 = vld [vmem:[#allocation20_spill] sm:$0xff]  ;;  %v26203_v57 = vld [vmem:[#allocation106_spill] sm:$0xff]  ;;  %v26204_v63 = vld [vmem:[#allocation9_spill] sm:$0xff] }
 0x611   : > { %v23419_v31 = vpop.f32.mrf.mxu1  ;;  %v10448_v61 = vpop.f32.mrf.mxu0 }
 0x612   : > { %v23421_v62 = vadd.f32 %v17180_v47, %v10280_v44  ;;  %v9830_v44 = vadd.f32 %v26203_v57, %v26202_v43  ;;  %v26207_v43 = vld [vmem:[#allocation63_spill] sm:$0xff] }
 0x613   : > { %v17119_v3 = vpop.f32.mrf.mxu1  ;;  %v17186_v17 = vpop.f32.mrf.mxu0  ;;  %17502 = vmatmul.mubr.msk.f32.gmra.mxu1 %vm9319_vm12, %v26196_v41  ;;  %v26208_v57 = vld [vmem:[#allocation23_spill] sm:$0xff] }
 0x614   : > { %v10282_v38 = vadd.f32 %v17119_v3, %v26199_v14  ;;  %17504 = vmatprep.mubr.msk.f32.mxu1 %vm9319_vm12, %v26200_v60 }
 0x615   : > { %v10186_v49 = vpop.f32.mrf.mxu1  ;;  %v10458_v39 = vpop.f32.mrf.mxu0 }
 0x616   : > { %v10281_v0 = vadd.f32 %v10186_v49, %v9820_v46  ;;  %v23430_v58 = vadd.f32 %v17183_v1, %v10282_v38  ;;  %v26206_v49 = vld [vmem:[#allocation18_spill] sm:$0xff] }
 0x617   : > { %v17122_v47 = vpop.f32.mrf.mxu1  ;;  %v17189_v59 = vpop.f32.mrf.mxu0  ;;  %17505 = vmatmul.mubr.msk.f32.gmra.mxu1 %vm9319_vm12, %v26201_v33  ;;  %v9840_v33 = vadd.f32 %v23140_v12, %v23142_v22  ;;  %v26209_v22 = vld [vmem:[#allocation88_spill] sm:$0xff] }
 0x618   : > { %v10284_v41 = vadd.f32 %v17122_v47, %v26204_v63  ;;  %17507 = vmatprep.mubr.msk.f32.mxu1 %vm9319_vm12, %v26205_v45  ;;  %v23439_v3 = vadd.f32 %v10448_v61, %v10281_v0 }
 0x619   : > { %v10196_v10 = vpop.f32.mrf.mxu1  ;;  %v10468_v14 = vpop.f32.mrf.mxu0 }
 0x61a   : > { %v10283_v46 = vadd.f32 %v10196_v10, %v9830_v44  ;;  %v23441_v1 = vadd.f32 %v17186_v17, %v10284_v41  ;;  %v11934_v17 = vld [vmem:[%s25152_s7 + $0x8] sm:$0xff] }
 0x61b   : > { %v17125_v38 = vpop.f32.mrf.mxu1  ;;  %v17192_v60 = vpop.f32.mrf.mxu0  ;;  %17508 = vmatmul.mubr.msk.f32.gmra.mxu1 %vm9319_vm12, %v26206_v49  ;;  %17529 = vmatprep.subr.mxu0 %v11934_v17 }
 0x61c   : > { %v10286_v47 = vadd.f32 %v17125_v38, %v26207_v43  ;;  %17510 = vmatprep.mubr.msk.f32.mxu1 %vm9319_vm12, %v26208_v57  ;;  %v23450_v61 = vadd.f32 %v10458_v39, %v10283_v46  ;;  %17530 = vmatpush3.msra.mxu0 %v11934_v17  ;;  %v9850_v39 = vadd.f32 %v23191_v19, %v23193_v40  ;;  %v26210_v46 = vld [vmem:[#allocation93_spill] sm:$0xff]  ;;  %v26212_v40 = vld [vmem:[#allocation98_spill] sm:$0xff] }
 0x61d   : > { %v10206_v0 = vpop.f32.mrf.mxu1  ;;  %v10478_v44 = vpop.f32.mrf.mxu0  ;;  %v26211_v17 = vld [vmem:[#allocation97_spill] sm:$0xff]  ;;  %v9860_v19 = vadd.f32 %v23241_v29, %v23243_v36  ;;  %v9870_v29 = vadd.f32 %v23271_v27, %v23273_v37  ;;  %v26213_v36 = vld [vmem:[#allocation103_spill] sm:$0xff]  ;;  %v26215_v27 = vld [vmem:[#allocation42_spill] sm:$0xff] }
 0x61e   : > { %v10285_v63 = vadd.f32 %v10206_v0, %v9840_v33  ;;  %v23455_v41 = vadd.f32 %v17189_v59, %v10286_v47 }
 0x61f   : > { %v17128_v45 = vpop.f32.mrf.mxu1  ;;  %v17195_v12 = vpop.f32.mrf.mxu0  ;;  %17511 = vmatmul.mubr.msk.f32.gmra.mxu1 %vm9319_vm12, %v26209_v22 }
 0x620   : > { %v10288_v10 = vadd.f32 %v17128_v45, %v23155_v7  ;;  %17513 = vmatprep.mubr.msk.f32.mxu1 %vm9319_vm12, %v26210_v46  ;;  %v23464_v38 = vadd.f32 %v10468_v14, %v10285_v63 }
 0x621   : > { %v10216_v49 = vpop.f32.mrf.mxu1  ;;  %v10488_v33 = vpop.f32.mrf.mxu0 }
 0x622   : > { %v10287_v59 = vadd.f32 %v10216_v49, %v9850_v39  ;;  %v23466_v43 = vadd.f32 %v17192_v60, %v10288_v10 }
 0x623   : > { %v17131_v47 = vpop.f32.mrf.mxu1  ;;  %v17198_v57 = vpop.f32.mrf.mxu0  ;;  %17514 = vmatmul.mubr.msk.f32.gmra.mxu1 %vm9319_vm12, %v26211_v17  ;;  %v26214_v17 = vld [vmem:[#allocation5_spill] sm:$0xff] }
 0x624   : > { %v10290_v7 = vadd.f32 %v17131_v47, %v23206_v30  ;;  %17516 = vmatprep.mubr.msk.f32.mxu1 %vm9319_vm12, %v26212_v40  ;;  %v23475_v14 = vadd.f32 %v10478_v44, %v10287_v59  ;;  %v26217_v40 = vld [vmem:[#allocation62_spill] sm:$0xff] }
 0x625   : > { %v10226_v0 = vpop.f32.mrf.mxu1  ;;  %v10498_v63 = vpop.f32.mrf.mxu0 }
 0x626   : > { %v10289_v45 = vadd.f32 %v10226_v0, %v9860_v19  ;;  %v23477_v60 = vadd.f32 %v17195_v12, %v10290_v7  ;;  %v26216_v7 = vld [vmem:[#allocation44_spill] sm:$0xff] }
 0x627   : > { %v17134_v22 = vpop.f32.mrf.mxu1  ;;  %v17201_v39 = vpop.f32.mrf.mxu0  ;;  %17517 = vmatmul.mubr.msk.f32.gmra.mxu1 %vm9319_vm12, %v22921_v26  ;;  %v9880_v26 = vadd.f32 %v23305_v56, %v23313_v48  ;;  %v9740_v0 = vadd.f32 %v26217_v40, %v26216_v7  ;;  %v26218_v48 = vld [vmem:[#allocation48_spill] sm:$0xff] }
 0x628   : > { %v10292_v30 = vadd.f32 %v17134_v22, %v23253_v35  ;;  %17519 = vmatprep.mubr.msk.f32.mxu1 %vm9319_vm12, %v26213_v36  ;;  %v23486_v44 = vadd.f32 %v10488_v33, %v10289_v45  ;;  %v11933_v33 = vld [vmem:[%s25152_s7] sm:$0xff]  ;;  %v26221_v7 = vld [vmem:[#allocation72_spill] sm:$0xff] }
 0x629   : > { %v10236_v10 = vpop.f32.mrf.mxu1  ;;  %v10508_v46 = vpop.f32.mrf.mxu0  ;;  %17531 = vmatprep.subr.mxu0 %v11933_v33  ;;  %v26222_v40 = vld [vmem:[#allocation8_spill] sm:$0xff] }
 0x62a   : > { %v10291_v49 = vadd.f32 %v10236_v10, %v9870_v29  ;;  %v23488_v12 = vadd.f32 %v17198_v57, %v10292_v30  ;;  %17532 = vmatpush3.msra.mxu0 %v11933_v33  ;;  %v10265_v29 = vadd.f32 %v23336_v4, %v9740_v0  ;;  %v9760_v0 = vadd.f32 %v26222_v40, %v26221_v7 }
 0x62b   : > { %v17137_v59 = vpop.f32.mrf.mxu1  ;;  %v17204_v47 = vpop.f32.mrf.mxu0  ;;  %17520 = vmatmul.mubr.msk.f32.gmra.mxu1 %vm9319_vm12, %v26214_v17 }
 0x62c   : > { %v10294_v35 = vadd.f32 %v17137_v59, %v23287_v50  ;;  %17522 = vmatprep.mubr.msk.f32.mxu1 %vm9319_vm12, %v26215_v27  ;;  %v23497_v37 = vadd.f32 %v10498_v63, %v10291_v49  ;;  %v9890_v63 = vadd.f32 %v23319_v28, %v23327_v13  ;;  %v26220_v59 = vld [vmem:[#allocation79_spill] sm:$0xff] }
 0x62d   : > { %v10246_v57 = vpop.f32.mrf.mxu1  ;;  %v10518_v19 = vpop.f32.mrf.mxu0 }
 0x62e   : > { %v10293_v45 = vadd.f32 %v10246_v57, %v9880_v26  ;;  %v23504_v22 = vadd.f32 %v17201_v39, %v10294_v35  ;;  %v26219_v39 = vld [vmem:[#allocation80_spill] sm:$0xff] }
 0x62f   : > { %v17140_v50 = vpop.f32.mrf.mxu1  ;;  %v23506_v56 = vpop.f32.mrf.mxu0  ;;  %17523 = vmatmul.mubr.msk.f32.gmra.mxu1 %vm9319_vm12, %v26218_v48  ;;  %v9750_v17 = vadd.f32 %v26220_v59, %v26219_v39 }
 0x630   : > { %v10296_v30 = vadd.f32 %v17140_v50, %v23323_v18  ;;  %v23514_v36 = vadd.f32 %v10508_v46, %v10293_v45  ;;  %v10527_v18 = vadd.f32 %v23329_v15, %v10265_v29  ;;  %v26224_v29 = vld [vmem:[#allocation39_spill] sm:$0xff] }
 0x631   : > { %v10256_v10 = vpop.f32.mrf.mxu1  ;;  %v23516_v49 = vpop.f32.mrf.mxu0  ;;  %v10267_v28 = vadd.f32 %v23347_v16, %v9750_v17  ;;  %v10269_v16 = vadd.f32 %v23361_v51, %v9760_v0 }
 0x632   : > { %v10295_v26 = vadd.f32 %v10256_v10, %v9890_v63  ;;  %v23520_v35 = vadd.f32 %v17204_v47, %v10296_v30  ;;  %v26223_v63 = vld [vmem:[#allocation67_spill] sm:$0xff] }
 0x633   : > { %v17223_v27 = vpop.f32.mrf.mxu1  ;;  %v23522_v33 = vpop.f32.mrf.mxu0  ;;  %v10529_v15 = vadd.f32 %v23338_v23, %v10267_v28  ;;  %v9770_v30 = vadd.f32 %v26224_v29, %v26223_v63  ;;  %v26226_v28 = vld [vmem:[#allocation100_spill] sm:$0xff] }
 0x634   : > { %v23526_v13 = vadd.f32 %v17223_v27, %v23340_v54  ;;  %v23529_v4 = vadd.f32 %v10518_v19, %v10295_v26  ;;  %v26225_v27 = vld [vmem:[#allocation84_spill] sm:$0xff] }
 0x635   : > { %v10635_v46 = vpop.f32.mrf.mxu1  ;;  %v23531_v57 = vpop.f32.mrf.mxu0  ;;  %v10271_v17 = vadd.f32 %v23372_v52, %v9770_v30 }
 0x636   : > { %v23535_v47 = vadd.f32 %v10635_v46, %v10527_v18  ;;  %v9780_v18 = vadd.f32 %v26226_v28, %v26225_v27 }
 0x637   : > { %v17226_v45 = vpop.f32.mrf.mxu1  ;;  %v23537_v50 = vpop.f32.mrf.mxu0 }
 0x638   : > { %v23541_v54 = vadd.f32 %v17226_v45, %v23351_v42  ;;  %v10531_v42 = vadd.f32 %v23349_v53, %v10269_v16  ;;  %v10273_v0 = vadd.f32 %v23383_v20, %v9780_v18  ;;  %v26227_v16 = vld [vmem:[#allocation91_spill] sm:$0xff] }
 0x639   : > { %v10645_v19 = vpop.f32.mrf.mxu1  ;;  %v23544_v48 = vpop.f32.mrf.mxu0 }
 0x63a   : > { %v23548_v10 = vadd.f32 %v10645_v19, %v10529_v15  ;;  %v26228_v15 = vld [vmem:[#allocation82_spill] sm:$0xff] }
 0x63b   : > { %v17229_v39 = vpop.f32.mrf.mxu1  ;;  %v23550_v59 = vpop.f32.mrf.mxu0  ;;  %v9790_v19 = vadd.f32 %v26228_v15, %v26227_v16  ;;  %v26232_v16 = vld [vmem:[#allocation105_spill] sm:$0xff] }
 0x63c   : > { %v23554_v51 = vadd.f32 %v17229_v39, %v23365_v24  ;;  %v10533_v24 = vadd.f32 %v23363_v21, %v10271_v17  ;;  %v26229_v17 = vld [vmem:[#allocation104_spill] sm:$0xff] }
 0x63d   : > { %v10655_v26 = vpop.f32.mrf.mxu1  ;;  %v23557_v23 = vpop.f32.mrf.mxu0  ;;  %v10275_v39 = vadd.f32 %v23394_v34, %v9790_v19 }
 0x63e   : > { %v23561_v46 = vadd.f32 %v10655_v26, %v10531_v42  ;;  %v26230_v26 = vld [vmem:[#allocation30_spill] sm:$0xff] }
 0x63f   : > { %v17232_v7 = vpop.f32.mrf.mxu1  ;;  %v23563_v40 = vpop.f32.mrf.mxu0  ;;  %v9800_v27 = vadd.f32 %v26230_v26, %v26229_v17 }
 0x640   : > { %v23567_v52 = vadd.f32 %v17232_v7, %v23376_v2  ;;  %v10535_v2 = vadd.f32 %v23374_v55, %v10273_v0  ;;  %v26231_v0 = vld [vmem:[#allocation101_spill] sm:$0xff] }
 0x641   : > { %v10665_v45 = vpop.f32.mrf.mxu1  ;;  %v23570_v53 = vpop.f32.mrf.mxu0  ;;  %v9810_v15 = vadd.f32 %v26232_v16, %v26231_v0 }
 0x642   : > { %v23574_v63 = vadd.f32 %v10665_v45, %v10533_v24  ;;  %v10277_v24 = vadd.f32 %v23408_v11, %v9800_v27 }
 0x643   : > { %v17235_v29 = vpop.f32.mrf.mxu1  ;;  %v23576_v30 = vpop.f32.mrf.mxu0 }
 0x644   : > { %v23580_v20 = vadd.f32 %v17235_v29, %v23387_v9  ;;  %v10537_v9 = vadd.f32 %v23385_v25, %v10275_v39 }
 0x645   : > { %v10675_v42 = vpop.f32.mrf.mxu1  ;;  %v23583_v21 = vpop.f32.mrf.mxu0 }
 0x646   : > { %v23587_v28 = vadd.f32 %v10675_v42, %v10535_v2  ;;  %v10279_v42 = vadd.f32 %v23419_v31, %v9810_v15 }
 0x647   : > { %v17238_v18 = vpop.f32.mrf.mxu1  ;;  %v23589_v7 = vpop.f32.mrf.mxu0 }
 0x648   : > { %v23593_v34 = vadd.f32 %v17238_v18, %v23398_v32  ;;  %v10539_v32 = vadd.f32 %v23396_v6, %v10277_v24 }
 0x649   : > { %v10685_v45 = vpop.f32.mrf.mxu1  ;;  %v23596_v55 = vpop.f32.mrf.mxu0 }
 0x64a   : > { %v23600_v19 = vadd.f32 %v10685_v45, %v10537_v9  ;;  %v10541_v9 = vadd.f32 %v23410_v8, %v10279_v42 }
 0x64b   : > { %v17241_v29 = vpop.f32.mrf.mxu1  ;;  %v23602_v2 = vpop.f32.mrf.mxu0 }
 0x64c   : > { %26233 = vst [vmem:[#allocation107_spill] sm:$0xff] %v23602_v2  ;;  %v23606_v11 = vadd.f32 %v17241_v29, %v23412_v5 }
 0x64d   : > { %v10695_v17 = vpop.f32.mrf.mxu1  ;;  %v23609_v25 = vpop.f32.mrf.mxu0 }
 0x64e   : > { %26234 = vst [vmem:[#allocation52_spill] sm:$0xff] %v23609_v25  ;;  %v23611_v39 = vadd.f32 %v10695_v17, %v10539_v32 }
 0x64f   : > { %v17244_v26 = vpop.f32.mrf.mxu1  ;;  %v23613_v27 = vpop.f32.mrf.mxu0 }
 0x650   : > { %26235 = vst [vmem:[#allocation56_spill] sm:$0xff] %v23613_v27  ;;  %v23616_v18 = vadd.f32 %v17244_v26, %v23421_v62 }
 0x651   : > { %v10705_v45 = vpop.f32.mrf.mxu1  ;;  %v23619_v31 = vpop.f32.mrf.mxu0 }
 0x652   : > { %26236 = vst [vmem:[#allocation64_spill] sm:$0xff] %v23619_v31  ;;  %v23621_v5 = vadd.f32 %v10705_v45, %v10541_v9 }
 0x653   : > { %v17247_v0 = vpop.f32.mrf.mxu1  ;;  %v23623_v6 = vpop.f32.mrf.mxu0 }
 0x654   : > { %26237 = vst [vmem:[#allocation59_spill] sm:$0xff] %v23621_v5  ;;  %26238 = vst [vmem:[#allocation13_spill] sm:$0xff] %v23623_v6  ;;  %v23626_v24 = vadd.f32 %v17247_v0, %v23430_v58 }
 0x655   : > { %v10715_v16 = vpop.f32.mrf.mxu1  ;;  %v23628_v15 = vpop.f32.mrf.mxu0 }
 0x656   : > { %26239 = vst [vmem:[#allocation14_spill] sm:$0xff] %v23626_v24  ;;  %26240 = vst [vmem:[#allocation78_spill] sm:$0xff] %v23628_v15  ;;  %v23631_v29 = vadd.f32 %v10715_v16, %v23439_v3 }
 0x657   : > { %v17250_v62 = vpop.f32.mrf.mxu1  ;;  %v23633_v32 = vpop.f32.mrf.mxu0 }
 0x658   : > { %26241 = vst [vmem:[#allocation71_spill] sm:$0xff] %v23631_v29  ;;  %26242 = vst [vmem:[#allocation85_spill] sm:$0xff] %v23633_v32  ;;  %v23636_v8 = vadd.f32 %v17250_v62, %v23441_v1 }
 0x659   : > { %v10725_v42 = vpop.f32.mrf.mxu1  ;;  %v23638_v17 = vpop.f32.mrf.mxu0 }
 0x65a   : > { %26243 = vst [vmem:[#allocation15_spill] sm:$0xff] %v23636_v8  ;;  %26244 = vst [vmem:[#allocation89_spill] sm:$0xff] %v23638_v17  ;;  %v23641_v26 = vadd.f32 %v10725_v42, %v23450_v61 }
 0x65b   : > { %v17253_v58 = vpop.f32.mrf.mxu1  ;;  %v23643_v9 = vpop.f32.mrf.mxu0 }
 0x65c   : > { %26245 = vst [vmem:[#allocation96_spill] sm:$0xff] %v23641_v26  ;;  %26246 = vst [vmem:[#allocation29_spill] sm:$0xff] %v23643_v9  ;;  %v23646_v45 = vadd.f32 %v17253_v58, %v23455_v41 }
 0x65d   : > { %v10735_v3 = vpop.f32.mrf.mxu1  ;;  %v23648_v0 = vpop.f32.mrf.mxu0 }
 0x65e   : > { %26247 = vst [vmem:[#allocation34_spill] sm:$0xff] %v23646_v45  ;;  %26248 = vst [vmem:[#allocation24_spill] sm:$0xff] %v23648_v0  ;;  %v23651_v16 = vadd.f32 %v10735_v3, %v23464_v38 }
 0x65f   : > { %v17256_v1 = vpop.f32.mrf.mxu1  ;;  %v23653_v62 = vpop.f32.mrf.mxu0 }
 0x660   : > { %26249 = vst [vmem:[#allocation36_spill] sm:$0xff] %v23651_v16  ;;  %26250 = vst [vmem:[#allocation32_spill] sm:$0xff] %v23653_v62  ;;  %v23656_v17 = vadd.f32 %v17256_v1, %v23466_v43 }
 0x661   : > { %v10745_v61 = vpop.f32.mrf.mxu1  ;;  %v23658_v42 = vpop.f32.mrf.mxu0 }
 0x662   : > { %26251 = vst [vmem:[#allocation33_spill] sm:$0xff] %v23656_v17  ;;  %26252 = vst [vmem:[#allocation51_spill] sm:$0xff] %v23658_v42  ;;  %v23661_v9 = vadd.f32 %v10745_v61, %v23475_v14 }
 0x663   : > { %v17259_v41 = vpop.f32.mrf.mxu1  ;;  %v23663_v58 = vpop.f32.mrf.mxu0 }
 0x664   : > { %26253 = vst [vmem:[#allocation46_spill] sm:$0xff] %v23661_v9  ;;  %26254 = vst [vmem:[#allocation65_spill] sm:$0xff] %v23663_v58  ;;  %v23666_v0 = vadd.f32 %v17259_v41, %v23477_v60 }
 0x665   : > { %v10755_v38 = vpop.f32.mrf.mxu1  ;;  %v23668_v3 = vpop.f32.mrf.mxu0 }
 0x666   : > { %26255 = vst [vmem:[#allocation50_spill] sm:$0xff] %v23666_v0  ;;  %26256 = vst [vmem:[#allocation49_spill] sm:$0xff] %v23668_v3  ;;  %v23671_v62 = vadd.f32 %v10755_v38, %v23486_v44 }
 0x667   : > { %v17262_v43 = vpop.f32.mrf.mxu1  ;;  %v23673_v1 = vpop.f32.mrf.mxu0 }
 0x668   : > { %26257 = vst [vmem:[#allocation61_spill] sm:$0xff] %v23671_v62  ;;  %26258 = vst [vmem:[#allocation70_spill] sm:$0xff] %v23673_v1  ;;  %v23676_v42 = vadd.f32 %v17262_v43, %v23488_v12 }
 0x669   : > { %v10765_v14 = vpop.f32.mrf.mxu1  ;;  %v23678_v61 = vpop.f32.mrf.mxu0 }
 0x66a   : > { %26259 = vst [vmem:[#allocation69_spill] sm:$0xff] %v23676_v42  ;;  %26260 = vst [vmem:[#allocation68_spill] sm:$0xff] %v23678_v61  ;;  %v23681_v58 = vadd.f32 %v10765_v14, %v23497_v37 }
 0x66b   : > { %v17265_v60 = vpop.f32.mrf.mxu1  ;;  %v23683_v41 = vpop.f32.mrf.mxu0 }
 0x66c   : > { %26261 = vst [vmem:[#allocation73_spill] sm:$0xff] %v23681_v58  ;;  %26262 = vst [vmem:[#allocation41_spill] sm:$0xff] %v23683_v41  ;;  %v23686_v3 = vadd.f32 %v17265_v60, %v23504_v22 }
 0x66d   : > { %v10775_v44 = vpop.f32.mrf.mxu1  ;;  %v23691_v1 = vpop.f32.mrf.mxu0 }
 0x66e   : > { %26263 = vst [vmem:[#allocation40_spill] sm:$0xff] %v23686_v3  ;;  %v23689_v38 = vadd.f32 %v10775_v44, %v23514_v36  ;;  %26265 = vst [vmem:[#allocation57_spill] sm:$0xff] %v23691_v1 }
 0x66f   : > { %v17268_v12 = vpop.f32.mrf.mxu1  ;;  %v17415_v14 = vpop.f32.mrf.mxu0 }
 0x670   : > { %26264 = vst [vmem:[#allocation43_spill] sm:$0xff] %v23689_v38  ;;  %v23694_v43 = vadd.f32 %v17268_v12, %v23520_v35 }
 0x671   : > { %v10785_v61 = vpop.f32.mrf.mxu1  ;;  %v11415_v42 = vpop.f32.mrf.mxu0 }
 0x672   : > { %26266 = vst [vmem:[#allocation58_spill] sm:$0xff] %v23694_v43  ;;  %v23697_v37 = vadd.f32 %v10785_v61, %v23529_v4 }
 0x673   : > { %v17351_v58 = vpop.f32.mrf.mxu1  ;;  %v17418_v3 = vpop.f32.mrf.mxu0 }
 0x674   : > { %26267 = vst [vmem:[#allocation77_spill] sm:$0xff] %v23697_v37 }
 0x675   : > { %v11158_v41 = vpop.f32.mrf.mxu1  ;;  %v23701_v44 = vpop.f32.mrf.mxu0 }
 0x677   : > { %v17354_v22 = vpop.f32.mrf.mxu1  ;;  %v23707_v12 = vpop.f32.mrf.mxu0 }
 0x679   : > { %v11168_v60 = vpop.f32.mrf.mxu1  ;;  %v23713_v37 = vpop.f32.mrf.mxu0 }
 0x67b   : > { %v17357_v62 = vpop.f32.mrf.mxu1  ;;  %v23719_v0 = vpop.f32.mrf.mxu0 }
 0x67d   : > { %v23699_v36 = vpop.f32.mrf.mxu1  ;;  %v23725_v16 = vpop.f32.mrf.mxu0 }
 0x67f   : > { %v23703_v1 = vpop.f32.mrf.mxu1  ;;  %v23731_v15 = vpop.f32.mrf.mxu0 }
 0x681   : > { %v23705_v35 = vpop.f32.mrf.mxu1  ;;  %v23737_v8 = vpop.f32.mrf.mxu0 }
 0x683   : > { %v23709_v4 = vpop.f32.mrf.mxu1  ;;  %v23743_v27 = vpop.f32.mrf.mxu0 }
 0x685   : > { %v23711_v61 = vpop.f32.mrf.mxu1 }
 0x687   : > { %v23715_v43 = vpop.f32.mrf.mxu1 }
 0x689   : > { %v23717_v38 = vpop.f32.mrf.mxu1 }
 0x68b   : > { %v23721_v9 = vpop.f32.mrf.mxu1 }
 0x68d   : > { %v23723_v17 = vpop.f32.mrf.mxu1 }
 0x68e   : > { %26268 = vst [vmem:[#allocation60_spill] sm:$0xff] %v23723_v17 }
 0x68f   : > { %v23727_v32 = vpop.f32.mrf.mxu1 }
 0x690   : > { %26269 = vst [vmem:[#allocation66_spill] sm:$0xff] %v23727_v32  ;;  %v23749_v32 = vpop.f32.mrf.mxu0 }
 0x691   : > { %v23729_v45 = vpop.f32.mrf.mxu1 }
 0x692   : > { %26270 = vst [vmem:[#allocation22_spill] sm:$0xff] %v23729_v45 }
 0x693   : > { %v23733_v26 = vpop.f32.mrf.mxu1 }
 0x694   : > { %26271 = vst [vmem:[#allocation95_spill] sm:$0xff] %v23733_v26  ;;  %v23755_v26 = vpop.f32.mrf.mxu0 }
 0x695   : > { %v23735_v6 = vpop.f32.mrf.mxu1  ;;  %26279 = vst [vmem:[#allocation25_spill] sm:$0xff] %v23755_v26 }
 0x696   : > { %26272 = vst [vmem:[#allocation17_spill] sm:$0xff] %v23735_v6 }
 0x697   : > { %v23739_v31 = vpop.f32.mrf.mxu1 }
 0x698   : > { %26273 = vst [vmem:[#allocation86_spill] sm:$0xff] %v23739_v31  ;;  %v23761_v31 = vpop.f32.mrf.mxu0 }
 0x699   : > { %v23741_v29 = vpop.f32.mrf.mxu1  ;;  %26282 = vst [vmem:[#allocation47_spill] sm:$0xff] %v23761_v31 }
 0x69a   : > { %26274 = vst [vmem:[#allocation99_spill] sm:$0xff] %v23741_v29 }
 0x69b   : > { %v23745_v24 = vpop.f32.mrf.mxu1 }
 0x69c   : > { %26275 = vst [vmem:[#allocation28_spill] sm:$0xff] %v23745_v24  ;;  %v23767_v24 = vpop.f32.mrf.mxu0 }
 0x69d   : > { %v23747_v25 = vpop.f32.mrf.mxu1  ;;  %26285 = vst [vmem:[#allocation4_spill] sm:$0xff] %v23767_v24 }
 0x69e   : > { %26276 = vst [vmem:[#allocation31_spill] sm:$0xff] %v23747_v25 }
 0x69f   : > { %v23751_v45 = vpop.f32.mrf.mxu1 }
 0x6a0   : > { %26277 = vst [vmem:[#allocation27_spill] sm:$0xff] %v23751_v45  ;;  %v11061_v45 = vadd.f32 %v23506_v56, %v23526_v13  ;;  %v11062_v56 = vadd.f32 %v23531_v57, %v23548_v10  ;;  %v11064_v57 = vadd.f32 %v23544_v48, %v23561_v46  ;;  %v11066_v48 = vadd.f32 %v23557_v23, %v23574_v63 }
 0x6a1   : > { %v23753_v5 = vpop.f32.mrf.mxu1 }
 0x6a2   : > { %26278 = vst [vmem:[#allocation26_spill] sm:$0xff] %v23753_v5  ;;  %v11318_v26 = vadd.f32 %v17351_v58, %v11061_v45  ;;  %v11319_v58 = vadd.f32 %v11168_v60, %v11062_v56 }
 0x6a3   : > { %v23757_v6 = vpop.f32.mrf.mxu1 }
 0x6a4   : > { %26280 = vst [vmem:[#allocation37_spill] sm:$0xff] %v23757_v6  ;;  %v11060_v6 = vadd.f32 %v23516_v49, %v23535_v47  ;;  %v11575_v13 = vadd.f32 %v17415_v14, %v11318_v26  ;;  %v11065_v49 = vadd.f32 %v23537_v50, %v23554_v51  ;;  %v23794_v47 = vld [vmem:[%s25151_s6] ss:$0 sm:$0xff] }
 0x6a5   : > { %v23759_v17 = vpop.f32.mrf.mxu1 }
 0x6a6   : > { %26281 = vst [vmem:[#allocation45_spill] sm:$0xff] %v23759_v17  ;;  %v23777_v17 = vpop.f32.mrf.mxu0 }
 0x6a7   : > { %v23763_v29 = vpop.f32.mrf.mxu1 }
 0x6a8   : > { %26283 = vst [vmem:[#allocation11_spill] sm:$0xff] %v23763_v29  ;;  %v11317_v29 = vadd.f32 %v11158_v41, %v11060_v6  ;;  %v11067_v41 = vadd.f32 %v23550_v59, %v23567_v52 }
 0x6a9   : > { %v23765_v2 = vpop.f32.mrf.mxu1 }
 0x6aa   : > { %26284 = vst [vmem:[#allocation102_spill] sm:$0xff] %v23765_v2  ;;  %v11063_v2 = vadd.f32 %v23522_v33, %v23541_v54  ;;  %v11574_v54 = vadd.f32 %v11415_v42, %v11317_v29 }
 0x6ab   : > { %v23769_v25 = vpop.f32.mrf.mxu1 }
 0x6ac   : > { %26286 = vst [vmem:[#allocation3_spill] sm:$0xff] %v23769_v25  ;;  %v11320_v25 = vadd.f32 %v17354_v22, %v11063_v2  ;;  %v11322_v2 = vadd.f32 %v17357_v62, %v11065_v49  ;;  %v11321_v22 = vadd.f32 %v23699_v36, %v11064_v57  ;;  %v11576_v62 = vadd.f32 %v23701_v44, %v11319_v58 }
 0x6ad   : > { %v23773_v5 = vpop.f32.mrf.mxu1  ;;  %v11323_v44 = vadd.f32 %v23705_v35, %v11066_v48  ;;  %v11071_v35 = vadd.f32 %v23576_v30, %v23593_v34 }
 0x6ae   : > { %26287 = vst [vmem:[#allocation76_spill] sm:$0xff] %v23773_v5  ;;  %v23787_v5 = vpop.f32.mrf.mxu0  ;;  %v11577_v26 = vadd.f32 %v17418_v3, %v11320_v25  ;;  %v11324_v25 = vadd.f32 %v23703_v1, %v11067_v41  ;;  %v11579_v52 = vadd.f32 %v23707_v12, %v11322_v2  ;;  %v11069_v3 = vadd.f32 %v23563_v40, %v23580_v20 }
 0x6af   : > { %v23779_v31 = vpop.f32.mrf.mxu1  ;;  %v11578_v1 = vadd.f32 %v23713_v37, %v11321_v22  ;;  %v11068_v12 = vadd.f32 %v23570_v53, %v23587_v28  ;;  %v11328_v30 = vadd.f32 %v23715_v43, %v11071_v35 }
 0x6b0   : > { %v23800_v14 = vpop.f32.mrf.mxu0  ;;  %v11326_v40 = vadd.f32 %v23709_v4, %v11069_v3  ;;  %v11580_v4 = vadd.f32 %v23725_v16, %v11323_v44 }
 0x6b1   : > { %v23783_v24 = vpop.f32.mrf.mxu1  ;;  %v11325_v53 = vadd.f32 %v23711_v61, %v11068_v12  ;;  %v11073_v61 = vadd.f32 %v23589_v7, %v23606_v11  ;;  %v11585_v48 = vadd.f32 %v23743_v27, %v11328_v30  ;;  %v26291_v27 = vld [vmem:[#allocation52_spill] sm:$0xff] }
 0x6b2   : > { %v23812_v56 = vpop.f32.mrf.mxu0  ;;  %v11583_v41 = vadd.f32 %v23731_v15, %v11326_v40  ;;  %v11072_v15 = vadd.f32 %v23596_v55, %v23611_v39  ;;  %v26295_v40 = vld [vmem:[#allocation56_spill] sm:$0xff] }
 0x6b3   : > { %v17479_v45 = vpop.f32.mrf.mxu1  ;;  %v11582_v43 = vadd.f32 %v23737_v8, %v11325_v53  ;;  %v11330_v7 = vadd.f32 %v23721_v9, %v11073_v61 }
 0x6b4   : > { %v11832_v33 = vadd.f32 %v17479_v45, %v11575_v13 }
 0x6b5   : > { %v11672_v6 = vpop.f32.mrf.mxu1 }
 0x6b6   : > { %v11831_v10 = vadd.f32 %v11672_v6, %v11574_v54  ;;  %v11870_v50 = vadd.f32 %v23794_v47, %v11832_v33  ;;  %v11581_v33 = vadd.f32 %v23719_v0, %v11324_v25  ;;  %v23826_v54 = vpop.f32.mrf.mxu0  ;;  %v11070_v0 = vadd.f32 %v23583_v21, %v23600_v19 }
 0x6b7   : > { %v17482_v51 = vpop.f32.mrf.mxu1 }
 0x6b8   : > { %v11869_v60 = vadd.f32 %v23794_v47, %v11831_v10  ;;  %v11834_v29 = vadd.f32 %v17482_v51, %v11577_v26  ;;  %v11902_v36 = vmax.f32 %v11870_v50, 0.0  ;;  %v23840_v50 = vpop.f32.mrf.mxu0  ;;  %v11327_v21 = vadd.f32 %v23717_v38, %v11070_v0  ;;  %v26288_v38 = vld [vmem:[#allocation107_spill] sm:$0xff]  ;;  %v26299_v0 = vld [vmem:[#allocation64_spill] sm:$0xff] }
 0x6b9   : > { %v11682_v46 = vpop.f32.mrf.mxu1 }
 0x6ba   : > { %v11901_v42 = vmax.f32 %v11869_v60, 0.0  ;;  %v11833_v59 = vadd.f32 %v11682_v46, %v11576_v62  ;;  %v11872_v13 = vadd.f32 %v23794_v47, %v11834_v29  ;;  %v11075_v46 = vadd.f32 %v26288_v38, %v23616_v18  ;;  %v23854_v25 = vpop.f32.mrf.mxu0  ;;  %v26292_v18 = vld [vmem:[#allocation66_spill] sm:$0xff] }
 0x6bb   : > { %v17485_v45 = vpop.f32.mrf.mxu1  ;;  %v11584_v9 = vadd.f32 %v23749_v32, %v11327_v21  ;;  %v26303_v21 = vld [vmem:[#allocation13_spill] sm:$0xff] }
 0x6bc   : > { %v11871_v23 = vadd.f32 %v23794_v47, %v11833_v59  ;;  %v11836_v63 = vadd.f32 %v17485_v45, %v11579_v52  ;;  %17533 = vmatprep.mubr.msk.f32.mxu0 %vm4098_vm4, %v11901_v42  ;;  %v11904_v6 = vmax.f32 %v11872_v13, 0.0  ;;  %v26289_v52 = vld [vmem:[#allocation60_spill] sm:$0xff]  ;;  %v11332_v44 = vadd.f32 %v26292_v18, %v11075_v46 }
 0x6bd   : > { %v11692_v58 = vpop.f32.mrf.mxu1  ;;  %17534 = vmatmul.mubr.msk.f32.vlgmr.msra.gmra.mxu0 %vm4098_vm4, %v11902_v36  ;;  %v11329_v55 = vadd.f32 %v26289_v52, %v11072_v15  ;;  %v26290_v36 = vld [vmem:[#allocation59_spill] sm:$0xff]  ;;  %v26305_v46 = vld [vmem:[#allocation96_spill] sm:$0xff]  ;;  %v26307_v52 = vld [vmem:[#allocation86_spill] sm:$0xff] }
 0x6be   : > { %v11903_v20 = vmax.f32 %v11871_v23, 0.0  ;;  %v11835_v49 = vadd.f32 %v11692_v58, %v11578_v1  ;;  %v11874_v37 = vadd.f32 %v23794_v47, %v11836_v63  ;;  %v11074_v13 = vadd.f32 %v26291_v27, %v26290_v36  ;;  %v26293_v1 = vld [vmem:[#allocation25_spill] sm:$0xff]  ;;  %v26294_v58 = vld [vmem:[#allocation14_spill] sm:$0xff] }
 0x6bf   : > { %v17488_v2 = vpop.f32.mrf.mxu1  ;;  %v11587_v12 = vadd.f32 %v26293_v1, %v11330_v7  ;;  %v26304_v7 = vld [vmem:[#allocation17_spill] sm:$0xff]  ;;  %v26308_v36 = vld [vmem:[#allocation34_spill] sm:$0xff] }
 0x6c0   : > { %v11873_v28 = vadd.f32 %v23794_v47, %v11835_v49  ;;  %v11838_v57 = vadd.f32 %v17488_v2, %v11581_v33  ;;  %17536 = vmatprep.mubr.msk.f32.mxu0 %vm4098_vm4, %v11903_v20  ;;  %v11906_v51 = vmax.f32 %v11874_v37, 0.0  ;;  %v11077_v20 = vadd.f32 %v26295_v40, %v26294_v58  ;;  %v23868_v49 = vpop.f32.mrf.mxu0  ;;  %v26309_v27 = vld [vmem:[#allocation85_spill] sm:$0xff]  ;;  %v26311_v40 = vld [vmem:[#allocation36_spill] sm:$0xff] }
 0x6c1   : > { %v11702_v10 = vpop.f32.mrf.mxu1  ;;  %17537 = vmatmul.mubr.msk.f32.gmra.mxu0 %vm4098_vm4, %v11904_v6  ;;  %v26296_v6 = vld [vmem:[#allocation22_spill] sm:$0xff] }
 0x6c2   : > { %v11905_v34 = vmax.f32 %v11873_v28, 0.0  ;;  %v11837_v26 = vadd.f32 %v11702_v10, %v11580_v4  ;;  %v11876_v16 = vadd.f32 %v23794_v47, %v11838_v57  ;;  %v11331_v37 = vadd.f32 %v26296_v6, %v11074_v13  ;;  %v26297_v28 = vld [vmem:[#allocation47_spill] sm:$0xff] }
 0x6c3   : > { %v17491_v22 = vpop.f32.mrf.mxu1  ;;  %v11586_v57 = vadd.f32 %v26297_v28, %v11329_v55  ;;  %v26298_v4 = vld [vmem:[#allocation71_spill] sm:$0xff]  ;;  %v11081_v13 = vadd.f32 %v26309_v27, %v26308_v36  ;;  %v26315_v28 = vld [vmem:[#allocation29_spill] sm:$0xff] }
 0x6c4   : > { %v11875_v19 = vadd.f32 %v23794_v47, %v11837_v26  ;;  %v11840_v60 = vadd.f32 %v17491_v22, %v11583_v41  ;;  %17539 = vmatprep.mubr.msk.f32.mxu0 %vm4098_vm4, %v11905_v34  ;;  %v11908_v42 = vmax.f32 %v11876_v16, 0.0  ;;  %v11076_v10 = vadd.f32 %v26299_v0, %v26298_v4  ;;  %v26300_v34 = vld [vmem:[#allocation95_spill] sm:$0xff]  ;;  %v26325_v36 = vld [vmem:[#allocation37_spill] sm:$0xff] }
 0x6c5   : > { %v11712_v29 = vpop.f32.mrf.mxu1  ;;  %17540 = vmatmul.mubr.msk.f32.gmra.mxu0 %vm4098_vm4, %v11906_v51  ;;  %v11334_v26 = vadd.f32 %v26300_v34, %v11077_v20  ;;  %v26301_v51 = vld [vmem:[#allocation4_spill] sm:$0xff]  ;;  %v26302_v22 = vld [vmem:[#allocation15_spill] sm:$0xff]  ;;  %v11588_v38 = vadd.f32 %v23777_v17, %v11331_v37 }
 0x6c6   : > { %v11907_v11 = vmax.f32 %v11875_v19, 0.0  ;;  %v11839_v62 = vadd.f32 %v11712_v29, %v11582_v43  ;;  %v11878_v8 = vadd.f32 %v23794_v47, %v11840_v60  ;;  %v11589_v16 = vadd.f32 %v26301_v51, %v11332_v44  ;;  %v23882_v60 = vpop.f32.mrf.mxu0  ;;  %v26317_v51 = vld [vmem:[#allocation46_spill] sm:$0xff] }
 0x6c7   : > { %v17494_v59 = vpop.f32.mrf.mxu1  ;;  %v11079_v19 = vadd.f32 %v26303_v21, %v26302_v22  ;;  %v26319_v21 = vld [vmem:[#allocation27_spill] sm:$0xff] }
 0x6c8   : > { %v11877_v39 = vadd.f32 %v23794_v47, %v11839_v62  ;;  %v11842_v3 = vadd.f32 %v17494_v59, %v11585_v48  ;;  %17542 = vmatprep.mubr.msk.f32.mxu0 %vm4098_vm4, %v11907_v11  ;;  %v11910_v33 = vmax.f32 %v11878_v8, 0.0  ;;  %v11333_v11 = vadd.f32 %v26304_v7, %v11076_v10  ;;  %v26320_v7 = vld [vmem:[#allocation50_spill] sm:$0xff] }
 0x6c9   : > { %v11722_v45 = vpop.f32.mrf.mxu1  ;;  %17543 = vmatmul.mubr.msk.f32.gmra.mxu0 %vm4098_vm4, %v11908_v42  ;;  %v26306_v42 = vld [vmem:[#allocation78_spill] sm:$0xff]  ;;  %v11336_v55 = vadd.f32 %v26307_v52, %v11079_v19 }
 0x6ca   : > { %v11909_v23 = vmax.f32 %v11877_v39, 0.0  ;;  %v11841_v63 = vadd.f32 %v11722_v45, %v11584_v9  ;;  %v11880_v32 = vadd.f32 %v23794_v47, %v11842_v3  ;;  %v11078_v8 = vadd.f32 %v26306_v42, %v26305_v46  ;;  %v23896_v45 = vpop.f32.mrf.mxu0  ;;  %v26322_v42 = vld [vmem:[#allocation26_spill] sm:$0xff] }
 0x6cb   : > { %v17497_v35 = vpop.f32.mrf.mxu1  ;;  %v11591_v9 = vadd.f32 %v23787_v5, %v11334_v26  ;;  %v11590_v58 = vadd.f32 %v23800_v14, %v11333_v11  ;;  %v26312_v5 = vld [vmem:[#allocation89_spill] sm:$0xff]  ;;  %v26321_v11 = vld [vmem:[#allocation32_spill] sm:$0xff] }
 0x6cc   : > { %v11879_v2 = vadd.f32 %v23794_v47, %v11841_v63  ;;  %v11844_v53 = vadd.f32 %v17497_v35, %v11587_v12  ;;  %17545 = vmatprep.mubr.msk.f32.mxu0 %vm4098_vm4, %v11909_v23  ;;  %v11912_v43 = vmax.f32 %v11880_v32, 0.0  ;;  %v26310_v23 = vld [vmem:[#allocation99_spill] sm:$0xff]  ;;  %v11080_v20 = vadd.f32 %v26312_v5, %v26311_v40  ;;  %v26313_v32 = vld [vmem:[#allocation28_spill] sm:$0xff]  ;;  %v11535_v4 = vpop.f32.mrf.mxu0  ;;  %v26328_v40 = vld [vmem:[#allocation45_spill] sm:$0xff] }
 0x6cd   : > { %v11732_v30 = vpop.f32.mrf.mxu1  ;;  %17546 = vmatmul.mubr.msk.f32.gmra.mxu0 %vm4098_vm4, %v11910_v33  ;;  %v11335_v63 = vadd.f32 %v26310_v23, %v11078_v8  ;;  %v11338_v35 = vadd.f32 %v26313_v32, %v11081_v13  ;;  %v26326_v23 = vld [vmem:[#allocation69_spill] sm:$0xff] }
 0x6ce   : > { %v11911_v41 = vmax.f32 %v11879_v2, 0.0  ;;  %v11843_v61 = vadd.f32 %v11732_v30, %v11586_v57  ;;  %v11882_v15 = vadd.f32 %v23794_v47, %v11844_v53  ;;  %v11593_v2 = vadd.f32 %v23812_v56, %v11336_v55  ;;  %v26314_v53 = vld [vmem:[#allocation33_spill] sm:$0xff]  ;;  %v26316_v30 = vld [vmem:[#allocation31_spill] sm:$0xff] }
 0x6cf   : > { %v17500_v29 = vpop.f32.mrf.mxu1  ;;  %v11083_v57 = vadd.f32 %v26315_v28, %v26314_v53  ;;  %v11337_v34 = vadd.f32 %v26316_v30, %v11080_v20  ;;  %v26333_v30 = vld [vmem:[#allocation70_spill] sm:$0xff] }
 0x6d0   : > { %v11881_v62 = vadd.f32 %v23794_v47, %v11843_v61  ;;  %v11846_v48 = vadd.f32 %v17500_v29, %v11589_v16  ;;  %17548 = vmatprep.mubr.msk.f32.mxu0 %vm4098_vm4, %v11911_v41  ;;  %v11914_v18 = vmax.f32 %v11882_v15, 0.0  ;;  %v11592_v61 = vadd.f32 %v23826_v54, %v11335_v63  ;;  %v26318_v16 = vld [vmem:[#allocation24_spill] sm:$0xff]  ;;  %v26327_v63 = vld [vmem:[#allocation65_spill] sm:$0xff] }
 0x6d1   : > { %v11742_v59 = vpop.f32.mrf.mxu1  ;;  %17549 = vmatmul.mubr.msk.f32.gmra.mxu0 %vm4098_vm4, %v11912_v43  ;;  %v11082_v56 = vadd.f32 %v26318_v16, %v26317_v51  ;;  %v11340_v19 = vadd.f32 %v26319_v21, %v11083_v57  ;;  %v11595_v29 = vadd.f32 %v23840_v50, %v11338_v35  ;;  %v11594_v55 = vadd.f32 %v23854_v25, %v11337_v34  ;;  %v26329_v35 = vld [vmem:[#allocation73_spill] sm:$0xff]  ;;  %v26335_v21 = vld [vmem:[#allocation43_spill] sm:$0xff] }
 0x6d2   : > { %v11913_v39 = vmax.f32 %v11881_v62, 0.0  ;;  %v11845_v3 = vadd.f32 %v11742_v59, %v11588_v38  ;;  %v11884_v17 = vadd.f32 %v23794_v47, %v11846_v48  ;;  %v11085_v62 = vadd.f32 %v26321_v11, %v26320_v7  ;;  %v17454_v48 = vpop.f32.mrf.mxu0 }
 0x6d3   : > { %v17503_v44 = vpop.f32.mrf.mxu1  ;;  %v11339_v8 = vadd.f32 %v26322_v42, %v11082_v56 }
 0x6d4   : > { %v11883_v1 = vadd.f32 %v23794_v47, %v11845_v3  ;;  %v11848_v12 = vadd.f32 %v17503_v44, %v11591_v9  ;;  %17551 = vmatprep.mubr.msk.f32.mxu0 %vm4098_vm4, %v11913_v39  ;;  %v11916_v0 = vmax.f32 %v11884_v17, 0.0  ;;  %v26323_v39 = vld [vmem:[#allocation61_spill] sm:$0xff]  ;;  %v26324_v3 = vld [vmem:[#allocation51_spill] sm:$0xff]  ;;  %v11342_v27 = vadd.f32 %v26325_v36, %v11085_v62  ;;  %v11545_v44 = vpop.f32.mrf.mxu0 }
 0x6d5   : > { %v11752_v33 = vpop.f32.mrf.mxu1  ;;  %17552 = vmatmul.mubr.msk.f32.gmra.mxu0 %vm4098_vm4, %v11914_v18  ;;  %v11084_v50 = vadd.f32 %v26324_v3, %v26323_v39  ;;  %v11597_v17 = vadd.f32 %v23868_v49, %v11340_v19  ;;  %v11596_v32 = vadd.f32 %v23882_v60, %v11339_v8  ;;  %v26336_v19 = vld [vmem:[#allocation68_spill] sm:$0xff]  ;;  %v26342_v36 = vld [vmem:[#allocation57_spill] sm:$0xff] }
 0x6d6   : > { %v11915_v6 = vmax.f32 %v11883_v1, 0.0  ;;  %v11847_v37 = vadd.f32 %v11752_v33, %v11590_v58  ;;  %v11886_v10 = vadd.f32 %v23794_v47, %v11848_v12  ;;  %v11087_v1 = vadd.f32 %v26327_v63, %v26326_v23 }
 0x6d7   : > { %v17506_v14 = vpop.f32.mrf.mxu1  ;;  %v11341_v5 = vadd.f32 %v26328_v40, %v11084_v50 }
 0x6d8   : > { %v11885_v26 = vadd.f32 %v23794_v47, %v11847_v37  ;;  %v11850_v41 = vadd.f32 %v17506_v14, %v11593_v2  ;;  %17554 = vmatprep.mubr.msk.f32.mxu0 %vm4098_vm4, %v11915_v6  ;;  %v11918_v38 = vmax.f32 %v11886_v10, 0.0  ;;  %v26330_v6 = vld [vmem:[#allocation49_spill] sm:$0xff]  ;;  %v26331_v2 = vld [vmem:[#allocation11_spill] sm:$0xff]  ;;  %v17457_v10 = vpop.f32.mrf.mxu0  ;;  %v26332_v14 = vld [vmem:[#allocation40_spill] sm:$0xff] }
 0x6d9   : > { %v11762_v22 = vpop.f32.mrf.mxu1  ;;  %17555 = vmatmul.mubr.msk.f32.gmra.mxu0 %vm4098_vm4, %v11916_v0  ;;  %v11086_v49 = vadd.f32 %v26330_v6, %v26329_v35  ;;  %v11344_v53 = vadd.f32 %v26331_v2, %v11087_v1  ;;  %v11599_v0 = vadd.f32 %v23896_v45, %v11342_v27  ;;  %v11089_v34 = vadd.f32 %v26333_v30, %v26332_v14 }
 0x6da   : > { %v11917_v43 = vmax.f32 %v11885_v26, 0.0  ;;  %v11849_v15 = vadd.f32 %v11762_v22, %v11592_v61  ;;  %v11888_v46 = vadd.f32 %v23794_v47, %v11850_v41  ;;  %v26334_v61 = vld [vmem:[#allocation102_spill] sm:$0xff]  ;;  %v11598_v22 = vadd.f32 %v11535_v4, %v11341_v5  ;;  %v26340_v4 = vld [vmem:[#allocation76_spill] sm:$0xff] }
 0x6db   : > { %v17509_v54 = vpop.f32.mrf.mxu1  ;;  %v11343_v51 = vadd.f32 %v26334_v61, %v11086_v49  ;;  %v11601_v62 = vadd.f32 %v17454_v48, %v11344_v53 }
 0x6dc   : > { %v11887_v59 = vadd.f32 %v23794_v47, %v11849_v15  ;;  %v11852_v52 = vadd.f32 %v17509_v54, %v11595_v29  ;;  %17557 = vmatprep.mubr.msk.f32.mxu0 %vm4098_vm4, %v11917_v43  ;;  %v11920_v12 = vmax.f32 %v11888_v46, 0.0  ;;  %v11088_v43 = vadd.f32 %v26336_v19, %v26335_v21  ;;  %v26337_v15 = vld [vmem:[#allocation3_spill] sm:$0xff]  ;;  %v26338_v46 = vld [vmem:[#allocation58_spill] sm:$0xff]  ;;  %v26339_v54 = vld [vmem:[#allocation41_spill] sm:$0xff] }
 0x6dd   : > { %v11772_v9 = vpop.f32.mrf.mxu1  ;;  %17558 = vmatmul.mubr.msk.f32.gmra.mxu0 %vm4098_vm4, %v11918_v38  ;;  %v11346_v29 = vadd.f32 %v26337_v15, %v11089_v34  ;;  %v11555_v38 = vpop.f32.mrf.mxu0  ;;  %v11091_v42 = vadd.f32 %v26339_v54, %v26338_v46  ;;  %v11600_v50 = vadd.f32 %v11545_v44, %v11343_v51 }
 0x6de   : > { %v11919_v13 = vmax.f32 %v11887_v59, 0.0  ;;  %v11851_v18 = vadd.f32 %v11772_v9, %v11594_v55  ;;  %v11890_v58 = vadd.f32 %v23794_v47, %v11852_v52  ;;  %v11345_v55 = vadd.f32 %v26340_v4, %v11088_v43  ;;  %v26341_v9 = vld [vmem:[#allocation77_spill] sm:$0xff] }
 0x6df   : > { %v17512_v25 = vpop.f32.mrf.mxu1  ;;  %v11090_v27 = vadd.f32 %v26342_v36, %v26341_v9  ;;  %v17460_v48 = vpop.f32.mrf.mxu0  ;;  %v11603_v63 = vadd.f32 %v17457_v10, %v11346_v29 }
 0x6e0   : > { %v11889_v20 = vadd.f32 %v23794_v47, %v11851_v18  ;;  %v11854_v33 = vadd.f32 %v17512_v25, %v11597_v17  ;;  %17560 = vmatprep.mubr.msk.f32.mxu0 %vm4098_vm4, %v11919_v13  ;;  %v11922_v26 = vmax.f32 %v11890_v58, 0.0  ;;  %v11348_v18 = vadd.f32 %v23779_v31, %v11091_v42 }
 0x6e1   : > { %v11782_v37 = vpop.f32.mrf.mxu1  ;;  %17561 = vmatmul.mubr.msk.f32.gmra.mxu0 %vm4098_vm4, %v11920_v12  ;;  %v11347_v25 = vadd.f32 %v23783_v24, %v11090_v27  ;;  %v11602_v5 = vadd.f32 %v11555_v38, %v11345_v55 }
 0x6e2   : > { %v11921_v28 = vmax.f32 %v11889_v20, 0.0  ;;  %v11853_v57 = vadd.f32 %v11782_v37, %v11596_v32  ;;  %v11892_v41 = vadd.f32 %v23794_v47, %v11854_v33  ;;  %v11565_v20 = vpop.f32.mrf.mxu0  ;;  %v11605_v31 = vadd.f32 %v17460_v48, %v11348_v18 }
 0x6e3   : > { %v17515_v60 = vpop.f32.mrf.mxu1  ;;  %v11604_v2 = vadd.f32 %v11565_v20, %v11347_v25 }
 0x6e4   : > { %v11891_v16 = vadd.f32 %v23794_v47, %v11853_v57  ;;  %v11856_v56 = vadd.f32 %v17515_v60, %v11599_v0  ;;  %17563 = vmatprep.mubr.msk.f32.mxu0 %vm4098_vm4, %v11921_v28  ;;  %v11924_v8 = vmax.f32 %v11892_v41, 0.0  ;;  %v23979_v41 = vld [vmem:[#allocation2] ss:$0 sm:$0xff] }
 0x6e5   : > { %v11792_v45 = vpop.f32.mrf.mxu1  ;;  %17564 = vmatmul.mubr.msk.f32.gmra.mxu0 %vm4098_vm4, %v11922_v26 }
 0x6e6   : > { %v11923_v7 = vmax.f32 %v11891_v16, 0.0  ;;  %v11855_v11 = vadd.f32 %v11792_v45, %v11598_v22  ;;  %v11894_v59 = vadd.f32 %v23794_v47, %v11856_v56  ;;  %v26343_v56 = vld [vmem:[#allocation53_spill] sm:$0xff] }
 0x6e7   : > { %v17518_v52 = vpop.f32.mrf.mxu1 }
 0x6e8   : > { %v11893_v39 = vadd.f32 %v23794_v47, %v11855_v11  ;;  %v11858_v3 = vadd.f32 %v17518_v52, %v11601_v62  ;;  %17566 = vmatprep.mubr.msk.f32.mxu0 %vm4098_vm4, %v11923_v7  ;;  %v11926_v1 = vmax.f32 %v11894_v59, 0.0 }
 0x6e9   : > { %v11802_v13 = vpop.f32.mrf.mxu1  ;;  %17567 = vmatmul.mubr.msk.f32.gmra.mxu0 %vm4098_vm4, %v11924_v8 }
 0x6ea   : > { %v11925_v17 = vmax.f32 %v11893_v39, 0.0  ;;  %v11857_v23 = vadd.f32 %v11802_v13, %v11600_v50  ;;  %v11896_v12 = vadd.f32 %v23794_v47, %v11858_v3 }
 0x6eb   : > { %v17521_v58 = vpop.f32.mrf.mxu1 }
 0x6ec   : > { %v11895_v44 = vadd.f32 %v23794_v47, %v11857_v23  ;;  %v11860_v40 = vadd.f32 %v17521_v58, %v11603_v63  ;;  %17569 = vmatprep.mubr.msk.f32.mxu0 %vm4098_vm4, %v11925_v17  ;;  %v11928_v6 = vmax.f32 %v11896_v12, 0.0 }
 0x6ed   : > { %v11812_v33 = vpop.f32.mrf.mxu1  ;;  %17570 = vmatmul.mubr.msk.f32.gmra.mxu0 %vm4098_vm4, %v11926_v1 }
 0x6ee   : > { %v11927_v32 = vmax.f32 %v11895_v44, 0.0  ;;  %v11859_v35 = vadd.f32 %v11812_v33, %v11602_v5  ;;  %v11898_v49 = vadd.f32 %v23794_v47, %v11860_v40 }
 0x6ef   : > { %v17524_v37 = vpop.f32.mrf.mxu1 }
 0x6f0   : > { %v11897_v24 = vadd.f32 %v23794_v47, %v11859_v35  ;;  %v11862_v53 = vadd.f32 %v17524_v37, %v11605_v31  ;;  %17572 = vmatprep.mubr.msk.f32.mxu0 %vm4098_vm4, %v11927_v32  ;;  %v11930_v10 = vmax.f32 %v11898_v49, 0.0 }
 0x6f1   : > { %v11822_v28 = vpop.f32.mrf.mxu1  ;;  %17573 = vmatmul.mubr.msk.f32.gmra.mxu0 %vm4098_vm4, %v11928_v6 }
 0x6f2   : > { %v11929_v57 = vmax.f32 %v11897_v24, 0.0  ;;  %v11861_v0 = vadd.f32 %v11822_v28, %v11604_v2  ;;  %v11900_v14 = vadd.f32 %v23794_v47, %v11862_v53 }
 0x6f4   : > { %v11899_v30 = vadd.f32 %v23794_v47, %v11861_v0  ;;  %17575 = vmatprep.mubr.msk.f32.mxu0 %vm4098_vm4, %v11929_v57  ;;  %v11932_v26 = vmax.f32 %v11900_v14, 0.0 }
 0x6f5   : > { %17576 = vmatmul.mubr.msk.f32.gmra.mxu0 %vm4098_vm4, %v11930_v10 }
 0x6f6   : > { %v11931_v34 = vmax.f32 %v11899_v30, 0.0 }
 0x6f8   : > { %17578 = vmatprep.mubr.msk.f32.mxu0 %vm4098_vm4, %v11931_v34 }
 0x6f9   : > { %17579 = vmatmul.mubr.msk.f32.gmra.mxu0 %vm4098_vm4, %v11932_v26  ;;  %vm15589_vm4 = vcmask 589312  }
 0x77d   : > { %v17535_v60 = vpop.f32.mrf.mxu0 }
 0x77e   : > { %v12112_v61 = vadd.f32 %v17535_v60, %v23979_v41 }
 0x77f   : > { %v12106_v51 = vpop.f32.mrf.mxu0 }
 0x780   : > { %v12346_v16 = vcombine.high %v12112_v61, %v12112_v61  ;;  %v12353_v22 = vrot.slane %v12112_v61, %v26343_v56  ;;  %v12107_v47 = vadd.f32 %v23979_v41, %v12106_v51 }
 0x781   : > { %v17538_v21 = vpop.f32.mrf.mxu0 }
 0x782   : > { %v12360_v19 = vrot.slane %v12346_v16, %v26343_v56  ;;  %v12361_v43 = vcombine.high %v12353_v22, %v12353_v22  ;;  %v12297_v45 = vcombine.high %v12107_v47, %v12107_v47  ;;  %v12304_v15 = vrot.slane %v12107_v47, %v26343_v56 }
 0x783   : > { %v12122_v29 = vadd.f32 %v17538_v21, %v23979_v41  ;;  %v12116_v7 = vpop.f32.mrf.mxu0  ;;  %v12369_v46 = vrot.slane %v12353_v22, %v26343_v56 }
 0x784   : > { %v12362_v11 = vcombine.high %v12360_v19, %v12360_v19  ;;  %v12383_v62 = vrot.slane %v12361_v43, %v26343_v56  ;;  %v12311_v38 = vrot.slane %v12297_v45, %v26343_v56  ;;  %v12312_v54 = vcombine.high %v12304_v15, %v12304_v15 }
 0x785   : > { %v12444_v42 = vcombine.high %v12122_v29, %v12122_v29  ;;  %v12451_v8 = vrot.slane %v12122_v29, %v26343_v56  ;;  %v17541_v59 = vpop.f32.mrf.mxu0  ;;  %v23997_v36 = vrot.slane %v12360_v19, %v26343_v56  ;;  %v12320_v27 = vrot.slane %v12304_v15, %v26343_v56 }
 0x786   : > { %v12313_v52 = vcombine.high %v12311_v38, %v12311_v38  ;;  %v23992_v4 = vrot.slane %v12362_v11, %v26343_v56  ;;  %v13914_v55 = vcombine.low %v12369_v46, %v12383_v62  ;;  %v16200_v39 = vcombine.high %v12369_v46, %v12383_v62 }
 0x787   : > { %v12458_v3 = vrot.slane %v12444_v42, %v26343_v56  ;;  %v12334_v50 = vrot.slane %v12312_v54, %v26343_v56  ;;  %v12126_v9 = vpop.f32.mrf.mxu0  ;;  %v12459_v48 = vcombine.high %v12451_v8, %v12451_v8  ;;  %v24001_v13 = vrot.slane %v12311_v38, %v26343_v56 }
 0x788   : > { %v24004_v18 = vrot.slane %v12313_v52, %v26343_v56  ;;  %v12117_v23 = vadd.f32 %v23979_v41, %v12116_v7  ;;  %v13916_v63 = vcombine.low %v23997_v36, %v23992_v4  ;;  %v16201_v1 = vcombine.high %v23997_v36, %v23992_v4 }
 0x789   : > { %v12460_v17 = vcombine.high %v12458_v3, %v12458_v3  ;;  %v24012_v12 = vrot.slane %v13914_v55, %v26343_v56  ;;  %v24015_v58 = vrot.slane %v16200_v39, %v26343_v56  ;;  %v13865_v25 = vcombine.low %v12320_v27, %v12334_v50  ;;  %v17544_v20 = vpop.f32.mrf.mxu0 }
 0x78a   : > { %v16198_v44 = vcombine.high %v12320_v27, %v12334_v50  ;;  %v12467_v40 = vrot.slane %v12451_v8, %v26343_v56  ;;  %v12395_v5 = vcombine.high %v12117_v23, %v12117_v23  ;;  %v12481_v33 = vrot.slane %v12459_v48, %v26343_v56 }
 0x78b   : > { %v12402_v31 = vrot.slane %v12117_v23, %v26343_v56  ;;  %v12132_v32 = vadd.f32 %v17541_v59, %v23979_v41  ;;  %v12127_v35 = vadd.f32 %v23979_v41, %v12126_v9  ;;  %v13867_v6 = vcombine.low %v24001_v13, %v24004_v18  ;;  %v12136_v15 = vpop.f32.mrf.mxu0 }
 0x78c   : > { %v16199_v49 = vcombine.high %v24001_v13, %v24004_v18  ;;  %v24027_v37 = vrot.slane %v12458_v3, %v26343_v56  ;;  %v24030_v2 = vrot.slane %v12460_v17, %v26343_v56  ;;  %v12409_v24 = vrot.slane %v12395_v5, %v26343_v56 }
 0x78d   : > { %v12410_v53 = vcombine.high %v12402_v31, %v12402_v31  ;;  %v12542_v28 = vcombine.high %v12132_v32, %v12132_v32  ;;  %v12142_v57 = vadd.f32 %v17544_v20, %v23979_v41  ;;  %v24035_v0 = vrot.slane %v13865_v25, %v26343_v56  ;;  %v17547_v27 = vpop.f32.mrf.mxu0 }
 0x78e   : > { %v12549_v10 = vrot.slane %v12132_v32, %v26343_v56  ;;  %v12493_v14 = vcombine.high %v12127_v35, %v12127_v35  ;;  %v12500_v30 = vrot.slane %v12127_v35, %v26343_v56  ;;  %v14012_v34 = vcombine.low %v12467_v40, %v12481_v33 }
 0x78f   : > { %v12411_v26 = vcombine.high %v12409_v24, %v12409_v24  ;;  %v12432_v60 = vrot.slane %v12410_v53, %v26343_v56  ;;  %v12556_v61 = vrot.slane %v12542_v28, %v26343_v56  ;;  %v24042_v51 = vrot.slane %v16198_v44, %v26343_v56 }
 0x790   : > { %v16204_v16 = vcombine.high %v12467_v40, %v12481_v33  ;;  %v12557_v22 = vcombine.high %v12549_v10, %v12549_v10  ;;  %v12507_v47 = vrot.slane %v12493_v14, %v26343_v56  ;;  %v14014_v21 = vcombine.low %v24027_v37, %v24030_v2 }
 0x791   : > { %v12418_v19 = vrot.slane %v12402_v31, %v26343_v56  ;;  %v12558_v43 = vcombine.high %v12556_v61, %v12556_v61  ;;  %v12640_v45 = vcombine.high %v12142_v57, %v12142_v57  ;;  %v16205_v29 = vcombine.high %v24027_v37, %v24030_v2 }
 0x792   : > { %v24051_v7 = vrot.slane %v12411_v26, %v26343_v56  ;;  %v12579_v11 = vrot.slane %v12557_v22, %v26343_v56  ;;  %v12508_v62 = vcombine.high %v12500_v30, %v12500_v30  ;;  %v24055_v38 = vrot.slane %v14012_v34, %v26343_v56 }
 0x793   : > { %v13963_v46 = vcombine.low %v12418_v19, %v12432_v60  ;;  %v16202_v54 = vcombine.high %v12418_v19, %v12432_v60  ;;  %v12565_v42 = vrot.slane %v12549_v10, %v26343_v56  ;;  %v24059_v8 = vrot.slane %v16204_v16, %v26343_v56  ;;  %v12146_v10 = vpop.f32.mrf.mxu0 }
 0x794   : > { %v24062_v59 = vrot.slane %v12409_v24, %v26343_v56  ;;  %v24065_v52 = vrot.slane %v12558_v43, %v26343_v56  ;;  %v12509_v55 = vcombine.high %v12507_v47, %v12507_v47  ;;  %v24068_v39 = vrot.slane %v12556_v61, %v26343_v56 }
 0x795   : > { %v14110_v3 = vcombine.low %v12565_v42, %v12579_v11  ;;  %v12647_v50 = vrot.slane %v12142_v57, %v26343_v56  ;;  %v12654_v9 = vrot.slane %v12640_v45, %v26343_v56  ;;  %v16208_v17 = vcombine.high %v12565_v42, %v12579_v11 }
 0x796   : > { %v13965_v48 = vcombine.low %v24062_v59, %v24051_v7  ;;  %v12516_v23 = vrot.slane %v12500_v30, %v26343_v56  ;;  %v12530_v25 = vrot.slane %v12508_v62, %v26343_v56  ;;  %v16203_v44 = vcombine.high %v24062_v59, %v24051_v7 }
 0x797   : > { %v24079_v40 = vrot.slane %v13963_v46, %v26343_v56  ;;  %v24082_v5 = vrot.slane %v16202_v54, %v26343_v56  ;;  %v24085_v20 = vrot.slane %v12507_v47, %v26343_v56  ;;  %v14112_v33 = vcombine.low %v24068_v39, %v24065_v52 }
 0x798   : > { %v16209_v31 = vcombine.high %v24068_v39, %v24065_v52  ;;  %v24092_v32 = vrot.slane %v12509_v55, %v26343_v56  ;;  %v12655_v35 = vcombine.high %v12647_v50, %v12647_v50  ;;  %v24095_v24 = vrot.slane %v14110_v3, %v26343_v56 }
 0x799   : > { %v12656_v53 = vcombine.high %v12654_v9, %v12654_v9  ;;  %v12137_v28 = vadd.f32 %v23979_v41, %v12136_v15  ;;  %v12152_v57 = vadd.f32 %v17547_v27, %v23979_v41  ;;  %v24100_v14 = vrot.slane %v16208_v17, %v26343_v56  ;;  %v17550_v27 = vpop.f32.mrf.mxu0 }
 0x79a   : > { %v14061_v30 = vcombine.low %v12516_v23, %v12530_v25  ;;  %v16206_v34 = vcombine.high %v12516_v23, %v12530_v25  ;;  %v12677_v26 = vrot.slane %v12655_v35, %v26343_v56  ;;  %v12663_v43 = vrot.slane %v12647_v50, %v26343_v56 }
 0x79b   : > { %v12591_v60 = vcombine.high %v12137_v28, %v12137_v28  ;;  %v12598_v61 = vrot.slane %v12137_v28, %v26343_v56  ;;  %v12738_v16 = vcombine.high %v12152_v57, %v12152_v57  ;;  %v12745_v22 = vrot.slane %v12152_v57, %v26343_v56  ;;  %v12156_v4 = vpop.f32.mrf.mxu0 }
 0x79c   : > { %v12147_v45 = vadd.f32 %v23979_v41, %v12146_v10  ;;  %v24112_v15 = vrot.slane %v12656_v53, %v26343_v56  ;;  %v24117_v54 = vrot.slane %v14061_v30, %v26343_v56  ;;  %v24120_v42 = vrot.slane %v12654_v9, %v26343_v56 }
 0x79d   : > { %v12605_v11 = vrot.slane %v12591_v60, %v26343_v56  ;;  %v12606_v62 = vcombine.high %v12598_v61, %v12598_v61  ;;  %v12752_v46 = vrot.slane %v12738_v16, %v26343_v56  ;;  %v14208_v55 = vcombine.low %v12663_v43, %v12677_v26  ;;  %v17553_v47 = vpop.f32.mrf.mxu0 }
 0x79e   : > { %v12753_v3 = vcombine.high %v12745_v22, %v12745_v22  ;;  %v24123_v50 = vrot.slane %v16206_v34, %v26343_v56  ;;  %v16212_v35 = vcombine.high %v12663_v43, %v12677_v26  ;;  %v12689_v28 = vcombine.high %v12147_v45, %v12147_v45 }
 0x79f   : > { %v12607_v17 = vcombine.high %v12605_v11, %v12605_v11  ;;  %v12628_v23 = vrot.slane %v12606_v62, %v26343_v56  ;;  %v12754_v25 = vcombine.high %v12752_v46, %v12752_v46  ;;  %v12696_v57 = vrot.slane %v12147_v45, %v26343_v56 }
 0x7a0   : > { %v12775_v53 = vrot.slane %v12753_v3, %v26343_v56  ;;  %v12614_v10 = vrot.slane %v12598_v61, %v26343_v56  ;;  %v12162_v34 = vadd.f32 %v17550_v27, %v23979_v41  ;;  %v24138_v26 = vrot.slane %v14208_v55, %v26343_v56 }
 0x7a1   : > { %v24132_v30 = vrot.slane %v12607_v17, %v26343_v56  ;;  %v12761_v16 = vrot.slane %v12745_v22, %v26343_v56  ;;  %v12703_v43 = vrot.slane %v12689_v28, %v26343_v56  ;;  %v24143_v45 = vrot.slane %v12605_v11, %v26343_v56 }
 0x7a2   : > { %v14159_v62 = vcombine.low %v12614_v10, %v12628_v23  ;;  %v16210_v61 = vcombine.high %v12614_v10, %v12628_v23  ;;  %v24146_v3 = vrot.slane %v12754_v25, %v26343_v56  ;;  %v24149_v27 = vrot.slane %v16212_v35, %v26343_v56 }
 0x7a3   : > { %v24152_v17 = vrot.slane %v12752_v46, %v26343_v56  ;;  %v14306_v55 = vcombine.low %v12761_v16, %v12775_v53  ;;  %v12704_v60 = vcombine.high %v12696_v57, %v12696_v57  ;;  %v16216_v28 = vcombine.high %v12761_v16, %v12775_v53 }
 0x7a4   : > { %v12705_v9 = vcombine.high %v12703_v43, %v12703_v43  ;;  %v12836_v23 = vcombine.high %v12162_v34, %v12162_v34  ;;  %v12843_v25 = vrot.slane %v12162_v34, %v26343_v56  ;;  %v13938_v35 = vrot.slane %v13916_v63, %v26343_v56 }
 0x7a5   : > { %v13945_v46 = vrot.slane %v16201_v1, %v26343_v56  ;;  %v24168_v10 = vrot.slane %v14159_v62, %v26343_v56  ;;  %v24171_v11 = vrot.slane %v16210_v61, %v26343_v56  ;;  %v13946_v34 = vcombine.low %v24012_v12, %v24015_v58 }
 0x7a6   : > { %v12726_v16 = vrot.slane %v12704_v60, %v26343_v56  ;;  %v12850_v63 = vrot.slane %v12836_v23, %v26343_v56  ;;  %v12851_v22 = vcombine.high %v12843_v25, %v12843_v25  ;;  %v24182_v1 = vrot.slane %v14306_v55, %v26343_v56 }
 0x7a7   : > { %v13947_v19 = vcombine.low %v13938_v35, %v13945_v46  ;;  %v24185_v62 = vrot.slane %v16216_v28, %v26343_v56  ;;  %v12712_v61 = vrot.slane %v12696_v57, %v26343_v56  ;;  %v24189_v12 = vrot.slane %v12703_v43, %v26343_v56 }
 0x7a8   : > { %v24192_v58 = vrot.slane %v12705_v9, %v26343_v56  ;;  %v12852_v60 = vcombine.high %v12850_v63, %v12850_v63  ;;  %v13954_v23 = vrot.slane %v13946_v34, %v26343_v56  ;;  %v12157_v46 = vadd.f32 %v23979_v41, %v12156_v4 }
 0x7a9   : > { %v13961_v35 = vrot.slane %v13947_v19, %v26343_v56  ;;  %v13889_v55 = vrot.slane %v13867_v6, %v26343_v56  ;;  %v13896_v57 = vrot.slane %v16199_v49, %v26343_v56  ;;  %v14257_v43 = vcombine.low %v12712_v61, %v12726_v16 }
 0x7aa   : > { %v16214_v9 = vcombine.high %v12712_v61, %v12726_v16  ;;  %v12873_v28 = vrot.slane %v12851_v22, %v26343_v56  ;;  %v13897_v34 = vcombine.low %v24035_v0, %v24042_v51  ;;  %v12787_v36 = vcombine.high %v12157_v46, %v12157_v46 }
 0x7ab   : > { %v13962_v19 = vcombine.low %v13954_v23, %v13961_v35  ;;  %v12794_v4 = vrot.slane %v12157_v46, %v26343_v56  ;;  %v13898_v53 = vcombine.low %v13889_v55, %v13896_v57  ;;  %v14259_v6 = vcombine.low %v24189_v12, %v24192_v58  ;;  %v12166_v55 = vpop.f32.mrf.mxu0 }
 0x7ac   : > { %v16215_v13 = vcombine.high %v24189_v12, %v24192_v58  ;;  %v12859_v18 = vrot.slane %v12843_v25, %v26343_v56  ;;  %v24215_v49 = vrot.slane %v12850_v63, %v26343_v56  ;;  %v24218_v22 = vrot.slane %v12852_v60, %v26343_v56 }
 0x7ad   : > { %15437 = vperm.xlu1 %17602, %v13962_v19   ;;  %v12801_v0 = vrot.slane %v12787_v36, %v26343_v56  ;;  %v12802_v51 = vcombine.high %v12794_v4, %v12794_v4  ;;  %v13905_v16 = vrot.slane %v13897_v34, %v26343_v56  ;;  %v13912_v61 = vrot.slane %v13898_v53, %v26343_v56 }
 0x7ae   : > { %v12172_v23 = vadd.f32 %v17553_v47, %v23979_v41  ;;  %v14036_v25 = vrot.slane %v14014_v21, %v26343_v56  ;;  %v14043_v63 = vrot.slane %v16205_v29, %v26343_v56  ;;  %v14404_v60 = vcombine.low %v12859_v18, %v12873_v28 }
 0x7af   : > { %v16220_v35 = vcombine.high %v12859_v18, %v12873_v28  ;;  %v12803_v36 = vcombine.high %v12801_v0, %v12801_v0  ;;  %v14044_v46 = vcombine.low %v24055_v38, %v24059_v8  ;;  %v13913_v53 = vcombine.low %v13905_v16, %v13912_v61 }
 0x7b0   : > { %v12934_v57 = vcombine.high %v12172_v23, %v12172_v23  ;;  %v12941_v47 = vrot.slane %v12172_v23, %v26343_v56  ;;  %v14045_v34 = vcombine.low %v14036_v25, %v14043_v63  ;;  %v24236_v19 = vrot.slane %v14257_v43, %v26343_v56 }
 0x7b1   : > { %v24239_v21 = vrot.slane %v16214_v9, %v26343_v56  ;;  %v14406_v37 = vcombine.low %v24215_v49, %v24218_v22  ;;  %v12824_v2 = vrot.slane %v12802_v51, %v26343_v56  ;;  %15434 = vperm.xlu0 %17601, %v13913_v53   ;;  %v14052_v8 = vrot.slane %v14044_v46, %v26343_v56  ;;  %v17556_v51 = vpop.f32.mrf.mxu0 }
 0x7b2   : > { %v12948_v29 = vrot.slane %v12934_v57, %v26343_v56  ;;  %v12949_v38 = vcombine.high %v12941_v47, %v12941_v47  ;;  %v14059_v28 = vrot.slane %v14045_v34, %v26343_v56  ;;  %v16221_v43 = vcombine.high %v24215_v49, %v24218_v22 }
 0x7b3   : > { %v24250_v18 = vrot.slane %v14404_v60, %v26343_v56  ;;  %v24253_v9 = vrot.slane %v16220_v35, %v26343_v56  ;;  %v12810_v16 = vrot.slane %v12794_v4, %v26343_v56  ;;  %v24257_v61 = vrot.slane %v12803_v36, %v26343_v56 }
 0x7b4   : > { %v12950_v23 = vcombine.high %v12948_v29, %v12948_v29  ;;  %v12971_v25 = vrot.slane %v12949_v38, %v26343_v56  ;;  %v14060_v63 = vcombine.low %v14052_v8, %v14059_v28  ;;  %v12167_v46 = vadd.f32 %v23979_v41, %v12166_v55 }
 0x7b5   : > { %v13987_v60 = vrot.slane %v13965_v48, %v26343_v56  ;;  %v13994_v4 = vrot.slane %v16203_v44, %v26343_v56  ;;  %v13995_v35 = vcombine.low %v24079_v40, %v24082_v5  ;;  %v24272_v36 = vrot.slane %v12801_v0, %v26343_v56 }
 0x7b6   : > { %v14355_v53 = vcombine.low %v12810_v16, %v12824_v2  ;;  %v12957_v57 = vrot.slane %v12941_v47, %v26343_v56  ;;  %15443 = vperm.xlu1 %17602, %v14060_v63   ;;  %v12182_v55 = vadd.f32 %v17556_v51, %v23979_v41  ;;  %v16218_v34 = vcombine.high %v12810_v16, %v12824_v2 }
 0x7b7   : > { %v12885_v38 = vcombine.high %v12167_v46, %v12167_v46  ;;  %v12892_v48 = vrot.slane %v12167_v46, %v26343_v56  ;;  %v13996_v8 = vcombine.low %v13987_v60, %v13994_v4  ;;  %v14357_v7 = vcombine.low %v24272_v36, %v24257_v61 }
 0x7b8   : > { %v24280_v59 = vrot.slane %v12948_v29, %v26343_v56  ;;  %v24283_v44 = vrot.slane %v12950_v23, %v26343_v56  ;;  %v14502_v40 = vcombine.low %v12957_v57, %v12971_v25  ;;  %v14003_v47 = vrot.slane %v13995_v35, %v26343_v56 }
 0x7b9   : > { %v12899_v5 = vrot.slane %v12885_v38, %v26343_v56  ;;  %v12900_v0 = vcombine.high %v12892_v48, %v12892_v48  ;;  %v14010_v2 = vrot.slane %v13996_v8, %v26343_v56  ;;  %v13032_v28 = vcombine.high %v12182_v55, %v12182_v55 }
 0x7ba   : > { %v13039_v16 = vrot.slane %v12182_v55, %v26343_v56  ;;  %v14134_v29 = vrot.slane %v14112_v33, %v26343_v56  ;;  %v14141_v51 = vrot.slane %v16209_v31, %v26343_v56  ;;  %v16224_v23 = vcombine.high %v12957_v57, %v12971_v25  ;;  %v12176_v25 = vpop.f32.mrf.mxu0 }
 0x7bb   : > { %v12901_v63 = vcombine.high %v12899_v5, %v12899_v5  ;;  %v12922_v46 = vrot.slane %v12900_v0, %v26343_v56  ;;  %v14011_v60 = vcombine.low %v14003_v47, %v14010_v2  ;;  %v16219_v4 = vcombine.high %v24272_v36, %v24257_v61 }
 0x7bc   : > { %v24301_v35 = vrot.slane %v14355_v53, %v26343_v56  ;;  %v13046_v55 = vrot.slane %v13032_v28, %v26343_v56  ;;  %v14142_v33 = vcombine.low %v24095_v24, %v24100_v14  ;;  %v24307_v38 = vrot.slane %v16218_v34, %v26343_v56 }
 0x7bd   : > { %v12908_v39 = vrot.slane %v12892_v48, %v26343_v56  ;;  %15440 = vperm.xlu0 %17601, %v14011_v60   ;;  %v14143_v31 = vcombine.low %v14134_v29, %v14141_v51  ;;  %v24315_v57 = vrot.slane %v14502_v40, %v26343_v56  ;;  %v24318_v8 = vrot.slane %v12901_v63, %v26343_v56 }
 0x7be   : > { %v13047_v24 = vcombine.high %v13039_v16, %v13039_v16  ;;  %v24321_v14 = vrot.slane %v16224_v23, %v26343_v56  ;;  %v24324_v34 = vrot.slane %v12899_v5, %v26343_v56  ;;  %v13055_v0 = vrot.slane %v13039_v16, %v26343_v56 }
 0x7bf   : > { %v14453_v48 = vcombine.low %v12908_v39, %v12922_v46  ;;  %v16222_v47 = vcombine.high %v12908_v39, %v12922_v46  ;;  %v13048_v2 = vcombine.high %v13046_v55, %v13046_v55  ;;  %v14150_v28 = vrot.slane %v14142_v33, %v26343_v56  ;;  %v17559_v46 = vpop.f32.mrf.mxu0 }
 0x7c0   : > { %v14157_v40 = vrot.slane %v14143_v31, %v26343_v56  ;;  %v12177_v29 = vadd.f32 %v23979_v41, %v12176_v25  ;;  %v26344_v51 = vcombine.low %v24085_v20, %v24092_v32  ;;  %v26345_v5 = vcombine.high %v24085_v20, %v24092_v32 }
 0x7c1   : > { %v14093_v16 = vcombine.low %v24117_v54, %v24123_v50  ;;  %v24345_v39 = vrot.slane %v13046_v55, %v26343_v56  ;;  %v13069_v31 = vrot.slane %v13047_v24, %v26343_v56  ;;  %v12192_v54 = vadd.f32 %v17559_v46, %v23979_v41 }
 0x7c2   : > { %v14085_v23 = vrot.slane %v26344_v51, %v26343_v56  ;;  %v14092_v63 = vrot.slane %v26345_v5, %v26343_v56  ;;  %v14158_v25 = vcombine.low %v14150_v28, %v14157_v40  ;;  %v12983_v51 = vcombine.high %v12177_v29, %v12177_v29 }
 0x7c3   : > { %26346 = vst [vmem:[#allocation87_spill] sm:$0xff] %v24345_v39  ;;  %v12990_v20 = vrot.slane %v12177_v29, %v26343_v56  ;;  %v24350_v5 = vrot.slane %v13048_v2, %v26343_v56  ;;  %v26348_v50 = vcombine.low %v24120_v42, %v24112_v15  ;;  %v26349_v55 = vcombine.high %v24120_v42, %v24112_v15  ;;  %v12186_v42 = vpop.f32.mrf.mxu0 }
 0x7c4   : > { %v14094_v32 = vcombine.low %v14085_v23, %v14092_v63  ;;  %15449 = vperm.xlu1 %17602, %v14158_v25   ;;  %v12997_v28 = vrot.slane %v12983_v51, %v26343_v56  ;;  %v14101_v29 = vrot.slane %v14093_v16, %v26343_v56  ;;  %v13130_v23 = vcombine.high %v12192_v54, %v12192_v54 }
 0x7c5   : > { %26347 = vst [vmem:[#allocation92_spill] sm:$0xff] %v24350_v5  ;;  %v14232_v33 = vrot.slane %v26348_v50, %v26343_v56  ;;  %v14239_v24 = vrot.slane %v26349_v55, %v26343_v56  ;;  %v12998_v40 = vcombine.high %v12990_v20, %v12990_v20  ;;  %v13137_v63 = vrot.slane %v12192_v54, %v26343_v56 }
 0x7c6   : > { %v14108_v2 = vrot.slane %v14094_v32, %v26343_v56  ;;  %v14240_v46 = vcombine.low %v24138_v26, %v24149_v27  ;;  %v14600_v60 = vcombine.low %v13055_v0, %v13069_v31  ;;  %v16228_v53 = vcombine.high %v13055_v0, %v13069_v31 }
 0x7c7   : > { %v14241_v50 = vcombine.low %v14232_v33, %v14239_v24  ;;  %v12999_v52 = vcombine.high %v12997_v28, %v12997_v28  ;;  %v24368_v25 = vrot.slane %v14453_v48, %v26343_v56  ;;  %v13020_v51 = vrot.slane %v12998_v40, %v26343_v56 }
 0x7c8   : > { %v14109_v15 = vcombine.low %v14101_v29, %v14108_v2  ;;  %v13144_v16 = vrot.slane %v13130_v23, %v26343_v56  ;;  %v13145_v32 = vcombine.high %v13137_v63, %v13137_v63  ;;  %v24373_v55 = vrot.slane %v16222_v47, %v26343_v56 }
 0x7c9   : > { %v13006_v27 = vrot.slane %v12990_v20, %v26343_v56  ;;  %v14255_v0 = vrot.slane %v14241_v50, %v26343_v56  ;;  %v24380_v33 = vrot.slane %v12999_v52, %v26343_v56  ;;  %v14248_v31 = vrot.slane %v14240_v46, %v26343_v56 }
 0x7ca   : > { %15446 = vperm.xlu0 %17601, %v14109_v15   ;;  %v13146_v48 = vcombine.high %v13144_v16, %v13144_v16  ;;  %v12187_v54 = vadd.f32 %v23979_v41, %v12186_v42  ;;  %v24387_v24 = vrot.slane %v14600_v60, %v26343_v56  ;;  %v24390_v40 = vrot.slane %v16228_v53, %v26343_v56 }
 0x7cb   : > { %26350 = vst [vmem:[#allocation75_spill] sm:$0xff] %v24380_v33  ;;  %v13167_v20 = vrot.slane %v13145_v32, %v26343_v56  ;;  %v24394_v29 = vrot.slane %v12997_v28, %v26343_v56  ;;  %v14551_v52 = vcombine.low %v13006_v27, %v13020_v51  ;;  %v13153_v2 = vrot.slane %v13137_v63, %v26343_v56  ;;  %v17562_v32 = vpop.f32.mrf.mxu0 }
 0x7cc   : > { %26351 = vst [vmem:[#allocation74_spill] sm:$0xff] %v24387_v24  ;;  %26352 = vst [vmem:[#allocation21_spill] sm:$0xff] %v24390_v40  ;;  %v14256_v23 = vcombine.low %v14248_v31, %v14255_v0  ;;  %v13081_v46 = vcombine.high %v12187_v54, %v12187_v54  ;;  %v13088_v50 = vrot.slane %v12187_v54, %v26343_v56 }
 0x7cd   : > { %26353 = vst [vmem:[#allocation83_spill] sm:$0xff] %v24394_v29  ;;  %v26354_v60 = vcombine.low %v24143_v45, %v24132_v30  ;;  %v26355_v53 = vcombine.high %v24143_v45, %v24132_v30  ;;  %v16226_v28 = vcombine.high %v13006_v27, %v13020_v51  ;;  %v24409_v63 = vrot.slane %v13144_v16, %v26343_v56 }
 0x7ce   : > { %v24412_v0 = vrot.slane %v13146_v48, %v26343_v56  ;;  %15455 = vperm.xlu1 %17602, %v14256_v23   ;;  %v14698_v31 = vcombine.low %v13153_v2, %v13167_v20  ;;  %v13095_v54 = vrot.slane %v13081_v46, %v26343_v56  ;;  %v14191_v30 = vcombine.low %v24168_v10, %v24171_v11  ;;  %v12196_v11 = vpop.f32.mrf.mxu0 }
 0x7cf   : > { %v14183_v15 = vrot.slane %v26354_v60, %v26343_v56  ;;  %v14190_v42 = vrot.slane %v26355_v53, %v26343_v56  ;;  %v13096_v60 = vcombine.high %v13088_v50, %v13088_v50  ;;  %v12202_v51 = vadd.f32 %v17562_v32, %v23979_v41 }
 0x7d0   : > { %v26356_v27 = vcombine.low %v24152_v17, %v24146_v3  ;;  %v26357_v48 = vcombine.high %v24152_v17, %v24146_v3  ;;  %v16232_v53 = vcombine.high %v13153_v2, %v13167_v20  ;;  %v13097_v26 = vcombine.high %v13095_v54, %v13095_v54 }
 0x7d1   : > { %v14192_v45 = vcombine.low %v14183_v15, %v14190_v42  ;;  %v13118_v46 = vrot.slane %v13096_v60, %v26343_v56  ;;  %v14199_v47 = vrot.slane %v14191_v30, %v26343_v56  ;;  %v13228_v15 = vcombine.high %v12202_v51, %v12202_v51 }
 0x7d2   : > { %v14330_v16 = vrot.slane %v26356_v27, %v26343_v56  ;;  %v14337_v23 = vrot.slane %v26357_v48, %v26343_v56  ;;  %v13235_v42 = vrot.slane %v12202_v51, %v26343_v56  ;;  %v14338_v32 = vcombine.low %v24182_v1, %v24185_v62 }
 0x7d3   : > { %v14206_v10 = vrot.slane %v14192_v45, %v26343_v56  ;;  %v24435_v3 = vrot.slane %v14551_v52, %v26343_v56  ;;  %v24438_v17 = vrot.slane %v16226_v28, %v26343_v56  ;;  %v13104_v2 = vrot.slane %v13088_v50, %v26343_v56  ;;  %v17565_v28 = vpop.f32.mrf.mxu0 }
 0x7d4   : > { %v14339_v20 = vcombine.low %v14330_v16, %v14337_v23  ;;  %v13242_v30 = vrot.slane %v13228_v15, %v26343_v56  ;;  %v13243_v45 = vcombine.high %v13235_v42, %v13235_v42  ;;  %v24447_v62 = vrot.slane %v14698_v31, %v26343_v56 }
 0x7d5   : > { %26358 = vst [vmem:[#allocation90_spill] sm:$0xff] %v24435_v3  ;;  %26359 = vst [vmem:[#allocation94_spill] sm:$0xff] %v24438_v17  ;;  %v14207_v60 = vcombine.low %v14199_v47, %v14206_v10  ;;  %v24450_v52 = vrot.slane %v16232_v53, %v26343_v56  ;;  %v24453_v16 = vrot.slane %v13097_v26, %v26343_v56 }
 0x7d6   : > { %v14649_v47 = vcombine.low %v13104_v2, %v13118_v46  ;;  %v13244_v50 = vcombine.high %v13242_v30, %v13242_v30  ;;  %v14346_v48 = vrot.slane %v14338_v32, %v26343_v56  ;;  %v14353_v23 = vrot.slane %v14339_v20, %v26343_v56 }
 0x7d7   : > { %15452 = vperm.xlu0 %17601, %v14207_v60   ;;  %v12197_v10 = vadd.f32 %v23979_v41, %v12196_v11  ;;  %v14281_v31 = vrot.slane %v14259_v6, %v26343_v56  ;;  %v14288_v26 = vrot.slane %v16215_v13, %v26343_v56  ;;  %v24467_v53 = vrot.slane %v13095_v54, %v26343_v56  ;;  %v12206_v6 = vpop.f32.mrf.mxu0 }
 0x7d8   : > { %v16230_v15 = vcombine.high %v13104_v2, %v13118_v46  ;;  %v13265_v32 = vrot.slane %v13243_v45, %v26343_v56  ;;  %v14289_v20 = vcombine.low %v24236_v19, %v24239_v21  ;;  %v14354_v11 = vcombine.low %v14346_v48, %v14353_v23 }
 0x7d9   : > { %v13179_v60 = vcombine.high %v12197_v10, %v12197_v10  ;;  %v13186_v27 = vrot.slane %v12197_v10, %v26343_v56  ;;  %v14290_v1 = vcombine.low %v14281_v31, %v14288_v26  ;;  %v24478_v58 = vrot.slane %v14649_v47, %v26343_v56 }
 0x7da   : > { %v13251_v13 = vrot.slane %v13235_v42, %v26343_v56  ;;  %v24482_v54 = vrot.slane %v13242_v30, %v26343_v56  ;;  %v24485_v19 = vrot.slane %v13244_v50, %v26343_v56  ;;  %15461 = vperm.xlu1 %17602, %v14354_v11   ;;  %v14297_v2 = vrot.slane %v14289_v20, %v26343_v56 }
 0x7db   : > { %v13193_v21 = vrot.slane %v13179_v60, %v26343_v56  ;;  %v13194_v46 = vcombine.high %v13186_v27, %v13186_v27  ;;  %v14304_v45 = vrot.slane %v14290_v1, %v26343_v56  ;;  %v12212_v48 = vadd.f32 %v17565_v28, %v23979_v41 }
 0x7dc   : > { %v12207_v47 = vadd.f32 %v23979_v41, %v12206_v6  ;;  %v14796_v23 = vcombine.low %v13251_v13, %v13265_v32  ;;  %v13202_v30 = vrot.slane %v13186_v27, %v26343_v56  ;;  %v24496_v60 = vrot.slane %v16230_v15, %v26343_v56 }
 0x7dd   : > { %v13195_v42 = vcombine.high %v13193_v21, %v13193_v21  ;;  %v13216_v10 = vrot.slane %v13194_v46, %v26343_v56  ;;  %v14305_v50 = vcombine.low %v14297_v2, %v14304_v45  ;;  %v13326_v31 = vcombine.high %v12212_v48, %v12212_v48 }
 0x7de   : > { %v13333_v26 = vrot.slane %v12212_v48, %v26343_v56  ;;  %v13277_v11 = vcombine.high %v12207_v47, %v12207_v47  ;;  %v16236_v20 = vcombine.high %v13251_v13, %v13265_v32  ;;  %v13284_v28 = vrot.slane %v12207_v47, %v26343_v56  ;;  %v17568_v48 = vpop.f32.mrf.mxu0 }
 0x7df   : > { %v24502_v6 = vrot.slane %v13195_v42, %v26343_v56  ;;  %v14747_v27 = vcombine.low %v13202_v30, %v13216_v10  ;;  %15458 = vperm.xlu0 %17601, %v14305_v50   ;;  %v13340_v46 = vrot.slane %v13326_v31, %v26343_v56  ;;  %v14428_v32 = vrot.slane %v14406_v37, %v26343_v56 }
 0x7e0   : > { %v13341_v2 = vcombine.high %v13333_v26, %v13333_v26  ;;  %v13291_v15 = vrot.slane %v13277_v11, %v26343_v56  ;;  %v14435_v13 = vrot.slane %v16221_v43, %v26343_v56  ;;  %v24517_v47 = vrot.slane %v14796_v23, %v26343_v56 }
 0x7e1   : > { %v24520_v42 = vrot.slane %v13193_v21, %v26343_v56  ;;  %v16234_v50 = vcombine.high %v13202_v30, %v13216_v10  ;;  %v13342_v31 = vcombine.high %v13340_v46, %v13340_v46  ;;  %v24523_v11 = vrot.slane %v16236_v20, %v26343_v56 }
 0x7e2   : > { %v13363_v45 = vrot.slane %v13341_v2, %v26343_v56  ;;  %v13292_v37 = vcombine.high %v13284_v28, %v13284_v28  ;;  %v14436_v1 = vcombine.low %v24250_v18, %v24253_v9  ;;  %v24533_v43 = vrot.slane %v14747_v27, %v26343_v56  ;;  %v12216_v2 = vpop.f32.mrf.mxu0 }
 0x7e3   : > { %v13349_v21 = vrot.slane %v13333_v26, %v26343_v56  ;;  %v24537_v23 = vrot.slane %v13342_v31, %v26343_v56  ;;  %v13293_v30 = vcombine.high %v13291_v15, %v13291_v15  ;;  %v14437_v10 = vcombine.low %v14428_v32, %v14435_v13 }
 0x7e4   : > { %v12222_v20 = vadd.f32 %v17568_v48, %v23979_v41  ;;  %v24541_v18 = vrot.slane %v16234_v50, %v26343_v56  ;;  %v24544_v9 = vrot.slane %v13340_v46, %v26343_v56  ;;  %v13300_v22 = vrot.slane %v13284_v28, %v26343_v56 }
 0x7e5   : > { %v24548_v27 = vrot.slane %v13291_v15, %v26343_v56  ;;  %v14894_v26 = vcombine.low %v13349_v21, %v13363_v45  ;;  %v16240_v49 = vcombine.high %v13349_v21, %v13363_v45  ;;  %v13314_v31 = vrot.slane %v13292_v37, %v26343_v56  ;;  %v17571_v15 = vpop.f32.mrf.mxu0 }
 0x7e6   : > { %v14444_v32 = vrot.slane %v14436_v1, %v26343_v56  ;;  %v14451_v13 = vrot.slane %v14437_v10, %v26343_v56  ;;  %v13424_v48 = vcombine.high %v12222_v20, %v12222_v20  ;;  %v13431_v50 = vrot.slane %v12222_v20, %v26343_v56 }
 0x7e7   : > { %v12217_v12 = vadd.f32 %v23979_v41, %v12216_v2  ;;  %v24558_v28 = vrot.slane %v13293_v30, %v26343_v56  ;;  %v14379_v45 = vrot.slane %v14357_v7, %v26343_v56  ;;  %v14386_v1 = vrot.slane %v16219_v4, %v26343_v56  ;;  %v12226_v37 = vpop.f32.mrf.mxu0 }
 0x7e8   : > { %v14452_v21 = vcombine.low %v14444_v32, %v14451_v13  ;;  %v13438_v10 = vrot.slane %v13424_v48, %v26343_v56  ;;  %v13439_v20 = vcombine.high %v13431_v50, %v13431_v50  ;;  %v14387_v46 = vcombine.low %v24301_v35, %v24307_v38 }
 0x7e9   : > { %v13375_v30 = vcombine.high %v12217_v12, %v12217_v12  ;;  %v13382_v2 = vrot.slane %v12217_v12, %v26343_v56  ;;  %v14388_v7 = vcombine.low %v14379_v45, %v14386_v1  ;;  %v14845_v51 = vcombine.low %v13300_v22, %v13314_v31  ;;  %v17574_v1 = vpop.f32.mrf.mxu0 }
 0x7ea   : > { %15467 = vperm.xlu0 %17601, %v14452_v21   ;;  %v13440_v24 = vcombine.high %v13438_v10, %v13438_v10  ;;  %v13461_v61 = vrot.slane %v13439_v20, %v26343_v56  ;;  %v12232_v36 = vadd.f32 %v17571_v15, %v23979_v41  ;;  %v24577_v4 = vrot.slane %v14894_v26, %v26343_v56 }
 0x7eb   : > { %v16238_v32 = vcombine.high %v13300_v22, %v13314_v31  ;;  %v13389_v13 = vrot.slane %v13375_v30, %v26343_v56  ;;  %v13390_v48 = vcombine.high %v13382_v2, %v13382_v2  ;;  %v24581_v12 = vrot.slane %v16240_v49, %v26343_v56 }
 0x7ec   : > { %v13447_v38 = vrot.slane %v13431_v50, %v26343_v56  ;;  %v14402_v45 = vrot.slane %v14388_v7, %v26343_v56  ;;  %v24590_v26 = vrot.slane %v13440_v24, %v26343_v56  ;;  %v14395_v22 = vrot.slane %v14387_v46, %v26343_v56 }
 0x7ed   : > { %v13522_v31 = vcombine.high %v12232_v36, %v12232_v36  ;;  %v24594_v15 = vrot.slane %v14845_v51, %v26343_v56  ;;  %v13391_v21 = vcombine.high %v13389_v13, %v13389_v13  ;;  %v13412_v20 = vrot.slane %v13390_v48, %v26343_v56  ;;  %v24634_v48 = vld [vmem:[#allocation2] ss:$0 sm:$0xff] }
 0x7ee   : > { %v14992_v49 = vcombine.low %v13447_v38, %v13461_v61  ;;  %v24598_v50 = vrot.slane %v16238_v32, %v26343_v56  ;;  %v24601_v30 = vrot.slane %v13438_v10, %v26343_v56  ;;  %v13398_v7 = vrot.slane %v13382_v2, %v26343_v56  ;;  %v12236_v32 = vpop.f32.mrf.mxu0 }
 0x7ef   : > { %v14403_v24 = vcombine.low %v14395_v22, %v14402_v45  ;;  %v16244_v35 = vcombine.high %v13447_v38, %v13461_v61  ;;  %v13529_v46 = vrot.slane %v12232_v36, %v26343_v56  ;;  %v13536_v51 = vrot.slane %v13522_v31, %v26343_v56 }
 0x7f0   : > { %v12227_v40 = vadd.f32 %v23979_v41, %v12226_v37  ;;  %v24612_v10 = vrot.slane %v13389_v13, %v26343_v56  ;;  %v26360_v2 = vcombine.low %v24280_v59, %v24283_v44  ;;  %v24619_v36 = vrot.slane %v14992_v49, %v26343_v56 }
 0x7f1   : > { %15464 = vperm.xlu0 %17601, %v14403_v24   ;;  %v24622_v41 = vrot.slane %v13391_v21, %v26343_v56  ;;  %v14943_v37 = vcombine.low %v13398_v7, %v13412_v20  ;;  %v13537_v38 = vcombine.high %v13529_v46, %v13529_v46  ;;  %v13538_v45 = vcombine.high %v13536_v51, %v13536_v51 }
 0x7f2   : > { %v14526_v61 = vrot.slane %v26360_v2, %v26343_v56  ;;  %v13473_v22 = vcombine.high %v12227_v40, %v12227_v40  ;;  %v13480_v31 = vrot.slane %v12227_v40, %v26343_v56  ;;  %v26361_v13 = vcombine.high %v24280_v59, %v24283_v44 }
 0x7f3   : > { %v24630_v2 = vrot.slane %v16244_v35, %v26343_v56  ;;  %v16242_v49 = vcombine.high %v13398_v7, %v13412_v20  ;;  %v14534_v21 = vcombine.low %v24315_v57, %v24321_v14  ;;  %v12242_v5 = vadd.f32 %v24634_v48, %v17574_v1 }
 0x7f4   : > { %v14533_v24 = vrot.slane %v26361_v13, %v26343_v56  ;;  %v13559_v39 = vrot.slane %v13537_v38, %v26343_v56  ;;  %v13487_v40 = vrot.slane %v13473_v22, %v26343_v56  ;;  %v13488_v3 = vcombine.high %v13480_v31, %v13480_v31 }
 0x7f5   : > { %v24644_v35 = vrot.slane %v14943_v37, %v26343_v56  ;;  %v12237_v57 = vadd.f32 %v24634_v48, %v12236_v32  ;;  %v13545_v14 = vrot.slane %v13529_v46, %v26343_v56  ;;  %v24649_v1 = vrot.slane %v13536_v51, %v26343_v56 }
 0x7f6   : > { %v14535_v17 = vcombine.low %v14526_v61, %v14533_v24  ;;  %v24652_v20 = vrot.slane %v13538_v45, %v26343_v56  ;;  %v13489_v7 = vcombine.high %v13487_v40, %v13487_v40  ;;  %v13510_v61 = vrot.slane %v13488_v3, %v26343_v56 }
 0x7f7   : > { %v14542_v38 = vrot.slane %v14534_v21, %v26343_v56  ;;  %v13620_v13 = vcombine.high %v12242_v5, %v12242_v5  ;;  %v15090_v37 = vcombine.low %v13545_v14, %v13559_v39  ;;  %v16248_v24 = vcombine.high %v13545_v14, %v13559_v39 }
 0x7f8   : > { %v14549_v22 = vrot.slane %v14535_v17, %v26343_v56  ;;  %v13496_v32 = vrot.slane %v13480_v31, %v26343_v56  ;;  %v13627_v46 = vrot.slane %v12242_v5, %v26343_v56  ;;  %v13571_v59 = vcombine.high %v12237_v57, %v12237_v57 }
 0x7f9   : > { %v13634_v51 = vrot.slane %v13620_v13, %v26343_v56  ;;  %v13578_v45 = vrot.slane %v12237_v57, %v26343_v56  ;;  %v24662_v33 = vrot.slane %v16242_v49, %v26343_v56  ;;  %v24669_v39 = vrot.slane %v13489_v7, %v26343_v56 }
 0x7fa   : > { %v14550_v44 = vcombine.low %v14542_v38, %v14549_v22  ;;  %v15041_v31 = vcombine.low %v13496_v32, %v13510_v61  ;;  %v16246_v5 = vcombine.high %v13496_v32, %v13510_v61  ;;  %v13635_v21 = vcombine.high %v13627_v46, %v13627_v46 }
 0x7fb   : > { %v13636_v14 = vcombine.high %v13634_v51, %v13634_v51  ;;  %v24672_v38 = vrot.slane %v15090_v37, %v26343_v56  ;;  %v24675_v49 = vrot.slane %v13487_v40, %v26343_v56  ;;  %v13585_v57 = vrot.slane %v13571_v59, %v26343_v56  ;;  %v17577_v40 = vpop.f32.mrf.mxu0 }
 0x7fc   : > { %15473 = vperm.xlu0 %17601, %v14550_v44   ;;  %v26363_v22 = vcombine.low %v24324_v34, %v24318_v8  ;;  %v24683_v7 = vrot.slane %v16248_v24, %v26343_v56  ;;  %v13657_v44 = vrot.slane %v13635_v21, %v26343_v56  ;;  %v13586_v61 = vcombine.high %v13578_v45, %v13578_v45 }
 0x7fd   : > { %26362 = vst [vmem:[#allocation19_spill] sm:$0xff] %v24672_v38  ;;  %v26365_v37 = vcombine.high %v24324_v34, %v24318_v8  ;;  %v14485_v24 = vcombine.low %v24368_v25, %v24373_v55  ;;  %v24700_v21 = vrot.slane %v15041_v31, %v26343_v56  ;;  %v24703_v3 = vrot.slane %v16246_v5, %v26343_v56  ;;  %v12246_v38 = vpop.f32.mrf.mxu0 }
 0x7fe   : > { %v14477_v13 = vrot.slane %v26363_v22, %v26343_v56  ;;  %26364 = vst [vmem:[#allocation10_spill] sm:$0xff] %v24683_v7  ;;  %v24695_v22 = vrot.slane %v13636_v14, %v26343_v56  ;;  %v13643_v8 = vrot.slane %v13627_v46, %v26343_v56  ;;  %v26366_v34 = vcombine.low %v24467_v53, %v24453_v16 }
 0x7ff   : > { %v14484_v32 = vrot.slane %v26365_v37, %v26343_v56  ;;  %v24711_v17 = vrot.slane %v13634_v51, %v26343_v56  ;;  %v13587_v14 = vcombine.high %v13585_v57, %v13585_v57  ;;  %v13594_v59 = vrot.slane %v13578_v45, %v26343_v56 }
 0x800   : > { %v14673_v37 = vrot.slane %v26366_v34, %v26343_v56  ;;  %v15188_v55 = vcombine.low %v13643_v8, %v13657_v44  ;;  %v24715_v31 = vrot.slane %v13585_v57, %v26343_v56  ;;  %v13608_v5 = vrot.slane %v13586_v61, %v26343_v56 }
 0x801   : > { %v14486_v25 = vcombine.low %v14477_v13, %v14484_v32  ;;  %v26367_v46 = vcombine.high %v24467_v53, %v24453_v16  ;;  %v16252_v34 = vcombine.high %v13643_v8, %v13657_v44  ;;  %v15190_v51 = vcombine.low %v24711_v17, %v24695_v22 }
 0x802   : > { %v14493_v13 = vrot.slane %v14485_v24, %v26343_v56  ;;  %v14681_v61 = vcombine.low %v24478_v58, %v24496_v60  ;;  %v12252_v7 = vadd.f32 %v24634_v48, %v17577_v40  ;;  %v12247_v16 = vadd.f32 %v24634_v48, %v12246_v38 }
 0x803   : > { %v14680_v29 = vrot.slane %v26367_v46, %v26343_v56  ;;  %v14500_v57 = vrot.slane %v14486_v25, %v26343_v56  ;;  %v26368_v53 = vcombine.low %v24409_v63, %v24412_v0  ;;  %v26369_v8 = vcombine.high %v24409_v63, %v24412_v0 }
 0x804   : > { %v14730_v25 = vcombine.low %v24447_v62, %v24450_v52  ;;  %v13718_v60 = vcombine.high %v12252_v7, %v12252_v7  ;;  %v13725_v38 = vrot.slane %v12252_v7, %v26343_v56  ;;  %v13669_v40 = vcombine.high %v12247_v16, %v12247_v16 }
 0x805   : > { %v14682_v32 = vcombine.low %v14673_v37, %v14680_v29  ;;  %v14722_v44 = vrot.slane %v26368_v53, %v26343_v56  ;;  %v14729_v24 = vrot.slane %v26369_v8, %v26343_v56  ;;  %v14501_v46 = vcombine.low %v14493_v13, %v14500_v57  ;;  %v17580_v8 = vpop.f32.mrf.mxu0 }
 0x806   : > { %v14689_v29 = vrot.slane %v14681_v61, %v26343_v56  ;;  %v13676_v37 = vrot.slane %v12247_v16, %v26343_v56  ;;  %v24747_v45 = vrot.slane %v13587_v14, %v26343_v56  ;;  %v15139_v63 = vcombine.low %v13594_v59, %v13608_v5 }
 0x807   : > { %v14696_v58 = vrot.slane %v14682_v32, %v26343_v56  ;;  %v14731_v53 = vcombine.low %v14722_v44, %v14729_v24  ;;  %15470 = vperm.xlu0 %17601, %v14501_v46   ;;  %v13732_v62 = vrot.slane %v13718_v60, %v26343_v56  ;;  %v16250_v52 = vcombine.high %v13594_v59, %v13608_v5 }
 0x808   : > { %v13733_v13 = vcombine.high %v13725_v38, %v13725_v38  ;;  %v13683_v57 = vrot.slane %v13669_v40, %v26343_v56  ;;  %v13684_v61 = vcombine.high %v13676_v37, %v13676_v37  ;;  %v24752_v32 = vrot.slane %v15188_v55, %v26343_v56 }
 0x809   : > { %v14697_v0 = vcombine.low %v14689_v29, %v14696_v58  ;;  %v14738_v7 = vrot.slane %v14730_v25, %v26343_v56  ;;  %v14745_v16 = vrot.slane %v14731_v53, %v26343_v56  ;;  %v26370_v14 = vcombine.low %v24520_v42, %v24502_v6 }
 0x80a   : > { %v24761_v59 = vrot.slane %v16252_v34, %v26343_v56  ;;  %v13734_v5 = vcombine.high %v13732_v62, %v13732_v62  ;;  %v13755_v24 = vrot.slane %v13733_v13, %v26343_v56  ;;  %v13685_v46 = vcombine.high %v13683_v57, %v13683_v57 }
 0x80b   : > { %15482 = vperm.xlu1 %17602, %v14697_v0   ;;  %v14771_v44 = vrot.slane %v26370_v14, %v26343_v56  ;;  %v24765_v55 = vrot.slane %v13684_v61, %v26343_v56  ;;  %v14746_v29 = vcombine.low %v14738_v7, %v14745_v16  ;;  %v26371_v25 = vcombine.high %v24520_v42, %v24502_v6 }
 0x80c   : > { %v14779_v60 = vcombine.low %v24533_v43, %v24541_v18  ;;  %v15141_v34 = vcombine.low %v24715_v31, %v24747_v45  ;;  %v16251_v40 = vcombine.high %v24715_v31, %v24747_v45  ;;  %v24778_v53 = vrot.slane %v15139_v63, %v26343_v56  ;;  %v12256_v18 = vpop.f32.mrf.mxu0 }
 0x80d   : > { %v14778_v58 = vrot.slane %v26371_v25, %v26343_v56  ;;  %v13741_v0 = vrot.slane %v13725_v38, %v26343_v56  ;;  %v24782_v13 = vrot.slane %v16250_v52, %v26343_v56  ;;  %v24785_v6 = vrot.slane %v13732_v62, %v26343_v56  ;;  %15485 = vperm.xlu0 %17601, %v14746_v29  }
 0x80e   : > { %v13692_v42 = vrot.slane %v13676_v37, %v26343_v56  ;;  %v24789_v61 = vrot.slane %v13734_v5, %v26343_v56  ;;  %v24792_v63 = vrot.slane %v13683_v57, %v26343_v56  ;;  %v24795_v38 = vrot.slane %v13685_v46, %v26343_v56 }
 0x80f   : > { %v14780_v43 = vcombine.low %v14771_v44, %v14778_v58  ;;  %v15286_v7 = vcombine.low %v13741_v0, %v13755_v24  ;;  %v16256_v16 = vcombine.high %v13741_v0, %v13755_v24  ;;  %v14787_v62 = vrot.slane %v14779_v60, %v26343_v56 }
 0x810   : > { %v15237_v52 = vcombine.low %v13692_v42, %v24765_v55  ;;  %v12262_v14 = vadd.f32 %v24634_v48, %v17580_v8  ;;  %v12257_v44 = vadd.f32 %v24634_v48, %v12256_v18  ;;  %v26372_v5 = vcombine.low %v24482_v54, %v24485_v19 }
 0x811   : > { %v14794_v37 = vrot.slane %v14780_v43, %v26343_v56  ;;  %v26373_v57 = vcombine.high %v24482_v54, %v24485_v19  ;;  %v14828_v25 = vcombine.low %v24517_v47, %v24523_v11  ;;  %v26374_v8 = vcombine.low %v24548_v27, %v24558_v28 }
 0x812   : > { %v14820_v24 = vrot.slane %v26372_v5, %v26343_v56  ;;  %v26375_v48 = vcombine.high %v24548_v27, %v24558_v28  ;;  %v13816_v0 = vcombine.high %v12262_v14, %v12262_v14  ;;  %v13823_v43 = vrot.slane %v12262_v14, %v26343_v56 }
 0x813   : > { %v14827_v46 = vrot.slane %v26373_v57, %v26343_v56  ;;  %v14795_v29 = vcombine.low %v14787_v62, %v14794_v37  ;;  %v14869_v58 = vrot.slane %v26374_v8, %v26343_v56  ;;  %v13767_v18 = vcombine.high %v12257_v44, %v12257_v44 }
 0x814   : > { %v14876_v60 = vrot.slane %v26375_v48, %v26343_v56  ;;  %v13774_v54 = vrot.slane %v12257_v44, %v26343_v56  ;;  %v15288_v19 = vcombine.low %v24785_v6, %v24789_v61  ;;  %v14877_v11 = vcombine.low %v24594_v15, %v24598_v50 }
 0x815   : > { %15488 = vperm.xlu1 %17602, %v14795_v29   ;;  %v14829_v47 = vcombine.low %v14820_v24, %v14827_v46  ;;  %v16257_v37 = vcombine.high %v24785_v6, %v24789_v61  ;;  %v13830_v27 = vrot.slane %v13816_v0, %v26343_v56  ;;  %v13831_v28 = vcombine.high %v13823_v43, %v13823_v43 }
 0x816   : > { %v14878_v62 = vcombine.low %v14869_v58, %v14876_v60  ;;  %v13781_v14 = vrot.slane %v13767_v18, %v26343_v56  ;;  %v16254_v5 = vcombine.high %v13692_v42, %v24765_v55  ;;  %v13782_v44 = vcombine.high %v13774_v54, %v13774_v54 }
 0x817   : > { %v14836_v57 = vrot.slane %v14828_v25, %v26343_v56  ;;  %v14843_v29 = vrot.slane %v14829_v47, %v26343_v56  ;;  %v24834_v24 = vrot.slane %v15286_v7, %v26343_v56  ;;  %v13832_v15 = vcombine.high %v13830_v27, %v13830_v27 }
 0x818   : > { %v24837_v50 = vrot.slane %v13831_v28, %v26343_v56  ;;  %v14885_v46 = vrot.slane %v14877_v11, %v26343_v56  ;;  %v13783_v8 = vcombine.high %v13781_v14, %v13781_v14  ;;  %v24841_v58 = vrot.slane %v13782_v44, %v26343_v56 }
 0x819   : > { %v14844_v48 = vcombine.low %v14836_v57, %v14843_v29  ;;  %v14892_v55 = vrot.slane %v14878_v62, %v26343_v56  ;;  %v24845_v42 = vrot.slane %v16256_v16, %v26343_v56  ;;  %v15239_v7 = vcombine.low %v24792_v63, %v24795_v38 }
 0x81a   : > { %v16255_v25 = vcombine.high %v24792_v63, %v24795_v38  ;;  %v24852_v60 = vrot.slane %v15237_v52, %v26343_v56  ;;  %v24855_v0 = vrot.slane %v13823_v43, %v26343_v56  ;;  %v24858_v18 = vrot.slane %v13832_v15, %v26343_v56 }
 0x81b   : > { %v24861_v47 = vrot.slane %v13774_v54, %v26343_v56  ;;  %15491 = vperm.xlu0 %17601, %v14844_v48   ;;  %v14893_v16 = vcombine.low %v14885_v46, %v14892_v55  ;;  %v24864_v11 = vrot.slane %v16254_v5, %v26343_v56  ;;  %v24867_v62 = vrot.slane %v13830_v27, %v26343_v56 }
 0x81c   : > { %v24870_v52 = vrot.slane %v13781_v14, %v26343_v56  ;;  %v26376_v43 = vcombine.low %v24544_v9, %v24537_v23  ;;  %v15384_v54 = vcombine.low %v24855_v0, %v24837_v50  ;;  %v24879_v44 = vrot.slane %v13783_v8, %v26343_v56 }
 0x81d   : > { %v15335_v5 = vcombine.low %v24861_v47, %v24841_v58  ;;  %v16258_v27 = vcombine.high %v24861_v47, %v24841_v58  ;;  %15494 = vperm.xlu1 %17602, %v14893_v16   ;;  %v26377_v14 = vcombine.high %v24544_v9, %v24537_v23  ;;  %v14926_v29 = vcombine.low %v24577_v4, %v24581_v12 }
 0x81e   : > { %v14918_v28 = vrot.slane %v26376_v43, %v26343_v56  ;;  %v26378_v15 = vcombine.low %v24612_v10, %v24622_v41  ;;  %v26379_v8 = vcombine.high %v24612_v10, %v24622_v41  ;;  %v15386_v55 = vcombine.low %v24867_v62, %v24858_v18 }
 0x81f   : > { %v14925_v57 = vrot.slane %v26377_v14, %v26343_v56  ;;  %v14975_v23 = vcombine.low %v24644_v35, %v24662_v33  ;;  %v26380_v9 = vcombine.low %v24601_v30, %v24590_v26  ;;  %v26381_v12 = vcombine.high %v24601_v30, %v24590_v26 }
 0x820   : > { %v14967_v46 = vrot.slane %v26378_v15, %v26343_v56  ;;  %v14974_v48 = vrot.slane %v26379_v8, %v26343_v56  ;;  %v15024_v10 = vcombine.low %v24619_v36, %v24630_v2  ;;  %v26382_v41 = vcombine.low %v24675_v49, %v24669_v39 }
 0x821   : > { %v15016_v4 = vrot.slane %v26380_v9, %v26343_v56  ;;  %v15023_v16 = vrot.slane %v26381_v12, %v26343_v56  ;;  %v14927_v43 = vcombine.low %v14918_v28, %v14925_v57  ;;  %v14934_v35 = vrot.slane %v14926_v29, %v26343_v56  ;;  %v26386_v12 = vld [vmem:[#allocation10_spill] sm:$0xff] }
 0x822   : > { %v14976_v14 = vcombine.low %v14967_v46, %v14974_v48  ;;  %v15065_v33 = vrot.slane %v26382_v41, %v26343_v56  ;;  %v14983_v15 = vrot.slane %v14975_v23, %v26343_v56  ;;  %v26383_v26 = vcombine.high %v24675_v49, %v24669_v39 }
 0x823   : > { %v15025_v8 = vcombine.low %v15016_v4, %v15023_v16  ;;  %v14941_v28 = vrot.slane %v14927_v43, %v26343_v56  ;;  %v15073_v36 = vcombine.low %v24700_v21, %v24703_v3  ;;  %v26384_v2 = vcombine.low %v24649_v1, %v24652_v20  ;;  %v26387_v3 = vld [vmem:[#allocation19_spill] sm:$0xff] }
 0x824   : > { %v15072_v30 = vrot.slane %v26383_v26, %v26343_v56  ;;  %v14990_v57 = vrot.slane %v14976_v14, %v26343_v56  ;;  %v15337_v46 = vcombine.low %v24870_v52, %v24879_v44  ;;  %v26385_v39 = vcombine.high %v24649_v1, %v24652_v20 }
 0x825   : > { %v15114_v29 = vrot.slane %v26384_v2, %v26343_v56  ;;  %v15039_v48 = vrot.slane %v15025_v8, %v26343_v56  ;;  %v14942_v9 = vcombine.low %v14934_v35, %v14941_v28  ;;  %v15122_v21 = vcombine.low %v26387_v3, %v26386_v12  ;;  %v26396_v12 = vld [vmem:[#allocation92_spill] sm:$0xff] }
 0x826   : > { %v15074_v23 = vcombine.low %v15065_v33, %v15072_v30  ;;  %v15121_v49 = vrot.slane %v26385_v39, %v26343_v56  ;;  %v14991_v4 = vcombine.low %v14983_v15, %v14990_v57  ;;  %v15212_v16 = vrot.slane %v15190_v51, %v26343_v56  ;;  %v26389_v15 = vld [vmem:[#allocation83_spill] sm:$0xff] }
 0x827   : > { %v15032_v43 = vrot.slane %v15024_v10, %v26343_v56  ;;  %v15081_v14 = vrot.slane %v15073_v36, %v26343_v56  ;;  %15497 = vperm.xlu0 %17601, %v14942_v9   ;;  %v26388_v1 = vcombine.high %v24711_v17, %v24695_v22  ;;  %v15220_v35 = vcombine.low %v24752_v32, %v24761_v59  ;;  %v26390_v51 = vld [vmem:[#allocation75_spill] sm:$0xff] }
 0x828   : > { %v15088_v41 = vrot.slane %v15074_v23, %v26343_v56  ;;  %v15123_v33 = vcombine.low %v15114_v29, %v15121_v49  ;;  %15500 = vperm.xlu1 %17602, %v14991_v4   ;;  %v26391_v8 = vcombine.low %v26389_v15, %v26390_v51  ;;  %v26392_v57 = vcombine.high %v26389_v15, %v26390_v51  ;;  %v26393_v29 = vld [vmem:[#allocation94_spill] sm:$0xff] }
 0x829   : > { %v15219_v20 = vrot.slane %v26388_v1, %v26343_v56  ;;  %v15040_v26 = vcombine.low %v15032_v43, %v15039_v48  ;;  %v15130_v17 = vrot.slane %v15122_v21, %v26343_v56  ;;  %v15163_v32 = vrot.slane %v15141_v34, %v26343_v56  ;;  %v26394_v48 = vld [vmem:[#allocation90_spill] sm:$0xff]  ;;  %v26395_v34 = vld [vmem:[#allocation87_spill] sm:$0xff] }
 0x82a   : > { %v14575_v10 = vrot.slane %v26391_v8, %v26343_v56  ;;  %v15089_v30 = vcombine.low %v15081_v14, %v15088_v41  ;;  %v15137_v28 = vrot.slane %v15123_v33, %v26343_v56  ;;  %v14582_v36 = vrot.slane %v26392_v57, %v26343_v56  ;;  %v26399_v33 = vld [vmem:[#allocation21_spill] sm:$0xff]  ;;  %v26400_v1 = vld [vmem:[#allocation74_spill] sm:$0xff] }
 0x82b   : > { %v15221_v22 = vcombine.low %v15212_v16, %v15219_v20  ;;  %v15170_v59 = vrot.slane %v16251_v40, %v26343_v56  ;;  %v15228_v2 = vrot.slane %v15220_v35, %v26343_v56  ;;  %v14583_v23 = vcombine.low %v26394_v48, %v26393_v29  ;;  %15503 = vperm.xlu0 %17601, %v15040_v26  }
 0x82c   : > { %v14584_v39 = vcombine.low %v14575_v10, %v14582_v36  ;;  %v15171_v49 = vcombine.low %v24778_v53, %v24782_v13  ;;  %15506 = vperm.xlu1 %17602, %v15089_v30   ;;  %v26397_v3 = vcombine.low %v26395_v34, %v26396_v12  ;;  %v16259_v45 = vcombine.high %v24870_v52, %v24879_v44 }
 0x82d   : > { %v15235_v9 = vrot.slane %v15221_v22, %v26343_v56  ;;  %v15172_v4 = vcombine.low %v15163_v32, %v15170_v59  ;;  %v15138_v40 = vcombine.low %v15130_v17, %v15137_v28  ;;  %v26398_v53 = vcombine.high %v26395_v34, %v26396_v12 }
 0x82e   : > { %v14624_v31 = vrot.slane %v26397_v3, %v26343_v56  ;;  %v14598_v21 = vrot.slane %v14584_v39, %v26343_v56  ;;  %v15310_v14 = vrot.slane %v15288_v19, %v26343_v56  ;;  %v15317_v52 = vrot.slane %v16257_v37, %v26343_v56 }
 0x82f   : > { %v14631_v13 = vrot.slane %v26398_v53, %v26343_v56  ;;  %v15236_v16 = vcombine.low %v15228_v2, %v15235_v9  ;;  %v15186_v43 = vrot.slane %v15172_v4, %v26343_v56  ;;  %v14591_v44 = vrot.slane %v14583_v23, %v26343_v56  ;;  %15509 = vperm.xlu0 %17601, %v15138_v40  }
 0x830   : > { %v15179_v41 = vrot.slane %v15171_v49, %v26343_v56  ;;  %v14632_v20 = vcombine.low %v26400_v1, %v26399_v33  ;;  %v15318_v15 = vcombine.low %v24834_v24, %v24845_v42  ;;  %v15319_v51 = vcombine.low %v15310_v14, %v15317_v52  ;;  %v15438_v49 = vpop.permute.xlu1 %15437  ;;  %v26402_v1 = vld [vmem:[#allocation6_spill] sm:$0xff] }
 0x831   : > { %v14633_v35 = vcombine.low %v14624_v31, %v14631_v13  ;;  %15515 = vperm.xlu1 %17602, %v15236_v16   ;;  %v15261_v6 = vrot.slane %v15239_v7, %v26343_v56  ;;  %v16261_v61 = vcombine.high %v24867_v62, %v24858_v18  ;;  %v14599_v19 = vcombine.low %v14591_v44, %v14598_v21 }
 0x832   : > { %v15268_v8 = vrot.slane %v16255_v25, %v26343_v56  ;;  %v15187_v10 = vcombine.low %v15179_v41, %v15186_v43  ;;  %v15333_v24 = vrot.slane %v15319_v51, %v26343_v56  ;;  %v15359_v42 = vrot.slane %v15337_v46, %v26343_v56 }
 0x833   : > { %v14647_v37 = vrot.slane %v14633_v35, %v26343_v56  ;;  %v15366_v26 = vrot.slane %v16259_v45, %v26343_v56  ;;  %v16260_v7 = vcombine.high %v24855_v0, %v24837_v50  ;;  %v15345_v30 = vrot.slane %v15335_v5, %v26343_v56  ;;  %15476 = vperm.xlu0 %17601, %v14599_v19  }
 0x834   : > { %v14640_v28 = vrot.slane %v14632_v20, %v26343_v56  ;;  %v15270_v57 = vcombine.low %v15261_v6, %v15268_v8  ;;  %v15352_v63 = vrot.slane %v16258_v27, %v26343_v56  ;;  %v15326_v38 = vrot.slane %v15318_v15, %v26343_v56  ;;  %v15444_v4 = vpop.permute.xlu1 %15443 }
 0x835   : > { %15512 = vperm.xlu1 %17602, %v15187_v10   ;;  %v15269_v25 = vcombine.low %v24852_v60, %v24864_v11  ;;  %v15408_v5 = vrot.slane %v15386_v55, %v26343_v56  ;;  %v15368_v22 = vcombine.low %v15359_v42, %v15366_v26  ;;  %v15415_v58 = vrot.slane %v16261_v61, %v26343_v56 }
 0x836   : > { %v14648_v46 = vcombine.low %v14640_v28, %v14647_v37  ;;  %v15334_v36 = vcombine.low %v15326_v38, %v15333_v24  ;;  %v15284_v17 = vrot.slane %v15270_v57, %v26343_v56  ;;  %v15394_v47 = vrot.slane %v15384_v54, %v26343_v56  ;;  %v15435_v54 = vpop.permute.xlu0 %15434 }
 0x837   : > { %v15401_v27 = vrot.slane %v16260_v7, %v26343_v56  ;;  %v15277_v60 = vrot.slane %v15269_v25, %v26343_v56  ;;  %v15367_v11 = vcombine.low %v15345_v30, %v15352_v63  ;;  %v15382_v62 = vrot.slane %v15368_v22, %v26343_v56 }
 0x838   : > { %15479 = vperm.xlu0 %17601, %v14648_v46   ;;  %v15417_v55 = vcombine.low %v15408_v5, %v15415_v58  ;;  %v26401_v43 = vlaneseq }
 0x839   : > { %15521 = vperm.xlu1 %17602, %v15334_v36   ;;  %v15285_v18 = vcombine.low %v15277_v60, %v15284_v17  ;;  %v15375_v32 = vrot.slane %v15367_v11, %v26343_v56  ;;  %v15416_v59 = vcombine.low %v15394_v47, %v15401_v27 }
 0x83a   : > { %v15431_v29 = vrot.slane %v15417_v55, %v26343_v56  ;;  %v15441_v48 = vpop.permute.xlu0 %15440  ;;  %v25066_v14 = vand.u32 127, %v26401_v43  ;;  %vm15737_vm12 = vcmp.lt.s32.totalorder %v26401_v43, 256 }
 0x83b   : > { %v15383_v2 = vcombine.low %v15375_v32, %v15382_v62  ;;  %v15424_v50 = vrot.slane %v15416_v59, %v26343_v56 }
 0x83c   : > { %v15542_v52 = vadd.s32 4294967280, %v25066_v14  ;;  %v15535_v33 = vadd.s32 4294967288, %v25066_v14  ;;  %v15533_v20 = vsub.s32 %v25066_v14, %v26402_v1  ;;  %v15549_v35 = vadd.s32 4294967272, %v25066_v14 }
 0x83d   : > { %15518 = vperm.xlu1 %17602, %v15285_v18   ;;  %v15432_v0 = vcombine.low %v15424_v50, %v15431_v29  ;;  %v15556_v51 = vadd.s32 4294967264, %v25066_v14  ;;  %v15570_v26 = vadd.s32 4294967248, %v25066_v14  ;;  %v15563_v30 = vadd.s32 4294967256, %v25066_v14 }
 0x83e   : > { %v15545_v15 = vsub.s32 %v15542_v52, %v26402_v1  ;;  %v15538_v6 = vsub.s32 %v15535_v33, %v26402_v1  ;;  %v15534_v37 = vrot.slane %v15435_v54, %v15533_v20  ;;  %v15552_v10 = vsub.s32 %v15549_v35, %v26402_v1 }
 0x83f   : > { %v25053_v12 = vpop.permute.xlu1 %15449  ;;  %v15559_v42 = vsub.s32 %v15556_v51, %v26402_v1  ;;  %v15573_v17 = vsub.s32 %v15570_v26, %v26402_v1  ;;  %v15584_v22 = vadd.s32 4294967232, %v25066_v14  ;;  %v15566_v27 = vsub.s32 %v15563_v30, %v26402_v1 }
 0x840   : > { %v15546_v24 = vrot.slane %v15441_v48, %v15545_v15  ;;  %v15539_v7 = vrot.slane %v15438_v49, %v15538_v6  ;;  %v15553_v47 = vrot.slane %v15444_v4, %v15552_v10  ;;  %v15577_v60 = vadd.s32 4294967240, %v25066_v14 }
 0x841   : > { %15524 = vperm.xlu1 %17602, %v15383_v2   ;;  %v15587_v50 = vsub.s32 %v15584_v22, %v26402_v1  ;;  %v15567_v54 = vrot.slane %v25053_v12, %v15566_v27  ;;  %v15605_v49 = vadd.s32 4294967208, %v25066_v14 }
 0x842   : > { %v15541_v38 = vsel %vm15540_vm13, %v15539_v7, %v15534_v37  ;;  %v15580_v48 = vsub.s32 %v15577_v60, %v26402_v1 }
 0x843   : > { %v15548_v5 = vsel %vm15547_vm14, %v15546_v24, %v15541_v38  ;;  %v15608_v51 = vsub.s32 %v15605_v49, %v26402_v1 }
 0x844   : > { %v15555_v55 = vsel %vm15554_vm15, %v15553_v47, %v15548_v5 }
 0x845   : > { %15527 = vperm.xlu1 %17602, %v15432_v0   ;;  %v15447_v23 = vpop.permute.xlu0 %15446  ;;  %v15598_v0 = vadd.s32 4294967216, %v25066_v14 }
 0x846   : > { %v15560_v36 = vrot.slane %v15447_v23, %v15559_v42  ;;  %v15591_v23 = vadd.s32 4294967224, %v25066_v14 }
 0x847   : > { %v15601_v33 = vsub.s32 %v15598_v0, %v26402_v1 }
 0x848   : > { %v15562_v2 = vsel %vm15561_vm0, %v15560_v36, %v15555_v55 }
 0x849   : > { %v25057_v31 = vpop.permute.xlu1 %15455 }
 0x84a   : > { %v15581_v35 = vrot.slane %v25057_v31, %v15580_v48 }
 0x852   : > { %v25047_v39 = vpop.permute.xlu0 %15452 }
 0x853   : > { %v15574_v29 = vrot.slane %v25047_v39, %v15573_v17  ;;  %v15569_v39 = vsel %vm15568_vm1, %v15567_v54, %v15562_v2 }
 0x855   : > { %v25061_v40 = vpop.permute.xlu1 %15461  ;;  %v15576_v12 = vsel %vm15575_vm2, %v15574_v29, %v15569_v39 }
 0x856   : > { %v15583_v37 = vsel %vm15582_vm3, %v15581_v35, %v15576_v12 }
 0x85a   : > { %v25049_v9 = vpop.permute.xlu0 %15458 }
 0x865   : > { %v25051_v34 = vpop.permute.xlu0 %15467 }
 0x866   : > { %v15609_v22 = vrot.slane %v25051_v34, %v15608_v51 }
 0x86c   : > { %v25055_v3 = vpop.permute.xlu0 %15464 }
 0x86d   : > { %v15602_v24 = vrot.slane %v25055_v3, %v15601_v33 }
 0x877   : > { %v25059_v45 = vpop.permute.xlu0 %15473 }
 0x882   : > { %v25063_v21 = vpop.permute.xlu0 %15470 }
 0x886   : > { %v15483_v53 = vpop.permute.xlu1 %15482 }
 0x887   : > { %v15643_v28 = vrot.slane %v15483_v53, %v15533_v20  ;;  %v15612_v20 = vadd.s32 4294967200, %v25066_v14 }
 0x888   : > { %v15486_v13 = vpop.permute.xlu0 %15485 }
 0x889   : > { %v15647_v8 = vrot.slane %v15486_v13, %v15538_v6 }
 0x88b   : > { %v15648_v25 = vsel %vm15540_vm13, %v15647_v8, %v15643_v28  ;;  %v15619_v28 = vadd.s32 4294967192, %v25066_v14 }
 0x890   : > { %v15489_v16 = vpop.permute.xlu1 %15488 }
 0x891   : > { %v15652_v57 = vrot.slane %v15489_v16, %v15545_v15  ;;  %v15594_v15 = vsub.s32 %v15591_v23, %v26402_v1 }
 0x893   : > { %v15653_v11 = vsel %vm15547_vm14, %v15652_v57, %v15648_v25  ;;  %v15595_v30 = vrot.slane %v25061_v40, %v15594_v15  ;;  %v15633_v57 = vadd.s32 4294967176, %v25066_v14 }
 0x895   : > { %v15636_v47 = vsub.s32 %v15633_v57, %v26402_v1 }
 0x896   : > { %v15492_v44 = vpop.permute.xlu0 %15491 }
 0x897   : > { %v15657_v46 = vrot.slane %v15492_v44, %v15552_v10  ;;  %v15626_v10 = vadd.s32 4294967184, %v25066_v14  ;;  %v15622_v14 = vsub.s32 %v15619_v28, %v26402_v1 }
 0x898   : > { %v15495_v41 = vpop.permute.xlu1 %15494 }
 0x899   : > { %v15662_v18 = vrot.slane %v15495_v41, %v15559_v42  ;;  %v15658_v32 = vsel %vm15554_vm15, %v15657_v46, %v15653_v11  ;;  %v15588_v41 = vrot.slane %v25049_v9, %v15587_v50  ;;  %v15615_v42 = vsub.s32 %v15612_v20, %v26402_v1 }
 0x89a   : > { %v15629_v46 = vsub.s32 %v15626_v10, %v26402_v1 }
 0x89b   : > { %v15663_v4 = vsel %vm15561_vm0, %v15662_v18, %v15658_v32  ;;  %v15590_v31 = vsel %vm15589_vm4, %v15588_v41, %v15583_v37  ;;  %v15616_v36 = vrot.slane %v25063_v21, %v15615_v42 }
 0x89c   : > { %v15597_v25 = vsel %vm15596_vm5, %v15595_v30, %v15590_v31 }
 0x89d   : > { %v15604_v5 = vsel %vm15603_vm6, %v15602_v24, %v15597_v25 }
 0x89e   : > { %v15611_v11 = vsel %vm15610_vm7, %v15609_v22, %v15604_v5 }
 0x89f   : > { %v15618_v55 = vsel %vm15617_vm8, %v15616_v36, %v15611_v11 }
 0x8a2   : > { %v15498_v61 = vpop.permute.xlu0 %15497 }
 0x8a3   : > { %v15501_v19 = vpop.permute.xlu1 %15500  ;;  %v15667_v59 = vrot.slane %v15498_v61, %v15566_v27 }
 0x8a4   : > { %v15672_v53 = vrot.slane %v15501_v19, %v15573_v17 }
 0x8a5   : > { %v15668_v52 = vsel %vm15568_vm1, %v15667_v59, %v15663_v4  ;;  %v15623_v59 = vrot.slane %v25059_v45, %v15622_v14 }
 0x8a6   : > { %v15504_v58 = vpop.permute.xlu0 %15503  ;;  %v15673_v6 = vsel %vm15575_vm2, %v15672_v53, %v15668_v52 }
 0x8a7   : > { %v25080_v63 = vpop.permute.xlu1 %15506  ;;  %v15677_v44 = vrot.slane %v15504_v58, %v15580_v48  ;;  %v15625_v29 = vsel %vm15624_vm9, %v15623_v59, %v15618_v55 }
 0x8a8   : > { %v15682_v61 = vrot.slane %v25080_v63, %v15587_v50 }
 0x8a9   : > { %v15678_v9 = vsel %vm15582_vm3, %v15677_v44, %v15673_v6 }
 0x8aa   : > { %v15510_v13 = vpop.permute.xlu0 %15509  ;;  %v15683_v63 = vsel %vm15589_vm4, %v15682_v61, %v15678_v9 }
 0x8ab   : > { %v15687_v8 = vrot.slane %v15510_v13, %v15594_v15 }
 0x8ac   : > { %v25088_v62 = vpop.permute.xlu1 %15515 }
 0x8ad   : > { %v15688_v3 = vsel %vm15596_vm5, %v15687_v8, %v15683_v63  ;;  %v15697_v58 = vrot.slane %v25088_v62, %v15608_v51 }
 0x8ae   : > { %v15477_v26 = vpop.permute.xlu0 %15476 }
 0x8af   : > { %v15630_v21 = vrot.slane %v15477_v26, %v15629_v46 }
 0x8b0   : > { %v15513_v16 = vpop.permute.xlu1 %15512 }
 0x8b1   : > { %v15692_v7 = vrot.slane %v15513_v16, %v15601_v33  ;;  %v15632_v54 = vsel %vm15631_vm10, %v15630_v21, %v15625_v29 }
 0x8b3   : > { %v15693_v40 = vsel %vm15603_vm6, %v15692_v7, %v15688_v3  ;;  %v15480_v27 = vpop.permute.xlu0 %15479 }
 0x8b4   : > { %v15522_v19 = vpop.permute.xlu1 %15521  ;;  %v15698_v18 = vsel %vm15610_vm7, %v15697_v58, %v15693_v40  ;;  %v15637_v62 = vrot.slane %v15480_v27, %v15636_v47 }
 0x8b5   : > { %v15707_v2 = vrot.slane %v15522_v19, %v15622_v14 }
 0x8b6   : > { %v15639_v23 = vsel %vm15638_vm11, %v15637_v62, %v15632_v54 }
 0x8b8   : > { %v15519_v38 = vpop.permute.xlu1 %15518 }
 0x8b9   : > { %v15702_v17 = vrot.slane %v15519_v38, %v15615_v42 }
 0x8bb   : > { %v15703_v32 = vsel %vm15617_vm8, %v15702_v17, %v15698_v18 }
 0x8bc   : > { %v15525_v60 = vpop.permute.xlu1 %15524  ;;  %v15708_v50 = vsel %vm15624_vm9, %v15707_v2, %v15703_v32 }
 0x8bd   : > { %v15712_v34 = vrot.slane %v15525_v60, %v15629_v46 }
 0x8bf   : > { %v15713_v48 = vsel %vm15631_vm10, %v15712_v34, %v15708_v50 }
 0x8c0   : > { %v15528_v1 = vpop.permute.xlu1 %15527 }
 0x8c1   : > { %v15717_v0 = vrot.slane %v15528_v1, %v15636_v47 }
 0x8c3   : > { %v15718_v49 = vsel %vm15638_vm11, %v15717_v0, %v15713_v48 }
 0x8c4   : > { %v15719_v4 = vcombine.low %v15639_v23, %v15718_v49 }
 0x8c6   : > { %v15726_v53 = vrot.slane %v15719_v4, %v26343_v56 }
 0x8c8   : > { %v15733_v45 = vrot.slane %v15726_v53, %v26343_v56 }
 0x8ca   : > { %15739 = vst.msk [vmem:[%s332_s27] sm:$0x3] %vm15737_vm12, %v15733_v45 }
 0x8cb PF: > { %s21_s11 = sadd.s32 1, %s17622_s11  }
 0x8cc   : > { %p18_p4 = scmp.ge.s32.totalorder %s21_s11, 4  }
 0x8ce   :  { %20 = sbr.rel (!%p18_p4) target bundleno = 3 (0x3), region = 86 }

</bundles_post_ra>
